<compile_context>
chip_gen: v7x
topology: tpu7x:2x2x1
jax: 0.10.0
libtpu: 0.0.40
codegen_flags: <defaults>
</compile_context>

<pallas_src>
import jax
import jax.numpy as jnp
from jax.experimental import pallas as pl
from jax.experimental.pallas import tpu as pltpu

NUM_UNITS = 27
EMBED_DIM = 128
NUM_HEADS = 8
NUM_LAYERS = 3
HEAD_DIM = EMBED_DIM // NUM_HEADS
TOPK = 3
S_PAD = 8          # top-k=3 sequence padded to 8 sublanes; padded slots masked
NEG = -1e30

assert EMBED_DIM % NUM_HEADS == 0


# ----------------------------- kernel helpers --------------------------------
def _matmul(x, w):
    # x: f32 activations, w: bf16 weights -> bf16 MXU path, f32 accumulation.
    return jnp.dot(x.astype(w.dtype), w, preferred_element_type=jnp.float32)


def _linear(x, w, b):
    return _matmul(x, w) + b


def _ffn2(x2d, w1, b1, w2, b2):
    h = jnp.maximum(_linear(x2d, w1, b1), 0.0)
    return _linear(h, w2, b2)


def _ffn3(x3d, w1, b1, w2, b2):
    BT, S, D = x3d.shape
    return _ffn2(x3d.reshape(BT * S, D), w1, b1, w2, b2).reshape(BT, S, -1)


def _mha(x, bias_kd, seg, g, gt, in_w, in_b, out_w, out_b, *, cross):
    # PyTorch nn.MultiheadAttention (batch_first=True, eval-mode) on the
    # stacked [left; right] rows.  cross=True swaps the two halves of K/V
    # (enemy attention: left queries attend right keys and vice versa).
    # Heads stay on the 128-lane axis throughout (no per-head slicing).
    BT, S, D = x.shape
    rows = BT * S

    qkv = _linear(x.reshape(rows, D), in_w, in_b).reshape(BT, S, 3 * D)
    q = qkv[:, :, 0:D]                # 1/sqrt(head_dim) pre-folded into weights
    k = qkv[:, :, D:2 * D]
    v = qkv[:, :, 2 * D:3 * D]

    if cross:
        half = BT // 2
        k = jnp.concatenate([k[half:], k[:half]], axis=0)
        v = jnp.concatenate([v[half:], v[:half]], axis=0)

    # Replicate every query row across S sublanes with one MXU matmul
    # (avoids an awkward sublane-splat relayout): (rows*S, D).
    qsplat = jnp.dot(g, q.reshape(rows, D), preferred_element_type=jnp.float32)
    prod = qsplat.reshape(BT, S, S, D) * k[:, None, :, :]        # (BT,S,S,D)

    # Per-head scores, replicated over the HEAD_DIM lanes of each head:
    #   scores[b,q,k,d] = sum_{d' in head(d)} q[b,q,d'] * k[b,k,d'].
    scores = jnp.dot(prod.reshape(rows * S, D), seg,
                     preferred_element_type=jnp.float32).reshape(BT, S, S, D)
    scores = scores + bias_kd[:, None, :, :]                     # key-padding mask

    mmax = jnp.max(scores, axis=2, keepdims=True)
    pexp = jnp.exp(scores - mmax)
    denom = jnp.sum(pexp, axis=2, keepdims=True)
    prob = pexp * pl.reciprocal(denom, approx=False)

    # ctx[b,q,d] = sum_k prob[b,q,k,d] * v[b,k,d]; the key-sum is one matmul
    # with gt so the result lands directly in lane-dense (rows, D) layout.
    pv = prob * v[:, None, :, :]
    ctx = jnp.dot(gt, pv.reshape(rows * S, D), preferred_element_type=jnp.float32)

    out = _linear(ctx, out_w, out_b)
    return out.reshape(BT, S, D)


# --------------------------------- kernel -------------------------------------
def transformer_kernel(x0_ref, m_ref, bs_ref, bc_ref, seg_ref, g_ref, gt_ref,
                       vw1, vb1, vw2, vb2,
                       eiw, eib, eow, eob, efw1, efb1, efw2, efb2,
                       fiw, fib, fow, fob, ffw1, ffb1, ffw2, ffb2,
                       fcw1, fcb1, fcw2, fcb2,
                       out_ref, x_scr):
    layer = pl.program_id(0)

    # value_ffn residual, once, before the first layer.
    @pl.when(layer == 0)
    def _():
        x0 = x0_ref[...]
        x_scr[...] = x0 + _ffn3(x0, vw1[...], vb1[...], vw2[...], vb2[...])

    x = x_scr[...]
    seg, g, gt = seg_ref[...], g_ref[...], gt_ref[...]
    bias_cross = bc_ref[...]
    bias_self = bs_ref[...]

    # TODO(synk): dropout (p=0.2) in attention/FFN is omitted (eval-mode semantics).
    # enemy (cross) attention + FFN
    x = x + _mha(x, bias_cross, seg, g, gt,
                 eiw[...], eib[...], eow[...], eob[...], cross=True)
    x = x + _ffn3(x, efw1[...], efb1[...], efw2[...], efb2[...])
    # friend (self) attention + FFN
    x = x + _mha(x, bias_self, seg, g, gt,
                 fiw[...], fib[...], fow[...], fob[...], cross=False)
    x = x + _ffn3(x, ffw1[...], ffb1[...], ffw2[...], ffb2[...])
    x_scr[...] = x

    # scoring head after the last layer: sigmoid(sum(R) - sum(L))
    @pl.when(layer == pl.num_programs(0) - 1)
    def _():
        BT, S, D = x.shape
        B = BT // 2
        sc = _ffn2(x.reshape(BT * S, D), fcw1[...], fcb1[...], fcw2[...], fcb2[...])
        sc = sc.reshape(BT, S) * m_ref[...]
        totals = jnp.sum(sc, axis=1, keepdims=True)              # (2B, 1)
        out_ref[...] = jax.nn.sigmoid(totals[B:, :] - totals[:B, :])   # (B, 1)


# ----------------------------- host-side wrapper ------------------------------
def _const_spec(shape):
    nd = len(shape)
    return pl.BlockSpec(tuple(shape), lambda i, _nd=nd: (0,) * _nd)


def _layer_spec(shape):
    nd = len(shape)
    return pl.BlockSpec((None,) + tuple(shape[1:]),
                        lambda i, _nd=nd: (i,) + (0,) * (_nd - 1))


def _preprocess(count, embed_w):
    # torch.topk(count, k=3, dim=1) + embedding + half-scaling, then pad S 3->8.
    values, indices = jax.lax.top_k(count, TOPK)                 # (B, 3)
    feat = embed_w[indices]                                      # (B, 3, D)
    half = EMBED_DIM // 2
    feat = jnp.concatenate(
        [feat[..., :half], feat[..., half:] * values[..., None]], axis=-1)
    feat = jnp.pad(feat, ((0, 0), (0, S_PAD - TOPK), (0, 0)))
    mask = (values > 0).astype(jnp.float32)
    mask = jnp.pad(mask, ((0, 0), (0, S_PAD - TOPK)))
    return feat.astype(jnp.float32), mask


_BF16_KEYS = ('vw1', 'vw2', 'e_in_w', 'e_out_w', 'e_fw1', 'e_fw2',
              'f_in_w', 'f_out_w', 'f_fw1', 'f_fw2', 'fc_w1', 'fc_w2')


def prepare_params(params):
    """One-time weight prep: fold 1/sqrt(head_dim) into the Q projection and
    cast matmul weights to bf16 (biases / embedding stay f32)."""
    p = dict(params)
    scale = 1.0 / (HEAD_DIM ** 0.5)
    for s in ('e', 'f'):
        p[f'{s}_in_w'] = p[f'{s}_in_w'].at[:, :, :EMBED_DIM].multiply(scale)
        p[f'{s}_in_b'] = p[f'{s}_in_b'].at[:, :, :EMBED_DIM].multiply(scale)
    for k in _BF16_KEYS:
        p[k] = p[k].astype(jnp.bfloat16)
    return p


@jax.jit
def unit_aware_transformer(prep, left_sign, left_count, right_sign, right_count):
    # left_sign / right_sign accepted for interface parity but unused
    # (they are also unused by the PyTorch forward).
    del left_sign, right_sign
    p = prep

    lf, lm = _preprocess(left_count, p['embed'])
    rf, rm = _preprocess(right_count, p['embed'])
    B = lf.shape[0]
    BT = 2 * B

    # Stack left/right on the row axis.
    x0 = jnp.concatenate([lf, rf], axis=0)                       # (2B, S, D)
    m = jnp.concatenate([lm, rm], axis=0)                        # (2B, S)
    m_swap = jnp.concatenate([rm, lm], axis=0)

    # Additive key-padding biases, lane-replicated so the in-kernel add is only
    # a free major-axis broadcast (lane-dense, 32 KB each).
    def _key_bias(mask):
        b = jnp.where(mask > 0, 0.0, NEG).astype(jnp.float32)
        return jnp.broadcast_to(b[:, :, None], (BT, S_PAD, EMBED_DIM))
    bias_self = _key_bias(m)
    bias_cross = _key_bias(m_swap)

    # Constant 0/1 matrices (folded to constants by XLA at compile time):
    #   seg: per-head segment all-ones blocks (scores replication / reduction)
    #   g  : query-row replication  (rows*S, rows)
    #   gt : sum over keys          (rows, rows*S)
    d_idx = jnp.arange(EMBED_DIM)
    seg = (d_idx[:, None] // HEAD_DIM == d_idx[None, :] // HEAD_DIM
           ).astype(jnp.float32)                                  # (128, 128)
    r_idx = jnp.arange(BT * S_PAD * S_PAD)
    c_idx = jnp.arange(BT * S_PAD)
    g = (r_idx[:, None] // S_PAD == c_idx[None, :]).astype(jnp.float32)  # (512, 64)
    gt = g.T                                                             # (64, 512)

    act_args = [x0, m, bias_self, bias_cross, seg, g, gt]
    vffn_args = [p['vw1'], p['vb1'], p['vw2'], p['vb2']]
    layer_args = [p['e_in_w'], p['e_in_b'], p['e_out_w'], p['e_out_b'],
                  p['e_fw1'], p['e_fb1'], p['e_fw2'], p['e_fb2'],
                  p['f_in_w'], p['f_in_b'], p['f_out_w'], p['f_out_b'],
                  p['f_fw1'], p['f_fb1'], p['f_fw2'], p['f_fb2']]
    fc_args = [p['fc_w1'], p['fc_b1'], p['fc_w2'], p['fc_b2']]
    args = act_args + vffn_args + layer_args + fc_args

    in_specs = ([_const_spec(a.shape) for a in act_args + vffn_args]
                + [_layer_spec(a.shape) for a in layer_args]
                + [_const_spec(a.shape) for a in fc_args])

    out = pl.pallas_call(
        transformer_kernel,
        out_shape=jax.ShapeDtypeStruct((B, 1), jnp.float32),
        grid=(NUM_LAYERS,),
        in_specs=in_specs,
        out_specs=pl.BlockSpec((B, 1), lambda i: (0, 0)),
        scratch_shapes=[pltpu.VMEM((BT, S_PAD, EMBED_DIM), jnp.float32)],
        compiler_params=pltpu.CompilerParams(
            dimension_semantics=("arbitrary",),
            vmem_limit_bytes=16 * 1024 * 1024),
    )(*args)
    return out[:, 0]


def init_params(key):
    keys = iter(jax.random.split(key, 64))

    def nrm(shape, std=0.02):
        return (std * jax.random.normal(next(keys), shape)).astype(jnp.float32)

    D, L = EMBED_DIM, NUM_LAYERS
    return {
        'embed': nrm((NUM_UNITS, D)),
        # value_ffn
        'vw1': nrm((D, 2 * D)), 'vb1': nrm((1, 2 * D)),
        'vw2': nrm((2 * D, D)), 'vb2': nrm((1, D)),
        # enemy attention / ffn (stacked over layers), weights pre-transposed to (in, out)
        'e_in_w': nrm((L, D, 3 * D)), 'e_in_b': nrm((L, 1, 3 * D)),
        'e_out_w': nrm((L, D, D)), 'e_out_b': nrm((L, 1, D)),
        'e_fw1': nrm((L, D, 4 * D)), 'e_fb1': nrm((L, 1, 4 * D)),
        'e_fw2': nrm((L, 4 * D, D)), 'e_fb2': nrm((L, 1, D)),
        # friend attention / ffn (stacked over layers)
        'f_in_w': nrm((L, D, 3 * D)), 'f_in_b': nrm((L, 1, 3 * D)),
        'f_out_w': nrm((L, D, D)), 'f_out_b': nrm((L, 1, D)),
        'f_fw1': nrm((L, D, 4 * D)), 'f_fb1': nrm((L, 1, 4 * D)),
        'f_fw2': nrm((L, 4 * D, D)), 'f_fb2': nrm((L, 1, D)),
        # scoring head
        'fc_w1': nrm((D, 2 * D)), 'fc_b1': nrm((1, 2 * D)),
        'fc_w2': nrm((2 * D, 1)), 'fc_b2': nrm((1, 1)),
    }


if __name__ == "__main__":
    key = jax.random.PRNGKey(0)
    pkey, k1, k2 = jax.random.split(key, 3)
    params = init_params(pkey)
    prep = prepare_params(params)       # one-time bf16 cast + scale folding

    B = 4
    # positive counts so each side has 3 valid (mask=True) top-k slots
    left_count = jax.random.uniform(k1, (B, NUM_UNITS), minval=0.0, maxval=10.0)
    right_count = jax.random.uniform(k2, (B, NUM_UNITS), minval=0.0, maxval=10.0)
    left_sign = jnp.zeros((B, NUM_UNITS), jnp.float32)     # unused, interface parity
    right_sign = jnp.zeros((B, NUM_UNITS), jnp.float32)    # unused, interface parity

    out = unit_aware_transformer(prep, left_sign, left_count,
                                 right_sign, right_count)
    out = jax.block_until_ready(out)
    assert out.shape == (B,)
    assert bool(jnp.all(jnp.isfinite(out)))
    print("KERNEL_OK")
</pallas_src>

<mosaic_0001>
module attributes {stable_mosaic.version = 11 : i64} {
  func.func @transformer_kernel(%arg0: i32, %arg1: memref<8x8x128xf32, #tpu.memory_space<vmem>>, %arg2: memref<8x8xf32, #tpu.memory_space<vmem>>, %arg3: memref<8x8x128xf32, #tpu.memory_space<vmem>>, %arg4: memref<8x8x128xf32, #tpu.memory_space<vmem>>, %arg5: memref<128x128xf32, #tpu.memory_space<vmem>>, %arg6: memref<512x64xf32, #tpu.memory_space<vmem>>, %arg7: memref<64x512xf32, #tpu.memory_space<vmem>>, %arg8: memref<128x256xbf16, #tpu.memory_space<vmem>>, %arg9: memref<1x256xf32, #tpu.memory_space<vmem>>, %arg10: memref<256x128xbf16, #tpu.memory_space<vmem>>, %arg11: memref<1x128xf32, #tpu.memory_space<vmem>>, %arg12: memref<1x128x384xbf16, #tpu.memory_space<vmem>>, %arg13: memref<1x1x384xf32, #tpu.memory_space<vmem>>, %arg14: memref<1x128x128xbf16, #tpu.memory_space<vmem>>, %arg15: memref<1x1x128xf32, #tpu.memory_space<vmem>>, %arg16: memref<1x128x512xbf16, #tpu.memory_space<vmem>>, %arg17: memref<1x1x512xf32, #tpu.memory_space<vmem>>, %arg18: memref<1x512x128xbf16, #tpu.memory_space<vmem>>, %arg19: memref<1x1x128xf32, #tpu.memory_space<vmem>>, %arg20: memref<1x128x384xbf16, #tpu.memory_space<vmem>>, %arg21: memref<1x1x384xf32, #tpu.memory_space<vmem>>, %arg22: memref<1x128x128xbf16, #tpu.memory_space<vmem>>, %arg23: memref<1x1x128xf32, #tpu.memory_space<vmem>>, %arg24: memref<1x128x512xbf16, #tpu.memory_space<vmem>>, %arg25: memref<1x1x512xf32, #tpu.memory_space<vmem>>, %arg26: memref<1x512x128xbf16, #tpu.memory_space<vmem>>, %arg27: memref<1x1x128xf32, #tpu.memory_space<vmem>>, %arg28: memref<128x256xbf16, #tpu.memory_space<vmem>>, %arg29: memref<1x256xf32, #tpu.memory_space<vmem>>, %arg30: memref<256x1xbf16, #tpu.memory_space<vmem>>, %arg31: memref<1x1xf32, #tpu.memory_space<vmem>>, %arg32: memref<4x1xf32, #tpu.memory_space<vmem>>, %arg33: memref<8x8x128xf32, #tpu.memory_space<vmem>>) attributes {dimension_semantics = [#tpu.dimension_semantics<arbitrary>], iteration_bounds = array<i64: 3>, scalar_prefetch = 0 : i64, scratch_operands = 1 : i64, tpu.core_type = #tpu.core_type<tc>, window_params = [{pipeline_mode = #tpu.pipeline_mode<synchronous>, transform_indices = @transform_0, window_bounds = array<i64: 8, 8, 128>}, {pipeline_mode = #tpu.pipeline_mode<synchronous>, transform_indices = @transform_1, window_bounds = array<i64: 8, 8>}, {pipeline_mode = #tpu.pipeline_mode<synchronous>, transform_indices = @transform_2, window_bounds = array<i64: 8, 8, 128>}, {pipeline_mode = #tpu.pipeline_mode<synchronous>, transform_indices = @transform_3, window_bounds = array<i64: 8, 8, 128>}, {pipeline_mode = #tpu.pipeline_mode<synchronous>, transform_indices = @transform_4, window_bounds = array<i64: 128, 128>}, {pipeline_mode = #tpu.pipeline_mode<synchronous>, transform_indices = @transform_5, window_bounds = array<i64: 512, 64>}, {pipeline_mode = #tpu.pipeline_mode<synchronous>, transform_indices = @transform_6, window_bounds = array<i64: 64, 512>}, {pipeline_mode = #tpu.pipeline_mode<synchronous>, transform_indices = @transform_7, window_bounds = array<i64: 128, 256>}, {pipeline_mode = #tpu.pipeline_mode<synchronous>, transform_indices = @transform_8, window_bounds = array<i64: 1, 256>}, {pipeline_mode = #tpu.pipeline_mode<synchronous>, transform_indices = @transform_9, window_bounds = array<i64: 256, 128>}, {pipeline_mode = #tpu.pipeline_mode<synchronous>, transform_indices = @transform_10, window_bounds = array<i64: 1, 128>}, {transform_indices = @transform_11, window_bounds = array<i64: 1, 128, 384>}, {transform_indices = @transform_12, window_bounds = array<i64: 1, 1, 384>}, {transform_indices = @transform_13, window_bounds = array<i64: 1, 128, 128>}, {transform_indices = @transform_14, window_bounds = array<i64: 1, 1, 128>}, {transform_indices = @transform_15, window_bounds = array<i64: 1, 128, 512>}, {transform_indices = @transform_16, window_bounds = array<i64: 1, 1, 512>}, {transform_indices = @transform_17, window_bounds = array<i64: 1, 512, 128>}, {transform_indices = @transform_18, window_bounds = array<i64: 1, 1, 128>}, {transform_indices = @transform_19, window_bounds = array<i64: 1, 128, 384>}, {transform_indices = @transform_20, window_bounds = array<i64: 1, 1, 384>}, {transform_indices = @transform_21, window_bounds = array<i64: 1, 128, 128>}, {transform_indices = @transform_22, window_bounds = array<i64: 1, 1, 128>}, {transform_indices = @transform_23, window_bounds = array<i64: 1, 128, 512>}, {transform_indices = @transform_24, window_bounds = array<i64: 1, 1, 512>}, {transform_indices = @transform_25, window_bounds = array<i64: 1, 512, 128>}, {transform_indices = @transform_26, window_bounds = array<i64: 1, 1, 128>}, {pipeline_mode = #tpu.pipeline_mode<synchronous>, transform_indices = @transform_27, window_bounds = array<i64: 128, 256>}, {pipeline_mode = #tpu.pipeline_mode<synchronous>, transform_indices = @transform_28, window_bounds = array<i64: 1, 256>}, {pipeline_mode = #tpu.pipeline_mode<synchronous>, transform_indices = @transform_29, window_bounds = array<i64: 256, 1>}, {pipeline_mode = #tpu.pipeline_mode<synchronous>, transform_indices = @transform_30, window_bounds = array<i64: 1, 1>}, {pipeline_mode = #tpu.pipeline_mode<synchronous>, transform_indices = @transform_31, window_bounds = array<i64: 4, 1>}]} {
    %c0_i32 = arith.constant 0 : i32
    %0 = arith.cmpi eq, %arg0, %c0_i32 : i32
    %1 = arith.extui %0 : i1 to i32
    %c0_i32_0 = arith.constant 0 : i32
    %2 = arith.cmpi ne, %1, %c0_i32_0 : i32
    scf.if %2 {
      %c0_86 = arith.constant 0 : index
      %c0_87 = arith.constant 0 : index
      %c0_88 = arith.constant 0 : index
      %161 = vector.load %arg1[%c0_86, %c0_87, %c0_88] : memref<8x8x128xf32, #tpu.memory_space<vmem>>, vector<8x8x128xf32>
      %c0_89 = arith.constant 0 : index
      %c0_90 = arith.constant 0 : index
      %162 = vector.load %arg8[%c0_89, %c0_90] : memref<128x256xbf16, #tpu.memory_space<vmem>>, vector<128x256xbf16>
      %c0_91 = arith.constant 0 : index
      %c0_92 = arith.constant 0 : index
      %163 = vector.load %arg9[%c0_91, %c0_92] : memref<1x256xf32, #tpu.memory_space<vmem>>, vector<1x256xf32>
      %c0_93 = arith.constant 0 : index
      %c0_94 = arith.constant 0 : index
      %164 = vector.load %arg10[%c0_93, %c0_94] : memref<256x128xbf16, #tpu.memory_space<vmem>>, vector<256x128xbf16>
      %c0_95 = arith.constant 0 : index
      %c0_96 = arith.constant 0 : index
      %165 = vector.load %arg11[%c0_95, %c0_96] : memref<1x128xf32, #tpu.memory_space<vmem>>, vector<1x128xf32>
      %166 = vector.shape_cast %161 : vector<8x8x128xf32> to vector<64x128xf32>
      %167 = arith.truncf %166 : vector<64x128xf32> to vector<64x128xbf16>
      %cst_97 = arith.constant dense<0.000000e+00> : vector<64x256xf32>
      %168 = tpu.matmul %167, %162, %cst_97 {dimension_numbers = #tpu.dot_dimension_numbers<[1], [0], [0], [1], [0, 0, 1, 1], [], []>} : vector<64x128xbf16>, vector<128x256xbf16>, vector<64x256xf32> -> vector<64x256xf32>
      %169 = vector.broadcast %163 : vector<1x256xf32> to vector<64x256xf32>
      %170 = arith.addf %168, %169 : vector<64x256xf32>
      %cst_98 = arith.constant 0.000000e+00 : f32
      %171 = vector.broadcast %cst_98 : f32 to vector<64x256xf32>
      %172 = arith.maximumf %170, %171 : vector<64x256xf32>
      %173 = arith.truncf %172 : vector<64x256xf32> to vector<64x256xbf16>
      %cst_99 = arith.constant dense<0.000000e+00> : vector<64x128xf32>
      %174 = tpu.matmul %173, %164, %cst_99 {dimension_numbers = #tpu.dot_dimension_numbers<[1], [0], [0], [1], [0, 0, 1, 1], [], []>} : vector<64x256xbf16>, vector<256x128xbf16>, vector<64x128xf32> -> vector<64x128xf32>
      %175 = vector.broadcast %165 : vector<1x128xf32> to vector<64x128xf32>
      %176 = arith.addf %174, %175 : vector<64x128xf32>
      %177 = vector.shape_cast %176 : vector<64x128xf32> to vector<8x8x128xf32>
      %178 = arith.addf %161, %177 : vector<8x8x128xf32>
      %c0_100 = arith.constant 0 : index
      %c0_101 = arith.constant 0 : index
      %c0_102 = arith.constant 0 : index
      %179 = vector.load %arg33[%c0_100, %c0_101, %c0_102] : memref<8x8x128xf32, #tpu.memory_space<vmem>>, vector<8x8x128xf32>
      tpu.vector_store %arg33[%c0_100, %c0_101, %c0_102], %178 {strides = array<i32>} : memref<8x8x128xf32, #tpu.memory_space<vmem>>, vector<8x8x128xf32>,
    } else {
    }
    %c0 = arith.constant 0 : index
    %c0_1 = arith.constant 0 : index
    %c0_2 = arith.constant 0 : index
    %3 = vector.load %arg33[%c0, %c0_1, %c0_2] : memref<8x8x128xf32, #tpu.memory_space<vmem>>, vector<8x8x128xf32>
    %c0_3 = arith.constant 0 : index
    %c0_4 = arith.constant 0 : index
    %4 = vector.load %arg5[%c0_3, %c0_4] : memref<128x128xf32, #tpu.memory_space<vmem>>, vector<128x128xf32>
    %c0_5 = arith.constant 0 : index
    %c0_6 = arith.constant 0 : index
    %5 = vector.load %arg6[%c0_5, %c0_6] : memref<512x64xf32, #tpu.memory_space<vmem>>, vector<512x64xf32>
    %c0_7 = arith.constant 0 : index
    %c0_8 = arith.constant 0 : index
    %6 = vector.load %arg7[%c0_7, %c0_8] : memref<64x512xf32, #tpu.memory_space<vmem>>, vector<64x512xf32>
    %c0_9 = arith.constant 0 : index
    %c0_10 = arith.constant 0 : index
    %c0_11 = arith.constant 0 : index
    %7 = vector.load %arg4[%c0_9, %c0_10, %c0_11] : memref<8x8x128xf32, #tpu.memory_space<vmem>>, vector<8x8x128xf32>
    %c0_12 = arith.constant 0 : index
    %c0_13 = arith.constant 0 : index
    %c0_14 = arith.constant 0 : index
    %8 = vector.load %arg3[%c0_12, %c0_13, %c0_14] : memref<8x8x128xf32, #tpu.memory_space<vmem>>, vector<8x8x128xf32>
    %c0_15 = arith.constant 0 : index
    %c0_16 = arith.constant 0 : index
    %c0_17 = arith.constant 0 : index
    %9 = vector.load %arg12[%c0_15, %c0_16, %c0_17] : memref<1x128x384xbf16, #tpu.memory_space<vmem>>, vector<1x128x384xbf16>
    %10 = vector.shape_cast %9 : vector<1x128x384xbf16> to vector<128x384xbf16>
    %c0_18 = arith.constant 0 : index
    %c0_19 = arith.constant 0 : index
    %c0_20 = arith.constant 0 : index
    %11 = vector.load %arg13[%c0_18, %c0_19, %c0_20] : memref<1x1x384xf32, #tpu.memory_space<vmem>>, vector<1x1x384xf32>
    %12 = vector.shape_cast %11 : vector<1x1x384xf32> to vector<1x384xf32>
    %c0_21 = arith.constant 0 : index
    %c0_22 = arith.constant 0 : index
    %c0_23 = arith.constant 0 : index
    %13 = vector.load %arg14[%c0_21, %c0_22, %c0_23] : memref<1x128x128xbf16, #tpu.memory_space<vmem>>, vector<1x128x128xbf16>
    %14 = vector.shape_cast %13 : vector<1x128x128xbf16> to vector<128x128xbf16>
    %c0_24 = arith.constant 0 : index
    %c0_25 = arith.constant 0 : index
    %c0_26 = arith.constant 0 : index
    %15 = vector.load %arg15[%c0_24, %c0_25, %c0_26] : memref<1x1x128xf32, #tpu.memory_space<vmem>>, vector<1x1x128xf32>
    %16 = vector.shape_cast %15 : vector<1x1x128xf32> to vector<1x128xf32>
    %17 = vector.shape_cast %3 : vector<8x8x128xf32> to vector<64x128xf32>
    %18 = arith.truncf %17 : vector<64x128xf32> to vector<64x128xbf16>
    %cst = arith.constant dense<0.000000e+00> : vector<64x384xf32>
    %19 = tpu.matmul %18, %10, %cst {dimension_numbers = #tpu.dot_dimension_numbers<[1], [0], [0], [1], [0, 0, 1, 1], [], []>} : vector<64x128xbf16>, vector<128x384xbf16>, vector<64x384xf32> -> vector<64x384xf32>
    %20 = vector.broadcast %12 : vector<1x384xf32> to vector<64x384xf32>
    %21 = arith.addf %19, %20 : vector<64x384xf32>
    %22 = vector.shape_cast %21 : vector<64x384xf32> to vector<8x8x384xf32>
    %23 = vector.extract_strided_slice %22 {offsets = [0, 0, 0], sizes = [8, 8, 128], strides = [1, 1, 1]} : vector<8x8x384xf32> to vector<8x8x128xf32>
    %24 = vector.extract_strided_slice %22 {offsets = [0, 0, 128], sizes = [8, 8, 128], strides = [1, 1, 1]} : vector<8x8x384xf32> to vector<8x8x128xf32>
    %25 = vector.extract_strided_slice %22 {offsets = [0, 0, 256], sizes = [8, 8, 128], strides = [1, 1, 1]} : vector<8x8x384xf32> to vector<8x8x128xf32>
    %26 = vector.extract_strided_slice %24 {offsets = [4, 0, 0], sizes = [4, 8, 128], strides = [1, 1, 1]} : vector<8x8x128xf32> to vector<4x8x128xf32>
    %27 = vector.extract_strided_slice %24 {offsets = [0, 0, 0], sizes = [4, 8, 128], strides = [1, 1, 1]} : vector<8x8x128xf32> to vector<4x8x128xf32>
    %28 = tpu.concatenate %26, %27 in 0 : vector<4x8x128xf32>, vector<4x8x128xf32> -> vector<8x8x128xf32>
    %29 = vector.extract_strided_slice %25 {offsets = [4, 0, 0], sizes = [4, 8, 128], strides = [1, 1, 1]} : vector<8x8x128xf32> to vector<4x8x128xf32>
    %30 = vector.extract_strided_slice %25 {offsets = [0, 0, 0], sizes = [4, 8, 128], strides = [1, 1, 1]} : vector<8x8x128xf32> to vector<4x8x128xf32>
    %31 = tpu.concatenate %29, %30 in 0 : vector<4x8x128xf32>, vector<4x8x128xf32> -> vector<8x8x128xf32>
    %32 = vector.shape_cast %23 : vector<8x8x128xf32> to vector<64x128xf32>
    %cst_27 = arith.constant dense<0.000000e+00> : vector<512x128xf32>
    %33 = tpu.matmul %5, %32, %cst_27 {dimension_numbers = #tpu.dot_dimension_numbers<[1], [0], [0], [1], [0, 0, 1, 1], [], []>} : vector<512x64xf32>, vector<64x128xf32>, vector<512x128xf32> -> vector<512x128xf32>
    %34 = vector.shape_cast %33 : vector<512x128xf32> to vector<8x8x8x128xf32>
    %35 = vector.shape_cast %28 : vector<8x8x128xf32> to vector<8x1x8x128xf32>
    %36 = vector.broadcast %35 : vector<8x1x8x128xf32> to vector<8x8x8x128xf32>
    %37 = arith.mulf %34, %36 : vector<8x8x8x128xf32>
    %38 = vector.shape_cast %37 : vector<8x8x8x128xf32> to vector<512x128xf32>
    %cst_28 = arith.constant dense<0.000000e+00> : vector<512x128xf32>
    %39 = tpu.matmul %38, %4, %cst_28 {dimension_numbers = #tpu.dot_dimension_numbers<[1], [0], [0], [1], [0, 0, 1, 1], [], []>} : vector<512x128xf32>, vector<128x128xf32>, vector<512x128xf32> -> vector<512x128xf32>
    %40 = vector.shape_cast %39 : vector<512x128xf32> to vector<8x8x8x128xf32>
    %41 = vector.shape_cast %7 : vector<8x8x128xf32> to vector<8x1x8x128xf32>
    %42 = vector.broadcast %41 : vector<8x1x8x128xf32> to vector<8x8x8x128xf32>
    %43 = arith.addf %40, %42 : vector<8x8x8x128xf32>
    %cst_29 = arith.constant dense<0xFF800000> : vector<8x8x128xf32>
    %44 = vector.multi_reduction <maximumf>, %43, %cst_29 [2] : vector<8x8x8x128xf32> to vector<8x8x128xf32>
    %45 = vector.shape_cast %44 : vector<8x8x128xf32> to vector<8x8x1x128xf32>
    %46 = vector.broadcast %45 : vector<8x8x1x128xf32> to vector<8x8x8x128xf32>
    %47 = arith.subf %43, %46 : vector<8x8x8x128xf32>
    %48 = math.exp %47 : vector<8x8x8x128xf32>
    %cst_30 = arith.constant dense<0.000000e+00> : vector<8x8x128xf32>
    %49 = vector.multi_reduction <add>, %48, %cst_30 [2] : vector<8x8x8x128xf32> to vector<8x8x128xf32>
    %50 = vector.shape_cast %49 : vector<8x8x128xf32> to vector<8x8x1x128xf32>
    %51 = tpu.reciprocal %50 : vector<8x8x1x128xf32> -> vector<8x8x1x128xf32>
    %52 = vector.broadcast %51 : vector<8x8x1x128xf32> to vector<8x8x8x128xf32>
    %53 = arith.mulf %48, %52 : vector<8x8x8x128xf32>
    %54 = vector.shape_cast %31 : vector<8x8x128xf32> to vector<8x1x8x128xf32>
    %55 = vector.broadcast %54 : vector<8x1x8x128xf32> to vector<8x8x8x128xf32>
    %56 = arith.mulf %53, %55 : vector<8x8x8x128xf32>
    %57 = vector.shape_cast %56 : vector<8x8x8x128xf32> to vector<512x128xf32>
    %cst_31 = arith.constant dense<0.000000e+00> : vector<64x128xf32>
    %58 = tpu.matmul %6, %57, %cst_31 {dimension_numbers = #tpu.dot_dimension_numbers<[1], [0], [0], [1], [0, 0, 1, 1], [], []>} : vector<64x512xf32>, vector<512x128xf32>, vector<64x128xf32> -> vector<64x128xf32>
    %59 = arith.truncf %58 : vector<64x128xf32> to vector<64x128xbf16>
    %cst_32 = arith.constant dense<0.000000e+00> : vector<64x128xf32>
    %60 = tpu.matmul %59, %14, %cst_32 {dimension_numbers = #tpu.dot_dimension_numbers<[1], [0], [0], [1], [0, 0, 1, 1], [], []>} : vector<64x128xbf16>, vector<128x128xbf16>, vector<64x128xf32> -> vector<64x128xf32>
    %61 = vector.broadcast %16 : vector<1x128xf32> to vector<64x128xf32>
    %62 = arith.addf %60, %61 : vector<64x128xf32>
    %63 = vector.shape_cast %62 : vector<64x128xf32> to vector<8x8x128xf32>
    %64 = arith.addf %3, %63 : vector<8x8x128xf32>
    %c0_33 = arith.constant 0 : index
    %c0_34 = arith.constant 0 : index
    %c0_35 = arith.constant 0 : index
    %65 = vector.load %arg16[%c0_33, %c0_34, %c0_35] : memref<1x128x512xbf16, #tpu.memory_space<vmem>>, vector<1x128x512xbf16>
    %66 = vector.shape_cast %65 : vector<1x128x512xbf16> to vector<128x512xbf16>
    %c0_36 = arith.constant 0 : index
    %c0_37 = arith.constant 0 : index
    %c0_38 = arith.constant 0 : index
    %67 = vector.load %arg17[%c0_36, %c0_37, %c0_38] : memref<1x1x512xf32, #tpu.memory_space<vmem>>, vector<1x1x512xf32>
    %68 = vector.shape_cast %67 : vector<1x1x512xf32> to vector<1x512xf32>
    %c0_39 = arith.constant 0 : index
    %c0_40 = arith.constant 0 : index
    %c0_41 = arith.constant 0 : index
    %69 = vector.load %arg18[%c0_39, %c0_40, %c0_41] : memref<1x512x128xbf16, #tpu.memory_space<vmem>>, vector<1x512x128xbf16>
    %70 = vector.shape_cast %69 : vector<1x512x128xbf16> to vector<512x128xbf16>
    %c0_42 = arith.constant 0 : index
    %c0_43 = arith.constant 0 : index
    %c0_44 = arith.constant 0 : index
    %71 = vector.load %arg19[%c0_42, %c0_43, %c0_44] : memref<1x1x128xf32, #tpu.memory_space<vmem>>, vector<1x1x128xf32>
    %72 = vector.shape_cast %71 : vector<1x1x128xf32> to vector<1x128xf32>
    %73 = vector.shape_cast %64 : vector<8x8x128xf32> to vector<64x128xf32>
    %74 = arith.truncf %73 : vector<64x128xf32> to vector<64x128xbf16>
    %cst_45 = arith.constant dense<0.000000e+00> : vector<64x512xf32>
    %75 = tpu.matmul %74, %66, %cst_45 {dimension_numbers = #tpu.dot_dimension_numbers<[1], [0], [0], [1], [0, 0, 1, 1], [], []>} : vector<64x128xbf16>, vector<128x512xbf16>, vector<64x512xf32> -> vector<64x512xf32>
    %76 = vector.broadcast %68 : vector<1x512xf32> to vector<64x512xf32>
    %77 = arith.addf %75, %76 : vector<64x512xf32>
    %cst_46 = arith.constant 0.000000e+00 : f32
    %78 = vector.broadcast %cst_46 : f32 to vector<64x512xf32>
    %79 = arith.maximumf %77, %78 : vector<64x512xf32>
    %80 = arith.truncf %79 : vector<64x512xf32> to vector<64x512xbf16>
    %cst_47 = arith.constant dense<0.000000e+00> : vector<64x128xf32>
    %81 = tpu.matmul %80, %70, %cst_47 {dimension_numbers = #tpu.dot_dimension_numbers<[1], [0], [0], [1], [0, 0, 1, 1], [], []>} : vector<64x512xbf16>, vector<512x128xbf16>, vector<64x128xf32> -> vector<64x128xf32>
    %82 = vector.broadcast %72 : vector<1x128xf32> to vector<64x128xf32>
    %83 = arith.addf %81, %82 : vector<64x128xf32>
    %84 = vector.shape_cast %83 : vector<64x128xf32> to vector<8x8x128xf32>
    %85 = arith.addf %64, %84 : vector<8x8x128xf32>
    %c0_48 = arith.constant 0 : index
    %c0_49 = arith.constant 0 : index
    %c0_50 = arith.constant 0 : index
    %86 = vector.load %arg20[%c0_48, %c0_49, %c0_50] : memref<1x128x384xbf16, #tpu.memory_space<vmem>>, vector<1x128x384xbf16>
    %87 = vector.shape_cast %86 : vector<1x128x384xbf16> to vector<128x384xbf16>
    %c0_51 = arith.constant 0 : index
    %c0_52 = arith.constant 0 : index
    %c0_53 = arith.constant 0 : index
    %88 = vector.load %arg21[%c0_51, %c0_52, %c0_53] : memref<1x1x384xf32, #tpu.memory_space<vmem>>, vector<1x1x384xf32>
    %89 = vector.shape_cast %88 : vector<1x1x384xf32> to vector<1x384xf32>
    %c0_54 = arith.constant 0 : index
    %c0_55 = arith.constant 0 : index
    %c0_56 = arith.constant 0 : index
    %90 = vector.load %arg22[%c0_54, %c0_55, %c0_56] : memref<1x128x128xbf16, #tpu.memory_space<vmem>>, vector<1x128x128xbf16>
    %91 = vector.shape_cast %90 : vector<1x128x128xbf16> to vector<128x128xbf16>
    %c0_57 = arith.constant 0 : index
    %c0_58 = arith.constant 0 : index
    %c0_59 = arith.constant 0 : index
    %92 = vector.load %arg23[%c0_57, %c0_58, %c0_59] : memref<1x1x128xf32, #tpu.memory_space<vmem>>, vector<1x1x128xf32>
    %93 = vector.shape_cast %92 : vector<1x1x128xf32> to vector<1x128xf32>
    %94 = vector.shape_cast %85 : vector<8x8x128xf32> to vector<64x128xf32>
    %95 = arith.truncf %94 : vector<64x128xf32> to vector<64x128xbf16>
    %cst_60 = arith.constant dense<0.000000e+00> : vector<64x384xf32>
    %96 = tpu.matmul %95, %87, %cst_60 {dimension_numbers = #tpu.dot_dimension_numbers<[1], [0], [0], [1], [0, 0, 1, 1], [], []>} : vector<64x128xbf16>, vector<128x384xbf16>, vector<64x384xf32> -> vector<64x384xf32>
    %97 = vector.broadcast %89 : vector<1x384xf32> to vector<64x384xf32>
    %98 = arith.addf %96, %97 : vector<64x384xf32>
    %99 = vector.shape_cast %98 : vector<64x384xf32> to vector<8x8x384xf32>
    %100 = vector.extract_strided_slice %99 {offsets = [0, 0, 0], sizes = [8, 8, 128], strides = [1, 1, 1]} : vector<8x8x384xf32> to vector<8x8x128xf32>
    %101 = vector.extract_strided_slice %99 {offsets = [0, 0, 128], sizes = [8, 8, 128], strides = [1, 1, 1]} : vector<8x8x384xf32> to vector<8x8x128xf32>
    %102 = vector.extract_strided_slice %99 {offsets = [0, 0, 256], sizes = [8, 8, 128], strides = [1, 1, 1]} : vector<8x8x384xf32> to vector<8x8x128xf32>
    %103 = vector.shape_cast %100 : vector<8x8x128xf32> to vector<64x128xf32>
    %cst_61 = arith.constant dense<0.000000e+00> : vector<512x128xf32>
    %104 = tpu.matmul %5, %103, %cst_61 {dimension_numbers = #tpu.dot_dimension_numbers<[1], [0], [0], [1], [0, 0, 1, 1], [], []>} : vector<512x64xf32>, vector<64x128xf32>, vector<512x128xf32> -> vector<512x128xf32>
    %105 = vector.shape_cast %104 : vector<512x128xf32> to vector<8x8x8x128xf32>
    %106 = vector.shape_cast %101 : vector<8x8x128xf32> to vector<8x1x8x128xf32>
    %107 = vector.broadcast %106 : vector<8x1x8x128xf32> to vector<8x8x8x128xf32>
    %108 = arith.mulf %105, %107 : vector<8x8x8x128xf32>
    %109 = vector.shape_cast %108 : vector<8x8x8x128xf32> to vector<512x128xf32>
    %cst_62 = arith.constant dense<0.000000e+00> : vector<512x128xf32>
    %110 = tpu.matmul %109, %4, %cst_62 {dimension_numbers = #tpu.dot_dimension_numbers<[1], [0], [0], [1], [0, 0, 1, 1], [], []>} : vector<512x128xf32>, vector<128x128xf32>, vector<512x128xf32> -> vector<512x128xf32>
    %111 = vector.shape_cast %110 : vector<512x128xf32> to vector<8x8x8x128xf32>
    %112 = vector.shape_cast %8 : vector<8x8x128xf32> to vector<8x1x8x128xf32>
    %113 = vector.broadcast %112 : vector<8x1x8x128xf32> to vector<8x8x8x128xf32>
    %114 = arith.addf %111, %113 : vector<8x8x8x128xf32>
    %cst_63 = arith.constant dense<0xFF800000> : vector<8x8x128xf32>
    %115 = vector.multi_reduction <maximumf>, %114, %cst_63 [2] : vector<8x8x8x128xf32> to vector<8x8x128xf32>
    %116 = vector.shape_cast %115 : vector<8x8x128xf32> to vector<8x8x1x128xf32>
    %117 = vector.broadcast %116 : vector<8x8x1x128xf32> to vector<8x8x8x128xf32>
    %118 = arith.subf %114, %117 : vector<8x8x8x128xf32>
    %119 = math.exp %118 : vector<8x8x8x128xf32>
    %cst_64 = arith.constant dense<0.000000e+00> : vector<8x8x128xf32>
    %120 = vector.multi_reduction <add>, %119, %cst_64 [2] : vector<8x8x8x128xf32> to vector<8x8x128xf32>
    %121 = vector.shape_cast %120 : vector<8x8x128xf32> to vector<8x8x1x128xf32>
    %122 = tpu.reciprocal %121 : vector<8x8x1x128xf32> -> vector<8x8x1x128xf32>
    %123 = vector.broadcast %122 : vector<8x8x1x128xf32> to vector<8x8x8x128xf32>
    %124 = arith.mulf %119, %123 : vector<8x8x8x128xf32>
    %125 = vector.shape_cast %102 : vector<8x8x128xf32> to vector<8x1x8x128xf32>
    %126 = vector.broadcast %125 : vector<8x1x8x128xf32> to vector<8x8x8x128xf32>
    %127 = arith.mulf %124, %126 : vector<8x8x8x128xf32>
    %128 = vector.shape_cast %127 : vector<8x8x8x128xf32> to vector<512x128xf32>
    %cst_65 = arith.constant dense<0.000000e+00> : vector<64x128xf32>
    %129 = tpu.matmul %6, %128, %cst_65 {dimension_numbers = #tpu.dot_dimension_numbers<[1], [0], [0], [1], [0, 0, 1, 1], [], []>} : vector<64x512xf32>, vector<512x128xf32>, vector<64x128xf32> -> vector<64x128xf32>
    %130 = arith.truncf %129 : vector<64x128xf32> to vector<64x128xbf16>
    %cst_66 = arith.constant dense<0.000000e+00> : vector<64x128xf32>
    %131 = tpu.matmul %130, %91, %cst_66 {dimension_numbers = #tpu.dot_dimension_numbers<[1], [0], [0], [1], [0, 0, 1, 1], [], []>} : vector<64x128xbf16>, vector<128x128xbf16>, vector<64x128xf32> -> vector<64x128xf32>
    %132 = vector.broadcast %93 : vector<1x128xf32> to vector<64x128xf32>
    %133 = arith.addf %131, %132 : vector<64x128xf32>
    %134 = vector.shape_cast %133 : vector<64x128xf32> to vector<8x8x128xf32>
    %135 = arith.addf %85, %134 : vector<8x8x128xf32>
    %c0_67 = arith.constant 0 : index
    %c0_68 = arith.constant 0 : index
    %c0_69 = arith.constant 0 : index
    %136 = vector.load %arg24[%c0_67, %c0_68, %c0_69] : memref<1x128x512xbf16, #tpu.memory_space<vmem>>, vector<1x128x512xbf16>
    %137 = vector.shape_cast %136 : vector<1x128x512xbf16> to vector<128x512xbf16>
    %c0_70 = arith.constant 0 : index
    %c0_71 = arith.constant 0 : index
    %c0_72 = arith.constant 0 : index
    %138 = vector.load %arg25[%c0_70, %c0_71, %c0_72] : memref<1x1x512xf32, #tpu.memory_space<vmem>>, vector<1x1x512xf32>
    %139 = vector.shape_cast %138 : vector<1x1x512xf32> to vector<1x512xf32>
    %c0_73 = arith.constant 0 : index
    %c0_74 = arith.constant 0 : index
    %c0_75 = arith.constant 0 : index
    %140 = vector.load %arg26[%c0_73, %c0_74, %c0_75] : memref<1x512x128xbf16, #tpu.memory_space<vmem>>, vector<1x512x128xbf16>
    %141 = vector.shape_cast %140 : vector<1x512x128xbf16> to vector<512x128xbf16>
    %c0_76 = arith.constant 0 : index
    %c0_77 = arith.constant 0 : index
    %c0_78 = arith.constant 0 : index
    %142 = vector.load %arg27[%c0_76, %c0_77, %c0_78] : memref<1x1x128xf32, #tpu.memory_space<vmem>>, vector<1x1x128xf32>
    %143 = vector.shape_cast %142 : vector<1x1x128xf32> to vector<1x128xf32>
    %144 = vector.shape_cast %135 : vector<8x8x128xf32> to vector<64x128xf32>
    %145 = arith.truncf %144 : vector<64x128xf32> to vector<64x128xbf16>
    %cst_79 = arith.constant dense<0.000000e+00> : vector<64x512xf32>
    %146 = tpu.matmul %145, %137, %cst_79 {dimension_numbers = #tpu.dot_dimension_numbers<[1], [0], [0], [1], [0, 0, 1, 1], [], []>} : vector<64x128xbf16>, vector<128x512xbf16>, vector<64x512xf32> -> vector<64x512xf32>
    %147 = vector.broadcast %139 : vector<1x512xf32> to vector<64x512xf32>
    %148 = arith.addf %146, %147 : vector<64x512xf32>
    %cst_80 = arith.constant 0.000000e+00 : f32
    %149 = vector.broadcast %cst_80 : f32 to vector<64x512xf32>
    %150 = arith.maximumf %148, %149 : vector<64x512xf32>
    %151 = arith.truncf %150 : vector<64x512xf32> to vector<64x512xbf16>
    %cst_81 = arith.constant dense<0.000000e+00> : vector<64x128xf32>
    %152 = tpu.matmul %151, %141, %cst_81 {dimension_numbers = #tpu.dot_dimension_numbers<[1], [0], [0], [1], [0, 0, 1, 1], [], []>} : vector<64x512xbf16>, vector<512x128xbf16>, vector<64x128xf32> -> vector<64x128xf32>
    %153 = vector.broadcast %143 : vector<1x128xf32> to vector<64x128xf32>
    %154 = arith.addf %152, %153 : vector<64x128xf32>
    %155 = vector.shape_cast %154 : vector<64x128xf32> to vector<8x8x128xf32>
    %156 = arith.addf %135, %155 : vector<8x8x128xf32>
    %c0_82 = arith.constant 0 : index
    %c0_83 = arith.constant 0 : index
    %c0_84 = arith.constant 0 : index
    %157 = vector.load %arg33[%c0_82, %c0_83, %c0_84] : memref<8x8x128xf32, #tpu.memory_space<vmem>>, vector<8x8x128xf32>
    tpu.vector_store %arg33[%c0_82, %c0_83, %c0_84], %156 {strides = array<i32>} : memref<8x8x128xf32, #tpu.memory_space<vmem>>, vector<8x8x128xf32>,
    %c2_i32 = arith.constant 2 : i32
    %158 = arith.cmpi eq, %arg0, %c2_i32 : i32
    %159 = arith.extui %158 : i1 to i32
    %c0_i32_85 = arith.constant 0 : i32
    %160 = arith.cmpi ne, %159, %c0_i32_85 : i32
    scf.if %160 {
      %161 = vector.shape_cast %156 : vector<8x8x128xf32> to vector<64x128xf32>
      %c0_86 = arith.constant 0 : index
      %c0_87 = arith.constant 0 : index
      %162 = vector.load %arg28[%c0_86, %c0_87] : memref<128x256xbf16, #tpu.memory_space<vmem>>, vector<128x256xbf16>
      %c0_88 = arith.constant 0 : index
      %c0_89 = arith.constant 0 : index
      %163 = vector.load %arg29[%c0_88, %c0_89] : memref<1x256xf32, #tpu.memory_space<vmem>>, vector<1x256xf32>
      %c0_90 = arith.constant 0 : index
      %c0_91 = arith.constant 0 : index
      %164 = vector.load %arg30[%c0_90, %c0_91] : memref<256x1xbf16, #tpu.memory_space<vmem>>, vector<256x1xbf16>
      %c0_92 = arith.constant 0 : index
      %c0_93 = arith.constant 0 : index
      %165 = vector.load %arg31[%c0_92, %c0_93] : memref<1x1xf32, #tpu.memory_space<vmem>>, vector<1x1xf32>
      %166 = arith.truncf %161 : vector<64x128xf32> to vector<64x128xbf16>
      %cst_94 = arith.constant dense<0.000000e+00> : vector<64x256xf32>
      %167 = tpu.matmul %166, %162, %cst_94 {dimension_numbers = #tpu.dot_dimension_numbers<[1], [0], [0], [1], [0, 0, 1, 1], [], []>} : vector<64x128xbf16>, vector<128x256xbf16>, vector<64x256xf32> -> vector<64x256xf32>
      %168 = vector.broadcast %163 : vector<1x256xf32> to vector<64x256xf32>
      %169 = arith.addf %167, %168 : vector<64x256xf32>
      %cst_95 = arith.constant 0.000000e+00 : f32
      %170 = vector.broadcast %cst_95 : f32 to vector<64x256xf32>
      %171 = arith.maximumf %169, %170 : vector<64x256xf32>
      %172 = arith.truncf %171 : vector<64x256xf32> to vector<64x256xbf16>
      %cst_96 = arith.constant dense<0.000000e+00> : vector<64x1xf32>
      %173 = tpu.matmul %172, %164, %cst_96 {dimension_numbers = #tpu.dot_dimension_numbers<[1], [0], [0], [1], [0, 0, 1, 1], [], []>} : vector<64x256xbf16>, vector<256x1xbf16>, vector<64x1xf32> -> vector<64x1xf32>
      %174 = vector.broadcast %165 : vector<1x1xf32> to vector<64x1xf32>
      %175 = arith.addf %173, %174 : vector<64x1xf32>
      %176 = vector.shape_cast %175 : vector<64x1xf32> to vector<8x8xf32>
      %c0_97 = arith.constant 0 : index
      %c0_98 = arith.constant 0 : index
      %177 = vector.load %arg2[%c0_97, %c0_98] : memref<8x8xf32, #tpu.memory_space<vmem>>, vector<8x8xf32>
      %178 = arith.mulf %176, %177 : vector<8x8xf32>
      %cst_99 = arith.constant dense<0.000000e+00> : vector<8xf32>
      %179 = vector.multi_reduction <add>, %178, %cst_99 [1] : vector<8x8xf32> to vector<8xf32>
      %180 = vector.shape_cast %179 : vector<8xf32> to vector<8x1xf32>
      %181 = vector.extract_strided_slice %180 {offsets = [4, 0], sizes = [4, 1], strides = [1, 1]} : vector<8x1xf32> to vector<4x1xf32>
      %182 = vector.extract_strided_slice %180 {offsets = [0, 0], sizes = [4, 1], strides = [1, 1]} : vector<8x1xf32> to vector<4x1xf32>
      %183 = arith.subf %181, %182 : vector<4x1xf32>
      %184 = arith.negf %183 : vector<4x1xf32>
      %185 = math.exp %184 : vector<4x1xf32>
      %cst_100 = arith.constant 1.000000e+00 : f32
      %186 = vector.broadcast %cst_100 : f32 to vector<4x1xf32>
      %187 = arith.addf %186, %185 : vector<4x1xf32>
      %188 = arith.divf %186, %187 : vector<4x1xf32>
      %c0_101 = arith.constant 0 : index
      %c0_102 = arith.constant 0 : index
      %189 = vector.load %arg32[%c0_101, %c0_102] : memref<4x1xf32, #tpu.memory_space<vmem>>, vector<4x1xf32>
      tpu.vector_store %arg32[%c0_101, %c0_102], %188 {strides = array<i32>} : memref<4x1xf32, #tpu.memory_space<vmem>>, vector<4x1xf32>,
    } else {
    }
    return
  }
  func.func @transform_0(%arg0: i32) -> (i32, i32, i32) {
    %c0_i32 = arith.constant 0 : i32
    %c0_i32_0 = arith.constant 0 : i32
    %c0_i32_1 = arith.constant 0 : i32
    %c0_i32_2 = arith.constant 0 : i32
    return %c0_i32, %c0_i32_0, %c0_i32_1 : i32, i32, i32
  }
  func.func @transform_1(%arg0: i32) -> (i32, i32) {
    %c0_i32 = arith.constant 0 : i32
    %c0_i32_0 = arith.constant 0 : i32
    %c0_i32_1 = arith.constant 0 : i32
    return %c0_i32, %c0_i32_0 : i32, i32
  }
  func.func @transform_2(%arg0: i32) -> (i32, i32, i32) {
    %c0_i32 = arith.constant 0 : i32
    %c0_i32_0 = arith.constant 0 : i32
    %c0_i32_1 = arith.constant 0 : i32
    %c0_i32_2 = arith.constant 0 : i32
    return %c0_i32, %c0_i32_0, %c0_i32_1 : i32, i32, i32
  }
  func.func @transform_3(%arg0: i32) -> (i32, i32, i32) {
    %c0_i32 = arith.constant 0 : i32
    %c0_i32_0 = arith.constant 0 : i32
    %c0_i32_1 = arith.constant 0 : i32
    %c0_i32_2 = arith.constant 0 : i32
    return %c0_i32, %c0_i32_0, %c0_i32_1 : i32, i32, i32
  }
  func.func @transform_4(%arg0: i32) -> (i32, i32) {
    %c0_i32 = arith.constant 0 : i32
    %c0_i32_0 = arith.constant 0 : i32
    %c0_i32_1 = arith.constant 0 : i32
    return %c0_i32, %c0_i32_0 : i32, i32
  }
  func.func @transform_5(%arg0: i32) -> (i32, i32) {
    %c0_i32 = arith.constant 0 : i32
    %c0_i32_0 = arith.constant 0 : i32
    %c0_i32_1 = arith.constant 0 : i32
    return %c0_i32, %c0_i32_0 : i32, i32
  }
  func.func @transform_6(%arg0: i32) -> (i32, i32) {
    %c0_i32 = arith.constant 0 : i32
    %c0_i32_0 = arith.constant 0 : i32
    %c0_i32_1 = arith.constant 0 : i32
    return %c0_i32, %c0_i32_0 : i32, i32
  }
  func.func @transform_7(%arg0: i32) -> (i32, i32) {
    %c0_i32 = arith.constant 0 : i32
    %c0_i32_0 = arith.constant 0 : i32
    %c0_i32_1 = arith.constant 0 : i32
    return %c0_i32, %c0_i32_0 : i32, i32
  }
  func.func @transform_8(%arg0: i32) -> (i32, i32) {
    %c0_i32 = arith.constant 0 : i32
    %c0_i32_0 = arith.constant 0 : i32
    %c0_i32_1 = arith.constant 0 : i32
    return %c0_i32, %c0_i32_0 : i32, i32
  }
  func.func @transform_9(%arg0: i32) -> (i32, i32) {
    %c0_i32 = arith.constant 0 : i32
    %c0_i32_0 = arith.constant 0 : i32
    %c0_i32_1 = arith.constant 0 : i32
    return %c0_i32, %c0_i32_0 : i32, i32
  }
  func.func @transform_10(%arg0: i32) -> (i32, i32) {
    %c0_i32 = arith.constant 0 : i32
    %c0_i32_0 = arith.constant 0 : i32
    %c0_i32_1 = arith.constant 0 : i32
    return %c0_i32, %c0_i32_0 : i32, i32
  }
  func.func @transform_11(%arg0: i32) -> (i32, i32, i32) {
    %c0_i32 = arith.constant 0 : i32
    %c0_i32_0 = arith.constant 0 : i32
    %c0_i32_1 = arith.constant 0 : i32
    return %arg0, %c0_i32, %c0_i32_0 : i32, i32, i32
  }
  func.func @transform_12(%arg0: i32) -> (i32, i32, i32) {
    %c0_i32 = arith.constant 0 : i32
    %c0_i32_0 = arith.constant 0 : i32
    %c0_i32_1 = arith.constant 0 : i32
    return %arg0, %c0_i32, %c0_i32_0 : i32, i32, i32
  }
  func.func @transform_13(%arg0: i32) -> (i32, i32, i32) {
    %c0_i32 = arith.constant 0 : i32
    %c0_i32_0 = arith.constant 0 : i32
    %c0_i32_1 = arith.constant 0 : i32
    return %arg0, %c0_i32, %c0_i32_0 : i32, i32, i32
  }
  func.func @transform_14(%arg0: i32) -> (i32, i32, i32) {
    %c0_i32 = arith.constant 0 : i32
    %c0_i32_0 = arith.constant 0 : i32
    %c0_i32_1 = arith.constant 0 : i32
    return %arg0, %c0_i32, %c0_i32_0 : i32, i32, i32
  }
  func.func @transform_15(%arg0: i32) -> (i32, i32, i32) {
    %c0_i32 = arith.constant 0 : i32
    %c0_i32_0 = arith.constant 0 : i32
    %c0_i32_1 = arith.constant 0 : i32
    return %arg0, %c0_i32, %c0_i32_0 : i32, i32, i32
  }
  func.func @transform_16(%arg0: i32) -> (i32, i32, i32) {
    %c0_i32 = arith.constant 0 : i32
    %c0_i32_0 = arith.constant 0 : i32
    %c0_i32_1 = arith.constant 0 : i32
    return %arg0, %c0_i32, %c0_i32_0 : i32, i32, i32
  }
  func.func @transform_17(%arg0: i32) -> (i32, i32, i32) {
    %c0_i32 = arith.constant 0 : i32
    %c0_i32_0 = arith.constant 0 : i32
    %c0_i32_1 = arith.constant 0 : i32
    return %arg0, %c0_i32, %c0_i32_0 : i32, i32, i32
  }
  func.func @transform_18(%arg0: i32) -> (i32, i32, i32) {
    %c0_i32 = arith.constant 0 : i32
    %c0_i32_0 = arith.constant 0 : i32
    %c0_i32_1 = arith.constant 0 : i32
    return %arg0, %c0_i32, %c0_i32_0 : i32, i32, i32
  }
  func.func @transform_19(%arg0: i32) -> (i32, i32, i32) {
    %c0_i32 = arith.constant 0 : i32
    %c0_i32_0 = arith.constant 0 : i32
    %c0_i32_1 = arith.constant 0 : i32
    return %arg0, %c0_i32, %c0_i32_0 : i32, i32, i32
  }
  func.func @transform_20(%arg0: i32) -> (i32, i32, i32) {
    %c0_i32 = arith.constant 0 : i32
    %c0_i32_0 = arith.constant 0 : i32
    %c0_i32_1 = arith.constant 0 : i32
    return %arg0, %c0_i32, %c0_i32_0 : i32, i32, i32
  }
  func.func @transform_21(%arg0: i32) -> (i32, i32, i32) {
    %c0_i32 = arith.constant 0 : i32
    %c0_i32_0 = arith.constant 0 : i32
    %c0_i32_1 = arith.constant 0 : i32
    return %arg0, %c0_i32, %c0_i32_0 : i32, i32, i32
  }
  func.func @transform_22(%arg0: i32) -> (i32, i32, i32) {
    %c0_i32 = arith.constant 0 : i32
    %c0_i32_0 = arith.constant 0 : i32
    %c0_i32_1 = arith.constant 0 : i32
    return %arg0, %c0_i32, %c0_i32_0 : i32, i32, i32
  }
  func.func @transform_23(%arg0: i32) -> (i32, i32, i32) {
    %c0_i32 = arith.constant 0 : i32
    %c0_i32_0 = arith.constant 0 : i32
    %c0_i32_1 = arith.constant 0 : i32
    return %arg0, %c0_i32, %c0_i32_0 : i32, i32, i32
  }
  func.func @transform_24(%arg0: i32) -> (i32, i32, i32) {
    %c0_i32 = arith.constant 0 : i32
    %c0_i32_0 = arith.constant 0 : i32
    %c0_i32_1 = arith.constant 0 : i32
    return %arg0, %c0_i32, %c0_i32_0 : i32, i32, i32
  }
  func.func @transform_25(%arg0: i32) -> (i32, i32, i32) {
    %c0_i32 = arith.constant 0 : i32
    %c0_i32_0 = arith.constant 0 : i32
    %c0_i32_1 = arith.constant 0 : i32
    return %arg0, %c0_i32, %c0_i32_0 : i32, i32, i32
  }
  func.func @transform_26(%arg0: i32) -> (i32, i32, i32) {
    %c0_i32 = arith.constant 0 : i32
    %c0_i32_0 = arith.constant 0 : i32
    %c0_i32_1 = arith.constant 0 : i32
    return %arg0, %c0_i32, %c0_i32_0 : i32, i32, i32
  }
  func.func @transform_27(%arg0: i32) -> (i32, i32) {
    %c0_i32 = arith.constant 0 : i32
    %c0_i32_0 = arith.constant 0 : i32
    %c0_i32_1 = arith.constant 0 : i32
    return %c0_i32, %c0_i32_0 : i32, i32
  }
  func.func @transform_28(%arg0: i32) -> (i32, i32) {
    %c0_i32 = arith.constant 0 : i32
    %c0_i32_0 = arith.constant 0 : i32
    %c0_i32_1 = arith.constant 0 : i32
    return %c0_i32, %c0_i32_0 : i32, i32
  }
  func.func @transform_29(%arg0: i32) -> (i32, i32) {
    %c0_i32 = arith.constant 0 : i32
    %c0_i32_0 = arith.constant 0 : i32
    %c0_i32_1 = arith.constant 0 : i32
    return %c0_i32, %c0_i32_0 : i32, i32
  }
  func.func @transform_30(%arg0: i32) -> (i32, i32) {
    %c0_i32 = arith.constant 0 : i32
    %c0_i32_0 = arith.constant 0 : i32
    %c0_i32_1 = arith.constant 0 : i32
    return %c0_i32, %c0_i32_0 : i32, i32
  }
  func.func @transform_31(%arg0: i32) -> (i32, i32) {
    %c0_i32 = arith.constant 0 : i32
    %c0_i32_0 = arith.constant 0 : i32
    %c0_i32_1 = arith.constant 0 : i32
    return %c0_i32, %c0_i32_0 : i32, i32
  }
}

</mosaic_0001>

<bundles_post_ra>
// kernel: unit_aware_transformer.1
= control target key start
LH: loop header
LB: loop body
LE: loop exit
PB: predicated region body
PF: predicated region fallthrough
CT: control target
= control target key end

     0   :  { %s14008_s6 = smov 1   ;;  %s14009_s10 = smov 2   ;;  %s17745_s0 = inlined_call_operand.smem [shape: u32[32], index: -1, kind: input, shape index: {}] }
   0x1   :  { %s14072_s5 = sld [smem:[%s17745_s0]]   ;;  %s14010_s14 = smov 3  }
   0x2   :  { %s14077_s9 = sld [smem:[%s17745_s0 + %s14008_s6]]   ;;  %s14011_s18 = smov 4  }
   0x3   :  { %s14082_s13 = sld [smem:[%s17745_s0 + %s14009_s10]]   ;;  %s14012_s22 = smov 5  }
   0x4   :  { %s14087_s17 = sld [smem:[%s17745_s0 + %s14010_s14]]   ;;  %s14013_s26 = smov 6  }
   0x5   :  { %s14092_s21 = sld [smem:[%s17745_s0 + %s14011_s18]]   ;;  %s14014_s30 = smov 7  }
   0x6   :  { %s14097_s25 = sld [smem:[%s17745_s0 + %s14012_s22]]   ;;  %s14015_s4 = smov 8  }
   0x7   :  { %17898 = sst [smem:[#allocation28_spill]] %s14072_s5  ;;  %s14016_s10 = smov 9  }
   0x8   :  { %17899 = sst [smem:[#allocation29_spill]] %s14077_s9  ;;  %s14017_s15 = smov 10  }
   0x9   :  { %17900 = sst [smem:[#allocation30_spill]] %s14082_s13  ;;  %s14018_s20 = smov 11  }
   0xa   :  { %17901 = sst [smem:[#allocation31_spill]] %s14087_s17  ;;  %s14020_s1 = smov 13  }
   0xb   :  { %17902 = sst [smem:[#allocation32_spill]] %s14092_s21  ;;  %s14021_s7 = smov 14  }
   0xc   :  { %17903 = sst [smem:[#allocation33_spill]] %s14097_s25  ;;  %s14023_s22 = smov 16  }
   0xd   :  { %s14102_s29 = sld [smem:[%s17745_s0 + %s14013_s26]]   ;;  %s14019_s26 = smov 12  }
   0xe   :  { %s14107_s3 = sld [smem:[%s17745_s0 + %s14014_s30]]   ;;  %s14024_s28 = smov 17  }
   0xf   :  { %s14112_s8 = sld [smem:[%s17745_s0 + %s14015_s4]]   ;;  %s14038_s16 = smov 31  }
  0x10   :  { %s14117_s14 = sld [smem:[%s17745_s0 + %s14016_s10]]  }
  0x11   :  { %s14122_s19 = sld [smem:[%s17745_s0 + %s14017_s15]]   ;;  %s14022_s15 = smov 15  }
  0x12   :  { %s14127_s24 = sld [smem:[%s17745_s0 + %s14018_s20]]  }
  0x13   :  { %17904 = sst [smem:[#allocation34_spill]] %s14102_s29 }
  0x14   :  { %17905 = sst [smem:[#allocation35_spill]] %s14107_s3 }
  0x15   :  { %17906 = sst [smem:[#allocation36_spill]] %s14112_s8 }
  0x16   :  { %s14132_s30 = sld [smem:[%s17745_s0 + %s14019_s26]]  }
  0x17   :  { %17907 = sst [smem:[#allocation37_spill]] %s14122_s19 }
  0x18   :  { %s14137_s6 = sld [smem:[%s17745_s0 + %s14020_s1]]  }
  0x19   :  { %s14142_s12 = sld [smem:[%s17745_s0 + %s14021_s7]]   ;;  %s14025_s7 = smov 18  }
  0x1a   :  { %s14147_s20 = sld [smem:[%s17745_s0 + %s14022_s15]]   ;;  %s14026_s15 = smov 19  }
  0x1b   :  { %s14152_s27 = sld [smem:[%s17745_s0 + %s14023_s22]]   ;;  %s14027_s22 = smov 20  }
  0x1c   :  { %s14157_s4 = sld [smem:[%s17745_s0 + %s14024_s28]]   ;;  %s14028_s28 = smov 21  }
  0x1d   :  { %s14162_s9 = sld [smem:[%s17745_s0 + %s14025_s7]]   ;;  %s14029_s7 = smov 22  }
  0x1e   :  { %17908 = sst [smem:[#allocation38_spill]] %s14137_s6 }
  0x1f   :  { %s14167_s13 = sld [smem:[%s17745_s0 + %s14026_s15]]   ;;  %s14030_s15 = smov 23  }
  0x20   :  { %17909 = sst [smem:[#allocation39_spill]] %s14147_s20 }
  0x21   :  { %s14172_s29 = sld [smem:[%s17745_s0 + %s14027_s22]]   ;;  %s14031_s22 = smov 24  }
  0x22   :  { %17910 = sst [smem:[#allocation40_spill]] %s14157_s4 }
  0x23   :  { %17911 = sst [smem:[#allocation41_spill]] %s14162_s9 }
  0x24   :  { %s14177_s17 = sld [smem:[%s17745_s0 + %s14028_s28]]   ;;  %s14032_s28 = smov 25  }
  0x25   :  { %s14182_s21 = sld [smem:[%s17745_s0 + %s14029_s7]]   ;;  %s14033_s7 = smov 26  }
  0x26   :  { %s14187_s25 = sld [smem:[%s17745_s0 + %s14030_s15]]   ;;  %s14034_s15 = smov 27  }
  0x27   :  { %s14192_s19 = sld [smem:[%s17745_s0 + %s14031_s22]]   ;;  %s14035_s22 = smov 28  }
  0x28   :  { %s14197_s8 = sld [smem:[%s17745_s0 + %s14032_s28]]   ;;  %s14036_s28 = smov 29  }
  0x29   :  { %s14202_s5 = sld [smem:[%s17745_s0 + %s14033_s7]]   ;;  %s14037_s7 = smov 30  }
  0x2a   :  { %17912 = sst [smem:[#allocation42_spill]] %s14177_s17 }
  0x2b   :  { %s14212_s17 = sld [smem:[%s17745_s0 + %s14035_s22]]  }
  0x2c   :  { %17913 = sst [smem:[#allocation43_spill]] %s14187_s25 }
  0x2d   :  { %s14207_s25 = sld [smem:[%s17745_s0 + %s14034_s15]]  }
  0x2e   :  { %17914 = sst [smem:[#allocation44_spill]] %s14197_s8 }
  0x2f   :  { %17915 = sst [smem:[#allocation45_spill]] %s14202_s5 }
  0x30   :  { %s14217_s4 = sld [smem:[%s17745_s0 + %s14036_s28]]  }
  0x31   :  { %17916 = sst [smem:[#allocation46_spill]] %s14212_s17 }
  0x32   :  { %s10276_s20 = sld [smem:[%s17745_s0 + %s14037_s7]]  }
  0x33   :  { %s14225_s5 = sld [smem:[%s17745_s0 + %s14038_s16]]  }
  0x36   :  { %17917 = sst [smem:[#allocation47_spill]] %s14217_s4 }
  0x38   :  { %v68_v0 = vstv %s10276_s20 }
  0x39   :  { %17918 = sst [smem:[#allocation48_spill]] %s14225_s5  ;;  %69 = vst [vmem:[#allocation3] sm:$0x1] %v68_v0 }
  0x3a   :  { %70 = vsyncpa [#allocation5], 0 }
  0x3b   :  { %71 = vsyncpa [#allocation7], 0 }
  0x3c   :  { %72 = vsyncpa [#allocation22], 0  ;;  %s14227_s22 = smov 0   ;;  %s14229_s23 = smov 0  }
  0x3d   :  { %s14231_s26 = smov 0   ;;  %s14233_s28 = smov 0  }
  0x3e LB: > { %s17919_s9 = sld [smem:[#allocation41_spill]]  ;;  %s17920_s8 = sld [smem:[#allocation44_spill]]  ;;  %s14006_s28 = sphi %s14233_s28, %s18181_s28   ;;  %s14002_s26 = sphi %s14231_s26, %s18184_s26   ;;  %s13998_s23 = sphi %s14229_s23, %s18183_s23   ;;  %s13994_s22 = sphi %s14227_s22, %s18182_s22  }
  0x3f   : > { %s17921_s6 = sld [smem:[#allocation38_spill]]  ;;  %s17922_s3 = sld [smem:[#allocation35_spill]] }
  0x40   : > { %17923 = sst [smem:[#allocation49_spill]] %s13998_s23  ;;  %s14246_s0 = sadd.s32 4294967295, %s14006_s28  }
  0x41   : > { %17924 = sst [smem:[#allocation50_spill]] %s14002_s26  ;;  %s14249_s20 = sadd.s32 1, %s14006_s28  }
  0x42   : > { %17925 = sst [smem:[#allocation51_spill]] %s14246_s0  ;;  %s313_s1 = ssub.s32 %s14006_s28, %s14249_s20 }
  0x43   : > { %17926 = sst [smem:[#allocation52_spill]] %s14249_s20  ;;  %s316_s2 = sadd.s32 1, %s14002_s26 }
  0x44   : > { %p314_p0 = scmp.eq.s32.totalorder %s313_s1, 0  ;;  %p323_p1 = scmp.ne.s32.totalorder %s14002_s26, %s13998_s23 }
  0x45   : > { %p324_p2 = scmp.eq.s32.totalorder %s14006_s28, 0  ;;  %p329_p3 = scmp.ne.s32.totalorder %s13998_s23, %s13994_s22 }
  0x46   : > { %s14259_s7 = scalar_select %p314_p0, %s14002_s26, %s316_s2  }
  0x47   : > { %p14261_p4 = por %p324_p2, %p323_p1  ;;  %p17756_p5 = scmp.eq.s32.totalorder %s14246_s0, 0 }
  0x48   : > { %17927 = sst [smem:[#allocation53_spill]] %s14259_s7  ;;  %p10279_p6 = scmp.ge.s32.totalorder %s14006_s28, 1 }
  0x49   : > { %p835_p7 = scmp.lt.s32.totalorder %s14006_s28, 4  ;;  %p14270_p8 = por %p17756_p5, %p329_p3 }
  0x4a   : > { %s14039_s15 = smov [#allocation4]   ;;  %p12461_p13 = scmp.lt.s32.totalorder %s14006_s28, 3 }
  0x4b   : > { %s17929_s11 = scalar_select %p14270_p8, 1, 0 }
  0x4c   : > { %p14275_p10 = pnand %p10279_p6, %p835_p7  ;;  %s868_s18 = sshll.u32 %s14039_s15, 4  ;;  %s869_s18 = int_to_ptr.vmem [resolvable:$true] %s868_s18 }
  0x4d   : > { %17930 = sst [smem:[#allocation54_spill]] %s17929_s11  ;;  %s14289_s1 = sand.u32 1, %s14002_s26  }
  0x4e   : > { %s17931_s16 = scalar_select %p14275_p10, 1, 0 }
  0x4f   : > { %p12407_p11 = pneg %p14275_p10  ;;  %s931_s2 = sand.u32 1, %s14006_s28  }
  0x50   : > { %17932 = sst [smem:[#allocation55_spill]] %s17931_s16  ;;  %p14294_p0 = pnand %p12461_p13, %p14261_p4 }
  0x51   : > { %p14283_p12 = pnand %p12407_p11, %p17756_p5  ;;  %s13484_s20 = scalar_lea.hbm %s17922_s3, 2048 }
  0x52   : > { %s17934_s7 = scalar_select %p14294_p0, 1, 0 }
  0x53   : > { %s17933_s22 = scalar_select %p14283_p12, 1, 0 }
  0x54   : > { %p13485_p1 = scmp.ne.s32.totalorder %s17922_s3, %s13484_s20  ;;  %p14302_p2 = pneg %p14283_p12 }
  0x55   : > { %p13491_p7 = scmp.lt.u32.totalorder %s13484_s20, %s17922_s3 }
  0x56   : > { %s17935_s15 = scalar_select %p14302_p2, 1, 0 }
  0x57   : > { %p13487_p3 = pnand %p14302_p2, %p13485_p1 }
  0x59   : > { %p13488_p6 = pneg %p13487_p3 }
  0x5b   : > { %p13493_p11 = pnand %p13491_p7, %p13488_p6 }
  0x5d   : > { %13496 = shalt.err (!%p13493_p11)
}
  0x5e   : > { %s13497_s26 = scalar_lea.vmem %s869_s18, 2048  ;;  %p13505_p5 = scmp.lt.s32.totalorder %s869_s18, %s869_s18 }
  0x5f   : > { %p13498_p4 = scmp.ne.s32.totalorder %s869_s18, %s13497_s26  ;;  %p13506_p8 = scmp.lt.s32.totalorder %s13497_s26, %s13497_s26 }
  0x61   : > { %p13500_p13 = pnand %p13498_p4, %p14302_p2  ;;  %p13507_p10 = por %p13506_p8, %p13505_p5 }
  0x63   : > { %p13501_p9 = pneg %p13500_p13 }
  0x65   : > { %p13508_p0 = pnand %p13507_p10, %p13501_p9 }
  0x67   : > { %13511 = shalt.err (!%p13508_p0)
}
  0x68   : > { %s17768_s10 = smov 128   ;;  %s17773_s20 = smov 8  }
  0x69   : > { %12410 = dma.hbm_to_vmem [thread:$0]  (!%p14283_p12), %s17922_s3, 2048, %s869_s18, [#allocation5], %s17768_s10, %s17768_s10, %s17773_s20  }
  0x6a   : > { %s17774_s26 = smul.u32 192, %s14289_s1  ;;  %s14329_s16 = scalar_lea.sflag [#allocation5], %s931_s2 }
  0x6b   : > { %s17775_s5 = smul.u32 3072, %s14006_s28  ;;  %p17936_p8 = scmp.ne.s32.totalorder %s17934_s7, 0 }
  0x6c   : > { %s17777_s4 = smul.u32 3, %s14289_s1  ;;  %s935_s23 = scalar_lea.vmem [#allocation8], %s17774_s26 }
  0x6d   : > { %s14323_s11 = scalar_lea.hbm %s14127_s24, %s17775_s5  ;;  %s942_s0 = sshll.u32 %s935_s23, 4  ;;  %s14327_s0 = int_to_ptr.vmem [resolvable:$true] %s942_s0 }
  0x6e   : > { %s13512_s17 = scalar_lea.hbm %s14323_s11, 3072  ;;  %p14335_p9 = pneg %p17936_p8 }
  0x6f   : > { %p13513_p5 = scmp.ne.s32.totalorder %s14323_s11, %s13512_s17  ;;  %s13517_s10 = scalar_lea.hbm %s14127_s24, 9216 }
  0x70   : > { %s17937_s18 = scalar_select %p14335_p9, 1, 0 }
  0x71   : > { %p13515_p10 = pnand %p14335_p9, %p13513_p5  ;;  %p13518_p1 = scmp.lt.u32.totalorder %s14323_s11, %s14127_s24 }
  0x72   : > { %p13519_p3 = scmp.lt.u32.totalorder %s13517_s10, %s13512_s17  ;;  %p13521_p7 = scmp.lt.u32.totalorder %s13512_s17, %s14323_s11 }
  0x73   : > { %p13516_p0 = pneg %p13515_p10 }
  0x74   : > { %p13520_p6 = por %p13519_p3, %p13518_p1 }
  0x76   : > { %p13522_p11 = por %p13521_p7, %p13520_p6 }
  0x78   : > { %p13523_p4 = pnand %p13522_p11, %p13516_p0 }
  0x7a   : > { %13526 = shalt.err (!%p13523_p4)
}
  0x7b   : > { %s13527_s23 = scalar_lea.vmem %s14327_s0, 3072  ;;  %s14042_s2 = smov [#allocation8]  }
  0x7c   : > { %p13528_p13 = scmp.ne.s32.totalorder %s14327_s0, %s13527_s23  ;;  %s13532_s20 = sshll.u32 %s14042_s2, 4  ;;  %s13533_s20 = int_to_ptr.vmem [resolvable:$false] %s13532_s20 }
  0x7d   : > { %s13534_s26 = scalar_lea.vmem %s13533_s20, 6144  ;;  %p13535_p5 = scmp.lt.s32.totalorder %s14327_s0, %s13533_s20 }
  0x7e   : > { %p13530_p12 = pnand %p13528_p13, %p14335_p9  ;;  %p13536_p10 = scmp.lt.s32.totalorder %s13534_s26, %s13527_s23 }
  0x80   : > { %p13531_p2 = pneg %p13530_p12  ;;  %p13537_p1 = por %p13536_p10, %p13535_p5 }
  0x82   : > { %p13538_p3 = pnand %p13537_p1, %p13531_p2 }
  0x84   : > { %13541 = shalt.err (!%p13538_p3)
}
  0x85   : > { %s17780_s17 = smov 192   ;;  %s17781_s10 = smov 12  }
  0x86   : > { %12423 = dma.hbm_to_vmem [thread:$0]  (!%p17936_p8), %s14323_s11, 3072, %s14327_s0, %s14329_s16, %s17780_s17, %s17780_s17, %s17781_s10  }
  0x87   : > { %s17779_s20 = smul.u32 48, %s14006_s28  ;;  %s956_s26 = scalar_lea.vmem [#allocation9], %s17777_s4 }
  0x88   : > { %s964_s23 = sshll.u32 %s956_s26, 4  ;;  %s13547_s3 = scalar_lea.hbm %s14132_s30, 144  ;;  %s965_s23 = int_to_ptr.vmem [resolvable:$true] %s964_s23 }
  0x89   : > { %s962_s2 = scalar_lea.hbm %s14132_s30, %s17779_s20 }
  0x8a   : > { %s13542_s5 = scalar_lea.hbm %s962_s2, 48  ;;  %p13548_p6 = scmp.lt.u32.totalorder %s962_s2, %s14132_s30 }
  0x8b   : > { %p13543_p12 = scmp.ne.s32.totalorder %s962_s2, %s13542_s5  ;;  %p13549_p7 = scmp.lt.u32.totalorder %s13547_s3, %s13542_s5 }
  0x8c   : > { %p13551_p4 = scmp.lt.u32.totalorder %s13542_s5, %s962_s2 }
  0x8d   : > { %p13545_p2 = pnand %p13543_p12, %p14335_p9  ;;  %p13550_p11 = por %p13549_p7, %p13548_p6 }
  0x8f   : > { %p13546_p0 = pneg %p13545_p2  ;;  %p13552_p13 = por %p13551_p4, %p13550_p11 }
  0x91   : > { %p13553_p5 = pnand %p13552_p13, %p13546_p0 }
  0x93   : > { %13556 = shalt.err (!%p13553_p5)
}
  0x94   : > { %s13557_s0 = scalar_lea.vmem %s965_s23, 48  ;;  %s14045_s11 = smov [#allocation9]  }
  0x95   : > { %p13558_p10 = scmp.ne.s32.totalorder %s965_s23, %s13557_s0  ;;  %s13562_s26 = sshll.u32 %s14045_s11, 4  ;;  %s13563_s26 = int_to_ptr.vmem [resolvable:$false] %s13562_s26 }
  0x96   : > { %s13564_s4 = scalar_lea.vmem %s13563_s26, 96  ;;  %p13565_p12 = scmp.lt.s32.totalorder %s965_s23, %s13563_s26 }
  0x97   : > { %p13560_p1 = pnand %p13558_p10, %p14335_p9  ;;  %p13566_p2 = scmp.lt.s32.totalorder %s13564_s4, %s13557_s0 }
  0x99   : > { %p13561_p3 = pneg %p13560_p1  ;;  %p13567_p8 = por %p13566_p2, %p13565_p12 }
  0x9b   : > { %p13568_p6 = pnand %p13567_p8, %p13561_p3 }
  0x9d   : > { %13571 = shalt.err (!%p13568_p6)
}
  0x9e   : > { %p17938_p7 = scmp.ne.s32.totalorder %s17934_s7, 0  ;;  %s10287_s5 = sshll.u32 %s14289_s1, 6 }
  0x9f   : > { %s10717_s3 = sshll.u32 %s14006_s28, 10  ;;  %s975_s4 = scalar_lea.vmem [#allocation10], %s10287_s5 }
  0xa0   : > { %12426 = dma.hbm_to_vmem [thread:$0]  (!%p17938_p7), %s962_s2, 48, %s965_s23, %s14329_s16  }
  0xa1   : > { %s14376_s11 = scalar_lea.hbm %s17921_s6, %s10717_s3  ;;  %s982_s0 = sshll.u32 %s975_s4, 4  ;;  %s14378_s0 = int_to_ptr.vmem [resolvable:$true] %s982_s0 }
  0xa2   : > { %s14381_s26 = sshll.u32 %s14006_s28, 4  ;;  %s13572_s20 = scalar_lea.hbm %s14376_s11, 1024 }
  0xa3   : > { %p13573_p8 = scmp.ne.s32.totalorder %s14376_s11, %s13572_s20  ;;  %s13577_s23 = scalar_lea.hbm %s17921_s6, 3072 }
  0xa4   : > { %p13578_p4 = scmp.lt.u32.totalorder %s14376_s11, %s17921_s6  ;;  %p13579_p13 = scmp.lt.u32.totalorder %s13577_s23, %s13572_s20 }
  0xa5   : > { %p13575_p0 = pnand %p13573_p8, %p14335_p9  ;;  %p13581_p10 = scmp.lt.u32.totalorder %s13572_s20, %s14376_s11 }
  0xa6   : > { %p13580_p5 = por %p13579_p13, %p13578_p4 }
  0xa7   : > { %p13576_p11 = pneg %p13575_p0 }
  0xa8   : > { %p13582_p1 = por %p13581_p10, %p13580_p5 }
  0xaa   : > { %p13583_p3 = pnand %p13582_p1, %p13576_p11 }
  0xac   : > { %13586 = shalt.err (!%p13583_p3)
}
  0xad   : > { %s13587_s2 = scalar_lea.vmem %s14378_s0, 1024  ;;  %s14046_s5 = smov [#allocation10]  }
  0xae   : > { %p13588_p12 = scmp.ne.s32.totalorder %s14378_s0, %s13587_s2  ;;  %s13592_s3 = sshll.u32 %s14046_s5, 4  ;;  %s13593_s3 = int_to_ptr.vmem [resolvable:$false] %s13592_s3 }
  0xaf   : > { %s13594_s4 = scalar_lea.vmem %s13593_s3, 2048  ;;  %p13595_p8 = scmp.lt.s32.totalorder %s14378_s0, %s13593_s3 }
  0xb0   : > { %p13590_p2 = pnand %p13588_p12, %p14335_p9  ;;  %p13596_p0 = scmp.lt.s32.totalorder %s13594_s4, %s13587_s2 }
  0xb2   : > { %p13591_p6 = pneg %p13590_p2  ;;  %p13597_p4 = por %p13596_p0, %p13595_p8 }
  0xb4   : > { %p13598_p13 = pnand %p13597_p4, %p13591_p6 }
  0xb6   : > { %13601 = shalt.err (!%p13598_p13)
}
  0xb7   : > { %s17782_s20 = smov 64   ;;  %s17785_s23 = smov 4  }
  0xb8   : > { %12429 = dma.hbm_to_vmem [thread:$0]  (!%p17938_p7), %s14376_s11, 1024, %s14378_s0, %s14329_s16, %s17782_s20, %s17782_s20, %s17785_s23  }
  0xb9   : > { %s14406_s2 = scalar_lea.hbm %s14142_s12, %s14381_s26  ;;  %s995_s5 = scalar_lea.vmem [#allocation11], %s14289_s1 }
  0xba   : > { %s1002_s3 = sshll.u32 %s995_s5, 4  ;;  %s17787_s4 = sshll.u32 %s14289_s1, 2  ;;  %s1003_s3 = int_to_ptr.vmem [resolvable:$true] %s1002_s3 }
  0xbb   : > { %s13602_s17 = scalar_lea.hbm %s14406_s2, 16  ;;  %s13607_s10 = scalar_lea.hbm %s14142_s12, 48 }
  0xbc   : > { %p13603_p11 = scmp.ne.s32.totalorder %s14406_s2, %s13602_s17  ;;  %p13608_p1 = scmp.lt.u32.totalorder %s14406_s2, %s14142_s12 }
  0xbd   : > { %p13609_p3 = scmp.lt.u32.totalorder %s13607_s10, %s13602_s17  ;;  %p13611_p2 = scmp.lt.u32.totalorder %s13602_s17, %s14406_s2 }
  0xbe   : > { %p13605_p5 = pnand %p13603_p11, %p14335_p9 }
  0xbf   : > { %p13610_p12 = por %p13609_p3, %p13608_p1 }
  0xc0   : > { %p13606_p10 = pneg %p13605_p5 }
  0xc1   : > { %p13612_p6 = por %p13611_p2, %p13610_p12 }
  0xc3   : > { %p13613_p8 = pnand %p13612_p6, %p13606_p10 }
  0xc5   : > { %13616 = shalt.err (!%p13613_p8)
}
  0xc6   : > { %s13617_s11 = scalar_lea.vmem %s1003_s3, 16  ;;  %s14049_s0 = smov [#allocation11]  }
  0xc7   : > { %p13618_p0 = scmp.ne.s32.totalorder %s1003_s3, %s13617_s11  ;;  %s13622_s5 = sshll.u32 %s14049_s0, 4  ;;  %s13623_s5 = int_to_ptr.vmem [resolvable:$false] %s13622_s5 }
  0xc8   : > { %s13624_s20 = scalar_lea.vmem %s13623_s5, 32  ;;  %p13625_p11 = scmp.lt.s32.totalorder %s1003_s3, %s13623_s5 }
  0xc9   : > { %p13620_p4 = pnand %p13618_p0, %p14335_p9  ;;  %p13626_p5 = scmp.lt.s32.totalorder %s13624_s20, %s13617_s11 }
  0xcb   : > { %p13621_p13 = pneg %p13620_p4  ;;  %p13627_p7 = por %p13626_p5, %p13625_p11 }
  0xcd   : > { %p13628_p1 = pnand %p13627_p7, %p13621_p13 }
  0xcf   : > { %13631 = shalt.err (!%p13628_p1)
}
  0xd0   : > { %p17939_p3 = scmp.ne.s32.totalorder %s17934_s7, 0  ;;  %s17788_s17 = sshll.u32 %s14006_s28, 6 }
  0xd1   : > { %s14428_s10 = scalar_lea.hbm %s14152_s27, %s17788_s17  ;;  %s1021_s20 = scalar_lea.vmem [#allocation12], %s17787_s4 }
  0xd2   : > { %12432 = dma.hbm_to_vmem [thread:$0]  (!%p17939_p3), %s14406_s2, 16, %s1003_s3, %s14329_s16  }
  0xd3   : > { %s1029_s11 = sshll.u32 %s1021_s20, 4  ;;  %s13632_s0 = scalar_lea.hbm %s14428_s10, 64  ;;  %s1030_s11 = int_to_ptr.vmem [resolvable:$true] %s1029_s11 }
  0xd4   : > { %p13633_p7 = scmp.ne.s32.totalorder %s14428_s10, %s13632_s0  ;;  %s13637_s5 = scalar_lea.hbm %s14152_s27, 192 }
  0xd5   : > { %p13638_p2 = scmp.lt.u32.totalorder %s14428_s10, %s14152_s27  ;;  %p13639_p6 = scmp.lt.u32.totalorder %s13637_s5, %s13632_s0 }
  0xd6   : > { %p13635_p10 = pnand %p13633_p7, %p14335_p9  ;;  %p13641_p0 = scmp.lt.u32.totalorder %s13632_s0, %s14428_s10 }
  0xd7   : > { %p13640_p8 = por %p13639_p6, %p13638_p2 }
  0xd8   : > { %p13636_p12 = pneg %p13635_p10 }
  0xd9   : > { %p13642_p4 = por %p13641_p0, %p13640_p8 }
  0xdb   : > { %p13643_p13 = pnand %p13642_p4, %p13636_p12 }
  0xdd   : > { %13646 = shalt.err (!%p13643_p13)
}
  0xde   : > { %s13647_s2 = scalar_lea.vmem %s1030_s11, 64  ;;  %s14050_s3 = smov [#allocation12]  }
  0xdf   : > { %p13648_p11 = scmp.ne.s32.totalorder %s1030_s11, %s13647_s2  ;;  %s13652_s20 = sshll.u32 %s14050_s3, 4  ;;  %s13653_s20 = int_to_ptr.vmem [resolvable:$false] %s13652_s20 }
  0xe0   : > { %s13654_s23 = scalar_lea.vmem %s13653_s20, 128  ;;  %p13655_p7 = scmp.lt.s32.totalorder %s1030_s11, %s13653_s20 }
  0xe1   : > { %p13650_p5 = pnand %p13648_p11, %p14335_p9  ;;  %p13656_p10 = scmp.lt.s32.totalorder %s13654_s23, %s13647_s2 }
  0xe3   : > { %p13651_p1 = pneg %p13650_p5  ;;  %p13657_p3 = por %p13656_p10, %p13655_p7 }
  0xe5   : > { %p13658_p2 = pnand %p13657_p3, %p13651_p1 }
  0xe7   : > { %13661 = shalt.err (!%p13658_p2)
}
  0xe8   : > { %p17940_p6 = scmp.ne.s32.totalorder %s17934_s7, 0  ;;  %s14448_s0 = scalar_lea.hbm %s17919_s9, %s14381_s26 }
  0xe9   : > { %s1047_s23 = scalar_lea.vmem [#allocation13], %s14289_s1  ;;  %s13662_s2 = scalar_lea.hbm %s14448_s0, 16 }
  0xea   : > { %12435 = dma.hbm_to_vmem [thread:$0]  (!%p17940_p6), %s14428_s10, 64, %s1030_s11, %s14329_s16  }
  0xeb   : > { %s1054_s5 = sshll.u32 %s1047_s23, 4  ;;  %p13663_p3 = scmp.ne.s32.totalorder %s14448_s0, %s13662_s2  ;;  %s1055_s5 = int_to_ptr.vmem [resolvable:$true] %s1054_s5 }
  0xec   : > { %s13667_s3 = scalar_lea.hbm %s17919_s9, 48  ;;  %p13668_p0 = scmp.lt.u32.totalorder %s14448_s0, %s17919_s9 }
  0xed   : > { %p13665_p12 = pnand %p13663_p3, %p14335_p9  ;;  %p13669_p4 = scmp.lt.u32.totalorder %s13667_s3, %s13662_s2 }
  0xee   : > { %p13671_p11 = scmp.lt.u32.totalorder %s13662_s2, %s14448_s0 }
  0xef   : > { %p13666_p8 = pneg %p13665_p12  ;;  %p13670_p13 = por %p13669_p4, %p13668_p0 }
  0xf1   : > { %p13672_p5 = por %p13671_p11, %p13670_p13 }
  0xf3   : > { %p13673_p1 = pnand %p13672_p5, %p13666_p8 }
  0xf5   : > { %13676 = shalt.err (!%p13673_p1)
}
  0xf6   : > { %s13677_s10 = scalar_lea.vmem %s1055_s5, 16  ;;  %s14051_s11 = smov [#allocation13]  }
  0xf7   : > { %p13678_p7 = scmp.ne.s32.totalorder %s1055_s5, %s13677_s10  ;;  %s13682_s20 = sshll.u32 %s14051_s11, 4  ;;  %s13683_s20 = int_to_ptr.vmem [resolvable:$false] %s13682_s20 }
  0xf8   : > { %s13684_s23 = scalar_lea.vmem %s13683_s20, 32  ;;  %p13685_p3 = scmp.lt.s32.totalorder %s1055_s5, %s13683_s20 }
  0xf9   : > { %p13680_p10 = pnand %p13678_p7, %p14335_p9  ;;  %p13686_p12 = scmp.lt.s32.totalorder %s13684_s23, %s13677_s10 }
  0xfb   : > { %p13681_p2 = pneg %p13680_p10  ;;  %p13687_p6 = por %p13686_p12, %p13685_p3 }
  0xfd   : > { %p13688_p0 = pnand %p13687_p6, %p13681_p2 }
  0xff   : > { %13691 = shalt.err (!%p13688_p0)
}
 0x100   : > { %p17941_p4 = scmp.ne.s32.totalorder %s17934_s7, 0  ;;  %s17942_s2 = smul.u32 3072, %s14006_s28 }
 0x101   : > { %s17943_s11 = smul.u32 192, %s14289_s1  ;;  %s13697_s4 = scalar_lea.hbm %s14167_s13, 9216 }
 0x102   : > { %12438 = dma.hbm_to_vmem [thread:$0]  (!%p17941_p4), %s14448_s0, 16, %s1055_s5, %s14329_s16  }
 0x103   : > { %s14468_s3 = scalar_lea.hbm %s14167_s13, %s17942_s2  ;;  %s1065_s10 = scalar_lea.vmem [#allocation14], %s17943_s11 }
 0x104   : > { %s1072_s20 = sshll.u32 %s1065_s10, 4  ;;  %s13692_s23 = scalar_lea.hbm %s14468_s3, 3072  ;;  %s14472_s20 = int_to_ptr.vmem [resolvable:$true] %s1072_s20 }
 0x105   : > { %p13693_p6 = scmp.ne.s32.totalorder %s14468_s3, %s13692_s23  ;;  %p13698_p11 = scmp.lt.u32.totalorder %s14468_s3, %s14167_s13 }
 0x106   : > { %p13699_p5 = scmp.lt.u32.totalorder %s13697_s4, %s13692_s23  ;;  %p13701_p7 = scmp.lt.u32.totalorder %s13692_s23, %s14468_s3 }
 0x107   : > { %p13695_p8 = pnand %p13693_p6, %p14335_p9 }
 0x108   : > { %p13700_p1 = por %p13699_p5, %p13698_p11 }
 0x109   : > { %p13696_p13 = pneg %p13695_p8 }
 0x10a   : > { %p13702_p10 = por %p13701_p7, %p13700_p1 }
 0x10c   : > { %p13703_p2 = pnand %p13702_p10, %p13696_p13 }
 0x10e   : > { %13706 = shalt.err (!%p13703_p2)
}
 0x10f   : > { %s13707_s0 = scalar_lea.vmem %s14472_s20, 3072  ;;  %s14052_s5 = smov [#allocation14]  }
 0x110   : > { %p13708_p3 = scmp.ne.s32.totalorder %s14472_s20, %s13707_s0  ;;  %s13712_s2 = sshll.u32 %s14052_s5, 4  ;;  %s13713_s2 = int_to_ptr.vmem [resolvable:$false] %s13712_s2 }
 0x111   : > { %s13714_s11 = scalar_lea.vmem %s13713_s2, 6144  ;;  %p13715_p6 = scmp.lt.s32.totalorder %s14472_s20, %s13713_s2 }
 0x112   : > { %p13710_p12 = pnand %p13708_p3, %p14335_p9  ;;  %p13716_p8 = scmp.lt.s32.totalorder %s13714_s11, %s13707_s0 }
 0x114   : > { %p13711_p0 = pneg %p13710_p12  ;;  %p13717_p11 = por %p13716_p8, %p13715_p6 }
 0x116   : > { %p13718_p5 = pnand %p13717_p11, %p13711_p0 }
 0x118   : > { %13721 = shalt.err (!%p13718_p5)
}
 0x119   : > { %s17944_s4 = smov 12   ;;  %s17945_s10 = smov 192  }
 0x11a   : > { %12441 = dma.hbm_to_vmem [thread:$0]  (!%p17941_p4), %s14468_s3, 3072, %s14472_s20, %s14329_s16, %s17945_s10, %s17945_s10, %s17944_s4  }
 0x11b   : > { %s17946_s23 = smul.u32 48, %s14006_s28  ;;  %s13727_s6 = scalar_lea.hbm %s14172_s29, 144 }
 0x11c   : > { %s17947_s5 = smul.u32 3, %s14289_s1 }
 0x11d   : > { %s14498_s0 = scalar_lea.hbm %s14172_s29, %s17946_s23 }
 0x11e   : > { %s1086_s2 = scalar_lea.vmem [#allocation15], %s17947_s5  ;;  %s13722_s17 = scalar_lea.hbm %s14498_s0, 48 }
 0x11f   : > { %s1094_s11 = sshll.u32 %s1086_s2, 4  ;;  %p13723_p13 = scmp.ne.s32.totalorder %s14498_s0, %s13722_s17  ;;  %s1095_s11 = int_to_ptr.vmem [resolvable:$true] %s1094_s11 }
 0x120   : > { %p13728_p10 = scmp.lt.u32.totalorder %s14498_s0, %s14172_s29  ;;  %p13729_p2 = scmp.lt.u32.totalorder %s13727_s6, %s13722_s17 }
 0x121   : > { %p13725_p1 = pnand %p13723_p13, %p14335_p9  ;;  %p13731_p12 = scmp.lt.u32.totalorder %s13722_s17, %s14498_s0 }
 0x122   : > { %p13730_p3 = por %p13729_p2, %p13728_p10 }
 0x123   : > { %p13726_p7 = pneg %p13725_p1 }
 0x124   : > { %p13732_p0 = por %p13731_p12, %p13730_p3 }
 0x126   : > { %p13733_p6 = pnand %p13732_p0, %p13726_p7 }
 0x128   : > { %13736 = shalt.err (!%p13733_p6)
}
 0x129   : > { %s13737_s3 = scalar_lea.vmem %s1095_s11, 48  ;;  %s14053_s20 = smov [#allocation15]  }
 0x12a   : > { %p13738_p8 = scmp.ne.s32.totalorder %s1095_s11, %s13737_s3  ;;  %s13742_s4 = sshll.u32 %s14053_s20, 4  ;;  %s13743_s4 = int_to_ptr.vmem [resolvable:$false] %s13742_s4 }
 0x12b   : > { %s13744_s10 = scalar_lea.vmem %s13743_s4, 96  ;;  %p13745_p13 = scmp.lt.s32.totalorder %s1095_s11, %s13743_s4 }
 0x12c   : > { %p13740_p11 = pnand %p13738_p8, %p14335_p9  ;;  %p13746_p1 = scmp.lt.s32.totalorder %s13744_s10, %s13737_s3 }
 0x12e   : > { %p13741_p5 = pneg %p13740_p11  ;;  %p13747_p4 = por %p13746_p1, %p13745_p13 }
 0x130   : > { %p13748_p2 = pnand %p13747_p4, %p13741_p5 }
 0x132   : > { %13751 = shalt.err (!%p13748_p2)
}
 0x133   : > { %p17948_p10 = scmp.ne.s32.totalorder %s17934_s7, 0  ;;  %s14518_s6 = scalar_lea.hbm %s14182_s21, %s14381_s26 }
 0x134   : > { %s1112_s17 = scalar_lea.vmem [#allocation16], %s14289_s1  ;;  %s13752_s5 = scalar_lea.hbm %s14518_s6, 16 }
 0x135   : > { %12444 = dma.hbm_to_vmem [thread:$0]  (!%p17948_p10), %s14498_s0, 48, %s1095_s11, %s14329_s16  }
 0x136   : > { %s1119_s23 = sshll.u32 %s1112_s17, 4  ;;  %p13753_p4 = scmp.ne.s32.totalorder %s14518_s6, %s13752_s5  ;;  %s1120_s23 = int_to_ptr.vmem [resolvable:$true] %s1119_s23 }
 0x137   : > { %s13757_s2 = scalar_lea.hbm %s14182_s21, 48  ;;  %p13758_p12 = scmp.lt.u32.totalorder %s14518_s6, %s14182_s21 }
 0x138   : > { %p13755_p7 = pnand %p13753_p4, %p14335_p9  ;;  %p13759_p0 = scmp.lt.u32.totalorder %s13757_s2, %s13752_s5 }
 0x139   : > { %p13761_p8 = scmp.lt.u32.totalorder %s13752_s5, %s14518_s6 }
 0x13a   : > { %p13756_p3 = pneg %p13755_p7  ;;  %p13760_p6 = por %p13759_p0, %p13758_p12 }
 0x13c   : > { %p13762_p11 = por %p13761_p8, %p13760_p6 }
 0x13e   : > { %p13763_p5 = pnand %p13762_p11, %p13756_p3 }
 0x140   : > { %13766 = shalt.err (!%p13763_p5)
}
 0x141   : > { %s13767_s0 = scalar_lea.vmem %s1120_s23, 16  ;;  %s14054_s11 = smov [#allocation16]  }
 0x142   : > { %p13768_p13 = scmp.ne.s32.totalorder %s1120_s23, %s13767_s0  ;;  %s13772_s3 = sshll.u32 %s14054_s11, 4  ;;  %s13773_s3 = int_to_ptr.vmem [resolvable:$false] %s13772_s3 }
 0x143   : > { %s13774_s20 = scalar_lea.vmem %s13773_s3, 32  ;;  %p13775_p4 = scmp.lt.s32.totalorder %s1120_s23, %s13773_s3 }
 0x144   : > { %p13770_p1 = pnand %p13768_p13, %p14335_p9  ;;  %p13776_p7 = scmp.lt.s32.totalorder %s13774_s20, %s13767_s0 }
 0x146   : > { %p13771_p2 = pneg %p13770_p1  ;;  %p13777_p10 = por %p13776_p7, %p13775_p4 }
 0x148   : > { %p13778_p0 = pnand %p13777_p10, %p13771_p2 }
 0x14a   : > { %13781 = shalt.err (!%p13778_p0)
}
 0x14b   : > { %p17949_p12 = scmp.ne.s32.totalorder %s17934_s7, 0  ;;  %s17950_s4 = sshll.u32 %s14006_s28, 6 }
 0x14c   : > { %s14538_s10 = scalar_lea.hbm %s14192_s19, %s17950_s4  ;;  %s17951_s17 = sshll.u32 %s14289_s1, 2 }
 0x14d   : > { %12447 = dma.hbm_to_vmem [thread:$0]  (!%p17949_p12), %s14518_s6, 16, %s1120_s23, %s14329_s16  }
 0x14e   : > { %s1138_s5 = scalar_lea.vmem [#allocation17], %s17951_s17  ;;  %s13782_s0 = scalar_lea.hbm %s14538_s10, 64 }
 0x14f   : > { %s1146_s2 = sshll.u32 %s1138_s5, 4  ;;  %p13783_p10 = scmp.ne.s32.totalorder %s14538_s10, %s13782_s0  ;;  %s1147_s2 = int_to_ptr.vmem [resolvable:$true] %s1146_s2 }
 0x150   : > { %s13787_s11 = scalar_lea.hbm %s14192_s19, 192  ;;  %p13788_p8 = scmp.lt.u32.totalorder %s14538_s10, %s14192_s19 }
 0x151   : > { %p13785_p3 = pnand %p13783_p10, %p14335_p9  ;;  %p13789_p11 = scmp.lt.u32.totalorder %s13787_s11, %s13782_s0 }
 0x152   : > { %p13791_p13 = scmp.lt.u32.totalorder %s13782_s0, %s14538_s10 }
 0x153   : > { %p13786_p6 = pneg %p13785_p3  ;;  %p13790_p5 = por %p13789_p11, %p13788_p8 }
 0x155   : > { %p13792_p1 = por %p13791_p13, %p13790_p5 }
 0x157   : > { %p13793_p2 = pnand %p13792_p1, %p13786_p6 }
 0x159   : > { %13796 = shalt.err (!%p13793_p2)
}
 0x15a   : > { %s13797_s6 = scalar_lea.vmem %s1147_s2, 64  ;;  %s14055_s23 = smov [#allocation17]  }
 0x15b   : > { %p13798_p4 = scmp.ne.s32.totalorder %s1147_s2, %s13797_s6  ;;  %s13802_s3 = sshll.u32 %s14055_s23, 4  ;;  %s13803_s3 = int_to_ptr.vmem [resolvable:$false] %s13802_s3 }
 0x15c   : > { %s13804_s20 = scalar_lea.vmem %s13803_s3, 128  ;;  %p13805_p10 = scmp.lt.s32.totalorder %s1147_s2, %s13803_s3 }
 0x15d   : > { %p13800_p7 = pnand %p13798_p4, %p14335_p9  ;;  %p13806_p3 = scmp.lt.s32.totalorder %s13804_s20, %s13797_s6 }
 0x15f   : > { %p13801_p0 = pneg %p13800_p7  ;;  %p13807_p12 = por %p13806_p3, %p13805_p10 }
 0x161   : > { %p13808_p8 = pnand %p13807_p12, %p13801_p0 }
 0x163   : > { %13811 = shalt.err (!%p13808_p8)
}
 0x164   : > { %p17952_p11 = scmp.ne.s32.totalorder %s17934_s7, 0  ;;  %s14056_s4 = smov [#allocation6]  }
 0x165   : > { %s884_s17 = sshll.u32 %s14056_s4, 4  ;;  %s10301_s5 = sshll.u32 %s14289_s1, 8  ;;  %s885_s17 = int_to_ptr.vmem [resolvable:$true] %s884_s17 }
 0x166   : > { %12450 = dma.hbm_to_vmem [thread:$0]  (!%p17952_p11), %s14538_s10, 64, %s1147_s2, %s14329_s16  }
 0x167   : > { %s13812_s0 = scalar_lea.hbm %s14117_s14, 2048  ;;  %p17953_p5 = scmp.ne.s32.totalorder %s17935_s15, 0 }
 0x168   : > { %p13813_p6 = scmp.ne.s32.totalorder %s14117_s14, %s13812_s0  ;;  %p13819_p1 = scmp.lt.u32.totalorder %s13812_s0, %s14117_s14 }
 0x16a   : > { %p13815_p13 = pnand %p13813_p6, %p17953_p5 }
 0x16c   : > { %p13816_p12 = pneg %p13815_p13 }
 0x16e   : > { %p13821_p2 = pnand %p13819_p1, %p13816_p12 }
 0x170   : > { %13824 = shalt.err (!%p13821_p2)
}
 0x171   : > { %s13825_s11 = scalar_lea.vmem %s885_s17, 2048  ;;  %p13833_p10 = scmp.lt.s32.totalorder %s885_s17, %s885_s17 }
 0x172   : > { %p13826_p4 = scmp.ne.s32.totalorder %s885_s17, %s13825_s11  ;;  %p13834_p3 = scmp.lt.s32.totalorder %s13825_s11, %s13825_s11 }
 0x174   : > { %p13828_p7 = pnand %p13826_p4, %p17953_p5  ;;  %p13835_p8 = por %p13834_p3, %p13833_p10 }
 0x176   : > { %p13829_p0 = pneg %p13828_p7 }
 0x178   : > { %p13836_p11 = pnand %p13835_p8, %p13829_p0 }
 0x17a   : > { %13839 = shalt.err (!%p13836_p11)
}
 0x17b   : > { %p17954_p9 = scmp.ne.s32.totalorder %s17933_s22, 0  ;;  %s17955_s10 = smov 4  }
 0x17c   : > { %s17956_s2 = smov 64   ;;  %s10720_s6 = sshll.u32 %s14006_s28, 12 }
 0x17d   : > { %12413 = dma.hbm_to_vmem [thread:$0]  (!%p17954_p9), %s14117_s14, 2048, %s885_s17, [#allocation7], %s17956_s2, %s17956_s2, %s17955_s10  }
 0x17e   : > { %s1157_s23 = scalar_lea.vmem [#allocation18], %s10301_s5  ;;  %s14572_s20 = scalar_lea.hbm %s17920_s8, %s10720_s6 }
 0x17f   : > { %s1164_s3 = sshll.u32 %s1157_s23, 4  ;;  %s13840_s4 = scalar_lea.hbm %s14572_s20, 4096  ;;  %s14574_s3 = int_to_ptr.vmem [resolvable:$true] %s1164_s3 }
 0x180   : > { %p13841_p11 = scmp.ne.s32.totalorder %s14572_s20, %s13840_s4  ;;  %p17957_p6 = scmp.ne.s32.totalorder %s17937_s18, 0 }
 0x181   : > { %s13845_s0 = scalar_lea.hbm %s17920_s8, 12288  ;;  %p13846_p1 = scmp.lt.u32.totalorder %s14572_s20, %s17920_s8 }
 0x182   : > { %p13843_p13 = pnand %p13841_p11, %p17957_p6  ;;  %p13847_p2 = scmp.lt.u32.totalorder %s13845_s0, %s13840_s4 }
 0x183   : > { %p13849_p7 = scmp.lt.u32.totalorder %s13840_s4, %s14572_s20 }
 0x184   : > { %p13844_p12 = pneg %p13843_p13  ;;  %p13848_p4 = por %p13847_p2, %p13846_p1 }
 0x186   : > { %p13850_p0 = por %p13849_p7, %p13848_p4 }
 0x188   : > { %p13851_p10 = pnand %p13850_p0, %p13844_p12 }
 0x18a   : > { %13854 = shalt.err (!%p13851_p10)
}
 0x18b   : > { %s13855_s28 = scalar_lea.vmem %s14574_s3, 4096  ;;  %s14057_s17 = smov [#allocation18]  }
 0x18c   : > { %p13856_p3 = scmp.ne.s32.totalorder %s14574_s3, %s13855_s28  ;;  %s13860_s5 = sshll.u32 %s14057_s17, 4  ;;  %s13861_s5 = int_to_ptr.vmem [resolvable:$false] %s13860_s5 }
 0x18d   : > { %s13862_s11 = scalar_lea.vmem %s13861_s5, 8192  ;;  %p13863_p11 = scmp.lt.s32.totalorder %s14574_s3, %s13861_s5 }
 0x18e   : > { %p13858_p8 = pnand %p13856_p3, %p17957_p6  ;;  %p13864_p13 = scmp.lt.s32.totalorder %s13862_s11, %s13855_s28 }
 0x190   : > { %p13859_p9 = pneg %p13858_p8  ;;  %p13865_p1 = por %p13864_p13, %p13863_p11 }
 0x192   : > { %p13866_p2 = pnand %p13865_p1, %p13859_p9 }
 0x194   : > { %13869 = shalt.err (!%p13866_p2)
}
 0x195   : > { %p17958_p12 = scmp.ne.s32.totalorder %s17934_s7, 0  ;;  %s14058_s6 = smov [#allocation20]  }
 0x196   : > { %s900_s23 = sshll.u32 %s14058_s6, 4  ;;  %s14059_s4 = smov [#allocation21]   ;;  %s901_s23 = int_to_ptr.vmem [resolvable:$true] %s900_s23 }
 0x197   : > { %12453 = dma.hbm_to_vmem [thread:$0]  (!%p17958_p12), %s14572_s20, 4096, %s14574_s3, %s14329_s16, %s17956_s2, %s17956_s2, %s17955_s10  }
 0x198   : > { %s914_s0 = sshll.u32 %s14059_s4, 4  ;;  %s13870_s28 = scalar_lea.hbm %s14207_s25, 2048  ;;  %s14597_s0 = int_to_ptr.vmem [resolvable:$true] %s914_s0 }
 0x199   : > { %p13871_p9 = scmp.ne.s32.totalorder %s14207_s25, %s13870_s28  ;;  %p13877_p0 = scmp.lt.u32.totalorder %s13870_s28, %s14207_s25 }
 0x19b   : > { %p13873_p4 = pnand %p13871_p9, %p17953_p5 }
 0x19d   : > { %p13874_p7 = pneg %p13873_p4 }
 0x19f   : > { %p13879_p10 = pnand %p13877_p0, %p13874_p7 }
 0x1a1   : > { %13882 = shalt.err (!%p13879_p10)
}
 0x1a2   : > { %s13883_s17 = scalar_lea.vmem %s901_s23, 2048  ;;  %p13891_p13 = scmp.lt.s32.totalorder %s901_s23, %s901_s23 }
 0x1a3   : > { %p13884_p3 = scmp.ne.s32.totalorder %s901_s23, %s13883_s17  ;;  %p13892_p1 = scmp.lt.s32.totalorder %s13883_s17, %s13883_s17 }
 0x1a5   : > { %p13886_p8 = pnand %p13884_p3, %p17953_p5  ;;  %p13893_p2 = por %p13892_p1, %p13891_p13 }
 0x1a7   : > { %p13887_p11 = pneg %p13886_p8 }
 0x1a9   : > { %p13894_p12 = pnand %p13893_p2, %p13887_p11 }
 0x1ab   : > { %13897 = shalt.err (!%p13894_p12)
}
 0x1ac   : > { %p17959_p6 = scmp.ne.s32.totalorder %s17933_s22, 0  ;;  %s17960_s10 = smov 8  }
 0x1ad   : > { %s17961_s2 = smov 128   ;;  %s17962_s3 = sld [smem:[#allocation46_spill]] }
 0x1ae   : > { %12416 = dma.hbm_to_vmem [thread:$0]  (!%p17959_p6), %s14207_s25, 2048, %s901_s23, [#allocation7], %s17961_s2, %s17961_s2, %s17960_s10  }
 0x1b3   : > { %s13898_s20 = scalar_lea.hbm %s17962_s3, 32 }
 0x1b4   : > { %p13899_p9 = scmp.ne.s32.totalorder %s17962_s3, %s13898_s20  ;;  %p13905_p0 = scmp.lt.u32.totalorder %s13898_s20, %s17962_s3 }
 0x1b6   : > { %p13901_p4 = pnand %p13899_p9, %p17953_p5 }
 0x1b8   : > { %p13902_p7 = pneg %p13901_p4 }
 0x1ba   : > { %p13907_p10 = pnand %p13905_p0, %p13902_p7 }
 0x1bc   : > { %13910 = shalt.err (!%p13907_p10)
}
 0x1bd   : > { %s13911_s5 = scalar_lea.vmem %s14597_s0, 32  ;;  %p13919_p11 = scmp.lt.s32.totalorder %s14597_s0, %s14597_s0 }
 0x1be   : > { %p13912_p12 = scmp.ne.s32.totalorder %s14597_s0, %s13911_s5  ;;  %p13920_p13 = scmp.lt.s32.totalorder %s13911_s5, %s13911_s5 }
 0x1c0   : > { %p13914_p3 = pnand %p13912_p12, %p17953_p5  ;;  %p13921_p1 = por %p13920_p13, %p13919_p11 }
 0x1c2   : > { %p13915_p8 = pneg %p13914_p3 }
 0x1c4   : > { %p13922_p2 = pnand %p13921_p1, %p13915_p8 }
 0x1c6   : > { %13925 = shalt.err (!%p13922_p2)
}
 0x1c7   : > { %s17963_s11 = sld [smem:[#allocation45_spill]]  ;;  %s1177_s6 = scalar_lea.vmem [#allocation19], %s14289_s1 }
 0x1c8   : > { %12419 = dma.hbm_to_vmem [thread:$0]  (!%p17959_p6), %s17962_s3, 32, %s14597_s0, [#allocation22]  }
 0x1c9   : > { %s1184_s23 = sshll.u32 %s1177_s6, 4  ;;  %p17964_p9 = scmp.ne.s32.totalorder %s17937_s18, 0  ;;  %s1185_s23 = int_to_ptr.vmem [resolvable:$true] %s1184_s23 }
 0x1cd   : > { %s14629_s15 = scalar_lea.hbm %s17963_s11, %s14381_s26  ;;  %s13931_s22 = scalar_lea.hbm %s17963_s11, 48 }
 0x1ce   : > { %s13926_s4 = scalar_lea.hbm %s14629_s15, 16  ;;  %p13932_p0 = scmp.lt.u32.totalorder %s14629_s15, %s17963_s11 }
 0x1cf   : > { %p13927_p5 = scmp.ne.s32.totalorder %s14629_s15, %s13926_s4  ;;  %p13933_p10 = scmp.lt.u32.totalorder %s13931_s22, %s13926_s4 }
 0x1d0   : > { %p13935_p3 = scmp.lt.u32.totalorder %s13926_s4, %s14629_s15 }
 0x1d1   : > { %p13929_p4 = pnand %p13927_p5, %p17964_p9  ;;  %p13934_p12 = por %p13933_p10, %p13932_p0 }
 0x1d3   : > { %p13930_p7 = pneg %p13929_p4  ;;  %p13936_p6 = por %p13935_p3, %p13934_p12 }
 0x1d5   : > { %p13937_p8 = pnand %p13936_p6, %p13930_p7 }
 0x1d7   : > { %13940 = shalt.err (!%p13937_p8)
}
 0x1d8   : > { %s13941_s26 = scalar_lea.vmem %s1185_s23, 16  ;;  %s14060_s1 = smov [#allocation19]  }
 0x1d9   : > { %p13942_p11 = scmp.ne.s32.totalorder %s1185_s23, %s13941_s26  ;;  %s13946_s0 = sshll.u32 %s14060_s1, 4  ;;  %s13947_s0 = int_to_ptr.vmem [resolvable:$false] %s13946_s0 }
 0x1da   : > { %s13948_s28 = scalar_lea.vmem %s13947_s0, 32  ;;  %p13949_p2 = scmp.lt.s32.totalorder %s1185_s23, %s13947_s0 }
 0x1db   : > { %p13944_p13 = pnand %p13942_p11, %p17964_p9  ;;  %p13950_p5 = scmp.lt.s32.totalorder %s13948_s28, %s13941_s26 }
 0x1dd   : > { %p13945_p1 = pneg %p13944_p13  ;;  %p13951_p4 = por %p13950_p5, %p13949_p2 }
 0x1df   : > { %p13952_p0 = pnand %p13951_p4, %p13945_p1 }
 0x1e1   : > { %13955 = shalt.err (!%p13952_p0)
}
 0x1e2   : > { %p17965_p10 = scmp.ne.s32.totalorder %s17934_s7, 0  ;;  %s17966_s17 = sld [smem:[#allocation55_spill]] }
 0x1e4   : > { %12456 = dma.hbm_to_vmem [thread:$0]  (!%p17965_p10), %s14629_s15, 16, %s1185_s23, %s14329_s16  }
 0x1e8   : > { %p17967_p7 = scmp.ne.s32.totalorder %s17966_s17, 0 }
 0x1ea   : > { %1193 = sbr.rel (%p17967_p7) target bundleno = 5713 (0x1651), region = 144 }
 0x1f1   : > { %s17968_s18 = sld [smem:[#allocation51_spill]] }
 0x1f7   : > { %p17969_p9 = scmp.eq.s32.totalorder %s17968_s18, 0 }
 0x1f9   : > { %13973 = dma.done.wait (%p17969_p9), [#allocation5], 2048   ;;  %p17970_p12 = pmov %p17969_p9 }
 0x1fa   : > { %p17971_p3 = pmov %p17969_p9 }
 0x1fb   : > { %13975 = vsyncadd (%p17970_p12), [#allocation5], 4294965248 }
 0x1fc   : > { %13977 = dma.done.wait (%p17971_p3), [#allocation7], 2048   ;;  %p17972_p6 = pmov %p17971_p3 }
 0x1fd   : > { %s17973_s7 = sld [smem:[#allocation49_spill]]  ;;  %s17974_s10 = sld [smem:[#allocation54_spill]] }
 0x1fe   : > { %13979 = vsyncadd (%p17972_p6), [#allocation7], 4294965248  ;;  %s1203_s2 = sand.u32 1, %s17968_s18  }
 0x1ff   : > { %s1204_s5 = scalar_lea.sflag [#allocation5], %s1203_s2 }
 0x203   : > { %s14658_s16 = sand.u32 1, %s17973_s7   ;;  %p17975_p8 = scmp.ne.s32.totalorder %s17974_s10, 0 }
 0x204   : > { %s12365_s20 = smul.u32 192, %s14658_s16 }
 0x206   : > { %s14661_s15 = scalar_lea.vmem [#allocation8], %s12365_s20 }
 0x207   : > { %13981 = dma.done.wait (%p17975_p8), %s1204_s5, 11552  }
 0x208   : > { %13983 = vsyncadd (%p17975_p8), %s1204_s5, 4294955744  ;;  %s12366_s6 = smul.u32 3, %s14658_s16  ;;  %s10308_s23 = sshll.u32 %s14658_s16, 6 }
 0x209   : > { %s10309_s4 = sshll.u32 %s14658_s16, 2  ;;  %s10311_s22 = sshll.u32 %s14658_s16, 8 }
 0x20a   : > { %s14671_s26 = scalar_lea.vmem [#allocation9], %s12366_s6  ;;  %s14673_s1 = scalar_lea.vmem [#allocation10], %s10308_s23 }
 0x20b   : > { %s14676_s28 = scalar_lea.vmem [#allocation12], %s10309_s4  ;;  %s14679_s7 = scalar_lea.vmem [#allocation14], %s12365_s20 }
 0x20c   : > { %s14681_s10 = scalar_lea.vmem [#allocation15], %s12366_s6  ;;  %s14684_s5 = scalar_lea.vmem [#allocation17], %s10309_s4 }
 0x20d   : > { %s14686_s3 = scalar_lea.vmem [#allocation18], %s10311_s22  ;;  %p17976_p11 = pmov %p17971_p3 }
 0x20e   : > { %p17977_p13 = pmov %p17971_p3 }
 0x20f   : > { %13985 = dma.done.wait (%p17976_p11), [#allocation7], 2048  }
 0x210   : > { %13987 = vsyncadd (%p17977_p13), [#allocation7], 4294965248  ;;  %p17978_p1 = pmov %p17971_p3 }
 0x212   : > { %13989 = dma.done.wait (%p17978_p1), [#allocation22], 32   ;;  %p17979_p2 = pmov %p17978_p1 }
 0x213   : > { %s17980_s20 = sld [smem:[#allocation39_spill]]  ;;  %s17981_s6 = sld [smem:[#allocation40_spill]] }
 0x214   : > { %13991 = vsyncadd (%p17979_p2), [#allocation22], 4294967264  ;;  %s17982_s23 = sld [smem:[#allocation42_spill]]  ;;  %s17983_s4 = sld [smem:[#allocation43_spill]] }
 0x215   : > { %p1455_p5 = scmp.lt.s32.totalorder %s17968_s18, 2  ;;  %p17984_p4 = scmp.ne.s32.totalorder %s17968_s18, 0 }
 0x216   : > { %v12542_v1 = vld [vmem:[#allocation4 + $0x4] ss:$8 sps:$4 sm:$0xff] (!%p17984_p4)   ;;  %v12544_v2 = vld [vmem:[#allocation4] ss:$8 sps:$4 sm:$0xff] (!%p17984_p4)   ;;  %v14061_v3 = vmov (!%p17984_p4), 0   ;;  %v12570_v17 = vld [vmem:[#allocation6 + $0x50] sm:$0xff] (!%p17984_p4)   ;;  %v1543_v46 = vlaneseq (!%p17984_p4) }
 0x217   : > { %s1456_s22 = scalar_select %p1455_p5, %s17968_s18, 2 }
 0x218   : > { %1479 = sbr.rel (%p17984_p4) target bundleno = 1036 (0x40c), region = 212  ;;  %1665 = vmatprep.mubr.bf16.mxu0 (!%p17984_p4), %v14061_v3  ;;  %1633 = vmatprep.subr.bf16.mxu0 (!%p17984_p4), %v12542_v1  ;;  %v12545_v4 = vld [vmem:[#allocation4 + $0x14] ss:$8 sps:$4 sm:$0xff] (!%p17984_p4)   ;;  %v12547_v5 = vld [vmem:[#allocation4 + $0x10] ss:$8 sps:$4 sm:$0xff] (!%p17984_p4)   ;;  %v12566_v13 = vld [vmem:[#allocation6 + $0x40] sm:$0xff] (!%p17984_p4)  }
 0x219   : > { %s10721_s8 = sshll.u32 %s1456_s22, 8  ;;  %s10723_s2 = sshll.u32 %s1456_s22, 6  ;;  %1634 = vmatpush1.bf16.msra.mxu0 (!%p17984_p4), %v12544_v2  ;;  %v12548_v6 = vld [vmem:[#allocation4 + $0x24] ss:$8 sps:$4 sm:$0xff] (!%p17984_p4)   ;;  %v12550_v7 = vld [vmem:[#allocation4 + $0x20] ss:$8 sps:$4 sm:$0xff] (!%p17984_p4)   ;;  %10725 = vmatprep.subr.bf16.mxu1 (!%p17984_p4), %v12566_v13 }
 0x21a   : > { %s14700_s17 = scalar_lea.vmem %s17980_s20, %s10721_s8  ;;  %s14703_s0 = scalar_lea.vmem %s17981_s6, %s10721_s8  ;;  %1635 = vmatprep.subr.bf16.mxu0 (!%p17984_p4), %v12545_v4  ;;  %v12551_v8 = vld [vmem:[#allocation4 + $0x34] ss:$8 sps:$4 sm:$0xff] (!%p17984_p4)   ;;  %v12553_v9 = vld [vmem:[#allocation4 + $0x30] ss:$8 sps:$4 sm:$0xff] (!%p17984_p4)   ;;  %v12554_v10 = vld [vmem:[#allocation4 + $0x44] ss:$8 sps:$4 sm:$0xff] (!%p17984_p4)  }
 0x21b   : > { %s14706_s9 = scalar_lea.vmem %s17982_s23, %s10723_s2  ;;  %s14709_s11 = scalar_lea.vmem %s17983_s4, %s10721_s8  ;;  %v12556_v11 = vld [vmem:[#allocation4 + $0x40] ss:$8 sps:$4 sm:$0xff] (!%p17984_p4)   ;;  %v12557_v12 = vld [vmem:[#allocation4 + $0x54] ss:$8 sps:$4 sm:$0xff] (!%p17984_p4)   ;;  %v12559_v18 = vld [vmem:[#allocation4 + $0x50] ss:$8 sps:$4 sm:$0xff] (!%p17984_p4)  }
 0x21c   : > { %v12567_v14 = vld [vmem:[#allocation6] sm:$0xff] (!%p17984_p4)   ;;  %v12568_v15 = vld [vmem:[#allocation6 + $0x48] sm:$0xff] (!%p17984_p4)   ;;  %s17985_s8 = sld [smem:[#allocation28_spill]] (!%p17984_p4)  ;;  %v12571_v21 = vld [vmem:[#allocation6 + $0x10] sm:$0xff] (!%p17984_p4)   ;;  %v1544_v47 = vshrl.u32 (!%p17984_p4), %v1543_v46, 7  ;;  %s17987_s2 = sld [smem:[#allocation37_spill]] (!%p17984_p4) }
 0x21d   : > { %1636 = vmatpush1.bf16.msra.mxu0 (!%p17984_p4), %v12547_v5  ;;  %10726 = vmatpush3.bf16.msra.mxu1 (!%p17984_p4), %v12567_v14  ;;  %v12569_v16 = vld [vmem:[#allocation6 + $0x8] sm:$0xff] (!%p17984_p4)   ;;  %v12572_v22 = vld [vmem:[#allocation6 + $0x58] sm:$0xff] (!%p17984_p4)   ;;  %v12574_v25 = vld [vmem:[#allocation6 + $0x60] sm:$0xff] (!%p17984_p4)   ;;  %s17986_s18 = sld [smem:[#allocation36_spill]] (!%p17984_p4) }
 0x21e   : > { %1637 = vmatprep.subr.bf16.mxu0 (!%p17984_p4), %v12548_v6  ;;  %10727 = vmatprep.subr.bf16.mxu1 (!%p17984_p4), %v12568_v15  ;;  %v12560_v19 = vld [vmem:[#allocation4 + $0x64] ss:$8 sps:$4 sm:$0xff] (!%p17984_p4)   ;;  %v12562_v20 = vld [vmem:[#allocation4 + $0x60] ss:$8 sps:$4 sm:$0xff] (!%p17984_p4)   ;;  %v12563_v23 = vld [vmem:[#allocation4 + $0x74] ss:$8 sps:$4 sm:$0xff] (!%p17984_p4)  }
 0x21f   : > { %v12573_v24 = vld [vmem:[#allocation6 + $0x18] sm:$0xff]   ;;  %v12575_v29 = vld [vmem:[#allocation6 + $0x20] sm:$0xff]   ;;  %v12576_v31 = vld [vmem:[#allocation6 + $0x68] sm:$0xff]   ;;  %v1545_v48 = vsub.s32 0, %v1544_v47  ;;  %v1549_v50 = vsub.s32 1, %v1544_v47 }
 0x220   : > { %v12565_v26 = vld [vmem:[#allocation4 + $0x70] ss:$8 sps:$4 sm:$0xff]   ;;  %v12577_v41 = vld [vmem:[#allocation6 + $0x28] sm:$0xff]  }
 0x221   : > { %1638 = vmatpush1.bf16.msra.mxu0 %v12550_v7  ;;  %10728 = vmatpush3.bf16.msra.mxu1 %v12569_v16  ;;  %v12578_v42 = vld [vmem:[#allocation6 + $0x70] sm:$0xff]   ;;  %v12580_v44 = vld [vmem:[#allocation6 + $0x78] sm:$0xff]  }
 0x222   : > { %1639 = vmatprep.subr.bf16.mxu0 %v12551_v8  ;;  %10729 = vmatprep.subr.bf16.mxu1 %v12570_v17  ;;  %v14715_v27 = vld [vmem:[%s17985_s8] sm:$0xff]  ;;  %v14718_v28 = vld [vmem:[%s17985_s8 + $0x8] sm:$0xff]  ;;  %v14724_v32 = vld [vmem:[%s17985_s8 + $0x10] sm:$0xff] }
 0x223   : > { %v1538_v30 = vpack.c.bf16 %v14718_v28, %v14715_v27  ;;  %v14727_v33 = vld [vmem:[%s17985_s8 + $0x18] sm:$0xff]  ;;  %v14733_v35 = vld [vmem:[%s17985_s8 + $0x20] sm:$0xff]  ;;  %v14736_v36 = vld [vmem:[%s17985_s8 + $0x28] sm:$0xff] }
 0x224   : > { %v1539_v34 = vpack.c.bf16 %v14727_v33, %v14724_v32  ;;  %v1540_v37 = vpack.c.bf16 %v14736_v36, %v14733_v35  ;;  %v14742_v38 = vld [vmem:[%s17985_s8 + $0x30] sm:$0xff]  ;;  %v14745_v39 = vld [vmem:[%s17985_s8 + $0x38] sm:$0xff]  ;;  %v1504_v49 = vld [vmem:[%s17986_s18] sm:$0x3] }
 0x225   : > { %1640 = vmatpush1.bf16.msra.mxu0 %v12553_v9  ;;  %10730 = vmatpush3.bf16.msra.mxu1 %v12571_v21  ;;  %v1541_v40 = vpack.c.bf16 %v14745_v39, %v14742_v38  ;;  %v12579_v43 = vld [vmem:[#allocation6 + $0x30] sm:$0xff]   ;;  %v12581_v45 = vld [vmem:[#allocation6 + $0x38] sm:$0xff]   ;;  %v1546_v51 = vrot.slane %v1504_v49, %v1545_v48  ;;  %v1550_v52 = vrot.slane %v1504_v49, %v1549_v50 }
 0x226   : > { %1641 = vmatprep.subr.bf16.mxu0 %v12554_v10  ;;  %10731 = vmatprep.subr.bf16.mxu1 %v12572_v22 }
 0x229   : > { %1642 = vmatpush1.bf16.msra.mxu0 %v12556_v11  ;;  %10732 = vmatpush3.bf16.msra.mxu1 %v12573_v24 }
 0x22a   : > { %1643 = vmatprep.subr.bf16.mxu0 %v12557_v12  ;;  %10733 = vmatprep.subr.bf16.mxu1 %v12574_v25 }
 0x22d   : > { %1644 = vmatpush1.bf16.msra.mxu0 %v12559_v18  ;;  %10734 = vmatpush3.bf16.msra.mxu1 %v12575_v29 }
 0x22e   : > { %1645 = vmatprep.subr.bf16.mxu0 %v12560_v19  ;;  %10735 = vmatprep.subr.bf16.mxu1 %v12576_v31 }
 0x231   : > { %1646 = vmatpush1.bf16.msra.mxu0 %v12562_v20  ;;  %10736 = vmatpush3.bf16.msra.mxu1 %v12577_v41 }
 0x232   : > { %1647 = vmatprep.subr.bf16.mxu0 %v12563_v23  ;;  %10737 = vmatprep.subr.bf16.mxu1 %v12578_v42 }
 0x235   : > { %1648 = vmatpush1.bf16.msra.mxu0 %v12565_v26  ;;  %10738 = vmatpush3.bf16.msra.mxu1 %v12579_v43 }
 0x236   : > { %10739 = vmatprep.subr.bf16.mxu1 %v12580_v44 }
 0x238   : > { %1666 = vmatmul.mubr.bf16.vlgmr.msra.gmra.mrb[0].mxu0 %v1538_v30 }
 0x239   : > { %1675 = vmatprep.mubr.bf16.mxu0 %v14061_v3  ;;  %10740 = vmatpush3.bf16.msra.mxu1 %v12581_v45 }
 0x240   : > { %1676 = vmatmul.mubr.bf16.gmra.mrb[4].mxu0 %v1539_v34 }
 0x241   : > { %1685 = vmatprep.mubr.bf16.mxu0 %v14061_v3 }
 0x248   : > { %1686 = vmatmul.mubr.bf16.gmra.mrb[8].mxu0 %v1540_v37 }
 0x249   : > { %1695 = vmatprep.mubr.bf16.mxu0 %v14061_v3 }
 0x250   : > { %1696 = vmatmul.mubr.bf16.gmra.mrb[12].mxu0 %v1541_v40 }
 0x30b   : > { %v1667_v53 = vpop.f32.mrb[0].mxu0 }
 0x30c   : > { %v1668_v54 = vadd.f32 %v1667_v53, %v1546_v51  ;;  %v1669_v55 = vpop.f32.mrb[1].mxu0 }
 0x30d   : > { %v1670_v56 = vadd.f32 %v1669_v55, %v1550_v52  ;;  %v1671_v57 = vpop.f32.mrb[2].mxu0 }
 0x30e   : > { %v1672_v58 = vadd.f32 %v1671_v57, %v1546_v51  ;;  %v1673_v59 = vpop.f32.mrb[3].mxu0  ;;  %v1706_v61 = vmax.f32 %v1668_v54, 0.0 }
 0x30f   : > { %v1674_v60 = vadd.f32 %v1673_v59, %v1550_v52  ;;  %v1707_v63 = vmax.f32 %v1670_v56, 0.0  ;;  %v10339_v56 = vld [vmem:[%s17987_s2] ss:$0 sm:$0xff] }
 0x310   : > { %v1708_v62 = vmax.f32 %v1672_v58, 0.0 }
 0x311   : > { %v1709_v0 = vmax.f32 %v1674_v60, 0.0 }
 0x312   : > { %v1722_v1 = vpack.c.bf16 %v1708_v62, %v1706_v61 }
 0x313   : > { %v1677_v2 = vpop.f32.mrb[4].mxu0  ;;  %v1723_v3 = vpack.c.bf16 %v1709_v0, %v1707_v63 }
 0x314   : > { %v1678_v4 = vadd.f32 %v1677_v2, %v1546_v51  ;;  %v1679_v5 = vpop.f32.mrb[5].mxu0 }
 0x315   : > { %v1680_v6 = vadd.f32 %v1679_v5, %v1550_v52  ;;  %v1681_v7 = vpop.f32.mrb[6].mxu0  ;;  %1864 = vmatprep.mubr.bf16.mxu1 %v1723_v3 }
 0x316   : > { %v1682_v8 = vadd.f32 %v1681_v7, %v1546_v51  ;;  %v1683_v9 = vpop.f32.mrb[7].mxu0  ;;  %1865 = vmatmul.mubr.bf16.vlgmr.msra.gmra.mrb[0].mxu1 %v1722_v1  ;;  %v1710_v11 = vmax.f32 %v1678_v4, 0.0 }
 0x317   : > { %v1684_v10 = vadd.f32 %v1683_v9, %v1550_v52  ;;  %v1711_v13 = vmax.f32 %v1680_v6, 0.0 }
 0x318   : > { %v1712_v12 = vmax.f32 %v1682_v8, 0.0 }
 0x319   : > { %v1713_v14 = vmax.f32 %v1684_v10, 0.0 }
 0x31a   : > { %v1724_v15 = vpack.c.bf16 %v1712_v12, %v1710_v11 }
 0x31b   : > { %v1725_v16 = vpack.c.bf16 %v1713_v14, %v1711_v13  ;;  %v1687_v17 = vpop.f32.mrb[8].mxu0 }
 0x31c   : > { %v1688_v18 = vadd.f32 %v1687_v17, %v1546_v51  ;;  %v1689_v19 = vpop.f32.mrb[9].mxu0 }
 0x31d   : > { %v1690_v20 = vadd.f32 %v1689_v19, %v1550_v52  ;;  %v1691_v21 = vpop.f32.mrb[10].mxu0  ;;  %1872 = vmatprep.mubr.bf16.mxu1 %v1725_v16 }
 0x31e   : > { %v1692_v22 = vadd.f32 %v1691_v21, %v1546_v51  ;;  %v1693_v23 = vpop.f32.mrb[11].mxu0  ;;  %1873 = vmatmul.mubr.bf16.gmra.mrb[4].mxu1 %v1724_v15  ;;  %v1714_v25 = vmax.f32 %v1688_v18, 0.0 }
 0x31f   : > { %v1694_v24 = vadd.f32 %v1693_v23, %v1550_v52  ;;  %v1715_v29 = vmax.f32 %v1690_v20, 0.0 }
 0x320   : > { %v1716_v26 = vmax.f32 %v1692_v22, 0.0 }
 0x321   : > { %v1717_v30 = vmax.f32 %v1694_v24, 0.0 }
 0x322   : > { %v1726_v31 = vpack.c.bf16 %v1716_v26, %v1714_v25 }
 0x323   : > { %v1727_v34 = vpack.c.bf16 %v1717_v30, %v1715_v29  ;;  %v1697_v37 = vpop.f32.mrb[12].mxu0 }
 0x324   : > { %v1698_v40 = vadd.f32 %v1697_v37, %v1546_v51  ;;  %v1699_v41 = vpop.f32.mrb[13].mxu0 }
 0x325   : > { %v1700_v42 = vadd.f32 %v1699_v41, %v1550_v52  ;;  %v1701_v43 = vpop.f32.mrb[14].mxu0  ;;  %1880 = vmatprep.mubr.bf16.mxu1 %v1727_v34 }
 0x326   : > { %v1702_v44 = vadd.f32 %v1701_v43, %v1546_v51  ;;  %v1703_v45 = vpop.f32.mrb[15].mxu0  ;;  %1881 = vmatmul.mubr.bf16.gmra.mrb[8].mxu1 %v1726_v31  ;;  %v1718_v47 = vmax.f32 %v1698_v40, 0.0 }
 0x327   : > { %v1704_v46 = vadd.f32 %v1703_v45, %v1550_v52  ;;  %v1719_v49 = vmax.f32 %v1700_v42, 0.0 }
 0x328   : > { %v1720_v48 = vmax.f32 %v1702_v44, 0.0 }
 0x329   : > { %v1721_v50 = vmax.f32 %v1704_v46, 0.0 }
 0x32a   : > { %v1728_v53 = vpack.c.bf16 %v1720_v48, %v1718_v47 }
 0x32b   : > { %v1729_v54 = vpack.c.bf16 %v1721_v50, %v1719_v49 }
 0x32d   : > { %1888 = vmatprep.mubr.bf16.mxu1 %v1729_v54 }
 0x32e   : > { %1889 = vmatmul.mubr.bf16.gmra.mrb[12].mxu1 %v1728_v53 }
 0x3e9   : > { %v10741_v55 = vpop.f32.mrb[0].mxu1 }
 0x3ea   : > { %v10742_v57 = vpop.f32.mrb[1].mxu1 }
 0x3eb   : > { %v10743_v58 = vadd.f32 %v10742_v57, %v10741_v55  ;;  %v10744_v59 = vpop.f32.mrb[2].mxu1 }
 0x3ec   : > { %v10745_v60 = vpop.f32.mrb[3].mxu1 }
 0x3ed   : > { %v1867_v61 = vadd.f32 %v10743_v58, %v10339_v56  ;;  %v10746_v62 = vadd.f32 %v10745_v60, %v10744_v59 }
 0x3ef   : > { %v1897_v51 = vadd.f32 %v1867_v61, %v14715_v27  ;;  %v1870_v63 = vadd.f32 %v10746_v62, %v10339_v56 }
 0x3f1   : > { %1905 = vst [vmem:[#allocation2] sm:$0xff] %v1897_v51  ;;  %v1898_v52 = vadd.f32 %v1870_v63, %v14718_v28  ;;  %v10747_v0 = vpop.f32.mrb[4].mxu1 }
 0x3f2   : > { %v10748_v1 = vpop.f32.mrb[5].mxu1 }
 0x3f3   : > { %1906 = vst [vmem:[#allocation2 + $0x8] sm:$0xff] %v1898_v52  ;;  %v10749_v2 = vadd.f32 %v10748_v1, %v10747_v0  ;;  %v10750_v3 = vpop.f32.mrb[6].mxu1 }
 0x3f4   : > { %v10751_v4 = vpop.f32.mrb[7].mxu1 }
 0x3f5   : > { %v1875_v5 = vadd.f32 %v10749_v2, %v10339_v56  ;;  %v10752_v6 = vadd.f32 %v10751_v4, %v10750_v3 }
 0x3f7   : > { %v1899_v7 = vadd.f32 %v1875_v5, %v14724_v32  ;;  %v1878_v8 = vadd.f32 %v10752_v6, %v10339_v56 }
 0x3f9   : > { %1907 = vst [vmem:[#allocation2 + $0x10] sm:$0xff] %v1899_v7  ;;  %v1900_v9 = vadd.f32 %v1878_v8, %v14727_v33  ;;  %v10753_v10 = vpop.f32.mrb[8].mxu1 }
 0x3fa   : > { %v10754_v27 = vpop.f32.mrb[9].mxu1 }
 0x3fb   : > { %1908 = vst [vmem:[#allocation2 + $0x18] sm:$0xff] %v1900_v9  ;;  %v10755_v11 = vadd.f32 %v10754_v27, %v10753_v10  ;;  %v10756_v12 = vpop.f32.mrb[10].mxu1 }
 0x3fc   : > { %v10757_v28 = vpop.f32.mrb[11].mxu1 }
 0x3fd   : > { %v1883_v13 = vadd.f32 %v10755_v11, %v10339_v56  ;;  %v10758_v14 = vadd.f32 %v10757_v28, %v10756_v12 }
 0x3ff   : > { %v1901_v15 = vadd.f32 %v1883_v13, %v14733_v35  ;;  %v1886_v16 = vadd.f32 %v10758_v14, %v10339_v56 }
 0x401   : > { %1909 = vst [vmem:[#allocation2 + $0x20] sm:$0xff] %v1901_v15  ;;  %v1902_v17 = vadd.f32 %v1886_v16, %v14736_v36  ;;  %v10759_v18 = vpop.f32.mrb[12].mxu1 }
 0x402   : > { %v10760_v32 = vpop.f32.mrb[13].mxu1 }
 0x403   : > { %1910 = vst [vmem:[#allocation2 + $0x28] sm:$0xff] %v1902_v17  ;;  %v10761_v19 = vadd.f32 %v10760_v32, %v10759_v18  ;;  %v10762_v20 = vpop.f32.mrb[14].mxu1 }
 0x404   : > { %v10763_v33 = vpop.f32.mrb[15].mxu1 }
 0x405   : > { %v1891_v21 = vadd.f32 %v10761_v19, %v10339_v56  ;;  %v10764_v22 = vadd.f32 %v10763_v33, %v10762_v20 }
 0x407   : > { %v1903_v23 = vadd.f32 %v1891_v21, %v14742_v38  ;;  %v1894_v24 = vadd.f32 %v10764_v22, %v10339_v56 }
 0x409   : > { %1911 = vst [vmem:[#allocation2 + $0x30] sm:$0xff] %v1903_v23  ;;  %v1904_v25 = vadd.f32 %v1894_v24, %v14745_v39 }
 0x40b   : > { %1912 = vst [vmem:[#allocation2 + $0x38] sm:$0xff] %v1904_v25 }
 0x40c PF: > { %v12582_v35 = vld [vmem:[%s14661_s15 + $0x4] ss:$12 sps:$4 sm:$0xff]   ;;  %v12584_v36 = vld [vmem:[%s14661_s15] ss:$12 sps:$4 sm:$0xff]   ;;  %v17799_v26 = vmov 0   ;;  %v1916_v60 = vld [vmem:[#allocation2 + $0x18] sm:$0xff]  ;;  %v17798_v4 = vlaneseq }
 0x40d   : > { %2279 = vmatprep.mubr.bf16.mxu0 %v17799_v26  ;;  %2247 = vmatprep.subr.bf16.mxu0 %v12582_v35  ;;  %v12585_v38 = vld [vmem:[%s14661_s15 + $0x1c] ss:$12 sps:$4 sm:$0xff]   ;;  %v12587_v39 = vld [vmem:[%s14661_s15 + $0x18] ss:$12 sps:$4 sm:$0xff]   ;;  %v12588_v29 = vld [vmem:[%s14661_s15 + $0x34] ss:$12 sps:$4 sm:$0xff]  }
 0x40e   : > { %2248 = vmatpush1.bf16.msra.mxu0 %v12584_v36  ;;  %v12590_v30 = vld [vmem:[%s14661_s15 + $0x30] ss:$12 sps:$4 sm:$0xff]   ;;  %v12591_v31 = vld [vmem:[%s14661_s15 + $0x4c] ss:$12 sps:$4 sm:$0xff]   ;;  %v12593_v37 = vld [vmem:[%s14661_s15 + $0x48] ss:$12 sps:$4 sm:$0xff]  }
 0x40f   : > { %2249 = vmatprep.subr.bf16.mxu0 %v12585_v38  ;;  %v1913_v34 = vld [vmem:[#allocation2] sm:$0xff]  ;;  %v1914_v40 = vld [vmem:[#allocation2 + $0x8] sm:$0xff]  ;;  %v1915_v59 = vld [vmem:[#allocation2 + $0x10] sm:$0xff]  ;;  %s17988_s20 = sld [smem:[#allocation33_spill]]  ;;  %vm2385_vm0 = vcmask 523264   ;;  %v14790_v5 = vshrl.u32 %v17798_v4, 7 }
 0x410   : > { %v12594_v41 = vld [vmem:[%s14661_s15 + $0x64] ss:$12 sps:$4 sm:$0xff]   ;;  %v2099_v42 = vpack.c.bf16 %v1914_v40, %v1913_v34  ;;  %v12596_v43 = vld [vmem:[%s14661_s15 + $0x60] ss:$12 sps:$4 sm:$0xff]   ;;  %v12606_v44 = vld [vmem:[%s14661_s15 + $0x8] ss:$12 sps:$4 sm:$0xff]   ;;  %v2100_v61 = vpack.c.bf16 %v1916_v60, %v1915_v59 }
 0x411   : > { %v12607_v45 = vld [vmem:[%s14661_s15 + $0x20] ss:$12 sps:$4 sm:$0xff]   ;;  %v12597_v46 = vld [vmem:[%s14661_s15 + $0x7c] ss:$12 sps:$4 sm:$0xff]   ;;  %11541 = vmatprep.subr.bf16.mxu1 %v12606_v44  ;;  %v12608_v47 = vld [vmem:[%s14661_s15 + $0x38] ss:$12 sps:$4 sm:$0xff]  }
 0x412   : > { %2250 = vmatpush1.bf16.msra.mxu0 %v12587_v39  ;;  %11557 = vmatprep.mubr.bf16.mxu1 %v2099_v42  ;;  %v12599_v48 = vld [vmem:[%s14661_s15 + $0x78] ss:$12 sps:$4 sm:$0xff]   ;;  %v12600_v49 = vld [vmem:[%s14661_s15 + $0x94] ss:$12 sps:$4 sm:$0xff]   ;;  %v12609_v50 = vld [vmem:[%s14661_s15 + $0x50] ss:$12 sps:$4 sm:$0xff]  }
 0x413   : > { %2251 = vmatprep.subr.bf16.mxu0 %v12588_v29  ;;  %11542 = vmatpush3.bf16.msra.mxu1 %v12606_v44  ;;  %v12602_v53 = vld [vmem:[%s14661_s15 + $0x90] ss:$12 sps:$4 sm:$0xff]   ;;  %v12603_v54 = vld [vmem:[%s14661_s15 + $0xac] ss:$12 sps:$4 sm:$0xff]   ;;  %v12610_v55 = vld [vmem:[%s14661_s15 + $0x68] ss:$12 sps:$4 sm:$0xff]  }
 0x414   : > { %11543 = vmatprep.subr.bf16.mxu1 %v12607_v45  ;;  %v12605_v56 = vld [vmem:[%s14661_s15 + $0xa8] ss:$12 sps:$4 sm:$0xff]   ;;  %v12611_v57 = vld [vmem:[%s14661_s15 + $0x80] ss:$12 sps:$4 sm:$0xff]   ;;  %v12612_v58 = vld [vmem:[%s14661_s15 + $0x98] ss:$12 sps:$4 sm:$0xff]  }
 0x415   : > { %v1917_v62 = vld [vmem:[#allocation2 + $0x20] sm:$0xff]  ;;  %v1918_v51 = vld [vmem:[#allocation2 + $0x28] sm:$0xff]  ;;  %v1919_v52 = vld [vmem:[#allocation2 + $0x30] sm:$0xff]  ;;  %17989 = vst [vmem:[#allocation56_spill] sm:$0xff] %v14790_v5  ;;  %v14793_v6 = vsub.s32 1, %v14790_v5  ;;  %v14799_v8 = vsub.s32 0, %v14790_v5 }
 0x416   : > { %2252 = vmatpush1.bf16.msra.mxu0 %v12590_v30  ;;  %v2101_v63 = vpack.c.bf16 %v1918_v51, %v1917_v62  ;;  %v1920_v0 = vld [vmem:[#allocation2 + $0x38] sm:$0xff]  ;;  %v1937_v3 = vld [vmem:[%s17988_s20] sm:$0xff]  ;;  %v1943_v51 = vld [vmem:[%s17988_s20 + $0x30] sm:$0xff]  ;;  %s18044_s23 = sld [smem:[#allocation34_spill]] }
 0x417   : > { %2253 = vmatprep.subr.bf16.mxu0 %v12591_v31  ;;  %11544 = vmatpush3.bf16.msra.mxu1 %v12607_v45  ;;  %v2102_v1 = vpack.c.bf16 %v1920_v0, %v1919_v52  ;;  %v12613_v2 = vld [vmem:[%s14661_s15 + $0xb0] ss:$12 sps:$4 sm:$0xff]   ;;  %17990 = vst [vmem:[#allocation57_spill] sm:$0xff] %v14793_v6  ;;  %v14796_v7 = vld [vmem:[%s14671_s26] sm:$0x7]  ;;  %17991 = vst [vmem:[#allocation58_spill] sm:$0xff] %v14799_v8 }
 0x418   : > { %11545 = vmatprep.subr.bf16.mxu1 %v12608_v47  ;;  %v14803_v9 = vrot.slane %v14796_v7, %v14793_v6  ;;  %v2107_v10 = vrot.slane %v14796_v7, %v14799_v8  ;;  %s17992_s15 = sld [smem:[#allocation32_spill]]  ;;  %v1944_v0 = vld [vmem:[%s17988_s20 + $0x38] sm:$0xff]  ;;  %s18007_s26 = sld [smem:[#allocation31_spill]] }
 0x41a   : > { %2254 = vmatpush1.bf16.msra.mxu0 %v12593_v37 }
 0x41b   : > { %2255 = vmatprep.subr.bf16.mxu0 %v12594_v41  ;;  %11546 = vmatpush3.bf16.msra.mxu1 %v12608_v47  ;;  %v1938_v47 = vld [vmem:[%s17988_s20 + $0x8] sm:$0xff] }
 0x41c   : > { %11547 = vmatprep.subr.bf16.mxu1 %v12609_v50  ;;  %s18045_s4 = smov %s18044_s23 }
 0x41e   : > { %2256 = vmatpush1.bf16.msra.mxu0 %v12596_v43  ;;  %v1921_v44 = vld [vmem:[%s17992_s15] sm:$0xff]  ;;  %v1922_v45 = vld [vmem:[%s17992_s15 + $0x8] sm:$0xff]  ;;  %v1927_v59 = vld [vmem:[%s17992_s15 + $0x30] sm:$0xff]  ;;  %s18008_s6 = smov %s18007_s26 }
 0x41f   : > { %2257 = vmatprep.subr.bf16.mxu0 %v12597_v46  ;;  %11548 = vmatpush3.bf16.msra.mxu1 %v12609_v50  ;;  %v1923_v46 = vld [vmem:[%s17992_s15 + $0x10] sm:$0xff]  ;;  %v1928_v60 = vld [vmem:[%s17992_s15 + $0x38] sm:$0xff]  ;;  %v1930_v52 = vld [vmem:[%s17992_s15 + $0x48] sm:$0xff] }
 0x420   : > { %11549 = vmatprep.subr.bf16.mxu1 %v12610_v55  ;;  %v1939_v50 = vld [vmem:[%s17988_s20 + $0x10] sm:$0xff]  ;;  %v14855_v62 = vpack.c.bf16 %v1928_v60, %v1927_v59 }
 0x422   : > { %2258 = vmatpush1.bf16.msra.mxu0 %v12599_v48  ;;  %v14831_v48 = vpack.c.bf16 %v1922_v45, %v1921_v44  ;;  %17996 = vst [vmem:[#allocation62_spill] sm:$0xff] %v14855_v62  ;;  %v1965_v44 = vld [vmem:[%s17988_s20 + $0xe0] sm:$0xff] }
 0x423   : > { %2259 = vmatprep.subr.bf16.mxu0 %v12600_v49  ;;  %11550 = vmatpush3.bf16.msra.mxu1 %v12610_v55  ;;  %v1924_v49 = vld [vmem:[%s17992_s15 + $0x18] sm:$0xff]  ;;  %v1926_v55 = vld [vmem:[%s17992_s15 + $0x28] sm:$0xff] }
 0x424   : > { %11551 = vmatprep.subr.bf16.mxu1 %v12611_v57  ;;  %17993 = vst [vmem:[#allocation59_spill] sm:$0xff] %v14831_v48 }
 0x426   : > { %2260 = vmatpush1.bf16.msra.mxu0 %v12602_v53  ;;  %v14835_v53 = vpack.c.bf16 %v1924_v49, %v1923_v46  ;;  %v1966_v46 = vld [vmem:[%s17988_s20 + $0xe8] sm:$0xff] }
 0x427   : > { %2261 = vmatprep.subr.bf16.mxu0 %v12603_v54  ;;  %11552 = vmatpush3.bf16.msra.mxu1 %v12611_v57  ;;  %v1925_v54 = vld [vmem:[%s17992_s15 + $0x20] sm:$0xff] }
 0x428   : > { %11553 = vmatprep.subr.bf16.mxu1 %v12612_v58  ;;  %17994 = vst [vmem:[#allocation60_spill] sm:$0xff] %v14835_v53  ;;  %v14845_v57 = vpack.c.bf16 %v1926_v55, %v1925_v54  ;;  %v1968_v55 = vld [vmem:[%s17988_s20 + $0xf8] sm:$0xff] }
 0x42a   : > { %2262 = vmatpush1.bf16.msra.mxu0 %v12605_v56  ;;  %v1940_v56 = vld [vmem:[%s17988_s20 + $0x18] sm:$0xff]  ;;  %17995 = vst [vmem:[#allocation61_spill] sm:$0xff] %v14845_v57 }
 0x42b   : > { %11554 = vmatpush3.bf16.msra.mxu1 %v12612_v58  ;;  %12134 = vmatprep.subr.bf16.mxu0 %v14831_v48  ;;  %v1941_v58 = vld [vmem:[%s17988_s20 + $0x20] sm:$0xff] }
 0x42c   : > { %11555 = vmatprep.subr.bf16.mxu1 %v12613_v2 }
 0x42d   : > { %2280 = vmatmul.mubr.bf16.vlgmr.msra.gmra.mrb[0].mxu0 %v2099_v42 }
 0x42e   : > { %2289 = vmatprep.mubr.bf16.mxu0 %v17799_v26  ;;  %12136 = vmatpush3.bf16.msra.mxu0 %v14831_v48 }
 0x42f   : > { %11556 = vmatpush3.bf16.msra.mxu1 %v12613_v2  ;;  %12138 = vmatprep.subr.bf16.mxu0 %v14835_v53  ;;  %v1945_v2 = vld [vmem:[%s17988_s20 + $0x40] sm:$0xff] }
 0x432   : > { %11558 = vmatmul.mubr.bf16.vlgmr.msra.gmra.mrb[0].mxu1 %v2100_v61  ;;  %12140 = vmatpush3.bf16.msra.mxu0 %v14835_v53 }
 0x433   : > { %11561 = vmatprep.mubr.bf16.mxu1 %v2101_v63  ;;  %12142 = vmatprep.subr.bf16.mxu0 %v14845_v57 }
 0x435   : > { %2290 = vmatmul.mubr.bf16.gmra.mrb[4].mxu0 %v2100_v61  ;;  %v1942_v61 = vld [vmem:[%s17988_s20 + $0x28] sm:$0xff] }
 0x436   : > { %2299 = vmatprep.mubr.bf16.mxu0 %v17799_v26  ;;  %12144 = vmatpush3.bf16.msra.mxu0 %v14845_v57 }
 0x437   : > { %12146 = vmatprep.subr.bf16.mxu0 %v14855_v62 }
 0x43a   : > { %11562 = vmatmul.mubr.bf16.gmra.mrb[4].mxu1 %v2102_v1  ;;  %12148 = vmatpush3.bf16.msra.mxu0 %v14855_v62 }
 0x43b   : > { %11581 = vmatprep.mubr.msk.f32.mxu1 %vm2385_vm0, %v1937_v3  ;;  %v1931_v3 = vld [vmem:[%s17992_s15 + $0x50] sm:$0xff] }
 0x43d   : > { %2300 = vmatmul.mubr.bf16.gmra.mrb[8].mxu0 %v2101_v63  ;;  %v1929_v63 = vld [vmem:[%s17992_s15 + $0x40] sm:$0xff] }
 0x43e   : > { %2309 = vmatprep.mubr.bf16.mxu0 %v17799_v26 }
 0x445   : > { %2310 = vmatmul.mubr.bf16.gmra.mrb[12].mxu0 %v2102_v1  ;;  %v14865_v1 = vpack.c.bf16 %v1930_v52, %v1929_v63  ;;  %v1971_v63 = vld [vmem:[%s17988_s20 + $0x110] sm:$0xff] }
 0x447   : > { %17997 = vst [vmem:[#allocation63_spill] sm:$0xff] %v14865_v1  ;;  %12150 = vmatprep.subr.bf16.mxu0 %v14865_v1 }
 0x448   : > { %12152 = vmatpush3.bf16.msra.mxu0 %v14865_v1 }
 0x500   : > { %v2281_v27 = vpop.f32.mrb[0].mxu0 }
 0x501   : > { %v2283_v11 = vpop.f32.mrb[1].mxu0  ;;  %v2282_v13 = vadd.f32 %v2281_v27, %v2107_v10  ;;  %v1946_v27 = vld [vmem:[%s17988_s20 + $0x48] sm:$0xff] }
 0x502   : > { %v14808_v12 = vadd.f32 %v2283_v11, %v14803_v9  ;;  %v2285_v28 = vpop.f32.mrb[2].mxu0 }
 0x503   : > { %v2286_v14 = vadd.f32 %v2285_v28, %v2107_v10  ;;  %v2287_v15 = vpop.f32.mrb[3].mxu0  ;;  %v1947_v28 = vld [vmem:[%s17988_s20 + $0x50] sm:$0xff] }
 0x504   : > { %v14811_v16 = vadd.f32 %v2287_v15, %v14803_v9  ;;  %v1948_v15 = vld [vmem:[%s17988_s20 + $0x58] sm:$0xff] }
 0x505   : > { %v12117_v17 = vpack.c.bf16 %v2286_v14, %v2282_v13  ;;  %v1933_v13 = vld [vmem:[%s17992_s15 + $0x60] sm:$0xff]  ;;  %v1934_v14 = vld [vmem:[%s17992_s15 + $0x68] sm:$0xff]  ;;  %v11559_v49 = vpop.f32.mrb[0].mxu1 }
 0x506   : > { %v2354_v54 = vpop.f32.mrb[1].mxu1 }
 0x507   : > { %12118 = vmatprep.subr.bf16.mxu1 %v12117_v17 }
 0x508   : > { %v2291_v18 = vpop.f32.mrb[4].mxu0  ;;  %12120 = vmatpush3.bf16.msra.mxu1 %v12117_v17  ;;  %v14885_v17 = vpack.c.bf16 %v1934_v14, %v1933_v13  ;;  %v1974_v13 = vld [vmem:[%s17988_s20 + $0x128] sm:$0xff]  ;;  %v1975_v14 = vld [vmem:[%s17988_s20 + $0x130] sm:$0xff] }
 0x509   : > { %v2293_v32 = vpop.f32.mrb[5].mxu0  ;;  %v2292_v33 = vadd.f32 %v2291_v18, %v2107_v10  ;;  %v1949_v18 = vld [vmem:[%s17988_s20 + $0x60] sm:$0xff] }
 0x50a   : > { %v14814_v19 = vadd.f32 %v2293_v32, %v14803_v9  ;;  %v2295_v20 = vpop.f32.mrb[6].mxu0  ;;  %17999 = vst [vmem:[#allocation65_spill] sm:$0xff] %v14885_v17  ;;  %v1950_v32 = vld [vmem:[%s17988_s20 + $0x68] sm:$0xff] }
 0x50b   : > { %v2296_v21 = vadd.f32 %v2295_v20, %v2107_v10  ;;  %v2297_v22 = vpop.f32.mrb[7].mxu0  ;;  %v1951_v20 = vld [vmem:[%s17988_s20 + $0x70] sm:$0xff] }
 0x50c   : > { %v14817_v23 = vadd.f32 %v2297_v22, %v14803_v9  ;;  %v1954_v22 = vld [vmem:[%s17988_s20 + $0x88] sm:$0xff] }
 0x50d   : > { %v12121_v24 = vpack.c.bf16 %v2296_v21, %v2292_v33  ;;  %v1952_v33 = vld [vmem:[%s17988_s20 + $0x78] sm:$0xff]  ;;  %v1953_v21 = vld [vmem:[%s17988_s20 + $0x80] sm:$0xff] }
 0x50f   : > { %12122 = vmatprep.subr.bf16.mxu1 %v12121_v24 }
 0x510   : > { %v2301_v25 = vpop.f32.mrb[8].mxu0  ;;  %12124 = vmatpush3.bf16.msra.mxu1 %v12121_v24  ;;  %v1955_v24 = vld [vmem:[%s17988_s20 + $0x90] sm:$0xff] }
 0x511   : > { %v14819_v35 = vpop.f32.mrb[9].mxu0  ;;  %v2302_v38 = vadd.f32 %v2301_v25, %v2107_v10  ;;  %v1956_v25 = vld [vmem:[%s17988_s20 + $0x98] sm:$0xff] }
 0x512   : > { %v2305_v36 = vpop.f32.mrb[10].mxu0 }
 0x513   : > { %v2306_v39 = vadd.f32 %v2305_v36, %v2107_v10  ;;  %v14821_v29 = vpop.f32.mrb[11].mxu0  ;;  %v1957_v36 = vld [vmem:[%s17988_s20 + $0xa0] sm:$0xff] }
 0x515   : > { %v12125_v30 = vpack.c.bf16 %v2306_v39, %v2302_v38  ;;  %v1958_v38 = vld [vmem:[%s17988_s20 + $0xa8] sm:$0xff]  ;;  %v1959_v39 = vld [vmem:[%s17988_s20 + $0xb0] sm:$0xff] }
 0x517   : > { %12126 = vmatprep.subr.bf16.mxu1 %v12125_v30 }
 0x518   : > { %v2311_v31 = vpop.f32.mrb[12].mxu0  ;;  %12128 = vmatpush3.bf16.msra.mxu1 %v12125_v30  ;;  %v1960_v30 = vld [vmem:[%s17988_s20 + $0xb8] sm:$0xff] }
 0x519   : > { %v14823_v34 = vpop.f32.mrb[13].mxu0  ;;  %v2312_v40 = vadd.f32 %v2311_v31, %v2107_v10  ;;  %v1961_v31 = vld [vmem:[%s17988_s20 + $0xc0] sm:$0xff] }
 0x51a   : > { %v2315_v37 = vpop.f32.mrb[14].mxu0 }
 0x51b   : > { %v2316_v41 = vadd.f32 %v2315_v37, %v2107_v10  ;;  %v14825_v42 = vpop.f32.mrb[15].mxu0  ;;  %v1932_v10 = vld [vmem:[%s17992_s15 + $0x58] sm:$0xff]  ;;  %v1962_v37 = vld [vmem:[%s17988_s20 + $0xc8] sm:$0xff] }
 0x51c   : > { %v14875_v11 = vpack.c.bf16 %v1932_v10, %v1931_v3  ;;  %v1973_v10 = vld [vmem:[%s17988_s20 + $0x120] sm:$0xff] }
 0x51d   : > { %v12129_v43 = vpack.c.bf16 %v2316_v41, %v2312_v40  ;;  %v1963_v40 = vld [vmem:[%s17988_s20 + $0xd0] sm:$0xff]  ;;  %v14921_v41 = vsub.s32 2, %v14790_v5 }
 0x51e   : > { %17998 = vst [vmem:[#allocation64_spill] sm:$0xff] %v14875_v11  ;;  %12154 = vmatprep.subr.bf16.mxu0 %v14875_v11 }
 0x51f   : > { %12130 = vmatprep.subr.bf16.mxu1 %v12129_v43  ;;  %12156 = vmatpush3.bf16.msra.mxu0 %v14875_v11  ;;  %18000 = vst [vmem:[#allocation66_spill] sm:$0xff] %v14921_v41  ;;  %v14929_v45 = vrot.slane %v14796_v7, %v14921_v41  ;;  %v15249_v11 = vld [vmem:[%s18008_s6 + $0x18] sm:$0xff] }
 0x520   : > { %12132 = vmatpush3.bf16.msra.mxu1 %v12129_v43  ;;  %12158 = vmatprep.subr.bf16.mxu0 %v14885_v17  ;;  %v1964_v43 = vld [vmem:[%s17988_s20 + $0xd8] sm:$0xff] }
 0x521   : > { %v14941_v7 = vadd.f32 %v2354_v54, %v14929_v45  ;;  %v1994_v54 = vld [vmem:[%s17988_s20 + $0x1c8] sm:$0xff] }
 0x523   : > { %11582 = vmatmul.mubr.msk.f32.vlgmr.msra.gmra.mrb[8].mxu1 %vm2385_vm0, %v1938_v47  ;;  %12160 = vmatpush3.bf16.msra.mxu0 %v14885_v17  ;;  %v1967_v47 = vld [vmem:[%s17988_s20 + $0xf0] sm:$0xff]  ;;  %18002 = vst [vmem:[#allocation68_spill] sm:$0xff] %v14941_v7 }
 0x524   : > { %11584 = vmatprep.mubr.msk.f32.mxu1 %vm2385_vm0, %v1939_v50  ;;  %v14936_v50 = vadd.f32 %v11559_v49, %v14929_v45  ;;  %v1993_v49 = vld [vmem:[%s17988_s20 + $0x1c0] sm:$0xff] }
 0x526   : > { %18001 = vst [vmem:[#allocation67_spill] sm:$0xff] %v14936_v50 }
 0x527   : > { %11585 = vmatmul.mubr.msk.f32.gmra.mrb[10].mxu1 %vm2385_vm0, %v1940_v56  ;;  %v11560_v56 = vpop.f32.mrb[2].mxu1 }
 0x528   : > { %11587 = vmatprep.mubr.msk.f32.mxu1 %vm2385_vm0, %v1941_v58  ;;  %v1969_v58 = vld [vmem:[%s17988_s20 + $0x100] sm:$0xff]  ;;  %v14945_v59 = vadd.f32 %v11560_v56, %v14929_v45  ;;  %v2357_v60 = vpop.f32.mrb[3].mxu1  ;;  %v1996_v56 = vld [vmem:[%s17988_s20 + $0x1d8] sm:$0xff] }
 0x529   : > { %v14954_v52 = vpop.f32.mrb[4].mxu1 }
 0x52a   : > { %18003 = vst [vmem:[#allocation69_spill] sm:$0xff] %v14945_v59 }
 0x52b   : > { %11588 = vmatmul.mubr.msk.f32.gmra.mrb[12].mxu1 %vm2385_vm0, %v1942_v61  ;;  %v14948_v61 = vadd.f32 %v2357_v60, %v14929_v45  ;;  %v1998_v60 = vld [vmem:[%s17988_s20 + $0x1e8] sm:$0xff] }
 0x52c   : > { %11590 = vmatprep.mubr.msk.f32.mxu1 %vm2385_vm0, %v1943_v51  ;;  %v1970_v51 = vld [vmem:[%s17988_s20 + $0x108] sm:$0xff] }
 0x52d   : > { %18004 = vst [vmem:[#allocation70_spill] sm:$0xff] %v14948_v61  ;;  %v15344_v61 = vld [vmem:[%s18008_s6 + $0x20] sm:$0xff] }
 0x52f   : > { %11591 = vmatmul.mubr.msk.f32.gmra.mrb[14].mxu1 %vm2385_vm0, %v1944_v0  ;;  %v14957_v0 = vpop.f32.mrb[5].mxu1 }
 0x530   : > { %11593 = vmatprep.mubr.msk.f32.mxu1 %vm2385_vm0, %v1945_v2  ;;  %v1972_v2 = vld [vmem:[%s17988_s20 + $0x118] sm:$0xff]  ;;  %v14961_v3 = vpop.f32.mrb[6].mxu1 }
 0x533   : > { %11594 = vmatmul.mubr.msk.f32.gmra.mrb[16].mxu1 %vm2385_vm0, %v1946_v27  ;;  %v2373_v27 = vpop.f32.mrb[7].mxu1 }
 0x534   : > { %11596 = vmatprep.mubr.msk.f32.mxu1 %vm2385_vm0, %v1947_v28  ;;  %v14965_v28 = vadd.f32 %v2373_v27, %v14929_v45 }
 0x536   : > { %18005 = vst [vmem:[#allocation71_spill] sm:$0xff] %v14965_v28 }
 0x537   : > { %11597 = vmatmul.mubr.msk.f32.gmra.mrb[18].mxu1 %vm2385_vm0, %v1948_v15  ;;  %v1976_v15 = vld [vmem:[%s17988_s20 + $0x138] sm:$0xff] }
 0x538   : > { %11599 = vmatprep.mubr.msk.f32.mxu1 %vm2385_vm0, %v1949_v18  ;;  %v1977_v18 = vld [vmem:[%s17988_s20 + $0x140] sm:$0xff] }
 0x53b   : > { %11600 = vmatmul.mubr.msk.f32.gmra.mrb[20].mxu1 %vm2385_vm0, %v1950_v32  ;;  %v1978_v32 = vld [vmem:[%s17988_s20 + $0x148] sm:$0xff] }
 0x53c   : > { %11602 = vmatprep.mubr.msk.f32.mxu1 %vm2385_vm0, %v1951_v20  ;;  %v1979_v20 = vld [vmem:[%s17988_s20 + $0x150] sm:$0xff] }
 0x53f   : > { %11603 = vmatmul.mubr.msk.f32.gmra.mrb[22].mxu1 %vm2385_vm0, %v1952_v33  ;;  %v1980_v33 = vld [vmem:[%s17988_s20 + $0x158] sm:$0xff] }
 0x540   : > { %11605 = vmatprep.mubr.msk.f32.mxu1 %vm2385_vm0, %v1953_v21  ;;  %v1935_v21 = vld [vmem:[%s17992_s15 + $0x70] sm:$0xff] }
 0x543   : > { %11606 = vmatmul.mubr.msk.f32.gmra.mrb[24].mxu1 %vm2385_vm0, %v1954_v22  ;;  %v1936_v22 = vld [vmem:[%s17992_s15 + $0x78] sm:$0xff] }
 0x544   : > { %11608 = vmatprep.mubr.msk.f32.mxu1 %vm2385_vm0, %v1955_v24  ;;  %v1981_v24 = vld [vmem:[%s17988_s20 + $0x160] sm:$0xff] }
 0x547   : > { %11609 = vmatmul.mubr.msk.f32.gmra.mrb[26].mxu1 %vm2385_vm0, %v1956_v25  ;;  %v14985_v25 = vpack.c.bf16 %v1936_v22, %v1935_v21 }
 0x548   : > { %11611 = vmatprep.mubr.msk.f32.mxu1 %vm2385_vm0, %v1957_v36  ;;  %v1982_v36 = vld [vmem:[%s17988_s20 + $0x168] sm:$0xff] }
 0x549   : > { %18006 = vst [vmem:[#allocation72_spill] sm:$0xff] %v14985_v25  ;;  %12162 = vmatprep.subr.bf16.mxu0 %v14985_v25 }
 0x54a   : > { %12164 = vmatpush3.bf16.msra.mxu0 %v14985_v25 }
 0x54b   : > { %11612 = vmatmul.mubr.msk.f32.gmra.mrb[28].mxu1 %vm2385_vm0, %v1958_v38  ;;  %v1983_v38 = vld [vmem:[%s17988_s20 + $0x170] sm:$0xff] }
 0x54c   : > { %11614 = vmatprep.mubr.msk.f32.mxu1 %vm2385_vm0, %v1959_v39  ;;  %v1984_v39 = vld [vmem:[%s17988_s20 + $0x178] sm:$0xff] }
 0x54f   : > { %11615 = vmatmul.mubr.msk.f32.gmra.mrb[30].mxu1 %vm2385_vm0, %v1960_v30  ;;  %v1985_v30 = vld [vmem:[%s17988_s20 + $0x180] sm:$0xff] }
 0x550   : > { %11617 = vmatprep.mubr.msk.f32.mxu1 %vm2385_vm0, %v1961_v31  ;;  %v1986_v31 = vld [vmem:[%s17988_s20 + $0x188] sm:$0xff] }
 0x553   : > { %11618 = vmatmul.mubr.msk.f32.gmra.mrb[32].mxu1 %vm2385_vm0, %v1962_v37  ;;  %v1987_v37 = vld [vmem:[%s17988_s20 + $0x190] sm:$0xff] }
 0x554   : > { %11620 = vmatprep.mubr.msk.f32.mxu1 %vm2385_vm0, %v1963_v40  ;;  %v1988_v40 = vld [vmem:[%s17988_s20 + $0x198] sm:$0xff] }
 0x557   : > { %11621 = vmatmul.mubr.msk.f32.gmra.mrb[34].mxu1 %vm2385_vm0, %v1964_v43  ;;  %v1989_v43 = vld [vmem:[%s17988_s20 + $0x1a0] sm:$0xff] }
 0x558   : > { %11623 = vmatprep.mubr.msk.f32.mxu1 %vm2385_vm0, %v1965_v44  ;;  %v1990_v44 = vld [vmem:[%s17988_s20 + $0x1a8] sm:$0xff] }
 0x55b   : > { %11624 = vmatmul.mubr.msk.f32.gmra.mrb[36].mxu1 %vm2385_vm0, %v1966_v46  ;;  %v1991_v46 = vld [vmem:[%s17988_s20 + $0x1b0] sm:$0xff] }
 0x55c   : > { %11626 = vmatprep.mubr.msk.f32.mxu1 %vm2385_vm0, %v1967_v47  ;;  %v1992_v47 = vld [vmem:[%s17988_s20 + $0x1b8] sm:$0xff] }
 0x55f   : > { %11627 = vmatmul.mubr.msk.f32.gmra.mrb[38].mxu1 %vm2385_vm0, %v1968_v55  ;;  %v1995_v55 = vld [vmem:[%s17988_s20 + $0x1d0] sm:$0xff] }
 0x560   : > { %11629 = vmatprep.mubr.msk.f32.mxu1 %vm2385_vm0, %v1969_v58  ;;  %v1997_v58 = vld [vmem:[%s17988_s20 + $0x1e0] sm:$0xff] }
 0x563   : > { %11630 = vmatmul.mubr.msk.f32.gmra.mrb[40].mxu1 %vm2385_vm0, %v1970_v51  ;;  %v1999_v51 = vld [vmem:[%s17988_s20 + $0x1f0] sm:$0xff] }
 0x564   : > { %11632 = vmatprep.mubr.msk.f32.mxu1 %vm2385_vm0, %v1971_v63  ;;  %v2000_v63 = vld [vmem:[%s17988_s20 + $0x1f8] sm:$0xff] }
 0x567   : > { %11633 = vmatmul.mubr.msk.f32.gmra.mrb[42].mxu1 %vm2385_vm0, %v1972_v2  ;;  %v2304_v2 = vadd.f32 %v14819_v35, %v14803_v9 }
 0x568   : > { %11635 = vmatprep.mubr.msk.f32.mxu1 %vm2385_vm0, %v1973_v10 }
 0x56b   : > { %11636 = vmatmul.mubr.msk.f32.gmra.mrb[44].mxu1 %vm2385_vm0, %v1974_v13 }
 0x56c   : > { %11638 = vmatprep.mubr.msk.f32.mxu1 %vm2385_vm0, %v1975_v14 }
 0x56f   : > { %11639 = vmatmul.mubr.msk.f32.gmra.mrb[46].mxu1 %vm2385_vm0, %v1976_v15 }
 0x570   : > { %11641 = vmatprep.mubr.msk.f32.mxu1 %vm2385_vm0, %v1977_v18 }
 0x573   : > { %11642 = vmatmul.mubr.msk.f32.gmra.mrb[48].mxu1 %vm2385_vm0, %v1978_v32 }
 0x574   : > { %11644 = vmatprep.mubr.msk.f32.mxu1 %vm2385_vm0, %v1979_v20 }
 0x577   : > { %11645 = vmatmul.mubr.msk.f32.gmra.mrb[50].mxu1 %vm2385_vm0, %v1980_v33 }
 0x578   : > { %11647 = vmatprep.mubr.msk.f32.mxu1 %vm2385_vm0, %v1981_v24 }
 0x57b   : > { %11648 = vmatmul.mubr.msk.f32.gmra.mrb[52].mxu1 %vm2385_vm0, %v1982_v36 }
 0x57c   : > { %11650 = vmatprep.mubr.msk.f32.mxu1 %vm2385_vm0, %v1983_v38 }
 0x57f   : > { %11651 = vmatmul.mubr.msk.f32.gmra.mrb[54].mxu1 %vm2385_vm0, %v1984_v39 }
 0x580   : > { %11653 = vmatprep.mubr.msk.f32.mxu1 %vm2385_vm0, %v1985_v30  ;;  %v2308_v30 = vadd.f32 %v14821_v29, %v14803_v9 }
 0x583   : > { %11654 = vmatmul.mubr.msk.f32.gmra.mrb[56].mxu1 %vm2385_vm0, %v1986_v31 }
 0x584   : > { %11656 = vmatprep.mubr.msk.f32.mxu1 %vm2385_vm0, %v1987_v37 }
 0x587   : > { %11657 = vmatmul.mubr.msk.f32.gmra.mrb[58].mxu1 %vm2385_vm0, %v1988_v40 }
 0x588   : > { %11659 = vmatprep.mubr.msk.f32.mxu1 %vm2385_vm0, %v1989_v43 }
 0x58b   : > { %11660 = vmatmul.mubr.msk.f32.gmra.mrb[60].mxu1 %vm2385_vm0, %v1990_v44 }
 0x58c   : > { %11662 = vmatprep.mubr.msk.f32.mxu1 %vm2385_vm0, %v1991_v46 }
 0x58f   : > { %11663 = vmatmul.mubr.msk.f32.gmra.mrb[62].mxu1 %vm2385_vm0, %v1992_v47 }
 0x590   : > { %11665 = vmatprep.mubr.msk.f32.mxu1 %vm2385_vm0, %v1993_v49 }
 0x593   : > { %11666 = vmatmul.mubr.msk.f32.gmra.mrb[64].mxu1 %vm2385_vm0, %v1994_v54 }
 0x594   : > { %11668 = vmatprep.mubr.msk.f32.mxu1 %vm2385_vm0, %v1995_v55 }
 0x597   : > { %11669 = vmatmul.mubr.msk.f32.gmra.mrb[66].mxu1 %vm2385_vm0, %v1996_v56 }
 0x598   : > { %11671 = vmatprep.mubr.msk.f32.mxu1 %vm2385_vm0, %v1997_v58 }
 0x59b   : > { %11672 = vmatmul.mubr.msk.f32.gmra.mrb[68].mxu1 %vm2385_vm0, %v1998_v60 }
 0x59c   : > { %11674 = vmatprep.mubr.msk.f32.mxu1 %vm2385_vm0, %v1999_v51 }
 0x59f   : > { %11675 = vmatmul.mubr.msk.f32.gmra.mrb[70].mxu1 %vm2385_vm0, %v2000_v63 }
 0x5f6   : > { %v11583_v10 = vpop.f32.mrb[8].mxu1 }
 0x5f7   : > { %v2964_v27 = vmul.f32 %v11583_v10, %v2304_v2  ;;  %v2644_v13 = vpop.f32.mrb[9].mxu1 }
 0x5f8   : > { %v2963_v14 = vmul.f32 %v2644_v13, %v2304_v2 }
 0x5fa   : > { %v11586_v15 = vpop.f32.mrb[10].mxu1  ;;  %11709 = vmatprep.mubr.f32.mxu0 %v2963_v14 }
 0x5fb   : > { %v2966_v18 = vmul.f32 %v11586_v15, %v2304_v2  ;;  %v2654_v32 = vpop.f32.mrb[11].mxu1  ;;  %11710 = vmatmul.mubr.f32.vlgmr.msra.gmra.mrb[16].mxu0 %v2964_v27 }
 0x5fc   : > { %v2965_v20 = vmul.f32 %v2654_v32, %v2304_v2 }
 0x5fe   : > { %v11589_v33 = vpop.f32.mrb[12].mxu1  ;;  %11712 = vmatprep.mubr.f32.mxu0 %v2965_v20 }
 0x5ff   : > { %v2968_v21 = vmul.f32 %v11589_v33, %v2304_v2  ;;  %v2664_v22 = vpop.f32.mrb[13].mxu1  ;;  %11713 = vmatmul.mubr.f32.gmra.mrb[18].mxu0 %v2966_v18 }
 0x600   : > { %v2967_v24 = vmul.f32 %v2664_v22, %v2304_v2 }
 0x602   : > { %v11592_v36 = vpop.f32.mrb[14].mxu1  ;;  %11715 = vmatprep.mubr.f32.mxu0 %v2967_v24 }
 0x603   : > { %v2970_v38 = vmul.f32 %v11592_v36, %v2304_v2  ;;  %v2674_v35 = vpop.f32.mrb[15].mxu1  ;;  %11716 = vmatmul.mubr.f32.gmra.mrb[20].mxu0 %v2968_v21 }
 0x604   : > { %v2969_v39 = vmul.f32 %v2674_v35, %v2304_v2  ;;  %v2314_v2 = vadd.f32 %v14823_v34, %v14803_v9 }
 0x606   : > { %v11595_v31 = vpop.f32.mrb[16].mxu1  ;;  %11718 = vmatprep.mubr.f32.mxu0 %v2969_v39  ;;  %v2318_v39 = vadd.f32 %v14825_v42, %v14803_v9 }
 0x607   : > { %v2972_v37 = vmul.f32 %v11595_v31, %v2308_v30  ;;  %v2684_v40 = vpop.f32.mrb[17].mxu1  ;;  %11719 = vmatmul.mubr.f32.gmra.mrb[22].mxu0 %v2970_v38 }
 0x608   : > { %v2971_v43 = vmul.f32 %v2684_v40, %v2308_v30 }
 0x60a   : > { %v11598_v44 = vpop.f32.mrb[18].mxu1  ;;  %11721 = vmatprep.mubr.f32.mxu0 %v2971_v43 }
 0x60b   : > { %v2974_v46 = vmul.f32 %v11598_v44, %v2308_v30  ;;  %v2694_v47 = vpop.f32.mrb[19].mxu1  ;;  %11722 = vmatmul.mubr.f32.gmra.mrb[24].mxu0 %v2972_v37 }
 0x60c   : > { %v2973_v49 = vmul.f32 %v2694_v47, %v2308_v30 }
 0x60e   : > { %v11601_v54 = vpop.f32.mrb[20].mxu1  ;;  %11724 = vmatprep.mubr.f32.mxu0 %v2973_v49 }
 0x60f   : > { %v2976_v55 = vmul.f32 %v11601_v54, %v2308_v30  ;;  %v2704_v56 = vpop.f32.mrb[21].mxu1  ;;  %11725 = vmatmul.mubr.f32.gmra.mrb[26].mxu0 %v2974_v46 }
 0x610   : > { %v2975_v58 = vmul.f32 %v2704_v56, %v2308_v30 }
 0x612   : > { %v11604_v60 = vpop.f32.mrb[22].mxu1  ;;  %11727 = vmatprep.mubr.f32.mxu0 %v2975_v58 }
 0x613   : > { %v2978_v29 = vmul.f32 %v11604_v60, %v2308_v30  ;;  %v2714_v51 = vpop.f32.mrb[23].mxu1  ;;  %11728 = vmatmul.mubr.f32.gmra.mrb[28].mxu0 %v2976_v55 }
 0x614   : > { %v2977_v63 = vmul.f32 %v2714_v51, %v2308_v30 }
 0x616   : > { %v11607_v10 = vpop.f32.mrb[24].mxu1  ;;  %11730 = vmatprep.mubr.f32.mxu0 %v2977_v63 }
 0x617   : > { %v2980_v27 = vmul.f32 %v11607_v10, %v2314_v2  ;;  %v2724_v13 = vpop.f32.mrb[25].mxu1  ;;  %11731 = vmatmul.mubr.f32.gmra.mrb[30].mxu0 %v2978_v29 }
 0x618   : > { %v2979_v14 = vmul.f32 %v2724_v13, %v2314_v2 }
 0x61a   : > { %v11610_v15 = vpop.f32.mrb[26].mxu1  ;;  %11733 = vmatprep.mubr.f32.mxu0 %v2979_v14 }
 0x61b   : > { %v2982_v18 = vmul.f32 %v11610_v15, %v2314_v2  ;;  %v2734_v32 = vpop.f32.mrb[27].mxu1  ;;  %11734 = vmatmul.mubr.f32.gmra.mrb[32].mxu0 %v2980_v27 }
 0x61c   : > { %v2981_v20 = vmul.f32 %v2734_v32, %v2314_v2 }
 0x61e   : > { %v11613_v33 = vpop.f32.mrb[28].mxu1  ;;  %11736 = vmatprep.mubr.f32.mxu0 %v2981_v20 }
 0x61f   : > { %v2984_v21 = vmul.f32 %v11613_v33, %v2314_v2  ;;  %v2744_v22 = vpop.f32.mrb[29].mxu1  ;;  %11737 = vmatmul.mubr.f32.gmra.mrb[34].mxu0 %v2982_v18 }
 0x620   : > { %v2983_v24 = vmul.f32 %v2744_v22, %v2314_v2 }
 0x622   : > { %v11616_v36 = vpop.f32.mrb[30].mxu1  ;;  %11739 = vmatprep.mubr.f32.mxu0 %v2983_v24 }
 0x623   : > { %v2986_v34 = vmul.f32 %v11616_v36, %v2314_v2  ;;  %v2754_v38 = vpop.f32.mrb[31].mxu1  ;;  %11740 = vmatmul.mubr.f32.gmra.mrb[36].mxu0 %v2984_v21 }
 0x624   : > { %v2985_v35 = vmul.f32 %v2754_v38, %v2314_v2 }
 0x626   : > { %v11619_v30 = vpop.f32.mrb[32].mxu1  ;;  %11742 = vmatprep.mubr.f32.mxu0 %v2985_v35 }
 0x627   : > { %v2988_v31 = vmul.f32 %v11619_v30, %v2318_v39  ;;  %v2764_v37 = vpop.f32.mrb[33].mxu1  ;;  %11743 = vmatmul.mubr.f32.gmra.mrb[38].mxu0 %v2986_v34 }
 0x628   : > { %v2987_v40 = vmul.f32 %v2764_v37, %v2318_v39 }
 0x62a   : > { %v11622_v43 = vpop.f32.mrb[34].mxu1  ;;  %11745 = vmatprep.mubr.f32.mxu0 %v2987_v40 }
 0x62b   : > { %v2990_v44 = vmul.f32 %v11622_v43, %v2318_v39  ;;  %v2774_v46 = vpop.f32.mrb[35].mxu1  ;;  %11746 = vmatmul.mubr.f32.gmra.mrb[40].mxu0 %v2988_v31 }
 0x62c   : > { %v2989_v47 = vmul.f32 %v2774_v46, %v2318_v39 }
 0x62e   : > { %v11625_v49 = vpop.f32.mrb[36].mxu1  ;;  %11748 = vmatprep.mubr.f32.mxu0 %v2989_v47 }
 0x62f   : > { %v2992_v54 = vmul.f32 %v11625_v49, %v2318_v39  ;;  %v2784_v55 = vpop.f32.mrb[37].mxu1  ;;  %11749 = vmatmul.mubr.f32.gmra.mrb[42].mxu0 %v2990_v44 }
 0x630   : > { %v2991_v56 = vmul.f32 %v2784_v55, %v2318_v39 }
 0x632   : > { %v11628_v58 = vpop.f32.mrb[38].mxu1  ;;  %11751 = vmatprep.mubr.f32.mxu0 %v2991_v56 }
 0x633   : > { %v2994_v9 = vmul.f32 %v11628_v58, %v2318_v39  ;;  %v2794_v42 = vpop.f32.mrb[39].mxu1  ;;  %11752 = vmatmul.mubr.f32.gmra.mrb[44].mxu0 %v2992_v54 }
 0x634   : > { %v2993_v60 = vmul.f32 %v2794_v42, %v2318_v39 }
 0x636   : > { %v11631_v29 = vpop.f32.mrb[40].mxu1  ;;  %11754 = vmatprep.mubr.f32.mxu0 %v2993_v60 }
 0x637   : > { %v2996_v51 = vmul.f32 %v11631_v29, %v14808_v12  ;;  %v2804_v63 = vpop.f32.mrb[41].mxu1  ;;  %11755 = vmatmul.mubr.f32.gmra.mrb[46].mxu0 %v2994_v9 }
 0x638   : > { %v2995_v2 = vmul.f32 %v2804_v63, %v14808_v12 }
 0x63a   : > { %v11634_v10 = vpop.f32.mrb[42].mxu1  ;;  %11757 = vmatprep.mubr.f32.mxu0 %v2995_v2 }
 0x63b   : > { %v2998_v27 = vmul.f32 %v11634_v10, %v14808_v12  ;;  %v2814_v13 = vpop.f32.mrb[43].mxu1  ;;  %11758 = vmatmul.mubr.f32.gmra.mrb[48].mxu0 %v2996_v51 }
 0x63c   : > { %v2997_v14 = vmul.f32 %v2814_v13, %v14808_v12 }
 0x63e   : > { %v11637_v15 = vpop.f32.mrb[44].mxu1  ;;  %11760 = vmatprep.mubr.f32.mxu0 %v2997_v14 }
 0x63f   : > { %v3000_v18 = vmul.f32 %v11637_v15, %v14808_v12  ;;  %v2824_v32 = vpop.f32.mrb[45].mxu1  ;;  %11761 = vmatmul.mubr.f32.gmra.mrb[50].mxu0 %v2998_v27 }
 0x640   : > { %v2999_v20 = vmul.f32 %v2824_v32, %v14808_v12 }
 0x642   : > { %v11640_v33 = vpop.f32.mrb[46].mxu1  ;;  %11763 = vmatprep.mubr.f32.mxu0 %v2999_v20 }
 0x643   : > { %v3002_v21 = vmul.f32 %v11640_v33, %v14808_v12  ;;  %v2834_v22 = vpop.f32.mrb[47].mxu1  ;;  %11764 = vmatmul.mubr.f32.gmra.mrb[52].mxu0 %v3000_v18 }
 0x644   : > { %v3001_v24 = vmul.f32 %v2834_v22, %v14808_v12 }
 0x646   : > { %v11643_v36 = vpop.f32.mrb[48].mxu1  ;;  %11766 = vmatprep.mubr.f32.mxu0 %v3001_v24 }
 0x647   : > { %v3004_v34 = vmul.f32 %v11643_v36, %v14811_v16  ;;  %v2844_v38 = vpop.f32.mrb[49].mxu1  ;;  %11767 = vmatmul.mubr.f32.gmra.mrb[54].mxu0 %v3002_v21 }
 0x648   : > { %v3003_v35 = vmul.f32 %v2844_v38, %v14811_v16 }
 0x64a   : > { %v11646_v39 = vpop.f32.mrb[50].mxu1  ;;  %11769 = vmatprep.mubr.f32.mxu0 %v3003_v35 }
 0x64b   : > { %v3006_v30 = vmul.f32 %v11646_v39, %v14811_v16  ;;  %v2854_v31 = vpop.f32.mrb[51].mxu1  ;;  %11770 = vmatmul.mubr.f32.gmra.mrb[56].mxu0 %v3004_v34 }
 0x64c   : > { %v3005_v37 = vmul.f32 %v2854_v31, %v14811_v16 }
 0x64e   : > { %v11649_v40 = vpop.f32.mrb[52].mxu1  ;;  %11772 = vmatprep.mubr.f32.mxu0 %v3005_v37 }
 0x64f   : > { %v3008_v12 = vmul.f32 %v11649_v40, %v14811_v16  ;;  %v2864_v43 = vpop.f32.mrb[53].mxu1  ;;  %11773 = vmatmul.mubr.f32.gmra.mrb[58].mxu0 %v3006_v30  ;;  %v2033_v40 = vld [vmem:[%s18007_s26] sm:$0xff] }
 0x650   : > { %v3007_v44 = vmul.f32 %v2864_v43, %v14811_v16 }
 0x652   : > { %v11652_v46 = vpop.f32.mrb[54].mxu1  ;;  %11775 = vmatprep.mubr.f32.mxu0 %v3007_v44 }
 0x653   : > { %v3010_v47 = vmul.f32 %v11652_v46, %v14811_v16  ;;  %v2874_v49 = vpop.f32.mrb[55].mxu1  ;;  %11776 = vmatmul.mubr.f32.gmra.mrb[60].mxu0 %v3008_v12 }
 0x654   : > { %v3009_v54 = vmul.f32 %v2874_v49, %v14811_v16 }
 0x656   : > { %v11655_v55 = vpop.f32.mrb[56].mxu1  ;;  %11778 = vmatprep.mubr.f32.mxu0 %v3009_v54 }
 0x657   : > { %v3012_v56 = vmul.f32 %v11655_v55, %v14814_v19  ;;  %v2884_v58 = vpop.f32.mrb[57].mxu1  ;;  %11779 = vmatmul.mubr.f32.gmra.mrb[62].mxu0 %v3010_v47 }
 0x658   : > { %v3011_v9 = vmul.f32 %v2884_v58, %v14814_v19 }
 0x65a   : > { %v11658_v42 = vpop.f32.mrb[58].mxu1  ;;  %11781 = vmatprep.mubr.f32.mxu0 %v3011_v9 }
 0x65b   : > { %v3014_v60 = vmul.f32 %v11658_v42, %v14814_v19  ;;  %v2894_v29 = vpop.f32.mrb[59].mxu1  ;;  %11782 = vmatmul.mubr.f32.gmra.mrb[64].mxu0 %v3012_v56 }
 0x65c   : > { %v3013_v51 = vmul.f32 %v2894_v29, %v14814_v19 }
 0x65e   : > { %v11661_v63 = vpop.f32.mrb[60].mxu1  ;;  %11784 = vmatprep.mubr.f32.mxu0 %v3013_v51 }
 0x65f   : > { %v3016_v16 = vmul.f32 %v11661_v63, %v14814_v19  ;;  %v2904_v2 = vpop.f32.mrb[61].mxu1  ;;  %11785 = vmatmul.mubr.f32.gmra.mrb[66].mxu0 %v3014_v60 }
 0x660   : > { %v3015_v10 = vmul.f32 %v2904_v2, %v14814_v19 }
 0x662   : > { %v11664_v27 = vpop.f32.mrb[62].mxu1  ;;  %11787 = vmatprep.mubr.f32.mxu0 %v3015_v10 }
 0x663   : > { %v3018_v13 = vmul.f32 %v11664_v27, %v14814_v19  ;;  %v2914_v14 = vpop.f32.mrb[63].mxu1  ;;  %11788 = vmatmul.mubr.f32.gmra.mrb[68].mxu0 %v3016_v16 }
 0x664   : > { %v3017_v15 = vmul.f32 %v2914_v14, %v14814_v19 }
 0x666   : > { %v11667_v18 = vpop.f32.mrb[64].mxu1  ;;  %11790 = vmatprep.mubr.f32.mxu0 %v3017_v15 }
 0x667   : > { %v3020_v32 = vmul.f32 %v11667_v18, %v14817_v23  ;;  %v2924_v20 = vpop.f32.mrb[65].mxu1  ;;  %11791 = vmatmul.mubr.f32.gmra.mrb[70].mxu0 %v3018_v13  ;;  %v15081_v13 = vadd.f32 %v14954_v52, %v14929_v45 }
 0x668   : > { %v3019_v33 = vmul.f32 %v2924_v20, %v14817_v23 }
 0x66a   : > { %v11670_v21 = vpop.f32.mrb[66].mxu1  ;;  %11793 = vmatprep.mubr.f32.mxu0 %v3019_v33 }
 0x66b   : > { %v3022_v22 = vmul.f32 %v11670_v21, %v14817_v23  ;;  %v2934_v24 = vpop.f32.mrb[67].mxu1  ;;  %11794 = vmatmul.mubr.f32.gmra.mrb[72].mxu0 %v3020_v32  ;;  %v15088_v32 = vadd.f32 %v14957_v0, %v14929_v45 }
 0x66c   : > { %v3021_v36 = vmul.f32 %v2934_v24, %v14817_v23 }
 0x66e   : > { %v11673_v34 = vpop.f32.mrb[68].mxu1  ;;  %11796 = vmatprep.mubr.f32.mxu0 %v3021_v36 }
 0x66f   : > { %v3024_v19 = vmul.f32 %v11673_v34, %v14817_v23  ;;  %v2944_v38 = vpop.f32.mrb[69].mxu1  ;;  %11797 = vmatmul.mubr.f32.gmra.mrb[74].mxu0 %v3022_v22  ;;  %v15093_v22 = vadd.f32 %v14961_v3, %v14929_v45 }
 0x670   : > { %v3023_v35 = vmul.f32 %v2944_v38, %v14817_v23 }
 0x671   : > { %18009 = vst [vmem:[#allocation73_spill] sm:$0xff] %v15093_v22  ;;  %v15439_v22 = vld [vmem:[%s18008_s6 + $0x28] sm:$0xff] }
 0x672   : > { %v11676_v39 = vpop.f32.mrb[70].mxu1  ;;  %11799 = vmatprep.mubr.f32.mxu0 %v3023_v35 }
 0x673   : > { %v3026_v30 = vmul.f32 %v11676_v39, %v14817_v23  ;;  %v2954_v31 = vpop.f32.mrb[71].mxu1  ;;  %11800 = vmatmul.mubr.f32.gmra.mrb[76].mxu0 %v3024_v19 }
 0x674   : > { %v3025_v37 = vmul.f32 %v2954_v31, %v14817_v23 }
 0x676   : > { %11802 = vmatprep.mubr.f32.mxu0 %v3025_v37 }
 0x677   : > { %11803 = vmatmul.mubr.f32.gmra.mrb[78].mxu0 %v3026_v30 }
 0x6ce   : > { %v11711_v12 = vpop.f32.mrb[16].mxu0 }
 0x6cf   : > { %v3413_v43 = vadd.f32 %v11711_v12, %v2033_v40  ;;  %v3093_v44 = vpop.f32.mrb[17].mxu0 }
 0x6d0   : > { %v3412_v46 = vadd.f32 %v3093_v44, %v2033_v40 }
 0x6d1   : > { %v3482_v47 = vrot.slane %v3413_v43, 4 }
 0x6d2   : > { %v3476_v49 = vrot.slane %v3412_v46, 4  ;;  %v11714_v54 = vpop.f32.mrb[18].mxu0 }
 0x6d3   : > { %v3483_v55 = vmax.f32 %v3413_v43, %v3482_v47  ;;  %v15070_v56 = vadd.f32 %v11714_v54, %v2033_v40  ;;  %v3103_v58 = vpop.f32.mrb[19].mxu0 }
 0x6d4   : > { %v3477_v9 = vmax.f32 %v3412_v46, %v3476_v49  ;;  %v15072_v42 = vadd.f32 %v3103_v58, %v2033_v40 }
 0x6d5   : > { %v3484_v60 = vrot.slane %v3483_v55, 2  ;;  %v3494_v23 = vrot.slane %v15070_v56, 4 }
 0x6d6   : > { %v3478_v29 = vrot.slane %v3477_v9, 2  ;;  %v3488_v51 = vrot.slane %v15072_v42, 4  ;;  %v11717_v63 = vpop.f32.mrb[20].mxu0 }
 0x6d7   : > { %v3485_v16 = vmax.f32 %v3483_v55, %v3484_v60  ;;  %v3495_v2 = vmax.f32 %v15070_v56, %v3494_v23  ;;  %v15077_v10 = vadd.f32 %v11717_v63, %v2033_v40  ;;  %v3113_v27 = vpop.f32.mrb[21].mxu0 }
 0x6d8   : > { %v3479_v14 = vmax.f32 %v3477_v9, %v3478_v29  ;;  %v3489_v15 = vmax.f32 %v15072_v42, %v3488_v51  ;;  %v15084_v18 = vadd.f32 %v3113_v27, %v2033_v40  ;;  %v15107_v27 = vld [vmem:[%s18008_s6 + $0x8] sm:$0xff] }
 0x6d9   : > { %v3486_v20 = vrot.slane %v3485_v16, 1  ;;  %v3496_v33 = vrot.slane %v3495_v2, 2  ;;  %v3506_v21 = vrot.slane %v15077_v10, 4 }
 0x6da   : > { %v3480_v24 = vrot.slane %v3479_v14, 1  ;;  %v3490_v52 = vrot.slane %v3489_v15, 2  ;;  %v3500_v36 = vrot.slane %v15084_v18, 4  ;;  %v11720_v34 = vpop.f32.mrb[22].mxu0 }
 0x6db   : > { %v3487_v19 = vmax.f32 %v3485_v16, %v3486_v20  ;;  %v3497_v38 = vmax.f32 %v3495_v2, %v3496_v33  ;;  %v3507_v35 = vmax.f32 %v15077_v10, %v3506_v21  ;;  %v15097_v39 = vadd.f32 %v11720_v34, %v2033_v40  ;;  %v3123_v0 = vpop.f32.mrb[23].mxu0 }
 0x6dc   : > { %v3481_v30 = vmax.f32 %v3479_v14, %v3480_v24  ;;  %v3491_v31 = vmax.f32 %v3489_v15, %v3490_v52  ;;  %v3501_v37 = vmax.f32 %v15084_v18, %v3500_v36  ;;  %v15100_v12 = vadd.f32 %v3123_v0, %v2033_v40 }
 0x6dd   : > { %v3861_v45 = vsub.f32 %v3413_v43, %v3487_v19  ;;  %v3498_v3 = vrot.slane %v3497_v38, 1  ;;  %v3508_v44 = vrot.slane %v3507_v35, 2  ;;  %v3518_v47 = vrot.slane %v15097_v39, 4 }
 0x6de   : > { %v3860_v49 = vsub.f32 %v3412_v46, %v3481_v30  ;;  %v3492_v54 = vrot.slane %v3491_v31, 1  ;;  %v3502_v55 = vrot.slane %v3501_v37, 2  ;;  %v3512_v58 = vrot.slane %v15100_v12, 4  ;;  %v11723_v9 = vpop.f32.mrb[24].mxu0 }
 0x6df   : > { %v3926_v60 = vmul.f32 1.442695, %v3861_v45  ;;  %v3499_v23 = vmax.f32 %v3497_v38, %v3498_v3  ;;  %v3509_v29 = vmax.f32 %v3507_v35, %v3508_v44  ;;  %v3519_v51 = vmax.f32 %v15097_v39, %v3518_v47  ;;  %v3133_v63 = vpop.f32.mrb[25].mxu0 }
 0x6e0   : > { %v3924_v40 = vmul.f32 1.442695, %v3860_v49  ;;  %v3493_v16 = vmax.f32 %v3491_v31, %v3492_v54  ;;  %v3503_v43 = vmax.f32 %v3501_v37, %v3502_v55  ;;  %v3513_v2 = vmax.f32 %v15100_v12, %v3512_v58 }
 0x6e1   : > { %12822 = vpow2.f32 %v3926_v60  ;;  %v3863_v46 = vsub.f32 %v15070_v56, %v3499_v23  ;;  %v3510_v14 = vrot.slane %v3509_v29, 1  ;;  %v3520_v15 = vrot.slane %v3519_v51, 2 }
 0x6e2   : > { %12824 = vpow2.f32 %v3924_v40  ;;  %v3862_v20 = vsub.f32 %v15072_v42, %v3493_v16  ;;  %v3504_v33 = vrot.slane %v3503_v43, 1  ;;  %v3514_v21 = vrot.slane %v3513_v2, 2  ;;  %v11726_v24 = vpop.f32.mrb[26].mxu0 }
 0x6e3   : > { %v3930_v52 = vmul.f32 1.442695, %v3863_v46  ;;  %v3511_v36 = vmax.f32 %v3509_v29, %v3510_v14  ;;  %v3521_v34 = vmax.f32 %v3519_v51, %v3520_v15  ;;  %v15112_v19 = vadd.f32 %v11723_v9, %v15107_v27  ;;  %v3143_v38 = vpop.f32.mrb[27].mxu0 }
 0x6e4   : > { %v3928_v35 = vmul.f32 1.442695, %v3862_v20  ;;  %v3505_v0 = vmax.f32 %v3503_v43, %v3504_v33  ;;  %v3515_v30 = vmax.f32 %v3513_v2, %v3514_v21  ;;  %v15115_v56 = vadd.f32 %v3133_v63, %v15107_v27 }
 0x6e5   : > { %12826 = vpow2.f32 %v3930_v52  ;;  %v3865_v31 = vsub.f32 %v15077_v10, %v3511_v36  ;;  %v3522_v42 = vrot.slane %v3521_v34, 1  ;;  %v3530_v37 = vrot.slane %v15112_v19, 4 }
 0x6e6   : > { %12828 = vpow2.f32 %v3928_v35  ;;  %v3864_v45 = vsub.f32 %v15084_v18, %v3505_v0  ;;  %v3516_v3 = vrot.slane %v3515_v30, 1  ;;  %v3524_v44 = vrot.slane %v15115_v56, 4  ;;  %v11729_v47 = vpop.f32.mrb[28].mxu0 }
 0x6e7   : > { %v3934_v49 = vmul.f32 1.442695, %v3865_v31  ;;  %v3523_v54 = vmax.f32 %v3521_v34, %v3522_v42  ;;  %v3531_v55 = vmax.f32 %v15112_v19, %v3530_v37  ;;  %v15123_v58 = vadd.f32 %v11726_v24, %v15107_v27  ;;  %v3153_v9 = vpop.f32.mrb[29].mxu0 }
 0x6e8   : > { %v3932_v60 = vmul.f32 1.442695, %v3864_v45  ;;  %v3517_v10 = vmax.f32 %v3515_v30, %v3516_v3  ;;  %v3525_v23 = vmax.f32 %v15115_v56, %v3524_v44  ;;  %v15127_v29 = vadd.f32 %v3143_v38, %v15107_v27 }
 0x6e9   : > { %12830 = vpow2.f32 %v3934_v49  ;;  %v3867_v18 = vsub.f32 %v15097_v39, %v3523_v54  ;;  %v3532_v51 = vrot.slane %v3531_v55, 2  ;;  %v3542_v63 = vrot.slane %v15123_v58, 4 }
 0x6ea   : > { %12832 = vpow2.f32 %v3932_v60  ;;  %v3866_v40 = vsub.f32 %v15100_v12, %v3517_v10  ;;  %v3526_v16 = vrot.slane %v3525_v23, 2  ;;  %v3536_v43 = vrot.slane %v15127_v29, 4  ;;  %v11732_v2 = vpop.f32.mrb[30].mxu0 }
 0x6eb   : > { %v15133_v46 = vpop.eup %12822  ;;  %v3938_v14 = vmul.f32 1.442695, %v3867_v18  ;;  %v3533_v15 = vmax.f32 %v3531_v55, %v3532_v51  ;;  %v3543_v20 = vmax.f32 %v15123_v58, %v3542_v63  ;;  %v15137_v33 = vadd.f32 %v11729_v47, %v15107_v27  ;;  %v3163_v39 = vpop.f32.mrb[31].mxu0 }
 0x6ec   : > { %v15139_v21 = vpop.eup %12824  ;;  %v3936_v24 = vmul.f32 1.442695, %v3866_v40  ;;  %v3527_v52 = vmax.f32 %v3525_v23, %v3526_v16  ;;  %v3537_v12 = vmax.f32 %v15127_v29, %v3536_v43  ;;  %v15143_v36 = vadd.f32 %v3153_v9, %v15107_v27 }
 0x6ed   : > { %12834 = vpow2.f32 %v3938_v14  ;;  %v3534_v34 = vrot.slane %v3533_v15, 1  ;;  %v3544_v38 = vrot.slane %v3543_v20, 2  ;;  %v3554_v35 = vrot.slane %v15137_v33, 4 }
 0x6ee   : > { %12836 = vpow2.f32 %v3936_v24  ;;  %v3528_v0 = vrot.slane %v3527_v52, 1  ;;  %v3538_v30 = vrot.slane %v3537_v12, 2  ;;  %v3548_v31 = vrot.slane %v15143_v36, 4  ;;  %v11735_v42 = vpop.f32.mrb[32].mxu0 }
 0x6ef   : > { %v15147_v37 = vpop.eup %12826  ;;  %v3535_v45 = vmax.f32 %v3533_v15, %v3534_v34  ;;  %v3545_v3 = vmax.f32 %v3543_v20, %v3544_v38  ;;  %v3555_v44 = vmax.f32 %v15137_v33, %v3554_v35  ;;  %v15151_v47 = vadd.f32 %v11732_v2, %v15107_v27  ;;  %v3173_v49 = vpop.f32.mrb[33].mxu0  ;;  %v15170_v35 = vld [vmem:[%s18008_s6 + $0x10] sm:$0xff] }
 0x6f0   : > { %v15153_v54 = vpop.eup %12828  ;;  %v3529_v55 = vmax.f32 %v3527_v52, %v3528_v0  ;;  %v3539_v9 = vmax.f32 %v3537_v12, %v3538_v30  ;;  %v3549_v60 = vmax.f32 %v15143_v36, %v3548_v31  ;;  %v15157_v10 = vadd.f32 %v3163_v39, %v15107_v27 }
 0x6f1   : > { %v3869_v23 = vsub.f32 %v15112_v19, %v3535_v45  ;;  %v3546_v18 = vrot.slane %v3545_v3, 1  ;;  %v3556_v51 = vrot.slane %v3555_v44, 2  ;;  %v3566_v63 = vrot.slane %v15151_v47, 4 }
 0x6f2   : > { %v3868_v40 = vsub.f32 %v15115_v56, %v3529_v55  ;;  %v3540_v16 = vrot.slane %v3539_v9, 1  ;;  %v3550_v43 = vrot.slane %v3549_v60, 2  ;;  %v3560_v2 = vrot.slane %v15157_v10, 4  ;;  %v11738_v14 = vpop.f32.mrb[34].mxu0 }
 0x6f3   : > { %v15163_v15 = vpop.eup %12830  ;;  %v3942_v20 = vmul.f32 1.442695, %v3869_v23  ;;  %v3547_v24 = vmax.f32 %v3545_v3, %v3546_v18  ;;  %v3557_v27 = vmax.f32 %v3555_v44, %v3556_v51  ;;  %v3567_v39 = vmax.f32 %v15151_v47, %v3566_v63  ;;  %v3183_v19 = vpop.f32.mrb[35].mxu0 }
 0x6f4   : > { %v15166_v52 = vpop.eup %12832  ;;  %v3940_v12 = vmul.f32 1.442695, %v3868_v40  ;;  %v3541_v34 = vmax.f32 %v3539_v9, %v3540_v16  ;;  %v3551_v38 = vmax.f32 %v3549_v60, %v3550_v43  ;;  %v3561_v56 = vmax.f32 %v15157_v10, %v3560_v2 }
 0x6f5   : > { %12838 = vpow2.f32 %v3942_v20  ;;  %v3871_v0 = vsub.f32 %v15123_v58, %v3547_v24  ;;  %v3558_v30 = vrot.slane %v3557_v27, 1  ;;  %v3568_v31 = vrot.slane %v3567_v39, 2 }
 0x6f6   : > { %12840 = vpow2.f32 %v3940_v12  ;;  %v3870_v45 = vsub.f32 %v15127_v29, %v3541_v34  ;;  %v3552_v3 = vrot.slane %v3551_v38, 1  ;;  %v3562_v44 = vrot.slane %v3561_v56, 2  ;;  %v11741_v55 = vpop.f32.mrb[36].mxu0 }
 0x6f7   : > { %v15174_v23 = vpop.eup %12834  ;;  %v3946_v18 = vmul.f32 1.442695, %v3871_v0  ;;  %v3559_v9 = vmax.f32 %v3557_v27, %v3558_v30  ;;  %v3569_v60 = vmax.f32 %v3567_v39, %v3568_v31  ;;  %v15177_v51 = vadd.f32 %v11735_v42, %v15170_v35  ;;  %v3193_v63 = vpop.f32.mrb[37].mxu0 }
 0x6f8   : > { %v15179_v40 = vpop.eup %12836  ;;  %v3944_v58 = vmul.f32 1.442695, %v3870_v45  ;;  %v3553_v16 = vmax.f32 %v3551_v38, %v3552_v3  ;;  %v3563_v43 = vmax.f32 %v3561_v56, %v3562_v44  ;;  %v15182_v2 = vadd.f32 %v3173_v49, %v15170_v35 }
 0x6f9   : > { %12842 = vpow2.f32 %v3946_v18  ;;  %v3873_v29 = vsub.f32 %v15137_v33, %v3559_v9  ;;  %v3570_v20 = vrot.slane %v3569_v60, 1  ;;  %v3578_v24 = vrot.slane %v15177_v51, 4 }
 0x6fa   : > { %12844 = vpow2.f32 %v3944_v58  ;;  %v3872_v27 = vsub.f32 %v15143_v36, %v3553_v16  ;;  %v3564_v42 = vrot.slane %v3563_v43, 1  ;;  %v3572_v39 = vrot.slane %v15182_v2, 4  ;;  %v11744_v12 = vpop.f32.mrb[38].mxu0 }
 0x6fb   : > { %v3950_v34 = vmul.f32 1.442695, %v3873_v29  ;;  %v3571_v0 = vmax.f32 %v3569_v60, %v3570_v20  ;;  %v3579_v38 = vmax.f32 %v15177_v51, %v3578_v24  ;;  %v15190_v49 = vadd.f32 %v11738_v14, %v15170_v35  ;;  %v3203_v56 = vpop.f32.mrb[39].mxu0 }
 0x6fc   : > { %v3948_v30 = vmul.f32 1.442695, %v3872_v27  ;;  %v3565_v33 = vmax.f32 %v3563_v43, %v3564_v42  ;;  %v3573_v31 = vmax.f32 %v15182_v2, %v3572_v39  ;;  %v15194_v45 = vadd.f32 %v3183_v19, %v15170_v35 }
 0x6fd   : > { %12846 = vpow2.f32 %v3950_v34  ;;  %v3875_v36 = vsub.f32 %v15151_v47, %v3571_v0  ;;  %v3580_v3 = vrot.slane %v3579_v38, 2  ;;  %v3590_v44 = vrot.slane %v15190_v49, 4 }
 0x6fe   : > { %12848 = vpow2.f32 %v3948_v30  ;;  %v3874_v18 = vsub.f32 %v15157_v10, %v3565_v33  ;;  %v3574_v9 = vrot.slane %v3573_v31, 2  ;;  %v3584_v14 = vrot.slane %v15194_v45, 4  ;;  %v15200_v60 = vpop.f32.mrb[40].mxu0 }
 0x6ff   : > { %v15202_v58 = vpop.eup %12838  ;;  %v3954_v16 = vmul.f32 1.442695, %v3875_v36  ;;  %v3581_v43 = vmax.f32 %v3579_v38, %v3580_v3  ;;  %v3591_v19 = vmax.f32 %v15190_v49, %v3590_v44  ;;  %v15206_v29 = vadd.f32 %v11741_v55, %v15170_v35  ;;  %v15208_v47 = vpop.f32.mrb[41].mxu0 }
 0x700   : > { %v15210_v20 = vpop.eup %12840  ;;  %v3952_v24 = vmul.f32 1.442695, %v3874_v18  ;;  %v3575_v10 = vmax.f32 %v3573_v31, %v3574_v9  ;;  %v3585_v27 = vmax.f32 %v15194_v45, %v3584_v14  ;;  %v15214_v42 = vadd.f32 %v3193_v63, %v15170_v35 }
 0x701   : > { %12850 = vpow2.f32 %v3954_v16  ;;  %v3582_v39 = vrot.slane %v3581_v43, 1  ;;  %v3592_v34 = vrot.slane %v3591_v19, 2  ;;  %v3602_v0 = vrot.slane %v15206_v29, 4 }
 0x702   : > { %12852 = vpow2.f32 %v3952_v24  ;;  %v3576_v38 = vrot.slane %v3575_v10, 1  ;;  %v3586_v55 = vrot.slane %v3585_v27, 2  ;;  %v3596_v30 = vrot.slane %v15214_v42, 4  ;;  %v15218_v33 = vpop.f32.mrb[42].mxu0 }
 0x703   : > { %v15220_v36 = vpop.eup %12842  ;;  %v3583_v31 = vmax.f32 %v3581_v43, %v3582_v39  ;;  %v3593_v3 = vmax.f32 %v3591_v19, %v3592_v34  ;;  %v3603_v44 = vmax.f32 %v15206_v29, %v3602_v0  ;;  %v15224_v63 = vadd.f32 %v11744_v12, %v15170_v35  ;;  %v15226_v18 = vpop.f32.mrb[43].mxu0 }
 0x704   : > { %18010 = vst [vmem:[#allocation74_spill] sm:$0xff] %v15220_v36  ;;  %v15228_v9 = vpop.eup %12844  ;;  %v3577_v14 = vmax.f32 %v3575_v10, %v3576_v38  ;;  %v3587_v16 = vmax.f32 %v3585_v27, %v3586_v55  ;;  %v3597_v24 = vmax.f32 %v15214_v42, %v3596_v30  ;;  %v15232_v4 = vadd.f32 %v3203_v56, %v15170_v35 }
 0x705   : > { %18011 = vst [vmem:[#allocation75_spill] sm:$0xff] %v15228_v9  ;;  %v3877_v26 = vsub.f32 %v15177_v51, %v3583_v31  ;;  %v3594_v43 = vrot.slane %v3593_v3, 1  ;;  %v3604_v19 = vrot.slane %v3603_v44, 2  ;;  %v3614_v39 = vrot.slane %v15224_v63, 4 }
 0x706   : > { %v3876_v12 = vsub.f32 %v15182_v2, %v3577_v14  ;;  %v3588_v34 = vrot.slane %v3587_v16, 1  ;;  %v3598_v0 = vrot.slane %v3597_v24, 2  ;;  %v3608_v25 = vrot.slane %v15232_v4, 4  ;;  %v15238_v10 = vpop.f32.mrb[44].mxu0 }
 0x707   : > { %v15240_v27 = vpop.eup %12846  ;;  %v3958_v38 = vmul.f32 1.442695, %v3877_v26  ;;  %v3595_v35 = vmax.f32 %v3593_v3, %v3594_v43  ;;  %v3605_v56 = vmax.f32 %v3603_v44, %v3604_v19  ;;  %v3615_v51 = vmax.f32 %v15224_v63, %v3614_v39  ;;  %v15243_v55 = vpop.f32.mrb[45].mxu0 }
 0x708   : > { %18012 = vst [vmem:[#allocation76_spill] sm:$0xff] %v15240_v27  ;;  %v15245_v30 = vpop.eup %12848  ;;  %v3956_v31 = vmul.f32 1.442695, %v3876_v12  ;;  %v3589_v2 = vmax.f32 %v3587_v16, %v3588_v34  ;;  %v3599_v14 = vmax.f32 %v3597_v24, %v3598_v0  ;;  %v3609_v17 = vmax.f32 %v15232_v4, %v3608_v25 }
 0x709   : > { %18013 = vst [vmem:[#allocation77_spill] sm:$0xff] %v15245_v30  ;;  %12854 = vpow2.f32 %v3958_v38  ;;  %v3879_v1 = vsub.f32 %v15190_v49, %v3595_v35  ;;  %v3606_v62 = vrot.slane %v3605_v56, 1  ;;  %v3616_v26 = vrot.slane %v3615_v51, 2 }
 0x70a   : > { %12856 = vpow2.f32 %v3956_v31  ;;  %v3878_v3 = vsub.f32 %v15194_v45, %v3589_v2  ;;  %v3600_v44 = vrot.slane %v3599_v14, 1  ;;  %v3610_v43 = vrot.slane %v3609_v17, 2  ;;  %v15253_v19 = vpop.f32.mrb[46].mxu0 }
 0x70b   : > { %v15255_v39 = vpop.eup %12850  ;;  %v3962_v16 = vmul.f32 1.442695, %v3879_v1  ;;  %v3607_v24 = vmax.f32 %v3605_v56, %v3606_v62  ;;  %v3617_v12 = vmax.f32 %v3615_v51, %v3616_v26  ;;  %v15259_v25 = vadd.f32 %v15200_v60, %v15249_v11  ;;  %v15261_v34 = vpop.f32.mrb[47].mxu0 }
 0x70c   : > { %18014 = vst [vmem:[#allocation78_spill] sm:$0xff] %v15255_v39  ;;  %v15263_v49 = vpop.eup %12852  ;;  %v3960_v0 = vmul.f32 1.442695, %v3878_v3  ;;  %v3601_v38 = vmax.f32 %v3599_v14, %v3600_v44  ;;  %v3611_v45 = vmax.f32 %v3609_v17, %v3610_v43  ;;  %v15267_v35 = vadd.f32 %v15208_v47, %v15249_v11 }
 0x70d   : > { %18015 = vst [vmem:[#allocation79_spill] sm:$0xff] %v15263_v49  ;;  %12858 = vpow2.f32 %v3962_v16  ;;  %v3881_v1 = vsub.f32 %v15206_v29, %v3607_v24  ;;  %v3618_v62 = vrot.slane %v3617_v12, 1  ;;  %v3626_v56 = vrot.slane %v15259_v25, 4 }
 0x70e   : > { %12860 = vpow2.f32 %v3960_v0  ;;  %v3880_v60 = vsub.f32 %v15214_v42, %v3601_v38  ;;  %v3612_v51 = vrot.slane %v3611_v45, 1  ;;  %v3620_v31 = vrot.slane %v15267_v35, 4  ;;  %v15273_v2 = vpop.f32.mrb[48].mxu0 }
 0x70f   : > { %v3966_v14 = vmul.f32 1.442695, %v3881_v1  ;;  %v3619_v17 = vmax.f32 %v3617_v12, %v3618_v62  ;;  %v3627_v26 = vmax.f32 %v15259_v25, %v3626_v56  ;;  %v15278_v47 = vadd.f32 %v15218_v33, %v15249_v11  ;;  %v15280_v29 = vpop.f32.mrb[49].mxu0 }
 0x710   : > { %v3964_v3 = vmul.f32 1.442695, %v3880_v60  ;;  %v3613_v44 = vmax.f32 %v3611_v45, %v3612_v51  ;;  %v3621_v43 = vmax.f32 %v15267_v35, %v3620_v31  ;;  %v15285_v42 = vadd.f32 %v15226_v18, %v15249_v11 }
 0x711   : > { %12862 = vpow2.f32 %v3966_v14  ;;  %v3883_v16 = vsub.f32 %v15224_v63, %v3619_v17  ;;  %v3628_v24 = vrot.slane %v3627_v26, 2  ;;  %v3638_v12 = vrot.slane %v15278_v47, 4 }
 0x712   : > { %12864 = vpow2.f32 %v3964_v3  ;;  %v3882_v33 = vsub.f32 %v15232_v4, %v3613_v44  ;;  %v3622_v0 = vrot.slane %v3621_v43, 2  ;;  %v3632_v38 = vrot.slane %v15285_v42, 4  ;;  %v15291_v1 = vpop.f32.mrb[50].mxu0 }
 0x713   : > { %v15293_v45 = vpop.eup %12854  ;;  %v3970_v62 = vmul.f32 1.442695, %v3883_v16  ;;  %v3629_v56 = vmax.f32 %v3627_v26, %v3628_v24  ;;  %v3639_v18 = vmax.f32 %v15278_v47, %v3638_v12  ;;  %v15298_v63 = vadd.f32 %v15238_v10, %v15249_v11  ;;  %v15300_v60 = vpop.f32.mrb[51].mxu0 }
 0x714   : > { %v15302_v51 = vpop.eup %12856  ;;  %v3968_v4 = vmul.f32 1.442695, %v3882_v33  ;;  %v3623_v31 = vmax.f32 %v3621_v43, %v3622_v0  ;;  %v3633_v14 = vmax.f32 %v15285_v42, %v3632_v38  ;;  %v15307_v17 = vadd.f32 %v15243_v55, %v15249_v11 }
 0x715   : > { %12866 = vpow2.f32 %v3970_v62  ;;  %v3630_v26 = vrot.slane %v3629_v56, 1  ;;  %v3640_v3 = vrot.slane %v3639_v18, 2  ;;  %v3650_v44 = vrot.slane %v15298_v63, 4 }
 0x716   : > { %12868 = vpow2.f32 %v3968_v4  ;;  %v3624_v10 = vrot.slane %v3623_v31, 1  ;;  %v3634_v16 = vrot.slane %v3633_v14, 2  ;;  %v3644_v24 = vrot.slane %v15307_v17, 4  ;;  %v15311_v12 = vpop.f32.mrb[52].mxu0 }
 0x717   : > { %v15313_v33 = vpop.eup %12858  ;;  %v3631_v43 = vmax.f32 %v3629_v56, %v3630_v26  ;;  %v3641_v0 = vmax.f32 %v3639_v18, %v3640_v3  ;;  %v3651_v38 = vmax.f32 %v15298_v63, %v3650_v44  ;;  %v15318_v55 = vadd.f32 %v15253_v19, %v15249_v11  ;;  %v15320_v62 = vpop.f32.mrb[53].mxu0 }
 0x718   : > { %v15322_v57 = vpop.eup %12860  ;;  %v3625_v4 = vmax.f32 %v3623_v31, %v3624_v10  ;;  %v3635_v53 = vmax.f32 %v3633_v14, %v3634_v16  ;;  %v3645_v48 = vmax.f32 %v15307_v17, %v3644_v24  ;;  %v15327_v6 = vadd.f32 %v15261_v34, %v15249_v11 }
 0x719   : > { %v3885_v56 = vsub.f32 %v15259_v25, %v3631_v43  ;;  %v3642_v18 = vrot.slane %v3641_v0, 1  ;;  %v3652_v26 = vrot.slane %v3651_v38, 2  ;;  %v3662_v3 = vrot.slane %v15318_v55, 4 }
 0x71a   : > { %v3884_v19 = vsub.f32 %v15267_v35, %v3625_v4  ;;  %v3636_v44 = vrot.slane %v3635_v53, 1  ;;  %v3646_v41 = vrot.slane %v3645_v48, 2  ;;  %v3656_v31 = vrot.slane %v15327_v6, 4  ;;  %v15333_v14 = vpop.f32.mrb[54].mxu0 }
 0x71b   : > { %v15335_v10 = vpop.eup %12862  ;;  %v3974_v16 = vmul.f32 1.442695, %v3885_v56  ;;  %v3643_v11 = vmax.f32 %v3641_v0, %v3642_v18  ;;  %v3653_v34 = vmax.f32 %v3651_v38, %v3652_v26  ;;  %v3663_v25 = vmax.f32 %v15318_v55, %v3662_v3  ;;  %v15338_v24 = vpop.f32.mrb[55].mxu0 }
 0x71c   : > { %v15340_v43 = vpop.eup %12864  ;;  %v3972_v8 = vmul.f32 1.442695, %v3884_v19  ;;  %v3637_v35 = vmax.f32 %v3635_v53, %v3636_v44  ;;  %v3647_v4 = vmax.f32 %v3645_v48, %v3646_v41  ;;  %v3657_v5 = vmax.f32 %v15327_v6, %v3656_v31 }
 0x71d   : > { %12870 = vpow2.f32 %v3974_v16  ;;  %v3887_v59 = vsub.f32 %v15278_v47, %v3643_v11  ;;  %v3654_v7 = vrot.slane %v3653_v34, 1  ;;  %v3664_v56 = vrot.slane %v3663_v25, 2 }
 0x71e   : > { %12872 = vpow2.f32 %v3972_v8  ;;  %v3886_v0 = vsub.f32 %v15285_v42, %v3637_v35  ;;  %v3648_v38 = vrot.slane %v3647_v4, 1  ;;  %v3658_v18 = vrot.slane %v3657_v5, 2  ;;  %v15348_v26 = vpop.f32.mrb[56].mxu0 }
 0x71f   : > { %v15350_v3 = vpop.eup %12866  ;;  %v3978_v53 = vmul.f32 1.442695, %v3887_v59  ;;  %v3655_v48 = vmax.f32 %v3653_v34, %v3654_v7  ;;  %v3665_v41 = vmax.f32 %v3663_v25, %v3664_v56  ;;  %v15354_v19 = vadd.f32 %v15273_v2, %v15344_v61  ;;  %v15356_v44 = vpop.f32.mrb[57].mxu0 }
 0x720   : > { %v15358_v47 = vpop.eup %12868  ;;  %v3976_v8 = vmul.f32 1.442695, %v3886_v0  ;;  %v3649_v31 = vmax.f32 %v3647_v4, %v3648_v38  ;;  %v3659_v42 = vmax.f32 %v3657_v5, %v3658_v18  ;;  %v15362_v16 = vadd.f32 %v15280_v29, %v15344_v61 }
 0x721   : > { %12874 = vpow2.f32 %v3978_v53  ;;  %v3889_v59 = vsub.f32 %v15298_v63, %v3655_v48  ;;  %v3666_v7 = vrot.slane %v3665_v41, 1  ;;  %v3674_v11 = vrot.slane %v15354_v19, 4 }
 0x722   : > { %12876 = vpow2.f32 %v3976_v8  ;;  %v3888_v2 = vsub.f32 %v15307_v17, %v3649_v31  ;;  %v3660_v34 = vrot.slane %v3659_v42, 1  ;;  %v3668_v25 = vrot.slane %v15362_v16, 4  ;;  %v15368_v35 = vpop.f32.mrb[58].mxu0 }
 0x723   : > { %v3982_v4 = vmul.f32 1.442695, %v3889_v59  ;;  %v3667_v5 = vmax.f32 %v3665_v41, %v3666_v7  ;;  %v3675_v56 = vmax.f32 %v15354_v19, %v3674_v11  ;;  %v15373_v29 = vadd.f32 %v15291_v1, %v15344_v61  ;;  %v15375_v63 = vpop.f32.mrb[59].mxu0 }
 0x724   : > { %v3980_v0 = vmul.f32 1.442695, %v3888_v2  ;;  %v3661_v38 = vmax.f32 %v3659_v42, %v3660_v34  ;;  %v3669_v18 = vmax.f32 %v15362_v16, %v3668_v25  ;;  %v15380_v17 = vadd.f32 %v15300_v60, %v15344_v61 }
 0x725   : > { %12878 = vpow2.f32 %v3982_v4  ;;  %v3891_v53 = vsub.f32 %v15318_v55, %v3667_v5  ;;  %v3676_v48 = vrot.slane %v3675_v56, 2  ;;  %v3686_v41 = vrot.slane %v15373_v29, 4 }
 0x726   : > { %12880 = vpow2.f32 %v3980_v0  ;;  %v3890_v1 = vsub.f32 %v15327_v6, %v3661_v38  ;;  %v3670_v8 = vrot.slane %v3669_v18, 2  ;;  %v3680_v31 = vrot.slane %v15380_v17, 4  ;;  %v15386_v59 = vpop.f32.mrb[60].mxu0 }
 0x727   : > { %v15388_v42 = vpop.eup %12870  ;;  %v3986_v7 = vmul.f32 1.442695, %v3891_v53  ;;  %v3677_v11 = vmax.f32 %v3675_v56, %v3676_v48  ;;  %v3687_v60 = vmax.f32 %v15373_v29, %v3686_v41  ;;  %v15393_v55 = vadd.f32 %v15311_v12, %v15344_v61  ;;  %v15395_v2 = vpop.f32.mrb[61].mxu0 }
 0x728   : > { %v15397_v34 = vpop.eup %12872  ;;  %v3984_v6 = vmul.f32 1.442695, %v3890_v1  ;;  %v3671_v25 = vmax.f32 %v3669_v18, %v3670_v8  ;;  %v3681_v4 = vmax.f32 %v15380_v17, %v3680_v31  ;;  %v15402_v5 = vadd.f32 %v15320_v62, %v15344_v61 }
 0x729   : > { %12882 = vpow2.f32 %v3986_v7  ;;  %v3678_v56 = vrot.slane %v3677_v11, 1  ;;  %v3688_v0 = vrot.slane %v3687_v60, 2  ;;  %v3698_v38 = vrot.slane %v15393_v55, 4 }
 0x72a   : > { %12884 = vpow2.f32 %v3984_v6  ;;  %v3672_v12 = vrot.slane %v3671_v25, 1  ;;  %v3682_v53 = vrot.slane %v3681_v4, 2  ;;  %v3692_v48 = vrot.slane %v15402_v5, 4  ;;  %v15406_v41 = vpop.f32.mrb[62].mxu0 }
 0x72b   : > { %v15408_v1 = vpop.eup %12874  ;;  %v3679_v18 = vmax.f32 %v3677_v11, %v3678_v56  ;;  %v3689_v8 = vmax.f32 %v3687_v60, %v3688_v0  ;;  %v3699_v31 = vmax.f32 %v15393_v55, %v3698_v38  ;;  %v15413_v62 = vadd.f32 %v15333_v14, %v15344_v61  ;;  %v15415_v7 = vpop.f32.mrb[63].mxu0 }
 0x72c   : > { %18016 = vst [vmem:[#allocation80_spill] sm:$0xff] %v15408_v1  ;;  %v15417_v50 = vpop.eup %12876  ;;  %v3673_v6 = vmax.f32 %v3671_v25, %v3672_v12  ;;  %v3683_v39 = vmax.f32 %v3681_v4, %v3682_v53  ;;  %v3693_v49 = vmax.f32 %v15402_v5, %v3692_v48  ;;  %v15422_v27 = vadd.f32 %v15338_v24, %v15344_v61 }
 0x72d   : > { %18017 = vst [vmem:[#allocation81_spill] sm:$0xff] %v15417_v50  ;;  %v3893_v11 = vsub.f32 %v15354_v19, %v3679_v18  ;;  %v3690_v60 = vrot.slane %v3689_v8, 1  ;;  %v3700_v56 = vrot.slane %v3699_v31, 2  ;;  %v3710_v0 = vrot.slane %v15413_v62, 4 }
 0x72e   : > { %v3892_v14 = vsub.f32 %v15362_v16, %v3673_v6  ;;  %v3684_v38 = vrot.slane %v3683_v39, 1  ;;  %v3694_v30 = vrot.slane %v3693_v49, 2  ;;  %v3704_v25 = vrot.slane %v15422_v27, 4  ;;  %v15428_v4 = vpop.f32.mrb[64].mxu0 }
 0x72f   : > { %v15430_v12 = vpop.eup %12878  ;;  %v3990_v53 = vmul.f32 1.442695, %v3893_v11  ;;  %v3691_v61 = vmax.f32 %v3689_v8, %v3690_v60  ;;  %v3701_v24 = vmax.f32 %v3699_v31, %v3700_v56  ;;  %v3711_v19 = vmax.f32 %v15413_v62, %v3710_v0  ;;  %v15433_v48 = vpop.f32.mrb[65].mxu0 }
 0x730   : > { %18018 = vst [vmem:[#allocation82_spill] sm:$0xff] %v15430_v12  ;;  %v15435_v18 = vpop.eup %12880  ;;  %v3988_v28 = vmul.f32 1.442695, %v3892_v14  ;;  %v3685_v16 = vmax.f32 %v3683_v39, %v3684_v38  ;;  %v3695_v6 = vmax.f32 %v3693_v49, %v3694_v30  ;;  %v3705_v36 = vmax.f32 %v15422_v27, %v3704_v25 }
 0x731   : > { %18019 = vst [vmem:[#allocation83_spill] sm:$0xff] %v15435_v18  ;;  %12886 = vpow2.f32 %v3990_v53  ;;  %v3895_v9 = vsub.f32 %v15373_v29, %v3691_v61  ;;  %v3702_v12 = vrot.slane %v3701_v24, 1  ;;  %v3712_v11 = vrot.slane %v3711_v19, 2 }
 0x732   : > { %12888 = vpow2.f32 %v3988_v28  ;;  %v3894_v8 = vsub.f32 %v15380_v17, %v3685_v16  ;;  %v3696_v31 = vrot.slane %v3695_v6, 1  ;;  %v3706_v60 = vrot.slane %v3705_v36, 2  ;;  %v15443_v56 = vpop.f32.mrb[66].mxu0 }
 0x733   : > { %v15445_v0 = vpop.eup %12882  ;;  %v3994_v39 = vmul.f32 1.442695, %v3895_v9  ;;  %v3703_v30 = vmax.f32 %v3701_v24, %v3702_v12  ;;  %v3713_v49 = vmax.f32 %v3711_v19, %v3712_v11  ;;  %v15449_v14 = vadd.f32 %v15348_v26, %v15439_v22  ;;  %v15451_v38 = vpop.f32.mrb[67].mxu0 }
 0x734   : > { %18020 = vst [vmem:[#allocation84_spill] sm:$0xff] %v15445_v0  ;;  %v15453_v29 = vpop.eup %12884  ;;  %v3992_v28 = vmul.f32 1.442695, %v3894_v8  ;;  %v3697_v25 = vmax.f32 %v3695_v6, %v3696_v31  ;;  %v3707_v17 = vmax.f32 %v3705_v36, %v3706_v60  ;;  %v15457_v53 = vadd.f32 %v15356_v44, %v15439_v22 }
 0x735   : > { %18021 = vst [vmem:[#allocation85_spill] sm:$0xff] %v15453_v29  ;;  %12890 = vpow2.f32 %v3994_v39  ;;  %v3897_v9 = vsub.f32 %v15393_v55, %v3703_v30  ;;  %v3714_v12 = vrot.slane %v3713_v49, 1  ;;  %v3722_v61 = vrot.slane %v15449_v14, 4 }
 0x736   : > { %12892 = vpow2.f32 %v3992_v28  ;;  %v3896_v26 = vsub.f32 %v15402_v5, %v3697_v25  ;;  %v3708_v24 = vrot.slane %v3707_v17, 1  ;;  %v3716_v19 = vrot.slane %v15457_v53, 4  ;;  %v15463_v16 = vpop.f32.mrb[68].mxu0 }
 0x737   : > { %v3998_v6 = vmul.f32 1.442695, %v3897_v9  ;;  %v3715_v36 = vmax.f32 %v3713_v49, %v3714_v12  ;;  %v3723_v11 = vmax.f32 %v15449_v14, %v3722_v61  ;;  %v15468_v44 = vadd.f32 %v15368_v35, %v15439_v22  ;;  %v15470_v55 = vpop.f32.mrb[69].mxu0 }
 0x738   : > { %v3996_v8 = vmul.f32 1.442695, %v3896_v26  ;;  %v3709_v31 = vmax.f32 %v3707_v17, %v3708_v24  ;;  %v3717_v60 = vmax.f32 %v15457_v53, %v3716_v19  ;;  %v15475_v5 = vadd.f32 %v15375_v63, %v15439_v22 }
 0x739   : > { %12894 = vpow2.f32 %v3998_v6  ;;  %v3899_v39 = vsub.f32 %v15413_v62, %v3715_v36  ;;  %v3724_v30 = vrot.slane %v3723_v11, 2  ;;  %v3734_v49 = vrot.slane %v15468_v44, 4 }
 0x73a   : > { %12896 = vpow2.f32 %v3996_v8  ;;  %v3898_v35 = vsub.f32 %v15422_v27, %v3709_v31  ;;  %v3718_v28 = vrot.slane %v3717_v60, 2  ;;  %v3728_v25 = vrot.slane %v15475_v5, 4  ;;  %v15481_v9 = vpop.f32.mrb[70].mxu0 }
 0x73b   : > { %v15483_v17 = vpop.eup %12886  ;;  %v4002_v12 = vmul.f32 1.442695, %v3899_v39  ;;  %v3725_v61 = vmax.f32 %v3723_v11, %v3724_v30  ;;  %v3735_v63 = vmax.f32 %v15468_v44, %v3734_v49  ;;  %v15488_v62 = vadd.f32 %v15386_v59, %v15439_v22  ;;  %v15490_v26 = vpop.f32.mrb[71].mxu0 }
 0x73c   : > { %18022 = vst [vmem:[#allocation86_spill] sm:$0xff] %v15483_v17  ;;  %v15492_v24 = vpop.eup %12888  ;;  %v4000_v27 = vmul.f32 1.442695, %v3898_v35  ;;  %v3719_v19 = vmax.f32 %v3717_v60, %v3718_v28  ;;  %v3729_v6 = vmax.f32 %v15475_v5, %v3728_v25  ;;  %v15497_v36 = vadd.f32 %v15395_v2, %v15439_v22 }
 0x73d   : > { %18023 = vst [vmem:[#allocation87_spill] sm:$0xff] %v15492_v24  ;;  %12898 = vpow2.f32 %v4002_v12  ;;  %v3726_v11 = vrot.slane %v3725_v61, 1  ;;  %v3736_v8 = vrot.slane %v3735_v63, 2  ;;  %v3746_v31 = vrot.slane %v15488_v62, 4 }
 0x73e   : > { %12900 = vpow2.f32 %v4000_v27  ;;  %v3720_v59 = vrot.slane %v3719_v19, 1  ;;  %v3730_v39 = vrot.slane %v3729_v6, 2  ;;  %v3740_v30 = vrot.slane %v15497_v36, 4  ;;  %v15501_v49 = vpop.f32.mrb[72].mxu0 }
 0x73f   : > { %v15503_v35 = vpop.eup %12890  ;;  %v3727_v60 = vmax.f32 %v3725_v61, %v3726_v11  ;;  %v3737_v28 = vmax.f32 %v3735_v63, %v3736_v8  ;;  %v3747_v25 = vmax.f32 %v15488_v62, %v3746_v31  ;;  %v15508_v2 = vadd.f32 %v15406_v41, %v15439_v22  ;;  %v15510_v12 = vpop.f32.mrb[73].mxu0 }
 0x740   : > { %18024 = vst [vmem:[#allocation88_spill] sm:$0xff] %v15503_v35  ;;  %18025 = vst [vmem:[#allocation89_spill] sm:$0xff] %v15510_v12  ;;  %v15512_v17 = vpop.eup %12892  ;;  %v3721_v27 = vmax.f32 %v3719_v19, %v3720_v59  ;;  %v3731_v24 = vmax.f32 %v3729_v6, %v3730_v39  ;;  %v3741_v0 = vmax.f32 %v15497_v36, %v3740_v30  ;;  %v4148_v29 = vrot.slane %v15302_v51, 4 }
 0x741   : > { %18026 = vst [vmem:[#allocation90_spill] sm:$0xff] %v15512_v17  ;;  %v3901_v35 = vsub.f32 %v15449_v14, %v3727_v60  ;;  %v3738_v61 = vrot.slane %v3737_v28, 1  ;;  %v3748_v63 = vrot.slane %v3747_v25, 2  ;;  %v3758_v11 = vrot.slane %v15508_v2, 4 }
 0x742   : > { %v3900_v8 = vsub.f32 %v15457_v53, %v3721_v27  ;;  %v3732_v41 = vrot.slane %v3731_v24, 1  ;;  %v3742_v31 = vrot.slane %v3741_v0, 2  ;;  %v4149_v18 = vadd.f32 %v15302_v51, %v4148_v29  ;;  %v15520_v12 = vpop.f32.mrb[74].mxu0 }
 0x743   : > { %18027 = vst [vmem:[#allocation91_spill] sm:$0xff] %v15520_v12  ;;  %v15522_v19 = vpop.eup %12894  ;;  %v4006_v6 = vmul.f32 1.442695, %v3901_v35  ;;  %v3739_v59 = vmax.f32 %v3737_v28, %v3738_v61  ;;  %v3749_v39 = vmax.f32 %v3747_v25, %v3748_v63  ;;  %v3759_v30 = vmax.f32 %v15508_v2, %v3758_v11  ;;  %v15525_v14 = vpop.f32.mrb[75].mxu0 }
 0x744   : > { %18028 = vst [vmem:[#allocation92_spill] sm:$0xff] %v15522_v19  ;;  %v15527_v60 = vpop.eup %12896  ;;  %v4004_v17 = vmul.f32 1.442695, %v3900_v8  ;;  %v3733_v1 = vmax.f32 %v3731_v24, %v3732_v41  ;;  %v3743_v53 = vmax.f32 %v3741_v0, %v3742_v31  ;;  %v4150_v27 = vrot.slane %v4149_v18, 2 }
 0x745   : > { %12902 = vpow2.f32 %v4006_v6  ;;  %v3903_v29 = vsub.f32 %v15468_v44, %v3739_v59  ;;  %v3750_v50 = vrot.slane %v3749_v39, 1  ;;  %v3760_v12 = vrot.slane %v3759_v30, 2 }
 0x746   : > { %12904 = vpow2.f32 %v4004_v17  ;;  %v3902_v35 = vsub.f32 %v15475_v5, %v3733_v1  ;;  %v3744_v28 = vrot.slane %v3743_v53, 1  ;;  %v4151_v25 = vadd.f32 %v4150_v27, %v4149_v18  ;;  %v15531_v61 = vpop.f32.mrb[76].mxu0 }
 0x747   : > { %v15533_v63 = vpop.eup %12898  ;;  %v4010_v11 = vmul.f32 1.442695, %v3903_v29  ;;  %v3751_v19 = vmax.f32 %v3749_v39, %v3750_v50  ;;  %v3761_v8 = vmax.f32 %v3759_v30, %v3760_v12  ;;  %v4154_v0 = vrot.slane %v15293_v45, 4  ;;  %v15536_v24 = vpop.f32.mrb[77].mxu0  ;;  %v15550_v29 = vld [vmem:[%s18008_s6 + $0x30] sm:$0xff] }
 0x748   : > { %18029 = vst [vmem:[#allocation93_spill] sm:$0xff] %v15533_v63  ;;  %v15538_v41 = vpop.eup %12900  ;;  %v4008_v44 = vmul.f32 1.442695, %v3902_v35  ;;  %v3745_v17 = vmax.f32 %v3743_v53, %v3744_v28  ;;  %v4152_v31 = vrot.slane %v4151_v25, 1  ;;  %v15542_v1 = vadd.f32 %v15415_v7, %v15439_v22 }
 0x749   : > { %18030 = vst [vmem:[#allocation94_spill] sm:$0xff] %v15538_v41  ;;  %12906 = vpow2.f32 %v4010_v11  ;;  %v3905_v18 = vsub.f32 %v15488_v62, %v3751_v19  ;;  %v3762_v5 = vrot.slane %v3761_v8, 1  ;;  %v4155_v50 = vadd.f32 %v15293_v45, %v4154_v0 }
 0x74a   : > { %12908 = vpow2.f32 %v4008_v44  ;;  %v3904_v12 = vsub.f32 %v15497_v36, %v3745_v17  ;;  %v4153_v6 = vadd.f32 %v4152_v31, %v4151_v25  ;;  %v3752_v59 = vrot.slane %v15542_v1, 4 }
 0x74b   : > { %v4014_v39 = vmul.f32 1.442695, %v3905_v18  ;;  %v3763_v30 = vmax.f32 %v3761_v8, %v3762_v5  ;;  %v4156_v53 = vrot.slane %v4155_v50, 2  ;;  %v4052_v27 = vrot.slane %v15139_v21, 4  ;;  %v15564_v18 = vpop.f32.mrb[78].mxu0 }
 0x74c   : > { %v4012_v22 = vmul.f32 1.442695, %v3904_v12  ;;  %12910 = vrcp.f32 %v4153_v6  ;;  %v3753_v7 = vmax.f32 %v15542_v1, %v3752_v59  ;;  %v4058_v62 = vrot.slane %v15133_v46, 4  ;;  %v15570_v59 = vpop.f32.mrb[79].mxu0 }
 0x74d   : > { %12912 = vpow2.f32 %v4014_v39  ;;  %v3907_v19 = vsub.f32 %v15508_v2, %v3763_v30  ;;  %v4157_v36 = vadd.f32 %v4156_v53, %v4155_v50  ;;  %v4053_v35 = vadd.f32 %v15139_v21, %v4052_v27 }
 0x74e   : > { %12914 = vpow2.f32 %v4012_v22  ;;  %v3754_v28 = vrot.slane %v3753_v7, 2  ;;  %v4059_v25 = vadd.f32 %v15133_v46, %v4058_v62  ;;  %v15559_v11 = vadd.f32 %v15428_v4, %v15550_v29 }
 0x74f   : > { %v15561_v8 = vpop.eup %12902  ;;  %v4018_v0 = vmul.f32 1.442695, %v3907_v19  ;;  %v4158_v44 = vrot.slane %v4157_v36, 1  ;;  %v4054_v17 = vrot.slane %v4053_v35, 2  ;;  %v4160_v31 = vrot.slane %v15322_v57, 4 }
 0x750   : > { %18031 = vst [vmem:[#allocation95_spill] sm:$0xff] %v15561_v8  ;;  %v15566_v2 = vpop.eup %12904  ;;  %v3755_v5 = vmax.f32 %v3753_v7, %v3754_v28  ;;  %v4060_v50 = vrot.slane %v4059_v25, 2  ;;  %v3770_v12 = vrot.slane %v15559_v11, 4  ;;  %v4166_v6 = vrot.slane %v15313_v33, 4 }
 0x751   : > { %18032 = vst [vmem:[#allocation96_spill] sm:$0xff] %v15566_v2  ;;  %12916 = vpow2.f32 %v4018_v0  ;;  %v4159_v4 = vadd.f32 %v4158_v44, %v4157_v36  ;;  %v4055_v39 = vadd.f32 %v4054_v17, %v4053_v35  ;;  %v4161_v30 = vadd.f32 %v15322_v57, %v4160_v31 }
 0x752   : > { %v3756_v53 = vrot.slane %v3755_v5, 1  ;;  %v4061_v27 = vadd.f32 %v4060_v50, %v4059_v25  ;;  %v3771_v22 = vmax.f32 %v15559_v11, %v3770_v12  ;;  %v4167_v62 = vadd.f32 %v15313_v33, %v4166_v6 }
 0x753   : > { %v15575_v19 = vpop.eup %12906  ;;  %12918 = vrcp.f32 %v4159_v4  ;;  %v4056_v7 = vrot.slane %v4055_v39, 1  ;;  %v4162_v28 = vrot.slane %v4161_v30, 2  ;;  %v15579_v8 = vadd.f32 %v15433_v48, %v15550_v29 }
 0x754   : > { %18033 = vst [vmem:[#allocation97_spill] sm:$0xff] %v15575_v19  ;;  %v15581_v0 = vpop.eup %12908  ;;  %v3757_v36 = vmax.f32 %v3755_v5, %v3756_v53  ;;  %v4062_v35 = vrot.slane %v4061_v27, 1  ;;  %v3772_v44 = vrot.slane %v3771_v22, 2  ;;  %v4168_v17 = vrot.slane %v4167_v62, 2 }
 0x755   : > { %18034 = vst [vmem:[#allocation98_spill] sm:$0xff] %v15581_v0  ;;  %v4057_v25 = vadd.f32 %v4056_v7, %v4055_v39  ;;  %v4163_v31 = vadd.f32 %v4162_v28, %v4161_v30  ;;  %v3764_v50 = vrot.slane %v15579_v8, 4  ;;  %v4064_v12 = vrot.slane %v15153_v54, 4 }
 0x756   : > { %v12911_v6 = vpop.eup %12910  ;;  %v3906_v4 = vsub.f32 %v15542_v1, %v3757_v36  ;;  %v4063_v19 = vadd.f32 %v4062_v35, %v4061_v27  ;;  %v3773_v2 = vmax.f32 %v3771_v22, %v3772_v44  ;;  %v4169_v63 = vadd.f32 %v4168_v17, %v4167_v62 }
 0x757   : > { %v15586_v48 = vpop.eup %12912  ;;  %v4516_v0 = vmul.f32 %v12911_v6, %v15302_v51  ;;  %12920 = vrcp.f32 %v4057_v25  ;;  %v4164_v5 = vrot.slane %v4163_v31, 1  ;;  %v3765_v53 = vmax.f32 %v15579_v8, %v3764_v50 }
 0x758   : > { %v15590_v39 = vpop.eup %12914  ;;  %v4016_v30 = vmul.f32 1.442695, %v3906_v4  ;;  %12922 = vrcp.f32 %v4063_v19  ;;  %v3774_v7 = vrot.slane %v3773_v2, 1  ;;  %v4170_v28 = vrot.slane %v4169_v63, 1 }
 0x759   : > { %v4580_v41 = vmul.f32 %v4516_v0, %v15081_v13  ;;  %v4165_v1 = vadd.f32 %v4164_v5, %v4163_v31  ;;  %v3766_v27 = vrot.slane %v3765_v53, 2  ;;  %v4065_v22 = vadd.f32 %v15153_v54, %v4064_v12 }
 0x75a   : > { %12924 = vpow2.f32 %v4016_v30  ;;  %v3775_v62 = vmax.f32 %v3773_v2, %v3774_v7  ;;  %v4171_v36 = vadd.f32 %v4170_v28, %v4169_v63  ;;  %v4070_v51 = vrot.slane %v15147_v37, 4 }
 0x75b   : > { %v15595_v35 = vpop.eup %12916  ;;  %12926 = vrcp.f32 %v4165_v1  ;;  %v3767_v44 = vmax.f32 %v3765_v53, %v3766_v27  ;;  %v4066_v17 = vrot.slane %v4065_v22, 2  ;;  %v15599_v19 = vadd.f32 %v15443_v56, %v15550_v29 }
 0x75c   : > { %v3909_v0 = vsub.f32 %v15559_v11, %v3775_v62  ;;  %12928 = vrcp.f32 %v4171_v36  ;;  %v4071_v25 = vadd.f32 %v15147_v37, %v4070_v51  ;;  %v4172_v31 = vrot.slane %v15340_v43, 4 }
 0x75d   : > { %v12919_v2 = vpop.eup %12918  ;;  %v3768_v63 = vrot.slane %v3767_v44, 1  ;;  %v4067_v50 = vadd.f32 %v4066_v17, %v4065_v22  ;;  %v3782_v12 = vrot.slane %v15599_v19, 4  ;;  %v4178_v6 = vrot.slane %v15335_v10, 4 }
 0x75e   : > { %v4517_v4 = vmul.f32 %v12919_v2, %v15293_v45  ;;  %v4022_v5 = vmul.f32 1.442695, %v3909_v0  ;;  %v4072_v53 = vrot.slane %v4071_v25, 2  ;;  %v4173_v56 = vadd.f32 %v15340_v43, %v4172_v31 }
 0x75f   : > { %v3769_v30 = vmax.f32 %v3767_v44, %v3768_v63  ;;  %v4068_v11 = vrot.slane %v4067_v50, 1  ;;  %v3783_v7 = vmax.f32 %v15599_v19, %v3782_v12  ;;  %v4179_v28 = vadd.f32 %v15335_v10, %v4178_v6 }
 0x760   : > { %v4581_v1 = vmul.f32 %v4517_v4, %v15081_v13  ;;  %12930 = vpow2.f32 %v4022_v5  ;;  %v4073_v27 = vadd.f32 %v4072_v53, %v4071_v25  ;;  %v4174_v22 = vrot.slane %v4173_v56, 2 }
 0x761   : > { %v12921_v62 = vpop.eup %12920  ;;  %v3908_v36 = vsub.f32 %v15579_v8, %v3769_v30  ;;  %v4069_v51 = vadd.f32 %v4068_v11, %v4067_v50  ;;  %v3784_v45 = vrot.slane %v3783_v7, 2  ;;  %v4180_v17 = vrot.slane %v4179_v28, 2 }
 0x762   : > { %v12923_v0 = vpop.eup %12922  ;;  %v12165_v2 = vpack.c.bf16 %v4581_v1, %v4580_v41  ;;  %v4500_v44 = vmul.f32 %v12921_v62, %v15139_v21  ;;  %v4074_v31 = vrot.slane %v4073_v27, 1  ;;  %v4175_v63 = vadd.f32 %v4174_v22, %v4173_v56 }
 0x763   : > { %v4501_v12 = vmul.f32 %v12923_v0, %v15133_v46  ;;  %v4020_v6 = vmul.f32 1.442695, %v3908_v36  ;;  %12932 = vrcp.f32 %v4069_v51  ;;  %v3785_v4 = vmax.f32 %v3783_v7, %v3784_v45 }
 0x764   : > { %v15614_v5 = vpop.eup %12924  ;;  %12166 = vmatprep.subr.bf16.mxu1 %v12165_v2  ;;  %v4564_v25 = vmul.f32 %v4500_v44, %v15088_v32  ;;  %v4075_v8 = vadd.f32 %v4074_v31, %v4073_v27  ;;  %v4176_v50 = vrot.slane %v4175_v63, 1  ;;  %v4181_v53 = vadd.f32 %v4180_v17, %v4179_v28 }
 0x765   : > { %v12927_v30 = vpop.eup %12926  ;;  %v4565_v41 = vmul.f32 %v4501_v12, %v15088_v32  ;;  %12934 = vpow2.f32 %v4020_v6  ;;  %v3786_v21 = vrot.slane %v3785_v4, 1  ;;  %v15620_v56 = vadd.f32 %v15451_v38, %v15550_v29 }
 0x766   : > { %v12929_v46 = vpop.eup %12928  ;;  %v4518_v11 = vmul.f32 %v12927_v30, %v15322_v57  ;;  %12936 = vrcp.f32 %v4075_v8  ;;  %v4177_v7 = vadd.f32 %v4176_v50, %v4175_v63  ;;  %v4182_v1 = vrot.slane %v4181_v53, 1 }
 0x767   : > { %v12167_v22 = vpack.c.bf16 %v4565_v41, %v4564_v25  ;;  %v4519_v27 = vmul.f32 %v12929_v46, %v15313_v33  ;;  %v3787_v62 = vmax.f32 %v3785_v4, %v3786_v21  ;;  %v3776_v28 = vrot.slane %v15620_v56, 4 }
 0x768   : > { %v4582_v36 = vmul.f32 %v4518_v11, %v15081_v13  ;;  %v4183_v51 = vadd.f32 %v4182_v1, %v4181_v53  ;;  %12938 = vrcp.f32 %v4177_v7  ;;  %v4076_v45 = vrot.slane %v15166_v52, 4 }
 0x769   : > { %12168 = vmatpush3.bf16.msra.mxu1 %v12167_v22  ;;  %v4583_v38 = vmul.f32 %v4519_v27, %v15081_v13  ;;  %v3911_v57 = vsub.f32 %v15599_v19, %v3787_v62  ;;  %v3777_v17 = vmax.f32 %v15620_v56, %v3776_v28  ;;  %v4082_v0 = vrot.slane %v15163_v15, 4 }
 0x76a   : > { %v15631_v2 = vpop.eup %12930  ;;  %12940 = vrcp.f32 %v4183_v51  ;;  %v4077_v33 = vadd.f32 %v15166_v52, %v4076_v45  ;;  %v15636_v44 = vadd.f32 %v15463_v16, %v15550_v29  ;;  %v4184_v31 = vrot.slane %v15358_v47, 4 }
 0x76b   : > { %v12169_v63 = vpack.c.bf16 %v4583_v38, %v4582_v36  ;;  %v4026_v12 = vmul.f32 1.442695, %v3911_v57  ;;  %v3778_v6 = vrot.slane %v3777_v17, 2  ;;  %v4083_v19 = vadd.f32 %v15163_v15, %v4082_v0 }
 0x76c   : > { %v4078_v4 = vrot.slane %v4077_v33, 2  ;;  %v3794_v25 = vrot.slane %v15636_v44, 4  ;;  %v4185_v8 = vadd.f32 %v15358_v47, %v4184_v31  ;;  %v4190_v50 = vrot.slane %v15350_v3, 4 }
 0x76d   : > { %v12933_v53 = vpop.eup %12932  ;;  %12170 = vmatprep.subr.bf16.mxu1 %v12169_v63  ;;  %12942 = vpow2.f32 %v4026_v12  ;;  %v3779_v30 = vmax.f32 %v3777_v17, %v3778_v6  ;;  %v4084_v16 = vrot.slane %v4083_v19, 2  ;;  %v15645_v41 = vadd.f32 %v15470_v55, %v15550_v29 }
 0x76e   : > { %v4502_v21 = vmul.f32 %v12933_v53, %v15153_v54  ;;  %v4079_v46 = vadd.f32 %v4078_v4, %v4077_v33  ;;  %v3795_v11 = vmax.f32 %v15636_v44, %v3794_v25  ;;  %v4186_v7 = vrot.slane %v4185_v8, 2 }
 0x76f   : > { %v15649_v1 = vpop.eup %12934  ;;  %v3780_v22 = vrot.slane %v3779_v30, 1  ;;  %v4085_v27 = vadd.f32 %v4084_v16, %v4083_v19  ;;  %v4191_v62 = vadd.f32 %v15350_v3, %v4190_v50  ;;  %v3788_v28 = vrot.slane %v15645_v41, 4 }
 0x770   : > { %v12937_v36 = vpop.eup %12936  ;;  %v4566_v51 = vmul.f32 %v4502_v21, %v15088_v32  ;;  %v4080_v45 = vrot.slane %v4079_v46, 1  ;;  %v3796_v55 = vrot.slane %v3795_v11, 2  ;;  %v4187_v38 = vadd.f32 %v4186_v7, %v4185_v8 }
 0x771   : > { %v4503_v54 = vmul.f32 %v12937_v36, %v15147_v37  ;;  %v3781_v57 = vmax.f32 %v3779_v30, %v3780_v22  ;;  %v4086_v17 = vrot.slane %v4085_v27, 1  ;;  %v4192_v0 = vrot.slane %v4191_v62, 2 }
 0x772   : > { %v12939_v33 = vpop.eup %12938  ;;  %v4081_v31 = vadd.f32 %v4080_v45, %v4079_v46  ;;  %v3797_v63 = vmax.f32 %v3795_v11, %v3796_v55  ;;  %v4188_v12 = vrot.slane %v4187_v38, 1  ;;  %v3789_v6 = vmax.f32 %v15645_v41, %v3788_v28 }
 0x773   : > { %v4567_v19 = vmul.f32 %v4503_v54, %v15088_v32  ;;  %v4520_v4 = vmul.f32 %v12939_v33, %v15340_v43  ;;  %v3910_v25 = vsub.f32 %v15620_v56, %v3781_v57  ;;  %v4087_v50 = vadd.f32 %v4086_v17, %v4085_v27 }
 0x774   : > { %v12941_v53 = vpop.eup %12940  ;;  %12944 = vrcp.f32 %v4081_v31  ;;  %v3798_v8 = vrot.slane %v3797_v63, 1  ;;  %v4189_v37 = vadd.f32 %v4188_v12, %v4187_v38  ;;  %v4193_v30 = vadd.f32 %v4192_v0, %v4191_v62 }
 0x775   : > { %v12171_v16 = vpack.c.bf16 %v4567_v19, %v4566_v51  ;;  %v4521_v21 = vmul.f32 %v12941_v53, %v15335_v10  ;;  %v4584_v46 = vmul.f32 %v4520_v4, %v15081_v13  ;;  %v4024_v11 = vmul.f32 1.442695, %v3910_v25 }
 0x776   : > { %12946 = vrcp.f32 %v4087_v50  ;;  %v3799_v7 = vmax.f32 %v3797_v63, %v3798_v8  ;;  %v4194_v22 = vrot.slane %v4193_v30, 1  ;;  %v3790_v28 = vrot.slane %v3789_v6, 2 }
 0x777   : > { %v15661_v36 = vpop.eup %12942  ;;  %12172 = vmatpush3.bf16.msra.mxu1 %v12171_v16  ;;  %v4585_v43 = vmul.f32 %v4521_v21, %v15081_v13  ;;  %12948 = vpow2.f32 %v4024_v11  ;;  %v4088_v56 = vrot.slane %v15179_v40, 4  ;;  %v4094_v27 = vrot.slane %v15174_v23, 4 }
 0x778   : > { %v3913_v62 = vsub.f32 %v15636_v44, %v3799_v7  ;;  %v4195_v10 = vadd.f32 %v4194_v22, %v4193_v30  ;;  %12950 = vrcp.f32 %v4189_v37  ;;  %v3791_v51 = vmax.f32 %v3789_v6, %v3790_v28 }
 0x779   : > { %v12173_v45 = vpack.c.bf16 %v4585_v43, %v4584_v46  ;;  %v4089_v55 = vadd.f32 %v15179_v40, %v4088_v56  ;;  %v4095_v38 = vadd.f32 %v15174_v23, %v4094_v27  ;;  %v15671_v54 = vadd.f32 %v15481_v9, %v15550_v29 }
 0x77a   : > { %v4030_v57 = vmul.f32 1.442695, %v3913_v62  ;;  %12952 = vrcp.f32 %v4195_v10  ;;  %v3792_v17 = vrot.slane %v3791_v51, 1  ;;  %v4196_v0 = vrot.slane %v15397_v34, 4 }
 0x77b   : > { %12174 = vmatprep.subr.bf16.mxu1 %v12173_v45  ;;  %v4090_v33 = vrot.slane %v4089_v55, 2  ;;  %v4096_v44 = vrot.slane %v4095_v38, 2  ;;  %v3806_v31 = vrot.slane %v15671_v54, 4  ;;  %v4202_v63 = vrot.slane %v15388_v42, 4 }
 0x77c   : > { %12954 = vpow2.f32 %v4030_v57  ;;  %v3793_v12 = vmax.f32 %v3791_v51, %v3792_v17  ;;  %v4197_v6 = vadd.f32 %v15397_v34, %v4196_v0  ;;  %v15679_v9 = vadd.f32 %v15490_v26, %v15550_v29 }
 0x77d   : > { %v4091_v19 = vadd.f32 %v4090_v33, %v4089_v55  ;;  %v4097_v4 = vadd.f32 %v4096_v44, %v4095_v38  ;;  %v3807_v25 = vmax.f32 %v15671_v54, %v3806_v31  ;;  %v4203_v50 = vadd.f32 %v15388_v42, %v4202_v63  ;;  %v15695_v31 = vld [vmem:[%s18008_s6 + $0x38] sm:$0xff] }
 0x77e   : > { %v12945_v53 = vpop.eup %12944  ;;  %v3912_v8 = vsub.f32 %v15645_v41, %v3793_v12  ;;  %v4198_v37 = vrot.slane %v4197_v6, 2  ;;  %v3800_v30 = vrot.slane %v15679_v9, 4  ;;  %v4100_v16 = vrot.slane %v15210_v20, 4 }
 0x77f   : > { %v4504_v21 = vmul.f32 %v12945_v53, %v15166_v52  ;;  %v4092_v46 = vrot.slane %v4091_v19, 1  ;;  %v4098_v11 = vrot.slane %v4097_v4, 1  ;;  %v3808_v26 = vrot.slane %v3807_v25, 2 }
 0x780   : > { %v12947_v29 = vpop.eup %12946  ;;  %v4028_v7 = vmul.f32 1.442695, %v3912_v8  ;;  %v4199_v22 = vadd.f32 %v4198_v37, %v4197_v6  ;;  %v4204_v28 = vrot.slane %v4203_v50, 2  ;;  %v3801_v43 = vmax.f32 %v15679_v9, %v3800_v30 }
 0x781   : > { %v15688_v56 = vpop.eup %12948  ;;  %v4505_v41 = vmul.f32 %v12947_v29, %v15163_v15  ;;  %v4568_v27 = vmul.f32 %v4504_v21, %v15088_v32  ;;  %v4093_v62 = vadd.f32 %v4092_v46, %v4091_v19  ;;  %v4099_v10 = vadd.f32 %v4098_v11, %v4097_v4  ;;  %v18035_v46 = vld [vmem:[#allocation81_spill] sm:$0xff] }
 0x782   : > { %v12951_v51 = vpop.eup %12950  ;;  %12956 = vpow2.f32 %v4028_v7  ;;  %v3809_v52 = vmax.f32 %v3807_v25, %v3808_v26  ;;  %v4200_v45 = vrot.slane %v4199_v22, 1  ;;  %v4205_v55 = vadd.f32 %v4204_v28, %v4203_v50 }
 0x783   : > { %v4569_v38 = vmul.f32 %v4505_v41, %v15088_v32  ;;  %v4522_v57 = vmul.f32 %v12951_v51, %v15358_v47  ;;  %12958 = vrcp.f32 %v4093_v62  ;;  %v3802_v17 = vrot.slane %v3801_v43, 2  ;;  %v18037_v62 = vld [vmem:[#allocation89_spill] sm:$0xff] }
 0x784   : > { %v12953_v0 = vpop.eup %12952  ;;  %12960 = vrcp.f32 %v4099_v10  ;;  %v3810_v33 = vrot.slane %v3809_v52, 1  ;;  %v4201_v15 = vadd.f32 %v4200_v45, %v4199_v22  ;;  %v4206_v44 = vrot.slane %v4205_v55, 1 }
 0x785   : > { %v12175_v63 = vpack.c.bf16 %v4569_v38, %v4568_v27  ;;  %v4523_v12 = vmul.f32 %v12953_v0, %v15350_v3  ;;  %v4586_v6 = vmul.f32 %v4522_v57, %v15081_v13  ;;  %v3803_v19 = vmax.f32 %v3801_v43, %v3802_v17  ;;  %v18036_v43 = vld [vmem:[#allocation80_spill] sm:$0xff] }
 0x786   : > { %v15699_v4 = vpop.eup %12954  ;;  %v3811_v25 = vmax.f32 %v3809_v52, %v3810_v33  ;;  %v4207_v50 = vadd.f32 %v4206_v44, %v4205_v55  ;;  %12962 = vrcp.f32 %v4201_v15  ;;  %v4101_v47 = vadd.f32 %v15210_v20, %v4100_v16 }
 0x787   : > { %12176 = vmatpush3.bf16.msra.mxu1 %v12175_v63  ;;  %v4587_v53 = vmul.f32 %v4523_v12, %v15081_v13  ;;  %v3804_v8 = vrot.slane %v3803_v19, 1  ;;  %v4106_v37 = vrot.slane %v15202_v58, 4  ;;  %v15706_v30 = vadd.f32 %v15501_v49, %v15695_v31 }
 0x788   : > { %v3915_v3 = vsub.f32 %v15671_v54, %v3811_v25  ;;  %12964 = vrcp.f32 %v4207_v50  ;;  %v4102_v21 = vrot.slane %v4101_v47, 2  ;;  %v4208_v11 = vrot.slane %v18035_v46, 4 }
 0x789   : > { %v12177_v26 = vpack.c.bf16 %v4587_v53, %v4586_v6  ;;  %v3805_v29 = vmax.f32 %v3803_v19, %v3804_v8  ;;  %v4107_v16 = vadd.f32 %v15202_v58, %v4106_v37  ;;  %v3818_v7 = vrot.slane %v15706_v30, 4 }
 0x78a   : > { %v4034_v13 = vmul.f32 1.442695, %v3915_v3  ;;  %v4103_v22 = vadd.f32 %v4102_v21, %v4101_v47  ;;  %v4209_v28 = vadd.f32 %v18035_v46, %v4208_v11  ;;  %v4214_v41 = vrot.slane %v18036_v43, 4 }
 0x78b   : > { %12178 = vmatprep.subr.bf16.mxu1 %v12177_v26  ;;  %v3914_v49 = vsub.f32 %v15679_v9, %v3805_v29  ;;  %v4108_v54 = vrot.slane %v4107_v16, 2  ;;  %v3819_v27 = vmax.f32 %v15706_v30, %v3818_v7  ;;  %v15718_v10 = vadd.f32 %v18037_v62, %v15695_v31  ;;  %v18040_v62 = vld [vmem:[#allocation74_spill] sm:$0xff] }
 0x78c   : > { %v15720_v51 = vpop.eup %12956  ;;  %12966 = vpow2.f32 %v4034_v13  ;;  %v4104_v52 = vrot.slane %v4103_v22, 1  ;;  %v4210_v45 = vrot.slane %v4209_v28, 2  ;;  %v4215_v55 = vadd.f32 %v18036_v43, %v4214_v41 }
 0x78d   : > { %v12959_v38 = vpop.eup %12958  ;;  %v4032_v57 = vmul.f32 1.442695, %v3914_v49  ;;  %v4109_v17 = vadd.f32 %v4108_v54, %v4107_v16  ;;  %v3820_v0 = vrot.slane %v3819_v27, 2  ;;  %v3812_v9 = vrot.slane %v15718_v10, 4  ;;  %v18038_v16 = vld [vmem:[#allocation75_spill] sm:$0xff] }
 0x78e   : > { %v12961_v33 = vpop.eup %12960  ;;  %v4506_v15 = vmul.f32 %v12959_v38, %v15179_v40  ;;  %v4105_v44 = vadd.f32 %v4104_v52, %v4103_v22  ;;  %v4211_v63 = vadd.f32 %v4210_v45, %v4209_v28  ;;  %v4216_v12 = vrot.slane %v4215_v55, 2  ;;  %v18039_v28 = vld [vmem:[#allocation73_spill] sm:$0xff]  ;;  %v18041_v45 = vld [vmem:[#allocation91_spill] sm:$0xff] }
 0x78f   : > { %v4507_v6 = vmul.f32 %v12961_v33, %v15174_v23  ;;  %12968 = vpow2.f32 %v4032_v57  ;;  %v4110_v19 = vrot.slane %v4109_v17, 1  ;;  %v3821_v25 = vmax.f32 %v3819_v27, %v3820_v0 }
 0x790   : > { %v12963_v50 = vpop.eup %12962  ;;  %v4570_v47 = vmul.f32 %v4506_v15, %v15088_v32  ;;  %12970 = vrcp.f32 %v4105_v44  ;;  %v4212_v53 = vrot.slane %v4211_v63, 1  ;;  %v4217_v8 = vadd.f32 %v4216_v12, %v4215_v55 }
 0x791   : > { %v4571_v37 = vmul.f32 %v4507_v6, %v15088_v32  ;;  %v4524_v3 = vmul.f32 %v12963_v50, %v15397_v34  ;;  %v4111_v21 = vadd.f32 %v4110_v19, %v4109_v17  ;;  %v3822_v40 = vrot.slane %v3821_v25, 1  ;;  %v18042_v17 = vld [vmem:[#allocation83_spill] sm:$0xff]  ;;  %v18043_v19 = vld [vmem:[#allocation82_spill] sm:$0xff] }
 0x792   : > { %v12965_v11 = vpop.eup %12964  ;;  %v4213_v26 = vadd.f32 %v4212_v53, %v4211_v63  ;;  %v4218_v29 = vrot.slane %v4217_v8, 1  ;;  %v3813_v23 = vmax.f32 %v15718_v10, %v3812_v9  ;;  %v4112_v7 = vrot.slane %v18038_v16, 4 }
 0x793   : > { %v12179_v13 = vpack.c.bf16 %v4571_v37, %v4570_v47  ;;  %v4525_v22 = vmul.f32 %v12965_v11, %v15388_v42  ;;  %v4588_v41 = vmul.f32 %v4524_v3, %v18039_v28  ;;  %12972 = vrcp.f32 %v4111_v21 }
 0x794   : > { %v3823_v49 = vmax.f32 %v3821_v25, %v3822_v40  ;;  %v4219_v54 = vadd.f32 %v4218_v29, %v4217_v8  ;;  %12974 = vrcp.f32 %v4213_v26  ;;  %v3814_v32 = vrot.slane %v3813_v23, 2 }
 0x795   : > { %12180 = vmatpush3.bf16.msra.mxu1 %v12179_v13  ;;  %v4589_v34 = vmul.f32 %v4525_v22, %v18039_v28  ;;  %v4113_v27 = vadd.f32 %v18038_v16, %v4112_v7  ;;  %v4118_v52 = vrot.slane %v18040_v62, 4  ;;  %v15738_v55 = vadd.f32 %v18041_v45, %v15695_v31 }
 0x796   : > { %v15740_v38 = vpop.eup %12966  ;;  %v3917_v42 = vsub.f32 %v15706_v30, %v3823_v49  ;;  %12976 = vrcp.f32 %v4219_v54  ;;  %v3815_v57 = vmax.f32 %v3813_v23, %v3814_v32  ;;  %v4220_v0 = vrot.slane %v18042_v17, 4  ;;  %v2002_v49 = vld [vmem:[%s18044_s23 + $0x8] sm:$0xff]  ;;  %v18046_v32 = vld [vmem:[#allocation71_spill] sm:$0xff] }
 0x797   : > { %v12181_v9 = vpack.c.bf16 %v4589_v34, %v4588_v41  ;;  %v4114_v33 = vrot.slane %v4113_v27, 2  ;;  %v4119_v15 = vadd.f32 %v18040_v62, %v4118_v52  ;;  %v3830_v44 = vrot.slane %v15738_v55, 4  ;;  %4692 = vmatprep.mubr.f32.mxu1 %v2002_v49 }
 0x798   : > { %v4038_v63 = vmul.f32 1.442695, %v3917_v42  ;;  %v3816_v12 = vrot.slane %v3815_v57, 1  ;;  %v4221_v6 = vadd.f32 %v18042_v17, %v4220_v0  ;;  %v4226_v25 = vrot.slane %v18043_v19, 4 }
 0x799   : > { %v15748_v50 = vpop.eup %12968  ;;  %12182 = vmatprep.subr.bf16.mxu1 %v12181_v9  ;;  %v4115_v30 = vadd.f32 %v4114_v33, %v4113_v27  ;;  %v4120_v47 = vrot.slane %v4119_v15, 2  ;;  %v3831_v53 = vmax.f32 %v15738_v55, %v3830_v44  ;;  %v15753_v8 = vadd.f32 %v15525_v14, %v15695_v31  ;;  %v2004_v14 = vld [vmem:[%s18045_s4 + $0x18] sm:$0xff] }
 0x79a   : > { %v12971_v37 = vpop.eup %12970  ;;  %12978 = vpow2.f32 %v4038_v63  ;;  %v3817_v3 = vmax.f32 %v3815_v57, %v3816_v12  ;;  %v4222_v21 = vrot.slane %v4221_v6, 2  ;;  %v4227_v40 = vadd.f32 %v18043_v19, %v4226_v25  ;;  %4797 = vmatprep.mubr.f32.mxu0 %v2004_v14 }
 0x79b   : > { %v4508_v11 = vmul.f32 %v12971_v37, %v15210_v20  ;;  %v4116_v26 = vrot.slane %v4115_v30, 1  ;;  %v4121_v29 = vadd.f32 %v4120_v47, %v4119_v15  ;;  %v3832_v23 = vrot.slane %v3831_v53, 2 }
 0x79c   : > { %v3916_v7 = vsub.f32 %v15718_v10, %v3817_v3  ;;  %v4223_v13 = vadd.f32 %v4222_v21, %v4221_v6  ;;  %v4228_v22 = vrot.slane %v4227_v40, 2  ;;  %v3824_v41 = vrot.slane %v15753_v8, 4  ;;  %v18047_v21 = vld [vmem:[#allocation77_spill] sm:$0xff] }
 0x79d   : > { %v12973_v54 = vpop.eup %12972  ;;  %v4572_v34 = vmul.f32 %v4508_v11, %v18046_v32  ;;  %v4117_v27 = vadd.f32 %v4116_v26, %v4115_v30  ;;  %v4122_v52 = vrot.slane %v4121_v29, 1  ;;  %v3833_v45 = vmax.f32 %v3831_v53, %v3832_v23  ;;  %v18048_v11 = vld [vmem:[#allocation76_spill] sm:$0xff] }
 0x79e   : > { %v12975_v20 = vpop.eup %12974  ;;  %v4509_v42 = vmul.f32 %v12973_v54, %v15202_v58  ;;  %v4036_v57 = vmul.f32 1.442695, %v3916_v7  ;;  %v4224_v0 = vrot.slane %v4223_v13, 1  ;;  %v4229_v10 = vadd.f32 %v4228_v22, %v4227_v40  ;;  %v18049_v7 = vld [vmem:[#allocation85_spill] sm:$0xff] }
 0x79f   : > { %v4526_v9 = vmul.f32 %v12975_v20, %v18035_v46  ;;  %v4123_v33 = vadd.f32 %v4122_v52, %v4121_v29  ;;  %12980 = vrcp.f32 %v4117_v27  ;;  %v3834_v15 = vrot.slane %v3833_v45, 1  ;;  %v18050_v27 = vld [vmem:[#allocation84_spill] sm:$0xff] }
 0x7a0   : > { %v12977_v44 = vpop.eup %12976  ;;  %v4573_v63 = vmul.f32 %v4509_v42, %v18046_v32  ;;  %12982 = vpow2.f32 %v4036_v57  ;;  %v4225_v12 = vadd.f32 %v4224_v0, %v4223_v13  ;;  %v4230_v6 = vrot.slane %v4229_v10, 1 }
 0x7a1   : > { %v4527_v25 = vmul.f32 %v12977_v44, %v18036_v43  ;;  %v4590_v30 = vmul.f32 %v4526_v9, %v18039_v28  ;;  %12984 = vrcp.f32 %v4123_v33  ;;  %v3835_v58 = vmax.f32 %v3833_v45, %v3834_v15 }
 0x7a2   : > { %v12183_v47 = vpack.c.bf16 %v4573_v63, %v4572_v34  ;;  %v4231_v53 = vadd.f32 %v4230_v6, %v4229_v10  ;;  %12986 = vrcp.f32 %v4225_v12  ;;  %v3825_v46 = vmax.f32 %v15753_v8, %v3824_v41  ;;  %v18051_v63 = vld [vmem:[#allocation79_spill] sm:$0xff] }
 0x7a3   : > { %v4591_v37 = vmul.f32 %v4527_v25, %v18039_v28  ;;  %v3919_v3 = vsub.f32 %v15738_v55, %v3835_v58  ;;  %v4124_v40 = vrot.slane %v18047_v21, 4  ;;  %v4130_v26 = vrot.slane %v18048_v11, 4 }
 0x7a4   : > { %v15772_v29 = vpop.eup %12978  ;;  %12184 = vmatpush3.bf16.msra.mxu1 %v12183_v47  ;;  %12988 = vrcp.f32 %v4231_v53  ;;  %v3826_v43 = vrot.slane %v3825_v46, 2  ;;  %v15776_v23 = vadd.f32 %v15531_v61, %v15695_v31  ;;  %v4232_v13 = vrot.slane %v18049_v7, 4 }
 0x7a5   : > { %v12185_v22 = vpack.c.bf16 %v4591_v37, %v4590_v30  ;;  %v4042_v41 = vmul.f32 1.442695, %v3919_v3  ;;  %v4125_v49 = vadd.f32 %v18047_v21, %v4124_v40  ;;  %v4131_v55 = vadd.f32 %v18048_v11, %v4130_v26 }
 0x7a6   : > { %v3827_v14 = vmax.f32 %v3825_v46, %v3826_v43  ;;  %v3842_v54 = vrot.slane %v15776_v23, 4  ;;  %v4233_v34 = vadd.f32 %v18049_v7, %v4232_v13  ;;  %v4238_v52 = vrot.slane %v18050_v27, 4 }
 0x7a7   : > { %12186 = vmatprep.subr.bf16.mxu1 %v12185_v22  ;;  %12990 = vpow2.f32 %v4042_v41  ;;  %v4126_v45 = vrot.slane %v4125_v49, 2  ;;  %v4132_v61 = vrot.slane %v4131_v55, 2  ;;  %v15786_v20 = vadd.f32 %v15536_v24, %v15695_v31 }
 0x7a8   : > { %v3828_v42 = vrot.slane %v3827_v14, 1  ;;  %v3843_v57 = vmax.f32 %v15776_v23, %v3842_v54  ;;  %v4234_v0 = vrot.slane %v4233_v34, 2  ;;  %v4239_v10 = vadd.f32 %v18050_v27, %v4238_v52 }
 0x7a9   : > { %v12981_v9 = vpop.eup %12980  ;;  %v4127_v33 = vadd.f32 %v4126_v45, %v4125_v49  ;;  %v4133_v15 = vadd.f32 %v4132_v61, %v4131_v55  ;;  %v3836_v44 = vrot.slane %v15786_v20, 4  ;;  %v4136_v12 = vrot.slane %v18051_v63, 4 }
 0x7aa   : > { %v15792_v6 = vpop.eup %12982  ;;  %v4510_v25 = vmul.f32 %v12981_v9, %v18038_v16  ;;  %v3829_v30 = vmax.f32 %v3827_v14, %v3828_v42  ;;  %v3844_v24 = vrot.slane %v3843_v57, 2  ;;  %v4235_v58 = vadd.f32 %v4234_v0, %v4233_v34 }
 0x7ab   : > { %v12985_v47 = vpop.eup %12984  ;;  %v4128_v53 = vrot.slane %v4127_v33, 1  ;;  %v4134_v46 = vrot.slane %v4133_v15, 1  ;;  %v4240_v37 = vrot.slane %v4239_v10, 2  ;;  %v3837_v3 = vmax.f32 %v15786_v20, %v3836_v44  ;;  %v18052_v44 = vld [vmem:[#allocation78_spill] sm:$0xff] }
 0x7ac   : > { %v12987_v40 = vpop.eup %12986  ;;  %v4511_v26 = vmul.f32 %v12985_v47, %v18040_v62  ;;  %v4574_v43 = vmul.f32 %v4510_v25, %v18046_v32  ;;  %v3918_v13 = vsub.f32 %v15753_v8, %v3829_v30  ;;  %v3845_v22 = vmax.f32 %v3843_v57, %v3844_v24 }
 0x7ad   : > { %v4528_v41 = vmul.f32 %v12987_v40, %v18042_v17  ;;  %v4129_v16 = vadd.f32 %v4128_v53, %v4127_v33  ;;  %v4135_v49 = vadd.f32 %v4134_v46, %v4133_v15  ;;  %v4236_v55 = vrot.slane %v4235_v58, 1 }
 0x7ae   : > { %v12989_v14 = vpop.eup %12988  ;;  %v4575_v54 = vmul.f32 %v4511_v26, %v18046_v32  ;;  %v4040_v34 = vmul.f32 1.442695, %v3918_v13  ;;  %v3846_v52 = vrot.slane %v3845_v22, 1  ;;  %v4241_v45 = vadd.f32 %v4240_v37, %v4239_v10 }
 0x7af   : > { %v4529_v61 = vmul.f32 %v12989_v14, %v18043_v19  ;;  %v4592_v62 = vmul.f32 %v4528_v41, %v18039_v28  ;;  %12992 = vrcp.f32 %v4129_v16  ;;  %v4237_v42 = vadd.f32 %v4236_v55, %v4235_v58  ;;  %v18053_v55 = vld [vmem:[#allocation87_spill] sm:$0xff] }
 0x7b0   : > { %v12187_v0 = vpack.c.bf16 %v4575_v54, %v4574_v43  ;;  %12994 = vpow2.f32 %v4040_v34  ;;  %v3847_v8 = vmax.f32 %v3845_v22, %v3846_v52  ;;  %v4242_v57 = vrot.slane %v4241_v45, 1 }
 0x7b1   : > { %v15803_v17 = vpop.eup %12990  ;;  %v4593_v9 = vmul.f32 %v4529_v61, %v18039_v28  ;;  %12996 = vrcp.f32 %v4135_v49  ;;  %v3838_v33 = vrot.slane %v3837_v3, 2  ;;  %v4137_v15 = vadd.f32 %v18051_v63, %v4136_v12 }
 0x7b2   : > { %12188 = vmatpush3.bf16.msra.mxu1 %v12187_v0  ;;  %v3921_v10 = vsub.f32 %v15776_v23, %v3847_v8  ;;  %v4243_v19 = vadd.f32 %v4242_v57, %v4241_v45  ;;  %12998 = vrcp.f32 %v4237_v42  ;;  %v4142_v25 = vrot.slane %v18052_v44, 4 }
 0x7b3   : > { %v12189_v30 = vpack.c.bf16 %v4593_v9, %v4592_v62  ;;  %v3839_v24 = vmax.f32 %v3837_v3, %v3838_v33  ;;  %v4138_v58 = vrot.slane %v4137_v15, 2  ;;  %v15811_v47 = vadd.f32 %v15564_v18, %v15695_v31 }
 0x7b4   : > { %v4046_v53 = vmul.f32 1.442695, %v3921_v10  ;;  %13000 = vrcp.f32 %v4243_v19  ;;  %v4143_v46 = vadd.f32 %v18052_v44, %v4142_v25  ;;  %v15816_v12 = vadd.f32 %v15570_v59, %v15695_v31 }
 0x7b5   : > { %12190 = vmatprep.subr.bf16.mxu1 %v12189_v30  ;;  %v3840_v23 = vrot.slane %v3839_v24, 1  ;;  %v4139_v37 = vadd.f32 %v4138_v58, %v4137_v15  ;;  %v3854_v40 = vrot.slane %v15811_v47, 4  ;;  %v4340_v3 = vrot.slane %v15649_v1, 4 }
 0x7b6   : > { %13002 = vpow2.f32 %v4046_v53  ;;  %v4144_v26 = vrot.slane %v4143_v46, 2  ;;  %v3848_v18 = vrot.slane %v15816_v12, 4  ;;  %v4346_v43 = vrot.slane %v15631_v2, 4 }
 0x7b7   : > { %v3841_v13 = vmax.f32 %v3839_v24, %v3840_v23  ;;  %v4140_v22 = vrot.slane %v4139_v37, 1  ;;  %v3855_v41 = vmax.f32 %v15811_v47, %v3854_v40  ;;  %v4341_v59 = vadd.f32 %v15649_v1, %v4340_v3 }
 0x7b8   : > { %v4145_v31 = vadd.f32 %v4144_v26, %v4143_v46  ;;  %v3849_v16 = vmax.f32 %v15816_v12, %v3848_v18  ;;  %v4347_v49 = vadd.f32 %v15631_v2, %v4346_v43  ;;  %v4244_v14 = vrot.slane %v18053_v55, 4 }
 0x7b9   : > { %v12993_v54 = vpop.eup %12992  ;;  %v3920_v34 = vsub.f32 %v15786_v20, %v3841_v13  ;;  %v4141_v52 = vadd.f32 %v4140_v22, %v4139_v37  ;;  %v3856_v45 = vrot.slane %v3855_v41, 2  ;;  %v4342_v61 = vrot.slane %v4341_v59, 2 }
 0x7ba   : > { %v15828_v62 = vpop.eup %12994  ;;  %v4512_v42 = vmul.f32 %v12993_v54, %v18047_v21  ;;  %v4146_v0 = vrot.slane %v4145_v31, 1  ;;  %v3850_v8 = vrot.slane %v3849_v16, 2  ;;  %v4348_v57 = vrot.slane %v4347_v49, 2 }
 0x7bb   : > { %v12997_v9 = vpop.eup %12996  ;;  %v4044_v33 = vmul.f32 1.442695, %v3920_v34  ;;  %13004 = vrcp.f32 %v4141_v52  ;;  %v3857_v15 = vmax.f32 %v3855_v41, %v3856_v45  ;;  %v4343_v10 = vadd.f32 %v4342_v61, %v4341_v59 }
 0x7bc   : > { %v12999_v19 = vpop.eup %12998  ;;  %v4513_v25 = vmul.f32 %v12997_v9, %v18048_v11  ;;  %v4576_v20 = vmul.f32 %v4512_v42, %v18046_v32  ;;  %v4147_v30 = vadd.f32 %v4146_v0, %v4145_v31  ;;  %v3851_v24 = vmax.f32 %v3849_v16, %v3850_v8  ;;  %v18054_v16 = vld [vmem:[#allocation86_spill] sm:$0xff] }
 0x7bd   : > { %v4530_v58 = vmul.f32 %v12999_v19, %v18049_v7  ;;  %13006 = vpow2.f32 %v4044_v33  ;;  %v3858_v53 = vrot.slane %v3857_v15, 1  ;;  %v4344_v21 = vrot.slane %v4343_v10, 1  ;;  %v18055_v9 = vld [vmem:[#allocation90_spill] sm:$0xff] }
 0x7be   : > { %v13001_v46 = vpop.eup %13000  ;;  %v4577_v23 = vmul.f32 %v4513_v25, %v18046_v32  ;;  %13008 = vrcp.f32 %v4147_v30  ;;  %v3852_v37 = vrot.slane %v3851_v24, 1  ;;  %v4349_v40 = vadd.f32 %v4348_v57, %v4347_v49 }
 0x7bf   : > { %v4531_v3 = vmul.f32 %v13001_v46, %v18050_v27  ;;  %v4594_v26 = vmul.f32 %v4530_v58, %v18039_v28  ;;  %v3859_v11 = vmax.f32 %v3857_v15, %v3858_v53  ;;  %v4345_v18 = vadd.f32 %v4344_v21, %v4343_v10  ;;  %v18056_v58 = vld [vmem:[#allocation88_spill] sm:$0xff] }
 0x7c0   : > { %v15837_v43 = vpop.eup %13002  ;;  %v12191_v13 = vpack.c.bf16 %v4577_v23, %v4576_v20  ;;  %v3853_v22 = vmax.f32 %v3851_v24, %v3852_v37  ;;  %v4350_v7 = vrot.slane %v4349_v40, 1  ;;  %v4245_v41 = vadd.f32 %v18053_v55, %v4244_v14 }
 0x7c1   : > { %v4595_v59 = vmul.f32 %v4531_v3, %v18039_v28  ;;  %v3923_v31 = vsub.f32 %v15811_v47, %v3859_v11  ;;  %13010 = vrcp.f32 %v4345_v18  ;;  %v4250_v49 = vrot.slane %v18054_v16, 4 }
 0x7c2   : > { %12192 = vmatpush3.bf16.msra.mxu1 %v12191_v13  ;;  %v3922_v27 = vsub.f32 %v15816_v12, %v3853_v22  ;;  %v4351_v54 = vadd.f32 %v4350_v7, %v4349_v40  ;;  %v4246_v34 = vrot.slane %v4245_v41, 2  ;;  %v4352_v52 = vrot.slane %v15688_v56, 4 }
 0x7c3   : > { %v12193_v45 = vpack.c.bf16 %v4595_v59, %v4594_v26  ;;  %v4050_v61 = vmul.f32 1.442695, %v3923_v31  ;;  %v4251_v42 = vadd.f32 %v18054_v16, %v4250_v49  ;;  %v4358_v14 = vrot.slane %v15661_v36, 4 }
 0x7c4   : > { %v4048_v0 = vmul.f32 1.442695, %v3922_v27  ;;  %13012 = vrcp.f32 %v4351_v54  ;;  %v4247_v28 = vadd.f32 %v4246_v34, %v4245_v41  ;;  %v4353_v47 = vadd.f32 %v15688_v56, %v4352_v52  ;;  %v12614_v52 = vld [vmem:[%s14673_s1] sm:$0xff]  }
 0x7c5   : > { %v13005_v8 = vpop.eup %13004  ;;  %12194 = vmatprep.subr.bf16.mxu1 %v12193_v45  ;;  %13014 = vpow2.f32 %v4050_v61  ;;  %v4252_v57 = vrot.slane %v4251_v42, 2  ;;  %v4359_v12 = vadd.f32 %v15661_v36, %v4358_v14  ;;  %v4256_v33 = vrot.slane %v18055_v9, 4 }
 0x7c6   : > { %v4514_v15 = vmul.f32 %v13005_v8, %v18051_v63  ;;  %13016 = vpow2.f32 %v4048_v0  ;;  %v4248_v10 = vrot.slane %v4247_v28, 1  ;;  %v4354_v19 = vrot.slane %v4353_v47, 2  ;;  %v18057_v0 = vld [vmem:[#allocation67_spill] sm:$0xff] }
 0x7c7   : > { %v15851_v25 = vpop.eup %13006  ;;  %v4253_v20 = vadd.f32 %v4252_v57, %v4251_v42  ;;  %v4360_v30 = vrot.slane %v4359_v12, 2  ;;  %v4257_v24 = vadd.f32 %v18055_v9, %v4256_v33  ;;  %v4262_v53 = vrot.slane %v18056_v58, 4  ;;  %v2001_v33 = vld [vmem:[%s18045_s4] sm:$0xff] }
 0x7c8   : > { %v13009_v21 = vpop.eup %13008  ;;  %v4578_v46 = vmul.f32 %v4514_v15, %v18046_v32  ;;  %v4249_v23 = vadd.f32 %v4248_v10, %v4247_v28  ;;  %v4355_v37 = vadd.f32 %v4354_v19, %v4353_v47  ;;  %v4364_v40 = vrot.slane %v15720_v51, 4 }
 0x7c9   : > { %v4515_v63 = vmul.f32 %v13009_v21, %v18052_v44  ;;  %v4254_v3 = vrot.slane %v4253_v20, 1  ;;  %v4361_v26 = vadd.f32 %v4360_v30, %v4359_v12  ;;  %v4258_v11 = vrot.slane %v4257_v24, 2  ;;  %v18058_v30 = vld [vmem:[#allocation92_spill] sm:$0xff]  ;;  %v12615_v21 = vld [vmem:[%s14673_s1 + $0x8] sm:$0xff]  }
 0x7ca   : > { %13018 = vrcp.f32 %v4249_v23  ;;  %v4356_v18 = vrot.slane %v4355_v37, 1  ;;  %v4263_v13 = vadd.f32 %v18056_v58, %v4262_v53  ;;  %v4365_v22 = vadd.f32 %v15720_v51, %v4364_v40  ;;  %v2006_v53 = vld [vmem:[%s18045_s4 + $0x28] sm:$0xff] }
 0x7cb   : > { %v13011_v7 = vpop.eup %13010  ;;  %v4579_v41 = vmul.f32 %v4515_v63, %v18046_v32  ;;  %v4255_v59 = vadd.f32 %v4254_v3, %v4253_v20  ;;  %v4362_v31 = vrot.slane %v4361_v26, 1  ;;  %v4259_v49 = vadd.f32 %v4258_v11, %v4257_v24 }
 0x7cc   : > { %v4548_v27 = vmul.f32 %v13011_v7, %v15649_v1  ;;  %v4357_v54 = vadd.f32 %v4356_v18, %v4355_v37  ;;  %v4264_v44 = vrot.slane %v4263_v13, 2  ;;  %v4366_v34 = vrot.slane %v4365_v22, 2 }
 0x7cd   : > { %v12195_v45 = vpack.c.bf16 %v4579_v41, %v4578_v46  ;;  %13020 = vrcp.f32 %v4255_v59  ;;  %v4363_v61 = vadd.f32 %v4362_v31, %v4361_v26  ;;  %v4260_v42 = vrot.slane %v4259_v49, 1  ;;  %v18059_v31 = vld [vmem:[#allocation94_spill] sm:$0xff] }
 0x7ce   : > { %v13013_v14 = vpop.eup %13012  ;;  %v4612_v28 = vmul.f32 %v4548_v27, %v18057_v0  ;;  %13022 = vrcp.f32 %v4357_v54  ;;  %v4265_v32 = vadd.f32 %v4264_v44, %v4263_v13  ;;  %v4367_v47 = vadd.f32 %v4366_v34, %v4365_v22  ;;  %v2005_v22 = vld [vmem:[%s18045_s4 + $0x20] sm:$0xff]  ;;  %v2010_v27 = vld [vmem:[%s18045_s4 + $0x48] sm:$0xff]  ;;  %v12616_v54 = vld [vmem:[%s14673_s1 + $0x10] sm:$0xff]  }
 0x7cf   : > { %v15864_v8 = vpop.eup %13014  ;;  %12196 = vmatpush3.bf16.msra.mxu1 %v12195_v45  ;;  %v4549_v1 = vmul.f32 %v13013_v14, %v15631_v2  ;;  %13024 = vrcp.f32 %v4363_v61  ;;  %v4261_v57 = vadd.f32 %v4260_v42, %v4259_v49  ;;  %v4370_v12 = vrot.slane %v15699_v4, 4 }
 0x7d0   : > { %v15869_v15 = vpop.eup %13016  ;;  %v4266_v10 = vrot.slane %v4265_v32, 1  ;;  %v4368_v19 = vrot.slane %v4367_v47, 1  ;;  %v4268_v20 = vrot.slane %v15527_v60, 4  ;;  %v4274_v24 = vrot.slane %v18058_v30, 4  ;;  %11805 = vmatprep.subr.bf16.mxu1 %v12614_v52 }
 0x7d1   : > { %v4613_v46 = vmul.f32 %v4549_v1, %v18057_v0  ;;  %13026 = vrcp.f32 %v4261_v57  ;;  %v4371_v2 = vadd.f32 %v15699_v4, %v4370_v12  ;;  %v4376_v23 = vrot.slane %v15748_v50, 4  ;;  %v18061_v12 = vld [vmem:[#allocation93_spill] sm:$0xff] }
 0x7d2   : > { %v4267_v37 = vadd.f32 %v4266_v10, %v4265_v32  ;;  %v4369_v40 = vadd.f32 %v4368_v19, %v4367_v47  ;;  %v4269_v63 = vadd.f32 %v15527_v60, %v4268_v20  ;;  %v4275_v3 = vadd.f32 %v18058_v30, %v4274_v24  ;;  %4693 = vmatmul.mubr.f32.vlgmr.msra.gmra.mrb[72].mxu1 %v2001_v33  ;;  %v18060_v32 = vld [vmem:[#allocation68_spill] sm:$0xff] }
 0x7d3   : > { %v12197_v26 = vpack.c.bf16 %v4613_v46, %v4612_v28  ;;  %v4372_v11 = vrot.slane %v4371_v2, 2  ;;  %v4377_v18 = vadd.f32 %v15748_v50, %v4376_v23  ;;  %v4382_v13 = vrot.slane %v15740_v38, 4  ;;  %4697 = vmatprep.mubr.f32.mxu1 %v2006_v53  ;;  %11806 = vmatpush3.bf16.msra.mxu1 %v12614_v52  ;;  %v2014_v46 = vld [vmem:[%s18045_s4 + $0x68] sm:$0xff] }
 0x7d4   : > { %v13019_v7 = vpop.eup %13018  ;;  %13028 = vrcp.f32 %v4267_v37  ;;  %v4270_v41 = vrot.slane %v4269_v63, 2  ;;  %v4276_v59 = vrot.slane %v4275_v3, 2  ;;  %v4280_v49 = vrot.slane %v18059_v31, 4  ;;  %11807 = vmatprep.subr.bf16.mxu1 %v12615_v21 }
 0x7d5   : > { %12198 = vmatprep.subr.bf16.mxu0 %v12197_v26  ;;  %v4532_v44 = vmul.f32 %v13019_v7, %v18053_v55  ;;  %v4373_v34 = vadd.f32 %v4372_v11, %v4371_v2  ;;  %13030 = vrcp.f32 %v4369_v40  ;;  %v4378_v45 = vrot.slane %v4377_v18, 2  ;;  %v2009_v55 = vld [vmem:[%s18045_s4 + $0x40] sm:$0xff] }
 0x7d6   : > { %v4271_v61 = vadd.f32 %v4270_v41, %v4269_v63  ;;  %v4277_v42 = vadd.f32 %v4276_v59, %v4275_v3  ;;  %v4383_v52 = vadd.f32 %v15740_v38, %v4382_v13  ;;  %v4281_v14 = vadd.f32 %v18059_v31, %v4280_v49  ;;  %4698 = vmatmul.mubr.f32.gmra.mrb[74].mxu1 %v2005_v22  ;;  %v2013_v7 = vld [vmem:[%s18045_s4 + $0x60] sm:$0xff] }
 0x7d7   : > { %v13021_v28 = vpop.eup %13020  ;;  %v4596_v47 = vmul.f32 %v4532_v44, %v18060_v32  ;;  %v4374_v1 = vrot.slane %v4373_v34, 1  ;;  %v4379_v57 = vadd.f32 %v4378_v45, %v4377_v18  ;;  %v4286_v33 = vrot.slane %v18061_v12, 4  ;;  %4702 = vmatprep.mubr.f32.mxu1 %v2010_v27  ;;  %11808 = vmatpush3.bf16.msra.mxu1 %v12615_v21 }
 0x7d8   : > { %v13023_v10 = vpop.eup %13022  ;;  %v4533_v19 = vmul.f32 %v13021_v28, %v18054_v16  ;;  %v4272_v20 = vrot.slane %v4271_v61, 1  ;;  %v4278_v24 = vrot.slane %v4277_v42, 1  ;;  %v4384_v53 = vrot.slane %v4383_v52, 2  ;;  %11809 = vmatprep.subr.bf16.mxu1 %v12616_v54 }
 0x7d9   : > { %v13025_v2 = vpop.eup %13024  ;;  %v4550_v23 = vmul.f32 %v13023_v10, %v15688_v56  ;;  %v4375_v37 = vadd.f32 %v4374_v1, %v4373_v34  ;;  %v4380_v40 = vrot.slane %v4379_v57, 1  ;;  %v4282_v63 = vrot.slane %v4281_v14, 2 }
 0x7da   : > { %v4597_v3 = vmul.f32 %v4533_v19, %v18060_v32  ;;  %v4551_v26 = vmul.f32 %v13025_v2, %v15661_v36  ;;  %v4273_v21 = vadd.f32 %v4272_v20, %v4271_v61  ;;  %v4279_v11 = vadd.f32 %v4278_v24, %v4277_v42  ;;  %4703 = vmatmul.mubr.f32.gmra.mrb[76].mxu1 %v2009_v55  ;;  %v2018_v36 = vld [vmem:[%s18045_s4 + $0x88] sm:$0xff] }
 0x7db   : > { %v13027_v16 = vpop.eup %13026  ;;  %v4614_v18 = vmul.f32 %v4550_v23, %v18057_v0  ;;  %13032 = vrcp.f32 %v4375_v37  ;;  %v4381_v13 = vadd.f32 %v4380_v40, %v4379_v57  ;;  %v4385_v22 = vadd.f32 %v4384_v53, %v4383_v52  ;;  %4707 = vmatprep.mubr.f32.mxu1 %v2014_v46  ;;  %11810 = vmatpush3.bf16.msra.mxu1 %v12616_v54  ;;  %v18062_v55 = vld [vmem:[#allocation96_spill] sm:$0xff]  ;;  %v18063_v40 = vld [vmem:[#allocation95_spill] sm:$0xff] }
 0x7dc   : > { %v12199_v56 = vpack.c.bf16 %v4597_v3, %v4596_v47  ;;  %v4615_v41 = vmul.f32 %v4551_v26, %v18057_v0  ;;  %v4534_v59 = vmul.f32 %v13027_v16, %v18055_v9  ;;  %13034 = vrcp.f32 %v4273_v21  ;;  %v2022_v19 = vld [vmem:[%s18045_s4 + $0xa8] sm:$0xff]  ;;  %v2021_v3 = vld [vmem:[%s18045_s4 + $0xa0] sm:$0xff] }
 0x7dd   : > { %13036 = vrcp.f32 %v4279_v11  ;;  %v4386_v49 = vrot.slane %v4385_v22, 1  ;;  %v4283_v27 = vadd.f32 %v4282_v63, %v4281_v14  ;;  %v4287_v44 = vadd.f32 %v18061_v12, %v4286_v33  ;;  %v2017_v14 = vld [vmem:[%s18045_s4 + $0x80] sm:$0xff] }
 0x7de   : > { %v13029_v34 = vpop.eup %13028  ;;  %12200 = vmatpush3.bf16.msra.mxu0 %v12199_v56  ;;  %v12201_v45 = vpack.c.bf16 %v4615_v41, %v4614_v18  ;;  %v4598_v61 = vmul.f32 %v4534_v59, %v18060_v32  ;;  %13038 = vrcp.f32 %v4381_v13  ;;  %v4388_v54 = vrot.slane %v15792_v6, 4  ;;  %4708 = vmatmul.mubr.f32.gmra.mrb[78].mxu1 %v2013_v7  ;;  %v2026_v18 = vld [vmem:[%s18045_s4 + $0xc8] sm:$0xff]  ;;  %v18064_v41 = vld [vmem:[#allocation98_spill] sm:$0xff] }
 0x7df   : > { %v13031_v42 = vpop.eup %13030  ;;  %v4535_v9 = vmul.f32 %v13029_v34, %v18056_v58  ;;  %v4387_v52 = vadd.f32 %v4386_v49, %v4385_v22  ;;  %v4284_v28 = vrot.slane %v4283_v27, 1  ;;  %v4288_v47 = vrot.slane %v4287_v44, 2  ;;  %4712 = vmatprep.mubr.f32.mxu1 %v2018_v36 }
 0x7e0   : > { %12202 = vmatprep.subr.bf16.mxu0 %v12201_v45  ;;  %v4552_v1 = vmul.f32 %v13031_v42, %v15720_v51  ;;  %v4389_v57 = vadd.f32 %v15792_v6, %v4388_v54  ;;  %v4394_v33 = vrot.slane %v15772_v29, 4  ;;  %v4292_v10 = vrot.slane %v18062_v55, 4 }
 0x7e1   : > { %v4599_v20 = vmul.f32 %v4535_v9, %v18060_v32  ;;  %13040 = vrcp.f32 %v4387_v52  ;;  %v4285_v58 = vadd.f32 %v4284_v28, %v4283_v27  ;;  %v4289_v24 = vadd.f32 %v4288_v47, %v4287_v44  ;;  %v2025_v9 = vld [vmem:[%s18045_s4 + $0xc0] sm:$0xff] }
 0x7e2   : > { %v4616_v53 = vmul.f32 %v4552_v1, %v18057_v0  ;;  %v4390_v46 = vrot.slane %v4389_v57, 2  ;;  %v4395_v2 = vadd.f32 %v15772_v29, %v4394_v33  ;;  %v4293_v51 = vadd.f32 %v18062_v55, %v4292_v10  ;;  %4713 = vmatmul.mubr.f32.gmra.mrb[80].mxu1 %v2017_v14  ;;  %v2030_v1 = vld [vmem:[%s18045_s4 + $0xe8] sm:$0xff] }
 0x7e3   : > { %v12203_v23 = vpack.c.bf16 %v4599_v20, %v4598_v61  ;;  %v4290_v37 = vrot.slane %v4289_v24, 1  ;;  %13042 = vrcp.f32 %v4285_v58  ;;  %v4298_v63 = vrot.slane %v18063_v40, 4  ;;  %4717 = vmatprep.mubr.f32.mxu1 %v2022_v19 }
 0x7e4   : > { %v4391_v26 = vadd.f32 %v4390_v46, %v4389_v57  ;;  %v4396_v21 = vrot.slane %v4395_v2, 2  ;;  %v4294_v11 = vrot.slane %v4293_v51, 2  ;;  %v4400_v16 = vrot.slane %v15828_v62, 4 }
 0x7e5   : > { %v13033_v13 = vpop.eup %13032  ;;  %12204 = vmatpush3.bf16.msra.mxu0 %v12203_v23  ;;  %v4291_v22 = vadd.f32 %v4290_v37, %v4289_v24  ;;  %v4299_v7 = vadd.f32 %v18063_v40, %v4298_v63  ;;  %v4406_v56 = vrot.slane %v15803_v17, 4  ;;  %v4304_v59 = vrot.slane %v18064_v41, 4  ;;  %v2029_v23 = vld [vmem:[%s18045_s4 + $0xe0] sm:$0xff] }
 0x7e6   : > { %v13035_v36 = vpop.eup %13034  ;;  %v4553_v49 = vmul.f32 %v13033_v13, %v15699_v4  ;;  %v4392_v27 = vrot.slane %v4391_v26, 1  ;;  %v4397_v44 = vadd.f32 %v4396_v21, %v4395_v2  ;;  %v4295_v34 = vadd.f32 %v4294_v11, %v4293_v51  ;;  %4718 = vmatmul.mubr.f32.gmra.mrb[82].mxu1 %v2021_v3  ;;  %v18065_v13 = vld [vmem:[#allocation97_spill] sm:$0xff] }
 0x7e7   : > { %v13037_v45 = vpop.eup %13036  ;;  %v4536_v61 = vmul.f32 %v13035_v36, %v15527_v60  ;;  %13044 = vrcp.f32 %v4291_v22  ;;  %v4300_v54 = vrot.slane %v4299_v7, 2  ;;  %v4401_v42 = vadd.f32 %v15828_v62, %v4400_v16  ;;  %4722 = vmatprep.mubr.f32.mxu1 %v2026_v18 }
 0x7e8   : > { %v13039_v52 = vpop.eup %13038  ;;  %v4617_v28 = vmul.f32 %v4553_v49, %v18057_v0  ;;  %v4537_v47 = vmul.f32 %v13037_v45, %v18058_v30  ;;  %v4393_v4 = vadd.f32 %v4392_v27, %v4391_v26  ;;  %v4398_v14 = vrot.slane %v4397_v44, 1 }
 0x7e9   : > { %v4600_v57 = vmul.f32 %v4536_v61, %v18060_v32  ;;  %v4554_v33 = vmul.f32 %v13039_v52, %v15748_v50  ;;  %v4296_v60 = vrot.slane %v4295_v34, 1  ;;  %v4301_v10 = vadd.f32 %v4300_v54, %v4299_v7 }
 0x7ea   : > { %v12205_v19 = vpack.c.bf16 %v4617_v28, %v4616_v53  ;;  %v4601_v20 = vmul.f32 %v4537_v47, %v18060_v32  ;;  %v4399_v58 = vadd.f32 %v4398_v14, %v4397_v44  ;;  %13046 = vrcp.f32 %v4393_v4  ;;  %4723 = vmatmul.mubr.f32.gmra.mrb[84].mxu1 %v2025_v9 }
 0x7eb   : > { %v13041_v24 = vpop.eup %13040  ;;  %v4618_v46 = vmul.f32 %v4554_v33, %v18057_v0  ;;  %v4297_v30 = vadd.f32 %v4296_v60, %v4295_v34  ;;  %v4302_v2 = vrot.slane %v4301_v10, 1  ;;  %v4402_v51 = vrot.slane %v4401_v42, 2  ;;  %4727 = vmatprep.mubr.f32.mxu1 %v2030_v1 }
 0x7ec   : > { %12206 = vmatprep.subr.bf16.mxu0 %v12205_v19  ;;  %v12207_v37 = vpack.c.bf16 %v4601_v20, %v4600_v57  ;;  %v4555_v50 = vmul.f32 %v13041_v24, %v15740_v38  ;;  %13048 = vrcp.f32 %v4399_v58  ;;  %v4407_v53 = vadd.f32 %v15803_v17, %v4406_v56 }
 0x7ed   : > { %v13043_v63 = vpop.eup %13042  ;;  %v4303_v3 = vadd.f32 %v4302_v2, %v4301_v10  ;;  %13050 = vrcp.f32 %v4297_v30  ;;  %v4403_v26 = vadd.f32 %v4402_v51, %v4401_v42  ;;  %v4305_v21 = vadd.f32 %v18064_v41, %v4304_v59  ;;  %v18066_v51 = vld [vmem:[#allocation69_spill] sm:$0xff] }
 0x7ee   : > { %12208 = vmatpush3.bf16.msra.mxu0 %v12207_v37  ;;  %v4619_v11 = vmul.f32 %v4555_v50, %v18057_v0  ;;  %v4538_v16 = vmul.f32 %v13043_v63, %v18059_v31  ;;  %v4408_v18 = vrot.slane %v4407_v53, 2  ;;  %v4310_v22 = vrot.slane %v18065_v13, 4  ;;  %4728 = vmatmul.mubr.f32.gmra.mrb[86].mxu1 %v2029_v23 }
 0x7ef   : > { %13052 = vrcp.f32 %v4303_v3  ;;  %v4404_v38 = vrot.slane %v4403_v26, 1  ;;  %v4306_v7 = vrot.slane %v4305_v21, 2  ;;  %v4412_v56 = vrot.slane %v15851_v25, 4 }
 0x7f0   : > { %v12209_v36 = vpack.c.bf16 %v4619_v11, %v4618_v46  ;;  %v4602_v49 = vmul.f32 %v4538_v16, %v18060_v32  ;;  %v4409_v27 = vadd.f32 %v4408_v18, %v4407_v53  ;;  %v4311_v59 = vadd.f32 %v18065_v13, %v4310_v22  ;;  %v18067_v16 = vld [vmem:[#allocation70_spill] sm:$0xff] }
 0x7f1   : > { %v13045_v44 = vpop.eup %13044  ;;  %v4405_v34 = vadd.f32 %v4404_v38, %v4403_v26  ;;  %v4307_v0 = vadd.f32 %v4306_v7, %v4305_v21  ;;  %v4413_v31 = vadd.f32 %v15851_v25, %v4412_v56  ;;  %v4418_v45 = vrot.slane %v15837_v43, 4 }
 0x7f2   : > { %12210 = vmatprep.subr.bf16.mxu0 %v12209_v36  ;;  %v4539_v61 = vmul.f32 %v13045_v44, %v18061_v12  ;;  %v4410_v54 = vrot.slane %v4409_v27, 1  ;;  %v4312_v42 = vrot.slane %v4311_v59, 2  ;;  %v4316_v9 = vrot.slane %v15590_v39, 4 }
 0x7f3   : > { %13054 = vrcp.f32 %v4405_v34  ;;  %v4308_v52 = vrot.slane %v4307_v0, 1  ;;  %v4414_v28 = vrot.slane %v4413_v31, 2  ;;  %v4419_v47 = vadd.f32 %v15837_v43, %v4418_v45 }
 0x7f4   : > { %v13047_v4 = vpop.eup %13046  ;;  %v4603_v14 = vmul.f32 %v4539_v61, %v18060_v32  ;;  %v4411_v1 = vadd.f32 %v4410_v54, %v4409_v27  ;;  %v4313_v57 = vadd.f32 %v4312_v42, %v4311_v59  ;;  %v4317_v33 = vadd.f32 %v15590_v39, %v4316_v9 }
 0x7f5   : > { %v4556_v60 = vmul.f32 %v13047_v4, %v15792_v6  ;;  %v4309_v10 = vadd.f32 %v4308_v52, %v4307_v0  ;;  %v4415_v12 = vadd.f32 %v4414_v28, %v4413_v31  ;;  %v4420_v19 = vrot.slane %v4419_v47, 2 }
 0x7f6   : > { %v13049_v20 = vpop.eup %13048  ;;  %v12211_v58 = vpack.c.bf16 %v4603_v14, %v4602_v49  ;;  %13056 = vrcp.f32 %v4411_v1  ;;  %v4314_v24 = vrot.slane %v4313_v57, 1  ;;  %v4318_v46 = vrot.slane %v4317_v33, 2 }
 0x7f7   : > { %v13051_v30 = vpop.eup %13050  ;;  %v4557_v2 = vmul.f32 %v13049_v20, %v15772_v29  ;;  %v4620_v23 = vmul.f32 %v4556_v60, %v18066_v51  ;;  %13058 = vrcp.f32 %v4309_v10  ;;  %v4416_v32 = vrot.slane %v4415_v12, 1 }
 0x7f8   : > { %12212 = vmatpush3.bf16.msra.mxu0 %v12211_v58  ;;  %v4540_v37 = vmul.f32 %v13051_v30, %v18062_v55  ;;  %v4315_v50 = vadd.f32 %v4314_v24, %v4313_v57  ;;  %v4421_v6 = vadd.f32 %v4420_v19, %v4419_v47  ;;  %v4319_v53 = vadd.f32 %v4318_v46, %v4317_v33 }
 0x7f9   : > { %v13053_v63 = vpop.eup %13052  ;;  %v4621_v3 = vmul.f32 %v4557_v2, %v18066_v51  ;;  %v4417_v26 = vadd.f32 %v4416_v32, %v4415_v12  ;;  %v4322_v21 = vrot.slane %v15586_v48, 4  ;;  %v4424_v11 = vrot.slane %v15869_v15, 4 }
 0x7fa   : > { %v4541_v29 = vmul.f32 %v13053_v63, %v18063_v40  ;;  %v4604_v18 = vmul.f32 %v4540_v37, %v18067_v16  ;;  %13060 = vrcp.f32 %v4315_v50  ;;  %v4422_v22 = vrot.slane %v4421_v6, 1 }
 0x7fb   : > { %v12213_v38 = vpack.c.bf16 %v4621_v3, %v4620_v23  ;;  %13062 = vrcp.f32 %v4417_v26  ;;  %v4320_v55 = vrot.slane %v4319_v53, 1  ;;  %v4323_v7 = vadd.f32 %v15586_v48, %v4322_v21 }
 0x7fc   : > { %v4605_v56 = vmul.f32 %v4541_v29, %v18067_v16  ;;  %v4423_v36 = vadd.f32 %v4422_v22, %v4421_v6  ;;  %v4425_v49 = vadd.f32 %v15869_v15, %v4424_v11  ;;  %v4430_v27 = vrot.slane %v15864_v8, 4 }
 0x7fd   : > { %v13055_v59 = vpop.eup %13054  ;;  %12214 = vmatprep.subr.bf16.mxu0 %v12213_v38  ;;  %v4321_v44 = vadd.f32 %v4320_v55, %v4319_v53  ;;  %v4324_v40 = vrot.slane %v4323_v7, 2  ;;  %v4328_v34 = vrot.slane %v15614_v5, 4  ;;  %v4334_v0 = vrot.slane %v15595_v35, 4 }
 0x7fe   : > { %v12215_v31 = vpack.c.bf16 %v4605_v56, %v4604_v18  ;;  %v4558_v45 = vmul.f32 %v13055_v59, %v15828_v62  ;;  %13064 = vrcp.f32 %v4423_v36  ;;  %v4426_v61 = vrot.slane %v4425_v49, 2 }
 0x7ff   : > { %v4325_v54 = vadd.f32 %v4324_v40, %v4323_v7  ;;  %13066 = vrcp.f32 %v4321_v44  ;;  %v4431_v42 = vadd.f32 %v15864_v8, %v4430_v27  ;;  %v4329_v9 = vadd.f32 %v15614_v5, %v4328_v34 }
 0x800   : > { %v13057_v52 = vpop.eup %13056  ;;  %12216 = vmatpush3.bf16.msra.mxu0 %v12215_v31  ;;  %v4622_v28 = vmul.f32 %v4558_v45, %v18066_v51  ;;  %v4427_v47 = vadd.f32 %v4426_v61, %v4425_v49  ;;  %v4335_v4 = vadd.f32 %v15595_v35, %v4334_v0 }
 0x801   : > { %v13059_v14 = vpop.eup %13058  ;;  %v4559_v1 = vmul.f32 %v13057_v52, %v15803_v17  ;;  %v4326_v57 = vrot.slane %v4325_v54, 1  ;;  %v4432_v62 = vrot.slane %v4431_v42, 2  ;;  %v4330_v33 = vrot.slane %v4329_v9, 2  ;;  %v2015_v52 = vld [vmem:[%s18045_s4 + $0x70] sm:$0xff] }
 0x802   : > { %v4542_v60 = vmul.f32 %v13059_v14, %v18064_v41  ;;  %v4428_v10 = vrot.slane %v4427_v47, 1  ;;  %v4336_v12 = vrot.slane %v4335_v4, 2  ;;  %v2023_v14 = vld [vmem:[%s18045_s4 + $0xb0] sm:$0xff] }
 0x803   : > { %v4623_v19 = vmul.f32 %v4559_v1, %v18066_v51  ;;  %v4327_v20 = vadd.f32 %v4326_v57, %v4325_v54  ;;  %v4433_v58 = vadd.f32 %v4432_v62, %v4431_v42  ;;  %v4331_v24 = vadd.f32 %v4330_v33, %v4329_v9  ;;  %v2003_v42 = vld [vmem:[%s18045_s4 + $0x10] sm:$0xff]  ;;  %v2028_v1 = vld [vmem:[%s18045_s4 + $0xd8] sm:$0xff] }
 0x804   : > { %v13061_v46 = vpop.eup %13060  ;;  %v4606_v30 = vmul.f32 %v4542_v60, %v18067_v16  ;;  %v4429_v2 = vadd.f32 %v4428_v10, %v4427_v47  ;;  %v4337_v23 = vadd.f32 %v4336_v12, %v4335_v4  ;;  %v2011_v9 = vld [vmem:[%s18045_s4 + $0x50] sm:$0xff]  ;;  %v2024_v4 = vld [vmem:[%s18045_s4 + $0xb8] sm:$0xff]  ;;  %v18068_v60 = vmov 0   ;;  %v12618_v12 = vld [vmem:[%s14673_s1 + $0x20] sm:$0xff]  }
 0x805   : > { %v13063_v32 = vpop.eup %13062  ;;  %v12217_v37 = vpack.c.bf16 %v4623_v19, %v4622_v28  ;;  %v4543_v17 = vmul.f32 %v13061_v46, %v18065_v13  ;;  %13068 = vrcp.f32 %v4327_v20  ;;  %v4434_v50 = vrot.slane %v4433_v58, 1  ;;  %v2020_v28 = vld [vmem:[%s18045_s4 + $0x98] sm:$0xff]  ;;  %v2019_v47 = vld [vmem:[%s18045_s4 + $0x90] sm:$0xff] }
 0x806   : > { %v4560_v41 = vmul.f32 %v13063_v32, %v15851_v25  ;;  %13070 = vrcp.f32 %v4429_v2  ;;  %v4332_v6 = vrot.slane %v4331_v24, 1  ;;  %v4338_v53 = vrot.slane %v4337_v23, 1  ;;  %v2027_v57 = vld [vmem:[%s18045_s4 + $0xd0] sm:$0xff]  ;;  %v2032_v62 = vld [vmem:[%s18045_s4 + $0xf8] sm:$0xff] }
 0x807   : > { %12218 = vmatprep.subr.bf16.mxu0 %v12217_v37  ;;  %v4607_v63 = vmul.f32 %v4543_v17, %v18067_v16  ;;  %v4435_v3 = vadd.f32 %v4434_v50, %v4433_v58  ;;  %v2031_v33 = vld [vmem:[%s18045_s4 + $0xf0] sm:$0xff]  ;;  %v12617_v10 = vld [vmem:[%s14673_s1 + $0x18] sm:$0xff]  }
 0x808   : > { %v13065_v26 = vpop.eup %13064  ;;  %v4624_v21 = vmul.f32 %v4560_v41, %v18066_v51  ;;  %v4333_v11 = vadd.f32 %v4332_v6, %v4331_v24  ;;  %v4339_v29 = vadd.f32 %v4338_v53, %v4337_v23  ;;  %11811 = vmatprep.subr.bf16.mxu1 %v12617_v10  ;;  %v12619_v19 = vld [vmem:[%s14673_s1 + $0x28] sm:$0xff]   ;;  %v12620_v20 = vld [vmem:[%s14673_s1 + $0x30] sm:$0xff]   ;;  %v12621_v58 = vld [vmem:[%s14673_s1 + $0x38] sm:$0xff]   ;;  %s18069_s1 = scalar_lea.vmem [#allocation11], %s14658_s16 }
 0x809   : > { %v13067_v18 = vpop.eup %13066  ;;  %v12219_v22 = vpack.c.bf16 %v4607_v63, %v4606_v30  ;;  %v4561_v13 = vmul.f32 %v13065_v26, %v15837_v43  ;;  %13072 = vrcp.f32 %v4435_v3  ;;  %11812 = vmatpush3.bf16.msra.mxu1 %v12617_v10  ;;  %v12622_v24 = vld [vmem:[%s14700_s17] ss:$16 sps:$4 sm:$0xff]   ;;  %v12624_v46 = vld [vmem:[%s14700_s17 + $0x4] ss:$16 sps:$4 sm:$0xff]   ;;  %v12627_v30 = vld [vmem:[%s14700_s17 + $0xc] ss:$16 sps:$4 sm:$0xff]  }
 0x80a   : > { %v4544_v38 = vmul.f32 %v13067_v18, %v15590_v39  ;;  %13074 = vrcp.f32 %v4333_v11  ;;  %11813 = vmatprep.subr.bf16.mxu1 %v12618_v12  ;;  %v12630_v2 = vld [vmem:[%s14700_s17 + $0x24] ss:$16 sps:$4 sm:$0xff]   ;;  %v12628_v23 = vld [vmem:[%s14700_s17 + $0x20] ss:$16 sps:$4 sm:$0xff]  }
 0x80b   : > { %12220 = vmatpush3.bf16.msra.mxu0 %v12219_v22  ;;  %v4625_v25 = vmul.f32 %v4561_v13, %v18066_v51  ;;  %13076 = vrcp.f32 %v4339_v29  ;;  %v12636_v32 = vld [vmem:[%s14700_s17 + $0x44] ss:$16 sps:$4 sm:$0xff]   ;;  %v12634_v37 = vld [vmem:[%s14700_s17 + $0x40] ss:$16 sps:$4 sm:$0xff]  }
 0x80c   : > { %v4608_v55 = vmul.f32 %v4544_v38, %v18067_v16  ;;  %v12642_v17 = vld [vmem:[%s14700_s17 + $0x64] ss:$16 sps:$4 sm:$0xff]   ;;  %v12640_v50 = vld [vmem:[%s14700_s17 + $0x60] ss:$16 sps:$4 sm:$0xff]  }
 0x80d   : > { %v12221_v7 = vpack.c.bf16 %v4625_v25, %v4624_v21  ;;  %11814 = vmatpush3.bf16.msra.mxu1 %v12618_v12  ;;  %v12648_v41 = vld [vmem:[%s14700_s17 + $0x84] ss:$16 sps:$4 sm:$0xff]   ;;  %v12646_v53 = vld [vmem:[%s14700_s17 + $0x80] ss:$16 sps:$4 sm:$0xff]   ;;  %v12633_v12 = vld [vmem:[%s14700_s17 + $0x2c] ss:$16 sps:$4 sm:$0xff]  }
 0x80e   : > { %11815 = vmatprep.subr.bf16.mxu1 %v12619_v19  ;;  %v12654_v3 = vld [vmem:[%s14700_s17 + $0xa4] ss:$16 sps:$4 sm:$0xff]   ;;  %v12652_v11 = vld [vmem:[%s14700_s17 + $0xa0] ss:$16 sps:$4 sm:$0xff]  }
 0x80f   : > { %v13069_v56 = vpop.eup %13068  ;;  %12222 = vmatprep.subr.bf16.mxu0 %v12221_v7 }
 0x810   : > { %v13071_v36 = vpop.eup %13070  ;;  %v4545_v49 = vmul.f32 %v13069_v56, %v15586_v48 }
 0x811   : > { %v4562_v27 = vmul.f32 %v13071_v36, %v15869_v15  ;;  %11816 = vmatpush3.bf16.msra.mxu1 %v12619_v19 }
 0x812   : > { %v4609_v43 = vmul.f32 %v4545_v49, %v18067_v16  ;;  %11817 = vmatprep.subr.bf16.mxu1 %v12620_v20 }
 0x813   : > { %v13073_v59 = vpop.eup %13072  ;;  %v4626_v39 = vmul.f32 %v4562_v27, %v18066_v51 }
 0x814   : > { %v13075_v44 = vpop.eup %13074  ;;  %v12223_v40 = vpack.c.bf16 %v4609_v43, %v4608_v55  ;;  %v4563_v34 = vmul.f32 %v13073_v59, %v15864_v8 }
 0x815   : > { %v13077_v0 = vpop.eup %13076  ;;  %v4546_v31 = vmul.f32 %v13075_v44, %v15614_v5  ;;  %v2008_v5 = vld [vmem:[%s18045_s4 + $0x38] sm:$0xff]  ;;  %11818 = vmatpush3.bf16.msra.mxu1 %v12620_v20 }
 0x816   : > { %12224 = vmatpush3.bf16.msra.mxu0 %v12223_v40  ;;  %v4627_v48 = vmul.f32 %v4563_v34, %v18066_v51  ;;  %v4547_v15 = vmul.f32 %v13077_v0, %v15595_v35  ;;  %v2007_v51 = vld [vmem:[%s18045_s4 + $0x30] sm:$0xff]  ;;  %v2012_v35 = vld [vmem:[%s18045_s4 + $0x58] sm:$0xff]  ;;  %11819 = vmatprep.subr.bf16.mxu1 %v12621_v58 }
 0x817   : > { %v4610_v45 = vmul.f32 %v4546_v31, %v18067_v16 }
 0x818   : > { %v12225_v61 = vpack.c.bf16 %v4627_v48, %v4626_v39  ;;  %v4611_v54 = vmul.f32 %v4547_v15, %v18067_v16  ;;  %v2016_v16 = vld [vmem:[%s18045_s4 + $0x78] sm:$0xff] }
 0x819   : > { %11820 = vmatpush3.bf16.msra.mxu1 %v12621_v58 }
 0x81a   : > { %12226 = vmatprep.subr.bf16.mxu0 %v12225_v61  ;;  %v12227_v8 = vpack.c.bf16 %v4611_v54, %v4610_v45  ;;  %5325 = vmatprep.subr.bf16.mxu1 %v12627_v30  ;;  %v12639_v30 = vld [vmem:[%s14700_s17 + $0x4c] ss:$16 sps:$4 sm:$0xff]  }
 0x81c   : > { %12228 = vmatpush3.bf16.msra.mxu0 %v12227_v8 }
 0x81d   : > { %5252 = vmatprep.subr.bf16.mxu0 %v12624_v46 }
 0x81f   : > { %4798 = vmatmul.mubr.f32.vlgmr.msra.gmra.mrb[80].mxu0 %v2003_v42 }
 0x820   : > { %4802 = vmatprep.mubr.f32.mxu0 %v2008_v5  ;;  %5253 = vmatpush1.bf16.msra.mxu0 %v12622_v24  ;;  %v12631_v24 = vld [vmem:[%s14700_s17 + $0x28] ss:$16 sps:$4 sm:$0xff]  }
 0x821   : > { %5254 = vmatprep.subr.bf16.mxu0 %v12630_v2 }
 0x823   : > { %4803 = vmatmul.mubr.f32.gmra.mrb[82].mxu0 %v2007_v51 }
 0x824   : > { %4807 = vmatprep.mubr.f32.mxu0 %v2012_v35  ;;  %5255 = vmatpush1.bf16.msra.mxu0 %v12628_v23 }
 0x825   : > { %5256 = vmatprep.subr.bf16.mxu0 %v12636_v32 }
 0x827   : > { %4808 = vmatmul.mubr.f32.gmra.mrb[84].mxu0 %v2011_v9 }
 0x828   : > { %4812 = vmatprep.mubr.f32.mxu0 %v2016_v16  ;;  %5257 = vmatpush1.bf16.msra.mxu0 %v12634_v37  ;;  %v12637_v37 = vld [vmem:[%s14700_s17 + $0x48] ss:$16 sps:$4 sm:$0xff]  }
 0x829   : > { %5258 = vmatprep.subr.bf16.mxu0 %v12642_v17 }
 0x82b   : > { %4813 = vmatmul.mubr.f32.gmra.mrb[86].mxu0 %v2015_v52 }
 0x82c   : > { %4817 = vmatprep.mubr.f32.mxu0 %v2020_v28  ;;  %5259 = vmatpush1.bf16.msra.mxu0 %v12640_v50 }
 0x82d   : > { %5260 = vmatprep.subr.bf16.mxu0 %v12648_v41  ;;  %v12645_v41 = vld [vmem:[%s14700_s17 + $0x6c] ss:$16 sps:$4 sm:$0xff]  }
 0x82f   : > { %4818 = vmatmul.mubr.f32.gmra.mrb[88].mxu0 %v2019_v47 }
 0x830   : > { %4822 = vmatprep.mubr.f32.mxu0 %v2024_v4  ;;  %5261 = vmatpush1.bf16.msra.mxu0 %v12646_v53 }
 0x831   : > { %5262 = vmatprep.subr.bf16.mxu0 %v12654_v3  ;;  %v12643_v3 = vld [vmem:[%s14700_s17 + $0x68] ss:$16 sps:$4 sm:$0xff]  }
 0x833   : > { %4823 = vmatmul.mubr.f32.gmra.mrb[90].mxu0 %v2023_v14 }
 0x834   : > { %4827 = vmatprep.mubr.f32.mxu0 %v2028_v1  ;;  %5263 = vmatpush1.bf16.msra.mxu0 %v12652_v11 }
 0x837   : > { %4828 = vmatmul.mubr.f32.gmra.mrb[92].mxu0 %v2027_v57 }
 0x838   : > { %4832 = vmatprep.mubr.f32.mxu0 %v2032_v62  ;;  %v12625_v62 = vld [vmem:[%s14700_s17 + $0x8] ss:$16 sps:$4 sm:$0xff]  }
 0x83b   : > { %4833 = vmatmul.mubr.f32.gmra.mrb[94].mxu0 %v2031_v33 }
 0x83c   : > { %5284 = vmatprep.mubr.bf16.mxu0 %v18068_v60 }
 0x8a5   : > { %v10961_v6 = vpop.f32.mrb[72].mxu1 }
 0x8a6   : > { %v10962_v63 = vpop.f32.mrb[73].mxu1 }
 0x8a7   : > { %v10963_v26 = vadd.f32 %v10962_v63, %v10961_v6 }
 0x8a9   : > { %v10964_v21 = vpop.f32.mrb[74].mxu1 }
 0x8aa   : > { %v10965_v29 = vpop.f32.mrb[75].mxu1 }
 0x8ab   : > { %v10966_v18 = vadd.f32 %v10965_v29, %v10964_v21  ;;  %v12651_v21 = vld [vmem:[%s14700_s17 + $0x8c] ss:$16 sps:$4 sm:$0xff]   ;;  %v12649_v29 = vld [vmem:[%s14700_s17 + $0x88] ss:$16 sps:$4 sm:$0xff]  }
 0x8ad   : > { %v10967_v22 = vpop.f32.mrb[76].mxu1 }
 0x8ae   : > { %v10968_v13 = vpop.f32.mrb[77].mxu1 }
 0x8af   : > { %v10969_v38 = vadd.f32 %v10968_v13, %v10967_v22  ;;  %v12657_v22 = vld [vmem:[%s14700_s17 + $0xac] ss:$16 sps:$4 sm:$0xff]   ;;  %v12655_v13 = vld [vmem:[%s14700_s17 + $0xa8] ss:$16 sps:$4 sm:$0xff]  }
 0x8b1   : > { %v10970_v25 = vpop.f32.mrb[78].mxu1 }
 0x8b2   : > { %v10971_v55 = vpop.f32.mrb[79].mxu1 }
 0x8b3   : > { %v10972_v7 = vadd.f32 %v10971_v55, %v10970_v25  ;;  %v12660_v25 = vld [vmem:[%s14700_s17 + $0xc4] ss:$16 sps:$4 sm:$0xff]   ;;  %v12661_v55 = vld [vmem:[%s14700_s17 + $0xc8] ss:$16 sps:$4 sm:$0xff]  }
 0x8b4   : > { %5264 = vmatprep.subr.bf16.mxu0 %v12660_v25  ;;  %v13341_v25 = vld [vmem:[#allocation2 + $0x30] sm:$0xff] }
 0x8b5   : > { %v10973_v56 = vpop.f32.mrb[80].mxu1 }
 0x8b6   : > { %v10974_v36 = vpop.f32.mrb[81].mxu1 }
 0x8b7   : > { %v10975_v49 = vadd.f32 %v10974_v36, %v10973_v56  ;;  %v12664_v56 = vld [vmem:[%s14700_s17 + $0xe0] ss:$16 sps:$4 sm:$0xff]   ;;  %v12666_v36 = vld [vmem:[%s14700_s17 + $0xe4] ss:$16 sps:$4 sm:$0xff]  }
 0x8b9   : > { %v10976_v27 = vpop.f32.mrb[82].mxu1 }
 0x8ba   : > { %v10977_v43 = vpop.f32.mrb[83].mxu1 }
 0x8bb   : > { %v10978_v59 = vadd.f32 %v10977_v43, %v10976_v27  ;;  %v12669_v27 = vld [vmem:[%s14700_s17 + $0xec] ss:$16 sps:$4 sm:$0xff]   ;;  %v12670_v43 = vld [vmem:[%s14703_s0 + $0x40] sm:$0xff]  }
 0x8bd   : > { %v10979_v39 = vpop.f32.mrb[84].mxu1 }
 0x8be   : > { %v10980_v44 = vpop.f32.mrb[85].mxu1 }
 0x8bf   : > { %v10981_v40 = vadd.f32 %v10980_v44, %v10979_v39  ;;  %v16051_v39 = vld [vmem:[%s18069_s1] ss:$0 sm:$0xff] }
 0x8c1   : > { %v10982_v34 = vpop.f32.mrb[86].mxu1 }
 0x8c2   : > { %v10983_v0 = vpop.f32.mrb[87].mxu1 }
 0x8c3   : > { %v10984_v31 = vadd.f32 %v10983_v0, %v10982_v34 }
 0x8f2   : > { %v11017_v48 = vpop.f32.mrb[80].mxu0 }
 0x8f3   : > { %v11018_v15 = vpop.f32.mrb[81].mxu0 }
 0x8f4   : > { %v11019_v45 = vadd.f32 %v11018_v15, %v11017_v48  ;;  %v13334_v15 = vld [vmem:[#allocation2] sm:$0xff] }
 0x8f6   : > { %v4800_v61 = vadd.f32 %v11019_v45, %v10963_v26  ;;  %v11020_v54 = vpop.f32.mrb[82].mxu0 }
 0x8f7   : > { %v11021_v8 = vpop.f32.mrb[83].mxu0 }
 0x8f8   : > { %v11022_v42 = vadd.f32 %v11021_v8, %v11020_v54 }
 0x8fa   : > { %v4805_v5 = vadd.f32 %v11022_v42, %v10966_v18  ;;  %v11023_v51 = vpop.f32.mrb[84].mxu0 }
 0x8fb   : > { %v11024_v35 = vpop.f32.mrb[85].mxu0 }
 0x8fc   : > { %v11025_v9 = vadd.f32 %v11024_v35, %v11023_v51  ;;  %v4838_v16 = vpack.c.bf16 %v4805_v5, %v4800_v61  ;;  %v13335_v61 = vld [vmem:[#allocation2 + $0x8] sm:$0xff]  ;;  %v12672_v5 = vld [vmem:[%s14703_s0] sm:$0xff]  }
 0x8fd   : > { %v12673_v51 = vld [vmem:[%s14703_s0 + $0x80] sm:$0xff]   ;;  %v12674_v35 = vld [vmem:[%s14703_s0 + $0x48] sm:$0xff]  }
 0x8fe   : > { %v4810_v52 = vadd.f32 %v11025_v9, %v10969_v38  ;;  %v11026_v28 = vpop.f32.mrb[86].mxu0  ;;  %11821 = vmatprep.mubr.bf16.mxu1 %v4838_v16  ;;  %v12658_v38 = vld [vmem:[%s14700_s17 + $0xc0] ss:$16 sps:$4 sm:$0xff]   ;;  %v12675_v9 = vld [vmem:[%s14703_s0 + $0xc8] sm:$0xff]  }
 0x8ff   : > { %v11027_v47 = vpop.f32.mrb[87].mxu0  ;;  %5265 = vmatpush1.bf16.msra.mxu0 %v12658_v38 }
 0x900   : > { %v11028_v4 = vadd.f32 %v11027_v47, %v11026_v28  ;;  %5266 = vmatprep.subr.bf16.mxu0 %v12666_v36  ;;  %v12676_v47 = vld [vmem:[%s14703_s0 + $0x8] sm:$0xff]  }
 0x901   : > { %v12693_v36 = vld [vmem:[%s14703_s0 + $0xa8] sm:$0xff]  }
 0x902   : > { %v4815_v14 = vadd.f32 %v11028_v4, %v10972_v7  ;;  %v11029_v1 = vpop.f32.mrb[88].mxu0  ;;  %v12663_v7 = vld [vmem:[%s14700_s17 + $0xcc] ss:$16 sps:$4 sm:$0xff]  }
 0x903   : > { %v11030_v57 = vpop.f32.mrb[89].mxu0  ;;  %5267 = vmatpush1.bf16.msra.mxu0 %v12664_v56  ;;  %v12677_v4 = vld [vmem:[%s14703_s0 + $0x88] sm:$0xff]  }
 0x904   : > { %v4839_v33 = vpack.c.bf16 %v4815_v14, %v4810_v52  ;;  %v11031_v10 = vadd.f32 %v11030_v57, %v11029_v1  ;;  %11053 = vmatprep.subr.bf16.mxu0 %v12670_v43  ;;  %v13336_v52 = vld [vmem:[#allocation2 + $0x18] sm:$0xff]  ;;  %v12678_v14 = vld [vmem:[%s14703_s0 + $0x50] sm:$0xff]   ;;  %v12692_v56 = vld [vmem:[%s14703_s0 + $0x28] sm:$0xff]  }
 0x905   : > { %v12679_v1 = vld [vmem:[%s14703_s0 + $0xd0] sm:$0xff]  }
 0x906   : > { %v4820_v19 = vadd.f32 %v11031_v10, %v10975_v49  ;;  %v11032_v20 = vpop.f32.mrb[90].mxu0  ;;  %11822 = vmatmul.mubr.bf16.vlgmr.msra.gmra.mrb[88].mxu1 %v4839_v33  ;;  %v12667_v49 = vld [vmem:[%s14700_s17 + $0xe8] ss:$16 sps:$4 sm:$0xff]   ;;  %v13337_v57 = vld [vmem:[#allocation2 + $0x10] sm:$0xff] }
 0x907   : > { %v11033_v58 = vpop.f32.mrb[91].mxu0  ;;  %5326 = vmatpush1.bf16.msra.mxu1 %v12625_v62  ;;  %v12696_v43 = vld [vmem:[%s14703_s0 + $0x30] sm:$0xff]  }
 0x908   : > { %v11034_v46 = vadd.f32 %v11033_v58, %v11032_v20  ;;  %5327 = vmatprep.subr.bf16.mxu1 %v12633_v12  ;;  %v12680_v12 = vld [vmem:[%s14703_s0 + $0x10] sm:$0xff]   ;;  %v12682_v58 = vld [vmem:[%s14703_s0 + $0x58] sm:$0xff]  }
 0x90a   : > { %v4825_v2 = vadd.f32 %v11034_v46, %v10978_v59  ;;  %v11035_v23 = vpop.f32.mrb[92].mxu0  ;;  %v12671_v59 = vld [vmem:[%s14703_s0 + $0xc0] sm:$0xff]  }
 0x90b   : > { %v11036_v32 = vpop.f32.mrb[93].mxu0  ;;  %5328 = vmatpush1.bf16.msra.mxu1 %v12631_v24  ;;  %v12683_v24 = vld [vmem:[%s14703_s0 + $0xd8] sm:$0xff]  }
 0x90c   : > { %v11037_v17 = vadd.f32 %v11036_v32, %v11035_v23  ;;  %v4840_v50 = vpack.c.bf16 %v4825_v2, %v4820_v19  ;;  %5329 = vmatprep.subr.bf16.mxu1 %v12639_v30  ;;  %v12681_v19 = vld [vmem:[%s14703_s0 + $0x90] sm:$0xff]   ;;  %v12684_v32 = vld [vmem:[%s14703_s0 + $0x18] sm:$0xff]  }
 0x90e   : > { %v4830_v6 = vadd.f32 %v11037_v17, %v10981_v40  ;;  %v11038_v53 = vpop.f32.mrb[94].mxu0  ;;  %11825 = vmatprep.mubr.bf16.mxu1 %v4840_v50  ;;  %v12686_v17 = vld [vmem:[%s14703_s0 + $0x60] sm:$0xff]  }
 0x90f   : > { %v11039_v63 = vpop.f32.mrb[95].mxu0  ;;  %5330 = vmatpush1.bf16.msra.mxu1 %v12637_v37  ;;  %v12685_v37 = vld [vmem:[%s14703_s0 + $0x98] sm:$0xff]   ;;  %v12687_v50 = vld [vmem:[%s14703_s0 + $0xe0] sm:$0xff]  }
 0x910   : > { %v11040_v26 = vadd.f32 %v11039_v63, %v11038_v53  ;;  %5331 = vmatprep.subr.bf16.mxu1 %v12645_v41  ;;  %v13338_v41 = vld [vmem:[#allocation2 + $0x20] sm:$0xff]  ;;  %v13339_v53 = vld [vmem:[#allocation2 + $0x28] sm:$0xff] }
 0x912   : > { %v4835_v11 = vadd.f32 %v11040_v26, %v10984_v31 }
 0x913   : > { %5332 = vmatpush1.bf16.msra.mxu1 %v12643_v3 }
 0x914   : > { %v4841_v18 = vpack.c.bf16 %v4835_v11, %v4830_v6  ;;  %5333 = vmatprep.subr.bf16.mxu1 %v12651_v21  ;;  %v12688_v21 = vld [vmem:[%s14703_s0 + $0x20] sm:$0xff]  }
 0x915   : > { %v12689_v11 = vld [vmem:[%s14703_s0 + $0xa0] sm:$0xff]  }
 0x916   : > { %11826 = vmatmul.mubr.bf16.gmra.mrb[92].mxu1 %v4841_v18  ;;  %v12691_v18 = vld [vmem:[%s14703_s0 + $0xe8] sm:$0xff]  }
 0x917   : > { %5334 = vmatpush1.bf16.msra.mxu1 %v12649_v29  ;;  %5357 = vmatprep.mubr.bf16.mxu1 %v18068_v60  ;;  %v12690_v29 = vld [vmem:[%s14703_s0 + $0x68] sm:$0xff]  }
 0x918   : > { %5335 = vmatprep.subr.bf16.mxu1 %v12657_v22 }
 0x91b   : > { %5336 = vmatpush1.bf16.msra.mxu1 %v12655_v13  ;;  %v13340_v13 = vld [vmem:[#allocation2 + $0x38] sm:$0xff] }
 0x91c   : > { %5337 = vmatprep.subr.bf16.mxu1 %v12663_v7 }
 0x91f   : > { %5338 = vmatpush1.bf16.msra.mxu1 %v12661_v55 }
 0x920   : > { %5339 = vmatprep.subr.bf16.mxu1 %v12669_v27  ;;  %v12695_v27 = vld [vmem:[%s14703_s0 + $0xf0] sm:$0xff]  }
 0x923   : > { %5340 = vmatpush1.bf16.msra.mxu1 %v12667_v49  ;;  %v12694_v49 = vld [vmem:[%s14703_s0 + $0x70] sm:$0xff]  }
 0x924   : > { %11093 = vmatprep.subr.bf16.mxu1 %v12671_v59  ;;  %v12697_v59 = vld [vmem:[%s14703_s0 + $0xb0] sm:$0xff]  }
 0x9d9   : > { %v11823_v44 = vpop.f32.mrb[88].mxu1 }
 0x9da   : > { %v4930_v40 = vpop.f32.mrb[89].mxu1  ;;  %v4939_v16 = vadd.f32 %v11823_v44, %v16051_v39  ;;  %v12699_v44 = vld [vmem:[%s14703_s0 + $0xf8] sm:$0xff]  }
 0x9db   : > { %v4931_v34 = vadd.f32 %v16051_v39, %v4930_v40  ;;  %v11824_v0 = vpop.f32.mrb[90].mxu1  ;;  %v12700_v40 = vld [vmem:[%s14703_s0 + $0x38] sm:$0xff]  }
 0x9dc   : > { %v4933_v31 = vpop.f32.mrb[91].mxu1  ;;  %v4942_v8 = vadd.f32 %v11824_v0, %v16051_v39  ;;  %v16075_v62 = vadd.f32 %v13337_v57, %v4939_v16  ;;  %v12704_v0 = vld [vmem:[%s14679_s7 + $0x4] ss:$12 sps:$4 sm:$0xff]  }
 0x9dd   : > { %v4934_v48 = vadd.f32 %v16051_v39, %v4933_v31  ;;  %v16055_v45 = vadd.f32 %v13334_v15, %v4931_v34  ;;  %v12701_v34 = vld [vmem:[%s14703_s0 + $0xb8] sm:$0xff]   ;;  %v18070_v15 = vld [vmem:[#allocation56_spill] sm:$0xff] }
 0x9de   : > { %v16069_v28 = vadd.f32 %v13336_v52, %v4942_v8  ;;  %v12711_v31 = vld [vmem:[%s14679_s7 + $0x8] ss:$12 sps:$4 sm:$0xff]  }
 0x9df   : > { %v16057_v54 = vadd.f32 %v13335_v61, %v4934_v48  ;;  %v5001_v48 = vld [vmem:[%s14676_s28] sm:$0xf]  ;;  %v16125_v61 = vsub.s32 3, %v18070_v15  ;;  %v18072_v8 = vld [vmem:[#allocation58_spill] sm:$0xff]  ;;  %s18097_s28 = sld [smem:[#allocation30_spill]] }
 0x9e0   : > { %v5068_v10 = vpack.c.bf16 %v16069_v28, %v16075_v62 }
 0x9e1   : > { %v5067_v42 = vpack.c.bf16 %v16057_v54, %v16055_v45  ;;  %18071 = vst [vmem:[#allocation81_spill] sm:$0xff] %v16125_v61  ;;  %v16137_v16 = vrot.slane %v5001_v48, %v16125_v61 }
 0x9e3   : > { %5285 = vmatmul.mubr.bf16.vlgmr.msra.gmra.mrb[96].mxu0 %v5067_v42  ;;  %5358 = vmatmul.mubr.bf16.vlgmr.msra.gmra.mrb[96].mxu1 %v5067_v42  ;;  %v16128_v42 = vrot.slane %v5001_v48, %v18072_v8 }
 0x9e4   : > { %5294 = vmatprep.mubr.bf16.mxu0 %v18068_v60  ;;  %5367 = vmatprep.mubr.bf16.mxu1 %v18068_v60 }
 0x9e5   : > { %11054 = vmatpush3.bf16.msra.mxu0 %v12672_v5  ;;  %11094 = vmatpush3.bf16.msra.mxu1 %v12673_v51  ;;  %v18073_v5 = vld [vmem:[#allocation66_spill] sm:$0xff]  ;;  %s18098_s17 = smov %s18097_s28 }
 0x9e6   : > { %11055 = vmatprep.subr.bf16.mxu0 %v12674_v35  ;;  %11095 = vmatprep.subr.bf16.mxu1 %v12675_v9  ;;  %v16131_v51 = vrot.slane %v5001_v48, %v18073_v5  ;;  %v18074_v35 = vld [vmem:[#allocation57_spill] sm:$0xff] }
 0x9e7   : > { %v16134_v9 = vrot.slane %v5001_v48, %v18074_v35 }
 0x9e9   : > { %v11827_v33 = vpop.f32.mrb[92].mxu1  ;;  %11056 = vmatpush3.bf16.msra.mxu0 %v12676_v47  ;;  %11096 = vmatpush3.bf16.msra.mxu1 %v12677_v4 }
 0x9ea   : > { %v4946_v20 = vpop.f32.mrb[93].mxu1  ;;  %11057 = vmatprep.subr.bf16.mxu0 %v12678_v14  ;;  %11097 = vmatprep.subr.bf16.mxu1 %v12679_v1  ;;  %v4955_v22 = vadd.f32 %v11827_v33, %v16051_v39 }
 0x9eb   : > { %v4947_v46 = vadd.f32 %v16051_v39, %v4946_v20  ;;  %v11828_v30 = vpop.f32.mrb[94].mxu1  ;;  %5295 = vmatmul.mubr.bf16.gmra.mrb[100].mxu0 %v5068_v10  ;;  %5368 = vmatmul.mubr.bf16.gmra.mrb[100].mxu1 %v5068_v10 }
 0x9ec   : > { %v4949_v2 = vpop.f32.mrb[95].mxu1  ;;  %5304 = vmatprep.mubr.bf16.mxu0 %v18068_v60  ;;  %5377 = vmatprep.mubr.bf16.mxu1 %v18068_v60  ;;  %v4958_v3 = vadd.f32 %v11828_v30, %v16051_v39  ;;  %v16107_v55 = vadd.f32 %v13341_v25, %v4955_v22 }
 0x9ed   : > { %v4950_v23 = vadd.f32 %v16051_v39, %v4949_v2  ;;  %11058 = vmatpush3.bf16.msra.mxu0 %v12680_v12  ;;  %11098 = vmatpush3.bf16.msra.mxu1 %v12681_v19  ;;  %v16091_v6 = vadd.f32 %v13338_v41, %v4947_v46  ;;  %v12698_v39 = vld [vmem:[%s14703_s0 + $0x78] sm:$0xff]   ;;  %s18076_s0 = scalar_lea.vmem [#allocation13], %s14658_s16 }
 0x9ee   : > { %11059 = vmatprep.subr.bf16.mxu0 %v12682_v58  ;;  %11099 = vmatprep.subr.bf16.mxu1 %v12683_v24  ;;  %v16105_v38 = vadd.f32 %v13340_v13, %v4958_v3  ;;  %v12702_v13 = vld [vmem:[%s14679_s7] ss:$12 sps:$4 sm:$0xff]  }
 0x9ef   : > { %v16093_v63 = vadd.f32 %v13339_v53, %v4950_v23 }
 0x9f0   : > { %v5070_v7 = vpack.c.bf16 %v16105_v38, %v16107_v55 }
 0x9f1   : > { %v5069_v26 = vpack.c.bf16 %v16093_v63, %v16091_v6  ;;  %11060 = vmatpush3.bf16.msra.mxu0 %v12684_v32  ;;  %11100 = vmatpush3.bf16.msra.mxu1 %v12685_v37 }
 0x9f2   : > { %11061 = vmatprep.subr.bf16.mxu0 %v12686_v17  ;;  %11101 = vmatprep.subr.bf16.mxu1 %v12687_v50 }
 0x9f3   : > { %5305 = vmatmul.mubr.bf16.gmra.mrb[104].mxu0 %v5069_v26  ;;  %5378 = vmatmul.mubr.bf16.gmra.mrb[104].mxu1 %v5069_v26 }
 0x9f4   : > { %5314 = vmatprep.mubr.bf16.mxu0 %v18068_v60  ;;  %5387 = vmatprep.mubr.bf16.mxu1 %v18068_v60 }
 0x9f5   : > { %11062 = vmatpush3.bf16.msra.mxu0 %v12688_v21  ;;  %11102 = vmatpush3.bf16.msra.mxu1 %v12689_v11 }
 0x9f6   : > { %11063 = vmatprep.subr.bf16.mxu0 %v12690_v29  ;;  %11103 = vmatprep.subr.bf16.mxu1 %v12691_v18 }
 0x9f9   : > { %11064 = vmatpush3.bf16.msra.mxu0 %v12692_v56  ;;  %11104 = vmatpush3.bf16.msra.mxu1 %v12693_v36 }
 0x9fa   : > { %11065 = vmatprep.subr.bf16.mxu0 %v12694_v49  ;;  %11105 = vmatprep.subr.bf16.mxu1 %v12695_v27  ;;  %v12707_v49 = vld [vmem:[%s14679_s7 + $0x1c] ss:$12 sps:$4 sm:$0xff]   ;;  %v12715_v27 = vld [vmem:[%s14679_s7 + $0x20] ss:$12 sps:$4 sm:$0xff]  }
 0x9fb   : > { %5315 = vmatmul.mubr.bf16.gmra.mrb[108].mxu0 %v5070_v7  ;;  %5388 = vmatmul.mubr.bf16.gmra.mrb[108].mxu1 %v5070_v7 }
 0x9fd   : > { %11066 = vmatpush3.bf16.msra.mxu0 %v12696_v43  ;;  %11106 = vmatpush3.bf16.msra.mxu1 %v12697_v59 }
 0x9fe   : > { %11067 = vmatprep.subr.bf16.mxu0 %v12698_v39  ;;  %11107 = vmatprep.subr.bf16.mxu1 %v12699_v44 }
 0xa01   : > { %11068 = vmatpush3.bf16.msra.mxu0 %v12700_v40  ;;  %11108 = vmatpush3.bf16.msra.mxu1 %v12701_v34 }
 0xa02   : > { %5980 = vmatprep.subr.bf16.mxu0 %v12704_v0  ;;  %11829 = vmatprep.subr.bf16.mxu1 %v12711_v31 }
 0xab6   : > { %v5286_v52 = vpop.f32.mrb[96].mxu0  ;;  %v5359_v47 = vpop.f32.mrb[96].mxu1 }
 0xab7   : > { %v5287_v4 = vadd.f32 %v5286_v52, %v16128_v42  ;;  %v5360_v14 = vadd.f32 %v5359_v47, %v16131_v51  ;;  %v5288_v1 = vpop.f32.mrb[97].mxu0  ;;  %v5361_v57 = vpop.f32.mrb[97].mxu1  ;;  %v12705_v47 = vld [vmem:[%s14679_s7 + $0x18] ss:$12 sps:$4 sm:$0xff]  }
 0xab8   : > { %v5289_v33 = vadd.f32 %v5288_v1, %v16134_v9  ;;  %v5362_v10 = vadd.f32 %v5361_v57, %v16137_v16  ;;  %v5290_v12 = vpop.f32.mrb[98].mxu0  ;;  %v5363_v19 = vpop.f32.mrb[98].mxu1 }
 0xab9   : > { %v5291_v20 = vadd.f32 %v5290_v12, %v16128_v42  ;;  %v5364_v58 = vadd.f32 %v5363_v19, %v16131_v51  ;;  %v5292_v24 = vpop.f32.mrb[99].mxu0  ;;  %v5365_v46 = vpop.f32.mrb[99].mxu1  ;;  %v5398_v23 = vmax.f32 %v5287_v4, 0.0  ;;  %v5400_v32 = vmax.f32 %v5360_v14, 0.0  ;;  %v12710_v4 = vld [vmem:[%s14679_s7 + $0x34] ss:$12 sps:$4 sm:$0xff]  }
 0xaba   : > { %v5293_v30 = vadd.f32 %v5292_v24, %v16134_v9  ;;  %v5366_v2 = vadd.f32 %v5365_v46, %v16137_v16  ;;  %v5399_v50 = vmax.f32 %v5289_v33, 0.0  ;;  %v5401_v41 = vmax.f32 %v5362_v10, 0.0  ;;  %v12719_v10 = vld [vmem:[%s14679_s7 + $0x38] ss:$12 sps:$4 sm:$0xff]  }
 0xabb   : > { %v5402_v37 = vmax.f32 %v5291_v20, 0.0  ;;  %v5404_v17 = vmax.f32 %v5364_v58, 0.0 }
 0xabc   : > { %v5403_v53 = vmax.f32 %v5293_v30, 0.0  ;;  %v5405_v3 = vmax.f32 %v5366_v2, 0.0 }
 0xabd   : > { %v5430_v26 = vpack.c.bf16 %v5402_v37, %v5398_v23  ;;  %v5432_v21 = vpack.c.bf16 %v5404_v17, %v5400_v32 }
 0xabe   : > { %v5431_v11 = vpack.c.bf16 %v5403_v53, %v5399_v50  ;;  %v5433_v29 = vpack.c.bf16 %v5405_v3, %v5401_v41  ;;  %v5296_v18 = vpop.f32.mrb[100].mxu0  ;;  %v5369_v22 = vpop.f32.mrb[100].mxu1  ;;  %v12714_v53 = vld [vmem:[%s14679_s7 + $0x4c] ss:$12 sps:$4 sm:$0xff]  }
 0xabf   : > { %v5297_v25 = vadd.f32 %v5296_v18, %v16128_v42  ;;  %v5370_v7 = vadd.f32 %v5369_v22, %v16131_v51  ;;  %v5298_v56 = vpop.f32.mrb[101].mxu0  ;;  %v5371_v36 = vpop.f32.mrb[101].mxu1 }
 0xac0   : > { %v5299_v43 = vadd.f32 %v5298_v56, %v16134_v9  ;;  %v5372_v59 = vadd.f32 %v5371_v36, %v16137_v16  ;;  %v5300_v39 = vpop.f32.mrb[102].mxu0  ;;  %v5373_v44 = vpop.f32.mrb[102].mxu1  ;;  %5676 = vmatprep.mubr.bf16.mxu0 %v5431_v11  ;;  %5741 = vmatprep.mubr.bf16.mxu1 %v5433_v29  ;;  %v12712_v56 = vld [vmem:[%s14679_s7 + $0x48] ss:$12 sps:$4 sm:$0xff]  }
 0xac1   : > { %v5301_v40 = vadd.f32 %v5300_v39, %v16128_v42  ;;  %v5374_v34 = vadd.f32 %v5373_v44, %v16131_v51  ;;  %v5302_v0 = vpop.f32.mrb[103].mxu0  ;;  %v5375_v48 = vpop.f32.mrb[103].mxu1  ;;  %5677 = vmatmul.mubr.bf16.vlgmr.msra.gmra.mrb[112].mxu0 %v5430_v26  ;;  %5742 = vmatmul.mubr.bf16.vlgmr.msra.gmra.mrb[112].mxu1 %v5432_v21  ;;  %v5406_v14 = vmax.f32 %v5297_v25, 0.0  ;;  %v5408_v1 = vmax.f32 %v5370_v7, 0.0 }
 0xac2   : > { %v5303_v15 = vadd.f32 %v5302_v0, %v16134_v9  ;;  %v5376_v52 = vadd.f32 %v5375_v48, %v16137_v16  ;;  %5981 = vmatpush1.bf16.msra.mxu0 %v12702_v13  ;;  %11830 = vmatpush3.bf16.msra.mxu1 %v12711_v31  ;;  %v5407_v12 = vmax.f32 %v5299_v43, 0.0  ;;  %v5409_v19 = vmax.f32 %v5372_v59, 0.0  ;;  %v12708_v31 = vld [vmem:[%s14679_s7 + $0x30] ss:$12 sps:$4 sm:$0xff]  }
 0xac3   : > { %v5410_v57 = vmax.f32 %v5301_v40, 0.0  ;;  %v5412_v33 = vmax.f32 %v5374_v34, 0.0  ;;  %5982 = vmatprep.subr.bf16.mxu0 %v12707_v49  ;;  %11831 = vmatprep.subr.bf16.mxu1 %v12715_v27  ;;  %v12718_v59 = vld [vmem:[%s14679_s7 + $0x64] ss:$12 sps:$4 sm:$0xff]  }
 0xac4   : > { %v5411_v20 = vmax.f32 %v5303_v15, 0.0  ;;  %v5413_v58 = vmax.f32 %v5376_v52, 0.0 }
 0xac5   : > { %v5434_v24 = vpack.c.bf16 %v5410_v57, %v5406_v14  ;;  %v5436_v46 = vpack.c.bf16 %v5412_v33, %v5408_v1  ;;  %v12716_v14 = vld [vmem:[%s14679_s7 + $0x60] ss:$12 sps:$4 sm:$0xff]  }
 0xac6   : > { %v5435_v30 = vpack.c.bf16 %v5411_v20, %v5407_v12  ;;  %v5437_v2 = vpack.c.bf16 %v5413_v58, %v5409_v19  ;;  %v5306_v23 = vpop.f32.mrb[104].mxu0  ;;  %v5379_v32 = vpop.f32.mrb[104].mxu1  ;;  %5983 = vmatpush1.bf16.msra.mxu0 %v12705_v47  ;;  %11832 = vmatpush3.bf16.msra.mxu1 %v12715_v27 }
 0xac7   : > { %v5307_v37 = vadd.f32 %v5306_v23, %v16128_v42  ;;  %v5380_v17 = vadd.f32 %v5379_v32, %v16131_v51  ;;  %v5308_v50 = vpop.f32.mrb[105].mxu0  ;;  %v5381_v41 = vpop.f32.mrb[105].mxu1  ;;  %5984 = vmatprep.subr.bf16.mxu0 %v12710_v4  ;;  %11833 = vmatprep.subr.bf16.mxu1 %v12719_v10 }
 0xac8   : > { %v5309_v3 = vadd.f32 %v5308_v50, %v16134_v9  ;;  %v5382_v26 = vadd.f32 %v5381_v41, %v16137_v16  ;;  %v5310_v21 = vpop.f32.mrb[106].mxu0  ;;  %v5383_v11 = vpop.f32.mrb[106].mxu1  ;;  %5684 = vmatprep.mubr.bf16.mxu0 %v5435_v30  ;;  %5749 = vmatprep.mubr.bf16.mxu1 %v5437_v2 }
 0xac9   : > { %v5311_v29 = vadd.f32 %v5310_v21, %v16128_v42  ;;  %v5384_v18 = vadd.f32 %v5383_v11, %v16131_v51  ;;  %v5312_v22 = vpop.f32.mrb[107].mxu0  ;;  %v5385_v13 = vpop.f32.mrb[107].mxu1  ;;  %5685 = vmatmul.mubr.bf16.gmra.mrb[116].mxu0 %v5434_v24  ;;  %5750 = vmatmul.mubr.bf16.gmra.mrb[116].mxu1 %v5436_v46  ;;  %v5414_v36 = vmax.f32 %v5307_v37, 0.0  ;;  %v5416_v49 = vmax.f32 %v5380_v17, 0.0  ;;  %v12722_v11 = vld [vmem:[%s14679_s7 + $0x7c] ss:$12 sps:$4 sm:$0xff]  }
 0xaca   : > { %v5313_v25 = vadd.f32 %v5312_v22, %v16134_v9  ;;  %v5386_v7 = vadd.f32 %v5385_v13, %v16137_v16  ;;  %5985 = vmatpush1.bf16.msra.mxu0 %v12708_v31  ;;  %11834 = vmatpush3.bf16.msra.mxu1 %v12719_v10  ;;  %v5415_v39 = vmax.f32 %v5309_v3, 0.0  ;;  %v5417_v44 = vmax.f32 %v5382_v26, 0.0  ;;  %v12726_v22 = vld [vmem:[%s14679_s7 + $0x94] ss:$12 sps:$4 sm:$0xff]  }
 0xacb   : > { %v5418_v27 = vmax.f32 %v5311_v29, 0.0  ;;  %v5420_v43 = vmax.f32 %v5384_v18, 0.0  ;;  %5986 = vmatprep.subr.bf16.mxu0 %v12714_v53  ;;  %v12723_v29 = vld [vmem:[%s14679_s7 + $0x50] ss:$12 sps:$4 sm:$0xff]   ;;  %v12727_v13 = vld [vmem:[%s14679_s7 + $0x68] ss:$12 sps:$4 sm:$0xff]  }
 0xacc   : > { %v5419_v40 = vmax.f32 %v5313_v25, 0.0  ;;  %v5421_v34 = vmax.f32 %v5386_v7, 0.0  ;;  %11835 = vmatprep.subr.bf16.mxu1 %v12723_v29  ;;  %v12724_v18 = vld [vmem:[%s14679_s7 + $0x90] ss:$12 sps:$4 sm:$0xff]   ;;  %v12728_v25 = vld [vmem:[%s14679_s7 + $0xa8] ss:$12 sps:$4 sm:$0xff]  }
 0xacd   : > { %v5438_v0 = vpack.c.bf16 %v5418_v27, %v5414_v36  ;;  %v5440_v48 = vpack.c.bf16 %v5420_v43, %v5416_v49  ;;  %v12730_v7 = vld [vmem:[%s14679_s7 + $0xac] ss:$12 sps:$4 sm:$0xff]   ;;  %v12733_v49 = vld [vmem:[%s14679_s7 + $0xb0] ss:$12 sps:$4 sm:$0xff]  }
 0xace   : > { %v5439_v15 = vpack.c.bf16 %v5419_v40, %v5415_v39  ;;  %v5441_v52 = vpack.c.bf16 %v5421_v34, %v5417_v44  ;;  %v5316_v47 = vpop.f32.mrb[108].mxu0  ;;  %v5389_v4 = vpop.f32.mrb[108].mxu1  ;;  %5987 = vmatpush1.bf16.msra.mxu0 %v12712_v56  ;;  %11836 = vmatpush3.bf16.msra.mxu1 %v12723_v29  ;;  %v12731_v56 = vld [vmem:[%s14679_s7 + $0x80] ss:$12 sps:$4 sm:$0xff]   ;;  %v12732_v36 = vld [vmem:[%s14679_s7 + $0x98] ss:$12 sps:$4 sm:$0xff]  }
 0xacf   : > { %v5317_v1 = vadd.f32 %v5316_v47, %v16128_v42  ;;  %v5390_v57 = vadd.f32 %v5389_v4, %v16131_v51  ;;  %v5318_v33 = vpop.f32.mrb[109].mxu0  ;;  %v5391_v10 = vpop.f32.mrb[109].mxu1  ;;  %5988 = vmatprep.subr.bf16.mxu0 %v12718_v59  ;;  %11837 = vmatprep.subr.bf16.mxu1 %v12727_v13  ;;  %v18075_v27 = vld [vmem:[#allocation59_spill] sm:$0xff] }
 0xad0   : > { %v5319_v12 = vadd.f32 %v5318_v33, %v16134_v9  ;;  %v5392_v19 = vadd.f32 %v5391_v10, %v16137_v16  ;;  %v5320_v20 = vpop.f32.mrb[110].mxu0  ;;  %v5393_v58 = vpop.f32.mrb[110].mxu1  ;;  %5692 = vmatprep.mubr.bf16.mxu0 %v5439_v15  ;;  %5757 = vmatprep.mubr.bf16.mxu1 %v5441_v52  ;;  %v16197_v39 = vld [vmem:[%s18076_s0] ss:$0 sm:$0xff] }
 0xad1   : > { %v5321_v24 = vadd.f32 %v5320_v20, %v16128_v42  ;;  %v5394_v46 = vadd.f32 %v5393_v58, %v16131_v51  ;;  %v5322_v30 = vpop.f32.mrb[111].mxu0  ;;  %v5395_v2 = vpop.f32.mrb[111].mxu1  ;;  %5693 = vmatmul.mubr.bf16.gmra.mrb[120].mxu0 %v5438_v0  ;;  %5758 = vmatmul.mubr.bf16.gmra.mrb[120].mxu1 %v5440_v48  ;;  %v5422_v31 = vmax.f32 %v5317_v1, 0.0  ;;  %v5424_v37 = vmax.f32 %v5390_v57, 0.0 }
 0xad2   : > { %v5323_v23 = vadd.f32 %v5322_v30, %v16134_v9  ;;  %v5396_v32 = vadd.f32 %v5395_v2, %v16137_v16  ;;  %5989 = vmatpush1.bf16.msra.mxu0 %v12716_v14  ;;  %v5423_v41 = vmax.f32 %v5319_v12, 0.0  ;;  %v5425_v42 = vmax.f32 %v5392_v19, 0.0  ;;  %v12720_v16 = vld [vmem:[%s14679_s7 + $0x78] ss:$12 sps:$4 sm:$0xff]   ;;  %11838 = vmatpush3.bf16.msra.mxu1 %v12727_v13 }
 0xad3   : > { %v5426_v17 = vmax.f32 %v5321_v24, 0.0  ;;  %v5428_v50 = vmax.f32 %v5394_v46, 0.0  ;;  %5990 = vmatprep.subr.bf16.mxu0 %v12722_v11  ;;  %11839 = vmatprep.subr.bf16.mxu1 %v12731_v56 }
 0xad4   : > { %v5427_v53 = vmax.f32 %v5323_v23, 0.0  ;;  %v5429_v51 = vmax.f32 %v5396_v32, 0.0 }
 0xad5   : > { %v5442_v3 = vpack.c.bf16 %v5426_v17, %v5422_v31  ;;  %v5444_v26 = vpack.c.bf16 %v5428_v50, %v5424_v37 }
 0xad6   : > { %v5443_v21 = vpack.c.bf16 %v5427_v53, %v5423_v41  ;;  %v5445_v9 = vpack.c.bf16 %v5429_v51, %v5425_v42  ;;  %5991 = vmatpush1.bf16.msra.mxu0 %v12720_v16  ;;  %11840 = vmatpush3.bf16.msra.mxu1 %v12731_v56 }
 0xad7   : > { %5992 = vmatprep.subr.bf16.mxu0 %v12726_v22  ;;  %11841 = vmatprep.subr.bf16.mxu1 %v12732_v36 }
 0xad8   : > { %5700 = vmatprep.mubr.bf16.mxu0 %v5443_v21  ;;  %5765 = vmatprep.mubr.bf16.mxu1 %v5445_v9 }
 0xad9   : > { %5701 = vmatmul.mubr.bf16.gmra.mrb[124].mxu0 %v5442_v3  ;;  %5766 = vmatmul.mubr.bf16.gmra.mrb[124].mxu1 %v5444_v26 }
 0xada   : > { %6012 = vmatprep.mubr.bf16.mxu0 %v18068_v60  ;;  %5993 = vmatpush1.bf16.msra.mxu0 %v12724_v18 }
 0xadb   : > { %5994 = vmatprep.subr.bf16.mxu0 %v12730_v7  ;;  %11842 = vmatpush3.bf16.msra.mxu1 %v12732_v36 }
 0xadc   : > { %11843 = vmatprep.subr.bf16.mxu1 %v12733_v49 }
 0xade   : > { %5995 = vmatpush1.bf16.msra.mxu0 %v12728_v25 }
 0xadf   : > { %11844 = vmatpush3.bf16.msra.mxu1 %v12733_v49 }
 0xae0   : > { %12246 = vmatprep.subr.bf16.mxu1 %v18075_v27 }
 0xb94   : > { %v11069_v43 = vpop.f32.mrb[112].mxu0  ;;  %v11109_v59 = vpop.f32.mrb[112].mxu1 }
 0xb95   : > { %v11070_v44 = vpop.f32.mrb[113].mxu0  ;;  %v11110_v40 = vpop.f32.mrb[113].mxu1 }
 0xb96   : > { %v11071_v34 = vadd.f32 %v11070_v44, %v11069_v43  ;;  %v11111_v0 = vadd.f32 %v11110_v40, %v11109_v59  ;;  %v11072_v48 = vpop.f32.mrb[114].mxu0  ;;  %v11112_v15 = vpop.f32.mrb[114].mxu1  ;;  %v18081_v40 = vld [vmem:[#allocation60_spill] sm:$0xff] }
 0xb97   : > { %v11073_v52 = vpop.f32.mrb[115].mxu0  ;;  %v11113_v47 = vpop.f32.mrb[115].mxu1 }
 0xb98   : > { %v5679_v4 = vadd.f32 %v11071_v34, %v16197_v39  ;;  %v11074_v14 = vadd.f32 %v11073_v52, %v11072_v48  ;;  %v11114_v1 = vadd.f32 %v11113_v47, %v11112_v15 }
 0xb9a   : > { %v5744_v57 = vadd.f32 %v11111_v0, %v5679_v4  ;;  %v5682_v33 = vadd.f32 %v11074_v14, %v16197_v39 }
 0xb9c   : > { %v5747_v10 = vadd.f32 %v11114_v1, %v5682_v33  ;;  %v11075_v12 = vpop.f32.mrb[116].mxu0  ;;  %v11115_v19 = vpop.f32.mrb[116].mxu1  ;;  %v16202_v24 = vadd.f32 %v5744_v57, %v16055_v45 }
 0xb9d   : > { %v11076_v20 = vpop.f32.mrb[117].mxu0  ;;  %v11116_v58 = vpop.f32.mrb[117].mxu1 }
 0xb9e   : > { %18077 = vst [vmem:[#allocation80_spill] sm:$0xff] %v16202_v24  ;;  %v16205_v46 = vadd.f32 %v5747_v10, %v16057_v54  ;;  %v11077_v30 = vadd.f32 %v11076_v20, %v11075_v12  ;;  %v11117_v2 = vadd.f32 %v11116_v58, %v11115_v19  ;;  %v11078_v23 = vpop.f32.mrb[118].mxu0  ;;  %v11118_v32 = vpop.f32.mrb[118].mxu1  ;;  %v18085_v58 = vld [vmem:[#allocation62_spill] sm:$0xff] }
 0xb9f   : > { %v11079_v31 = vpop.f32.mrb[119].mxu0  ;;  %v11119_v37 = vpop.f32.mrb[119].mxu1 }
 0xba0   : > { %18078 = vst [vmem:[#allocation89_spill] sm:$0xff] %v16205_v46  ;;  %v5832_v17 = vpack.c.bf16 %v16205_v46, %v16202_v24  ;;  %v5687_v50 = vadd.f32 %v11077_v30, %v16197_v39  ;;  %v11080_v41 = vadd.f32 %v11079_v31, %v11078_v23  ;;  %v11120_v42 = vadd.f32 %v11119_v37, %v11118_v32  ;;  %v18088_v23 = vld [vmem:[#allocation63_spill] sm:$0xff]  ;;  %v18091_v31 = vld [vmem:[#allocation72_spill] sm:$0xff]  ;;  %v5814_v37 = vld [vmem:[%s14681_s10] sm:$0x7] }
 0xba1   : > { %v13342_v32 = vld [vmem:[%s17988_s20] sm:$0xff] }
 0xba2   : > { %v5752_v53 = vadd.f32 %v11117_v2, %v5687_v50  ;;  %v5690_v45 = vadd.f32 %v11080_v41, %v16197_v39  ;;  %6013 = vmatmul.mubr.bf16.vlgmr.msra.gmra.mrb[128].mxu0 %v5832_v17  ;;  %11845 = vmatprep.mubr.bf16.mxu1 %v5832_v17  ;;  %v5840_v17 = vrot.slane %v5814_v37, %v18072_v8  ;;  %v16656_v8 = vld [vmem:[%s18098_s17 + $0x18] sm:$0xff] }
 0xba3   : > { %6022 = vmatprep.mubr.bf16.mxu0 %v18068_v60 }
 0xba4   : > { %v5755_v54 = vadd.f32 %v11120_v42, %v5690_v45  ;;  %v11081_v51 = vpop.f32.mrb[120].mxu0  ;;  %v11121_v3 = vpop.f32.mrb[120].mxu1  ;;  %v16213_v9 = vadd.f32 %v5752_v53, %v16075_v62 }
 0xba5   : > { %v11082_v26 = vpop.f32.mrb[121].mxu0  ;;  %v11122_v21 = vpop.f32.mrb[121].mxu1 }
 0xba6   : > { %18079 = vst [vmem:[#allocation75_spill] sm:$0xff] %v16213_v9  ;;  %v16216_v16 = vadd.f32 %v5755_v54, %v16069_v28  ;;  %v11083_v11 = vadd.f32 %v11082_v26, %v11081_v51  ;;  %v11123_v29 = vadd.f32 %v11122_v21, %v11121_v3  ;;  %v11084_v18 = vpop.f32.mrb[122].mxu0  ;;  %v11124_v22 = vpop.f32.mrb[122].mxu1 }
 0xba7   : > { %v11085_v13 = vpop.f32.mrb[123].mxu0  ;;  %v11125_v25 = vpop.f32.mrb[123].mxu1 }
 0xba8   : > { %18080 = vst [vmem:[#allocation73_spill] sm:$0xff] %v16216_v16  ;;  %v5695_v7 = vadd.f32 %v11083_v11, %v16197_v39  ;;  %v11086_v56 = vadd.f32 %v11085_v13, %v11084_v18  ;;  %v11126_v36 = vadd.f32 %v11125_v25, %v11124_v22  ;;  %v5833_v49 = vpack.c.bf16 %v16216_v16, %v16213_v9 }
 0xbaa   : > { %v5760_v43 = vadd.f32 %v11123_v29, %v5695_v7  ;;  %v5698_v62 = vadd.f32 %v11086_v56, %v16197_v39  ;;  %6023 = vmatmul.mubr.bf16.gmra.mrb[132].mxu0 %v5833_v49  ;;  %11846 = vmatmul.mubr.bf16.vlgmr.msra.gmra.mrb[128].mxu1 %v5833_v49  ;;  %v16272_v29 = vrot.slane %v5814_v37, %v18073_v5 }
 0xbab   : > { %6032 = vmatprep.mubr.bf16.mxu0 %v18068_v60  ;;  %12248 = vmatpush3.bf16.msra.mxu1 %v18075_v27 }
 0xbac   : > { %v5763_v28 = vadd.f32 %v11126_v36, %v5698_v62  ;;  %v11087_v59 = vpop.f32.mrb[124].mxu0  ;;  %v11127_v44 = vpop.f32.mrb[124].mxu1  ;;  %12250 = vmatprep.subr.bf16.mxu1 %v18081_v40  ;;  %v16226_v48 = vadd.f32 %v5760_v43, %v16091_v6  ;;  %v18084_v6 = vld [vmem:[#allocation61_spill] sm:$0xff]  ;;  %v16282_v43 = vrot.slane %v5814_v37, %v18074_v35  ;;  %v13345_v37 = vld [vmem:[%s17988_s20 + $0x18] sm:$0xff] }
 0xbad   : > { %v11088_v34 = vpop.f32.mrb[125].mxu0  ;;  %v11128_v0 = vpop.f32.mrb[125].mxu1 }
 0xbae   : > { %18082 = vst [vmem:[#allocation74_spill] sm:$0xff] %v16226_v48  ;;  %v16229_v15 = vadd.f32 %v5763_v28, %v16093_v63  ;;  %v11089_v52 = vadd.f32 %v11088_v34, %v11087_v59  ;;  %v11129_v47 = vadd.f32 %v11128_v0, %v11127_v44  ;;  %v11090_v4 = vpop.f32.mrb[126].mxu0  ;;  %v11130_v14 = vpop.f32.mrb[126].mxu1 }
 0xbaf   : > { %v11091_v1 = vpop.f32.mrb[127].mxu0  ;;  %v11131_v57 = vpop.f32.mrb[127].mxu1  ;;  %12252 = vmatpush3.bf16.msra.mxu1 %v18081_v40 }
 0xbb0   : > { %18083 = vst [vmem:[#allocation91_spill] sm:$0xff] %v16229_v15  ;;  %v5703_v27 = vadd.f32 %v11089_v52, %v16197_v39  ;;  %v11092_v33 = vadd.f32 %v11091_v1, %v11090_v4  ;;  %v11132_v10 = vadd.f32 %v11131_v57, %v11130_v14  ;;  %v5834_v12 = vpack.c.bf16 %v16229_v15, %v16226_v48 }
 0xbb1   : > { %12254 = vmatprep.subr.bf16.mxu1 %v18084_v6 }
 0xbb2   : > { %v5768_v63 = vadd.f32 %v11129_v47, %v5703_v27  ;;  %v5706_v19 = vadd.f32 %v11092_v33, %v16197_v39  ;;  %6033 = vmatmul.mubr.bf16.gmra.mrb[136].mxu0 %v5834_v12  ;;  %11849 = vmatprep.mubr.bf16.mxu1 %v5834_v12 }
 0xbb3   : > { %6042 = vmatprep.mubr.bf16.mxu0 %v18068_v60  ;;  %12256 = vmatpush3.bf16.msra.mxu1 %v18084_v6 }
 0xbb4   : > { %v5771_v20 = vadd.f32 %v11132_v10, %v5706_v19  ;;  %12258 = vmatprep.subr.bf16.mxu1 %v18085_v58  ;;  %v16241_v30 = vadd.f32 %v5768_v63, %v16107_v55  ;;  %v18089_v55 = vld [vmem:[#allocation64_spill] sm:$0xff] }
 0xbb6   : > { %18086 = vst [vmem:[#allocation83_spill] sm:$0xff] %v16241_v30  ;;  %v16244_v2 = vadd.f32 %v5771_v20, %v16105_v38  ;;  %v18090_v38 = vld [vmem:[#allocation65_spill] sm:$0xff] }
 0xbb7   : > { %12260 = vmatpush3.bf16.msra.mxu1 %v18085_v58 }
 0xbb8   : > { %18087 = vst [vmem:[#allocation82_spill] sm:$0xff] %v16244_v2  ;;  %v5835_v39 = vpack.c.bf16 %v16244_v2, %v16241_v30  ;;  %12262 = vmatprep.subr.bf16.mxu1 %v18088_v23 }
 0xbba   : > { %6043 = vmatmul.mubr.bf16.gmra.mrb[140].mxu0 %v5835_v39  ;;  %11850 = vmatmul.mubr.bf16.gmra.mrb[132].mxu1 %v5835_v39 }
 0xbbb   : > { %11869 = vmatprep.mubr.msk.f32.mxu0 %vm2385_vm0, %v13342_v32  ;;  %12264 = vmatpush3.bf16.msra.mxu1 %v18088_v23 }
 0xbbc   : > { %12266 = vmatprep.subr.bf16.mxu1 %v18089_v55 }
 0xbbf   : > { %12268 = vmatpush3.bf16.msra.mxu1 %v18089_v55 }
 0xbc0   : > { %12270 = vmatprep.subr.bf16.mxu1 %v18090_v38 }
 0xbc3   : > { %12272 = vmatpush3.bf16.msra.mxu1 %v18090_v38  ;;  %v13343_v38 = vld [vmem:[%s17988_s20 + $0x8] sm:$0xff] }
 0xbc4   : > { %12274 = vmatprep.subr.bf16.mxu1 %v18091_v31 }
 0xbc7   : > { %12276 = vmatpush3.bf16.msra.mxu1 %v18091_v31  ;;  %v13344_v31 = vld [vmem:[%s17988_s20 + $0x10] sm:$0xff] }
 0xc75   : > { %v6014_v50 = vpop.f32.mrb[128].mxu0 }
 0xc76   : > { %v16261_v41 = vpop.f32.mrb[129].mxu0  ;;  %v6015_v53 = vadd.f32 %v6014_v50, %v5840_v17  ;;  %v13347_v50 = vld [vmem:[%s17988_s20 + $0x28] sm:$0xff] }
 0xc77   : > { %v6018_v42 = vpop.f32.mrb[130].mxu0 }
 0xc78   : > { %v6019_v45 = vadd.f32 %v6018_v42, %v5840_v17  ;;  %v16263_v54 = vpop.f32.mrb[131].mxu0  ;;  %v13348_v42 = vld [vmem:[%s17988_s20 + $0x30] sm:$0xff] }
 0xc7a   : > { %v12229_v51 = vpack.c.bf16 %v6019_v45, %v6015_v53  ;;  %v13349_v53 = vld [vmem:[%s17988_s20 + $0x38] sm:$0xff]  ;;  %v13350_v45 = vld [vmem:[%s17988_s20 + $0x40] sm:$0xff] }
 0xc7c   : > { %12230 = vmatprep.subr.bf16.mxu0 %v12229_v51 }
 0xc7d   : > { %v6024_v3 = vpop.f32.mrb[132].mxu0  ;;  %v16265_v26 = vpop.f32.mrb[128].mxu1  ;;  %12232 = vmatpush3.bf16.msra.mxu0 %v12229_v51  ;;  %v13351_v51 = vld [vmem:[%s17988_s20 + $0x48] sm:$0xff] }
 0xc7e   : > { %v16267_v21 = vpop.f32.mrb[133].mxu0  ;;  %v16269_v11 = vpop.f32.mrb[129].mxu1  ;;  %v6025_v13 = vadd.f32 %v6024_v3, %v5840_v17  ;;  %v13352_v3 = vld [vmem:[%s17988_s20 + $0x50] sm:$0xff] }
 0xc7f   : > { %v6028_v18 = vpop.f32.mrb[134].mxu0  ;;  %v16274_v22 = vpop.f32.mrb[130].mxu1 }
 0xc80   : > { %v6029_v25 = vadd.f32 %v6028_v18, %v5840_v17  ;;  %v16276_v7 = vpop.f32.mrb[135].mxu0  ;;  %v6090_v56 = vpop.f32.mrb[131].mxu1  ;;  %v13353_v18 = vld [vmem:[%s17988_s20 + $0x58] sm:$0xff] }
 0xc81   : > { %v16279_v36 = vadd.f32 %v6090_v56, %v16272_v29  ;;  %v13356_v56 = vld [vmem:[%s17988_s20 + $0x70] sm:$0xff] }
 0xc82   : > { %v12233_v49 = vpack.c.bf16 %v6029_v25, %v6025_v13  ;;  %v13354_v13 = vld [vmem:[%s17988_s20 + $0x60] sm:$0xff]  ;;  %v13355_v25 = vld [vmem:[%s17988_s20 + $0x68] sm:$0xff] }
 0xc83   : > { %18092 = vst [vmem:[#allocation71_spill] sm:$0xff] %v16279_v36 }
 0xc84   : > { %12234 = vmatprep.subr.bf16.mxu0 %v12233_v49 }
 0xc85   : > { %v6034_v62 = vpop.f32.mrb[136].mxu0  ;;  %12236 = vmatpush3.bf16.msra.mxu0 %v12233_v49  ;;  %v13357_v49 = vld [vmem:[%s17988_s20 + $0x78] sm:$0xff] }
 0xc86   : > { %v6036_v28 = vpop.f32.mrb[137].mxu0  ;;  %v6035_v40 = vadd.f32 %v6034_v62, %v5840_v17  ;;  %v13358_v62 = vld [vmem:[%s17988_s20 + $0x80] sm:$0xff] }
 0xc87   : > { %v16285_v59 = vadd.f32 %v6036_v28, %v16282_v43  ;;  %v6038_v44 = vpop.f32.mrb[138].mxu0  ;;  %v13359_v28 = vld [vmem:[%s17988_s20 + $0x88] sm:$0xff] }
 0xc88   : > { %v6039_v34 = vadd.f32 %v6038_v44, %v5840_v17  ;;  %v6040_v0 = vpop.f32.mrb[139].mxu0  ;;  %v13360_v44 = vld [vmem:[%s17988_s20 + $0x90] sm:$0xff] }
 0xc89   : > { %v16288_v52 = vadd.f32 %v6040_v0, %v16282_v43  ;;  %v13363_v0 = vld [vmem:[%s17988_s20 + $0xa8] sm:$0xff] }
 0xc8a   : > { %v12237_v47 = vpack.c.bf16 %v6039_v34, %v6035_v40  ;;  %v13361_v40 = vld [vmem:[%s17988_s20 + $0x98] sm:$0xff]  ;;  %v13362_v34 = vld [vmem:[%s17988_s20 + $0xa0] sm:$0xff] }
 0xc8c   : > { %12238 = vmatprep.subr.bf16.mxu0 %v12237_v47 }
 0xc8d   : > { %v6044_v4 = vpop.f32.mrb[140].mxu0  ;;  %v11851_v14 = vpop.f32.mrb[132].mxu1  ;;  %12240 = vmatpush3.bf16.msra.mxu0 %v12237_v47  ;;  %v13364_v47 = vld [vmem:[%s17988_s20 + $0xb0] sm:$0xff] }
 0xc8e   : > { %v16291_v1 = vadd.f32 %v11851_v14, %v16272_v29  ;;  %v6046_v57 = vpop.f32.mrb[141].mxu0  ;;  %v6103_v27 = vpop.f32.mrb[133].mxu1  ;;  %v6045_v63 = vadd.f32 %v6044_v4, %v5840_v17  ;;  %v13365_v4 = vld [vmem:[%s17988_s20 + $0xb8] sm:$0xff]  ;;  %v13366_v14 = vld [vmem:[%s17988_s20 + $0xc0] sm:$0xff] }
 0xc8f   : > { %v16294_v33 = vadd.f32 %v6046_v57, %v16282_v43  ;;  %v16297_v10 = vadd.f32 %v6103_v27, %v16272_v29  ;;  %v6048_v12 = vpop.f32.mrb[142].mxu0  ;;  %v11852_v6 = vpop.f32.mrb[134].mxu1  ;;  %v13367_v57 = vld [vmem:[%s17988_s20 + $0xc8] sm:$0xff]  ;;  %v13368_v27 = vld [vmem:[%s17988_s20 + $0xd0] sm:$0xff] }
 0xc90   : > { %18093 = vst [vmem:[#allocation77_spill] sm:$0xff] %v16291_v1  ;;  %v6049_v19 = vadd.f32 %v6048_v12, %v5840_v17  ;;  %v16300_v20 = vadd.f32 %v11852_v6, %v16272_v29  ;;  %v6050_v58 = vpop.f32.mrb[143].mxu0  ;;  %v6106_v39 = vpop.f32.mrb[135].mxu1  ;;  %v13346_v17 = vld [vmem:[%s17988_s20 + $0x20] sm:$0xff]  ;;  %v13369_v12 = vld [vmem:[%s17988_s20 + $0xd8] sm:$0xff] }
 0xc91   : > { %18094 = vst [vmem:[#allocation76_spill] sm:$0xff] %v16297_v10  ;;  %v16303_v23 = vadd.f32 %v6050_v58, %v16282_v43  ;;  %v16306_v32 = vadd.f32 %v6106_v39, %v16272_v29  ;;  %v13370_v6 = vld [vmem:[%s17988_s20 + $0xe0] sm:$0xff]  ;;  %v13373_v58 = vld [vmem:[%s17988_s20 + $0xf8] sm:$0xff] }
 0xc92   : > { %18095 = vst [vmem:[#allocation85_spill] sm:$0xff] %v16300_v20  ;;  %v12241_v55 = vpack.c.bf16 %v6049_v19, %v6045_v63  ;;  %v13371_v63 = vld [vmem:[%s17988_s20 + $0xe8] sm:$0xff]  ;;  %v13372_v19 = vld [vmem:[%s17988_s20 + $0xf0] sm:$0xff]  ;;  %v13374_v39 = vld [vmem:[%s17988_s20 + $0x100] sm:$0xff] }
 0xc93   : > { %18096 = vst [vmem:[#allocation84_spill] sm:$0xff] %v16306_v32  ;;  %v16751_v32 = vld [vmem:[%s18098_s17 + $0x20] sm:$0xff] }
 0xc94   : > { %12242 = vmatprep.subr.bf16.mxu0 %v12241_v55 }
 0xc95   : > { %12244 = vmatpush3.bf16.msra.mxu0 %v12241_v55  ;;  %v13375_v55 = vld [vmem:[%s17988_s20 + $0x108] sm:$0xff] }
 0xc98   : > { %11870 = vmatmul.mubr.msk.f32.vlgmr.msra.gmra.mrb[144].mxu0 %vm2385_vm0, %v13343_v38  ;;  %v13376_v38 = vld [vmem:[%s17988_s20 + $0x110] sm:$0xff] }
 0xc99   : > { %11872 = vmatprep.mubr.msk.f32.mxu0 %vm2385_vm0, %v13344_v31  ;;  %v13377_v31 = vld [vmem:[%s17988_s20 + $0x118] sm:$0xff] }
 0xc9c   : > { %11873 = vmatmul.mubr.msk.f32.gmra.mrb[146].mxu0 %vm2385_vm0, %v13345_v37  ;;  %v13378_v37 = vld [vmem:[%s17988_s20 + $0x120] sm:$0xff] }
 0xc9d   : > { %11875 = vmatprep.mubr.msk.f32.mxu0 %vm2385_vm0, %v13346_v17  ;;  %v13379_v17 = vld [vmem:[%s17988_s20 + $0x128] sm:$0xff] }
 0xca0   : > { %11876 = vmatmul.mubr.msk.f32.gmra.mrb[148].mxu0 %vm2385_vm0, %v13347_v50  ;;  %v13380_v50 = vld [vmem:[%s17988_s20 + $0x130] sm:$0xff] }
 0xca1   : > { %11878 = vmatprep.mubr.msk.f32.mxu0 %vm2385_vm0, %v13348_v42  ;;  %v13381_v42 = vld [vmem:[%s17988_s20 + $0x138] sm:$0xff] }
 0xca4   : > { %11879 = vmatmul.mubr.msk.f32.gmra.mrb[150].mxu0 %vm2385_vm0, %v13349_v53  ;;  %v13382_v53 = vld [vmem:[%s17988_s20 + $0x140] sm:$0xff] }
 0xca5   : > { %11881 = vmatprep.mubr.msk.f32.mxu0 %vm2385_vm0, %v13350_v45  ;;  %v13383_v45 = vld [vmem:[%s17988_s20 + $0x148] sm:$0xff] }
 0xca8   : > { %11882 = vmatmul.mubr.msk.f32.gmra.mrb[152].mxu0 %vm2385_vm0, %v13351_v51  ;;  %v13384_v51 = vld [vmem:[%s17988_s20 + $0x150] sm:$0xff] }
 0xca9   : > { %11884 = vmatprep.mubr.msk.f32.mxu0 %vm2385_vm0, %v13352_v3  ;;  %v13385_v3 = vld [vmem:[%s17988_s20 + $0x158] sm:$0xff] }
 0xcac   : > { %11885 = vmatmul.mubr.msk.f32.gmra.mrb[154].mxu0 %vm2385_vm0, %v13353_v18  ;;  %v13386_v18 = vld [vmem:[%s17988_s20 + $0x160] sm:$0xff] }
 0xcad   : > { %11887 = vmatprep.mubr.msk.f32.mxu0 %vm2385_vm0, %v13354_v13  ;;  %v13387_v13 = vld [vmem:[%s17988_s20 + $0x168] sm:$0xff] }
 0xcb0   : > { %11888 = vmatmul.mubr.msk.f32.gmra.mrb[156].mxu0 %vm2385_vm0, %v13355_v25  ;;  %v13388_v25 = vld [vmem:[%s17988_s20 + $0x170] sm:$0xff] }
 0xcb1   : > { %11890 = vmatprep.mubr.msk.f32.mxu0 %vm2385_vm0, %v13356_v56  ;;  %v13389_v56 = vld [vmem:[%s17988_s20 + $0x178] sm:$0xff] }
 0xcb4   : > { %11891 = vmatmul.mubr.msk.f32.gmra.mrb[158].mxu0 %vm2385_vm0, %v13357_v49  ;;  %v13390_v49 = vld [vmem:[%s17988_s20 + $0x180] sm:$0xff] }
 0xcb5   : > { %11893 = vmatprep.mubr.msk.f32.mxu0 %vm2385_vm0, %v13358_v62  ;;  %v13391_v62 = vld [vmem:[%s17988_s20 + $0x188] sm:$0xff] }
 0xcb8   : > { %11894 = vmatmul.mubr.msk.f32.gmra.mrb[160].mxu0 %vm2385_vm0, %v13359_v28  ;;  %v13392_v28 = vld [vmem:[%s17988_s20 + $0x190] sm:$0xff] }
 0xcb9   : > { %11896 = vmatprep.mubr.msk.f32.mxu0 %vm2385_vm0, %v13360_v44  ;;  %v13393_v44 = vld [vmem:[%s17988_s20 + $0x198] sm:$0xff] }
 0xcbc   : > { %11897 = vmatmul.mubr.msk.f32.gmra.mrb[162].mxu0 %vm2385_vm0, %v13361_v40  ;;  %v13394_v40 = vld [vmem:[%s17988_s20 + $0x1a0] sm:$0xff] }
 0xcbd   : > { %11899 = vmatprep.mubr.msk.f32.mxu0 %vm2385_vm0, %v13362_v34  ;;  %v13395_v34 = vld [vmem:[%s17988_s20 + $0x1a8] sm:$0xff] }
 0xcc0   : > { %11900 = vmatmul.mubr.msk.f32.gmra.mrb[164].mxu0 %vm2385_vm0, %v13363_v0  ;;  %v13396_v0 = vld [vmem:[%s17988_s20 + $0x1b0] sm:$0xff] }
 0xcc1   : > { %11902 = vmatprep.mubr.msk.f32.mxu0 %vm2385_vm0, %v13364_v47  ;;  %v13397_v47 = vld [vmem:[%s17988_s20 + $0x1b8] sm:$0xff] }
 0xcc4   : > { %11903 = vmatmul.mubr.msk.f32.gmra.mrb[166].mxu0 %vm2385_vm0, %v13365_v4  ;;  %v13398_v4 = vld [vmem:[%s17988_s20 + $0x1c0] sm:$0xff] }
 0xcc5   : > { %11905 = vmatprep.mubr.msk.f32.mxu0 %vm2385_vm0, %v13366_v14  ;;  %v13399_v14 = vld [vmem:[%s17988_s20 + $0x1c8] sm:$0xff] }
 0xcc8   : > { %11906 = vmatmul.mubr.msk.f32.gmra.mrb[168].mxu0 %vm2385_vm0, %v13367_v57  ;;  %v13400_v57 = vld [vmem:[%s17988_s20 + $0x1d0] sm:$0xff] }
 0xcc9   : > { %11908 = vmatprep.mubr.msk.f32.mxu0 %vm2385_vm0, %v13368_v27  ;;  %v13401_v27 = vld [vmem:[%s17988_s20 + $0x1d8] sm:$0xff] }
 0xccc   : > { %11909 = vmatmul.mubr.msk.f32.gmra.mrb[170].mxu0 %vm2385_vm0, %v13369_v12  ;;  %v13402_v12 = vld [vmem:[%s17988_s20 + $0x1e0] sm:$0xff] }
 0xccd   : > { %11911 = vmatprep.mubr.msk.f32.mxu0 %vm2385_vm0, %v13370_v6  ;;  %v13403_v6 = vld [vmem:[%s17988_s20 + $0x1e8] sm:$0xff] }
 0xcd0   : > { %11912 = vmatmul.mubr.msk.f32.gmra.mrb[172].mxu0 %vm2385_vm0, %v13371_v63  ;;  %v13404_v63 = vld [vmem:[%s17988_s20 + $0x1f0] sm:$0xff] }
 0xcd1   : > { %11914 = vmatprep.mubr.msk.f32.mxu0 %vm2385_vm0, %v13372_v19  ;;  %v13405_v19 = vld [vmem:[%s17988_s20 + $0x1f8] sm:$0xff] }
 0xcd4   : > { %11915 = vmatmul.mubr.msk.f32.gmra.mrb[174].mxu0 %vm2385_vm0, %v13373_v58  ;;  %v13406_v58 = vld [vmem:[%s18045_s4 + $0x8] sm:$0xff] }
 0xcd5   : > { %11917 = vmatprep.mubr.msk.f32.mxu0 %vm2385_vm0, %v13374_v39  ;;  %v6017_v39 = vadd.f32 %v16261_v41, %v16282_v43 }
 0xcd8   : > { %11918 = vmatmul.mubr.msk.f32.gmra.mrb[176].mxu0 %vm2385_vm0, %v13375_v55 }
 0xcd9   : > { %11920 = vmatprep.mubr.msk.f32.mxu0 %vm2385_vm0, %v13376_v38 }
 0xcdc   : > { %11921 = vmatmul.mubr.msk.f32.gmra.mrb[178].mxu0 %vm2385_vm0, %v13377_v31 }
 0xcdd   : > { %11923 = vmatprep.mubr.msk.f32.mxu0 %vm2385_vm0, %v13378_v37 }
 0xce0   : > { %11924 = vmatmul.mubr.msk.f32.gmra.mrb[180].mxu0 %vm2385_vm0, %v13379_v17 }
 0xce1   : > { %11926 = vmatprep.mubr.msk.f32.mxu0 %vm2385_vm0, %v13380_v50 }
 0xce4   : > { %11927 = vmatmul.mubr.msk.f32.gmra.mrb[182].mxu0 %vm2385_vm0, %v13381_v42 }
 0xce5   : > { %11929 = vmatprep.mubr.msk.f32.mxu0 %vm2385_vm0, %v13382_v53 }
 0xce8   : > { %11930 = vmatmul.mubr.msk.f32.gmra.mrb[184].mxu0 %vm2385_vm0, %v13383_v45 }
 0xce9   : > { %11932 = vmatprep.mubr.msk.f32.mxu0 %vm2385_vm0, %v13384_v51 }
 0xcec   : > { %11933 = vmatmul.mubr.msk.f32.gmra.mrb[186].mxu0 %vm2385_vm0, %v13385_v3 }
 0xced   : > { %11935 = vmatprep.mubr.msk.f32.mxu0 %vm2385_vm0, %v13386_v18 }
 0xcf0   : > { %11936 = vmatmul.mubr.msk.f32.gmra.mrb[188].mxu0 %vm2385_vm0, %v13387_v13 }
 0xcf1   : > { %11938 = vmatprep.mubr.msk.f32.mxu0 %vm2385_vm0, %v13388_v25 }
 0xcf4   : > { %11939 = vmatmul.mubr.msk.f32.gmra.mrb[190].mxu0 %vm2385_vm0, %v13389_v56 }
 0xcf5   : > { %11941 = vmatprep.mubr.msk.f32.mxu0 %vm2385_vm0, %v13390_v49  ;;  %v6021_v49 = vadd.f32 %v16263_v54, %v16282_v43 }
 0xcf8   : > { %11942 = vmatmul.mubr.msk.f32.gmra.mrb[192].mxu0 %vm2385_vm0, %v13391_v62 }
 0xcf9   : > { %11944 = vmatprep.mubr.msk.f32.mxu0 %vm2385_vm0, %v13392_v28 }
 0xcfc   : > { %11945 = vmatmul.mubr.msk.f32.gmra.mrb[194].mxu0 %vm2385_vm0, %v13393_v44 }
 0xcfd   : > { %11947 = vmatprep.mubr.msk.f32.mxu0 %vm2385_vm0, %v13394_v40 }
 0xd00   : > { %11948 = vmatmul.mubr.msk.f32.gmra.mrb[196].mxu0 %vm2385_vm0, %v13395_v34 }
 0xd01   : > { %11950 = vmatprep.mubr.msk.f32.mxu0 %vm2385_vm0, %v13396_v0 }
 0xd04   : > { %11951 = vmatmul.mubr.msk.f32.gmra.mrb[198].mxu0 %vm2385_vm0, %v13397_v47 }
 0xd05   : > { %11953 = vmatprep.mubr.msk.f32.mxu0 %vm2385_vm0, %v13398_v4 }
 0xd08   : > { %11954 = vmatmul.mubr.msk.f32.gmra.mrb[200].mxu0 %vm2385_vm0, %v13399_v14 }
 0xd09   : > { %11956 = vmatprep.mubr.msk.f32.mxu0 %vm2385_vm0, %v13400_v57 }
 0xd0c   : > { %11957 = vmatmul.mubr.msk.f32.gmra.mrb[202].mxu0 %vm2385_vm0, %v13401_v27 }
 0xd0d   : > { %11959 = vmatprep.mubr.msk.f32.mxu0 %vm2385_vm0, %v13402_v12 }
 0xd10   : > { %11960 = vmatmul.mubr.msk.f32.gmra.mrb[204].mxu0 %vm2385_vm0, %v13403_v6 }
 0xd11   : > { %11962 = vmatprep.mubr.msk.f32.mxu0 %vm2385_vm0, %v13404_v63 }
 0xd14   : > { %11963 = vmatmul.mubr.msk.f32.gmra.mrb[206].mxu0 %vm2385_vm0, %v13405_v19 }
 0xd15   : > { %8232 = vmatprep.mubr.f32.mxu0 %v13406_v58  ;;  %v6027_v58 = vadd.f32 %v16267_v21, %v16282_v43 }
 0xd6b   : > { %v11871_v55 = vpop.f32.mrb[144].mxu0 }
 0xd6c   : > { %v6504_v38 = vmul.f32 %v11871_v55, %v6017_v39  ;;  %v6184_v31 = vpop.f32.mrb[145].mxu0 }
 0xd6d   : > { %v6503_v37 = vmul.f32 %v6184_v31, %v6017_v39 }
 0xd6f   : > { %v11874_v17 = vpop.f32.mrb[146].mxu0  ;;  %11997 = vmatprep.mubr.f32.mxu1 %v6503_v37 }
 0xd70   : > { %v6506_v50 = vmul.f32 %v11874_v17, %v6017_v39  ;;  %v6194_v42 = vpop.f32.mrb[147].mxu0  ;;  %11998 = vmatmul.mubr.f32.vlgmr.msra.gmra.mrb[136].mxu1 %v6504_v38 }
 0xd71   : > { %v6505_v53 = vmul.f32 %v6194_v42, %v6017_v39 }
 0xd73   : > { %v11877_v45 = vpop.f32.mrb[148].mxu0  ;;  %12000 = vmatprep.mubr.f32.mxu1 %v6505_v53 }
 0xd74   : > { %v6508_v51 = vmul.f32 %v11877_v45, %v6017_v39  ;;  %v6204_v3 = vpop.f32.mrb[149].mxu0  ;;  %12001 = vmatmul.mubr.f32.gmra.mrb[138].mxu1 %v6506_v50 }
 0xd75   : > { %v6507_v18 = vmul.f32 %v6204_v3, %v6017_v39 }
 0xd77   : > { %v11880_v13 = vpop.f32.mrb[150].mxu0  ;;  %12003 = vmatprep.mubr.f32.mxu1 %v6507_v18 }
 0xd78   : > { %v6510_v25 = vmul.f32 %v11880_v13, %v6017_v39  ;;  %v6214_v41 = vpop.f32.mrb[151].mxu0  ;;  %12004 = vmatmul.mubr.f32.gmra.mrb[140].mxu1 %v6508_v51 }
 0xd79   : > { %v6509_v56 = vmul.f32 %v6214_v41, %v6017_v39  ;;  %v6031_v41 = vadd.f32 %v16276_v7, %v16282_v43 }
 0xd7b   : > { %v11883_v62 = vpop.f32.mrb[152].mxu0  ;;  %12006 = vmatprep.mubr.f32.mxu1 %v6509_v56 }
 0xd7c   : > { %v6512_v28 = vmul.f32 %v11883_v62, %v6021_v49  ;;  %v6224_v44 = vpop.f32.mrb[153].mxu0  ;;  %12007 = vmatmul.mubr.f32.gmra.mrb[142].mxu1 %v6510_v25 }
 0xd7d   : > { %v6511_v40 = vmul.f32 %v6224_v44, %v6021_v49 }
 0xd7f   : > { %v11886_v34 = vpop.f32.mrb[154].mxu0  ;;  %12009 = vmatprep.mubr.f32.mxu1 %v6511_v40 }
 0xd80   : > { %v6514_v0 = vmul.f32 %v11886_v34, %v6021_v49  ;;  %v6234_v47 = vpop.f32.mrb[155].mxu0  ;;  %12010 = vmatmul.mubr.f32.gmra.mrb[144].mxu1 %v6512_v28 }
 0xd81   : > { %v6513_v4 = vmul.f32 %v6234_v47, %v6021_v49 }
 0xd83   : > { %v11889_v14 = vpop.f32.mrb[156].mxu0  ;;  %12012 = vmatprep.mubr.f32.mxu1 %v6513_v4 }
 0xd84   : > { %v6516_v57 = vmul.f32 %v11889_v14, %v6021_v49  ;;  %v6244_v27 = vpop.f32.mrb[157].mxu0  ;;  %12013 = vmatmul.mubr.f32.gmra.mrb[146].mxu1 %v6514_v0 }
 0xd85   : > { %v6515_v12 = vmul.f32 %v6244_v27, %v6021_v49 }
 0xd87   : > { %v11892_v6 = vpop.f32.mrb[158].mxu0  ;;  %12015 = vmatprep.mubr.f32.mxu1 %v6515_v12 }
 0xd88   : > { %v6518_v54 = vmul.f32 %v11892_v6, %v6021_v49  ;;  %v6254_v63 = vpop.f32.mrb[159].mxu0  ;;  %12016 = vmatmul.mubr.f32.gmra.mrb[148].mxu1 %v6516_v57 }
 0xd89   : > { %v6517_v19 = vmul.f32 %v6254_v63, %v6021_v49 }
 0xd8b   : > { %v11895_v39 = vpop.f32.mrb[160].mxu0  ;;  %12018 = vmatprep.mubr.f32.mxu1 %v6517_v19 }
 0xd8c   : > { %v6520_v55 = vmul.f32 %v11895_v39, %v6027_v58  ;;  %v6264_v38 = vpop.f32.mrb[161].mxu0  ;;  %12019 = vmatmul.mubr.f32.gmra.mrb[150].mxu1 %v6518_v54 }
 0xd8d   : > { %v6519_v31 = vmul.f32 %v6264_v38, %v6027_v58 }
 0xd8f   : > { %v11898_v37 = vpop.f32.mrb[162].mxu0  ;;  %12021 = vmatprep.mubr.f32.mxu1 %v6519_v31 }
 0xd90   : > { %v6522_v17 = vmul.f32 %v11898_v37, %v6027_v58  ;;  %v6274_v50 = vpop.f32.mrb[163].mxu0  ;;  %12022 = vmatmul.mubr.f32.gmra.mrb[152].mxu1 %v6520_v55 }
 0xd91   : > { %v6521_v42 = vmul.f32 %v6274_v50, %v6027_v58 }
 0xd93   : > { %v11901_v53 = vpop.f32.mrb[164].mxu0  ;;  %12024 = vmatprep.mubr.f32.mxu1 %v6521_v42 }
 0xd94   : > { %v6524_v45 = vmul.f32 %v11901_v53, %v6027_v58  ;;  %v6284_v51 = vpop.f32.mrb[165].mxu0  ;;  %12025 = vmatmul.mubr.f32.gmra.mrb[154].mxu1 %v6522_v17 }
 0xd95   : > { %v6523_v3 = vmul.f32 %v6284_v51, %v6027_v58 }
 0xd97   : > { %v11904_v18 = vpop.f32.mrb[166].mxu0  ;;  %12027 = vmatprep.mubr.f32.mxu1 %v6523_v3 }
 0xd98   : > { %v6526_v21 = vmul.f32 %v11904_v18, %v6027_v58  ;;  %v6294_v13 = vpop.f32.mrb[167].mxu0  ;;  %12028 = vmatmul.mubr.f32.gmra.mrb[156].mxu1 %v6524_v45 }
 0xd99   : > { %v6525_v25 = vmul.f32 %v6294_v13, %v6027_v58 }
 0xd9b   : > { %v11907_v56 = vpop.f32.mrb[168].mxu0  ;;  %12030 = vmatprep.mubr.f32.mxu1 %v6525_v25 }
 0xd9c   : > { %v6528_v49 = vmul.f32 %v11907_v56, %v6031_v41  ;;  %v6304_v62 = vpop.f32.mrb[169].mxu0  ;;  %12031 = vmatmul.mubr.f32.gmra.mrb[158].mxu1 %v6526_v21 }
 0xd9d   : > { %v6527_v28 = vmul.f32 %v6304_v62, %v6031_v41 }
 0xd9f   : > { %v11910_v44 = vpop.f32.mrb[170].mxu0  ;;  %12033 = vmatprep.mubr.f32.mxu1 %v6527_v28 }
 0xda0   : > { %v6530_v40 = vmul.f32 %v11910_v44, %v6031_v41  ;;  %v6314_v34 = vpop.f32.mrb[171].mxu0  ;;  %12034 = vmatmul.mubr.f32.gmra.mrb[160].mxu1 %v6528_v49 }
 0xda1   : > { %v6529_v0 = vmul.f32 %v6314_v34, %v6031_v41 }
 0xda3   : > { %v11913_v47 = vpop.f32.mrb[172].mxu0  ;;  %12036 = vmatprep.mubr.f32.mxu1 %v6529_v0 }
 0xda4   : > { %v6532_v4 = vmul.f32 %v11913_v47, %v6031_v41  ;;  %v6324_v14 = vpop.f32.mrb[173].mxu0  ;;  %12037 = vmatmul.mubr.f32.gmra.mrb[162].mxu1 %v6530_v40 }
 0xda5   : > { %v6531_v57 = vmul.f32 %v6324_v14, %v6031_v41 }
 0xda7   : > { %v11916_v27 = vpop.f32.mrb[174].mxu0  ;;  %12039 = vmatprep.mubr.f32.mxu1 %v6531_v57 }
 0xda8   : > { %v6534_v7 = vmul.f32 %v11916_v27, %v6031_v41  ;;  %v6334_v43 = vpop.f32.mrb[175].mxu0  ;;  %12040 = vmatmul.mubr.f32.gmra.mrb[164].mxu1 %v6532_v4 }
 0xda9   : > { %v6533_v12 = vmul.f32 %v6334_v43, %v6031_v41 }
 0xdab   : > { %v11919_v6 = vpop.f32.mrb[176].mxu0  ;;  %12042 = vmatprep.mubr.f32.mxu1 %v6533_v12 }
 0xdac   : > { %v6536_v54 = vmul.f32 %v11919_v6, %v16285_v59  ;;  %v6344_v63 = vpop.f32.mrb[177].mxu0  ;;  %12043 = vmatmul.mubr.f32.gmra.mrb[166].mxu1 %v6534_v7 }
 0xdad   : > { %v6535_v19 = vmul.f32 %v6344_v63, %v16285_v59 }
 0xdaf   : > { %v11922_v58 = vpop.f32.mrb[178].mxu0  ;;  %12045 = vmatprep.mubr.f32.mxu1 %v6535_v19 }
 0xdb0   : > { %v6538_v39 = vmul.f32 %v11922_v58, %v16285_v59  ;;  %v6354_v55 = vpop.f32.mrb[179].mxu0  ;;  %12046 = vmatmul.mubr.f32.gmra.mrb[168].mxu1 %v6536_v54 }
 0xdb1   : > { %v6537_v38 = vmul.f32 %v6354_v55, %v16285_v59 }
 0xdb3   : > { %v11925_v31 = vpop.f32.mrb[180].mxu0  ;;  %12048 = vmatprep.mubr.f32.mxu1 %v6537_v38 }
 0xdb4   : > { %v6540_v37 = vmul.f32 %v11925_v31, %v16285_v59  ;;  %v6364_v17 = vpop.f32.mrb[181].mxu0  ;;  %12049 = vmatmul.mubr.f32.gmra.mrb[170].mxu1 %v6538_v39 }
 0xdb5   : > { %v6539_v50 = vmul.f32 %v6364_v17, %v16285_v59 }
 0xdb7   : > { %v11928_v42 = vpop.f32.mrb[182].mxu0  ;;  %12051 = vmatprep.mubr.f32.mxu1 %v6539_v50 }
 0xdb8   : > { %v6542_v53 = vmul.f32 %v11928_v42, %v16285_v59  ;;  %v6374_v45 = vpop.f32.mrb[183].mxu0  ;;  %12052 = vmatmul.mubr.f32.gmra.mrb[172].mxu1 %v6540_v37 }
 0xdb9   : > { %v6541_v51 = vmul.f32 %v6374_v45, %v16285_v59 }
 0xdbb   : > { %v11931_v3 = vpop.f32.mrb[184].mxu0  ;;  %12054 = vmatprep.mubr.f32.mxu1 %v6541_v51 }
 0xdbc   : > { %v6544_v18 = vmul.f32 %v11931_v3, %v16288_v52  ;;  %v6384_v21 = vpop.f32.mrb[185].mxu0  ;;  %12055 = vmatmul.mubr.f32.gmra.mrb[174].mxu1 %v6542_v53 }
 0xdbd   : > { %v6543_v13 = vmul.f32 %v6384_v21, %v16288_v52 }
 0xdbf   : > { %v11934_v25 = vpop.f32.mrb[186].mxu0  ;;  %12057 = vmatprep.mubr.f32.mxu1 %v6543_v13 }
 0xdc0   : > { %v6546_v41 = vmul.f32 %v11934_v25, %v16288_v52  ;;  %v6394_v56 = vpop.f32.mrb[187].mxu0  ;;  %12058 = vmatmul.mubr.f32.gmra.mrb[176].mxu1 %v6544_v18 }
 0xdc1   : > { %v6545_v49 = vmul.f32 %v6394_v56, %v16288_v52 }
 0xdc3   : > { %v11937_v62 = vpop.f32.mrb[188].mxu0  ;;  %12060 = vmatprep.mubr.f32.mxu1 %v6545_v49  ;;  %v13407_v49 = vld [vmem:[%s18045_s4 + $0x18] sm:$0xff] }
 0xdc4   : > { %v6548_v59 = vmul.f32 %v11937_v62, %v16288_v52  ;;  %v6404_v28 = vpop.f32.mrb[189].mxu0  ;;  %12061 = vmatmul.mubr.f32.gmra.mrb[178].mxu1 %v6546_v41  ;;  %v2041_v62 = vld [vmem:[%s18097_s28] sm:$0xff] }
 0xdc5   : > { %v6547_v44 = vmul.f32 %v6404_v28, %v16288_v52 }
 0xdc7   : > { %v11940_v40 = vpop.f32.mrb[190].mxu0  ;;  %12063 = vmatprep.mubr.f32.mxu1 %v6547_v44 }
 0xdc8   : > { %v6550_v34 = vmul.f32 %v11940_v40, %v16288_v52  ;;  %v6414_v0 = vpop.f32.mrb[191].mxu0  ;;  %12064 = vmatmul.mubr.f32.gmra.mrb[180].mxu1 %v6548_v59 }
 0xdc9   : > { %v6549_v47 = vmul.f32 %v6414_v0, %v16288_v52 }
 0xdcb   : > { %v11943_v4 = vpop.f32.mrb[192].mxu0  ;;  %12066 = vmatprep.mubr.f32.mxu1 %v6549_v47 }
 0xdcc   : > { %v6552_v14 = vmul.f32 %v11943_v4, %v16294_v33  ;;  %v6424_v57 = vpop.f32.mrb[193].mxu0  ;;  %12067 = vmatmul.mubr.f32.gmra.mrb[182].mxu1 %v6550_v34 }
 0xdcd   : > { %v6551_v27 = vmul.f32 %v6424_v57, %v16294_v33 }
 0xdcf   : > { %v11946_v7 = vpop.f32.mrb[194].mxu0  ;;  %12069 = vmatprep.mubr.f32.mxu1 %v6551_v27 }
 0xdd0   : > { %v6554_v43 = vmul.f32 %v11946_v7, %v16294_v33  ;;  %v6434_v12 = vpop.f32.mrb[195].mxu0  ;;  %12070 = vmatmul.mubr.f32.gmra.mrb[184].mxu1 %v6552_v14 }
 0xdd1   : > { %v6553_v6 = vmul.f32 %v6434_v12, %v16294_v33 }
 0xdd3   : > { %v11949_v54 = vpop.f32.mrb[196].mxu0  ;;  %12072 = vmatprep.mubr.f32.mxu1 %v6553_v6 }
 0xdd4   : > { %v6556_v52 = vmul.f32 %v11949_v54, %v16294_v33  ;;  %v6444_v63 = vpop.f32.mrb[197].mxu0  ;;  %12073 = vmatmul.mubr.f32.gmra.mrb[186].mxu1 %v6554_v43 }
 0xdd5   : > { %v6555_v19 = vmul.f32 %v6444_v63, %v16294_v33 }
 0xdd7   : > { %v11952_v58 = vpop.f32.mrb[198].mxu0  ;;  %12075 = vmatprep.mubr.f32.mxu1 %v6555_v19 }
 0xdd8   : > { %v6558_v39 = vmul.f32 %v11952_v58, %v16294_v33  ;;  %v6454_v55 = vpop.f32.mrb[199].mxu0  ;;  %12076 = vmatmul.mubr.f32.gmra.mrb[188].mxu1 %v6556_v52 }
 0xdd9   : > { %v6557_v38 = vmul.f32 %v6454_v55, %v16294_v33 }
 0xddb   : > { %v11955_v31 = vpop.f32.mrb[200].mxu0  ;;  %12078 = vmatprep.mubr.f32.mxu1 %v6557_v38 }
 0xddc   : > { %v6560_v37 = vmul.f32 %v11955_v31, %v16303_v23  ;;  %v6464_v17 = vpop.f32.mrb[201].mxu0  ;;  %12079 = vmatmul.mubr.f32.gmra.mrb[190].mxu1 %v6558_v39  ;;  %v16488_v39 = vadd.f32 %v16265_v26, %v16272_v29 }
 0xddd   : > { %v6559_v50 = vmul.f32 %v6464_v17, %v16303_v23 }
 0xddf   : > { %v11958_v42 = vpop.f32.mrb[202].mxu0  ;;  %12081 = vmatprep.mubr.f32.mxu1 %v6559_v50 }
 0xde0   : > { %v6562_v53 = vmul.f32 %v11958_v42, %v16303_v23  ;;  %v6474_v45 = vpop.f32.mrb[203].mxu0  ;;  %12082 = vmatmul.mubr.f32.gmra.mrb[192].mxu1 %v6560_v37  ;;  %v16495_v37 = vadd.f32 %v16269_v11, %v16272_v29 }
 0xde1   : > { %v6561_v51 = vmul.f32 %v6474_v45, %v16303_v23 }
 0xde3   : > { %v11961_v3 = vpop.f32.mrb[204].mxu0  ;;  %12084 = vmatprep.mubr.f32.mxu1 %v6561_v51 }
 0xde4   : > { %v6564_v33 = vmul.f32 %v11961_v3, %v16303_v23  ;;  %v6484_v18 = vpop.f32.mrb[205].mxu0  ;;  %12085 = vmatmul.mubr.f32.gmra.mrb[194].mxu1 %v6562_v53  ;;  %v16500_v53 = vadd.f32 %v16274_v22, %v16272_v29 }
 0xde5   : > { %v6563_v21 = vmul.f32 %v6484_v18, %v16303_v23 }
 0xde6   : > { %18099 = vst [vmem:[#allocation79_spill] sm:$0xff] %v16500_v53  ;;  %v16846_v53 = vld [vmem:[%s18098_s17 + $0x28] sm:$0xff] }
 0xde7   : > { %v11964_v13 = vpop.f32.mrb[206].mxu0  ;;  %12087 = vmatprep.mubr.f32.mxu1 %v6563_v21 }
 0xde8   : > { %v6566_v25 = vmul.f32 %v11964_v13, %v16303_v23  ;;  %v6494_v41 = vpop.f32.mrb[207].mxu0  ;;  %12088 = vmatmul.mubr.f32.gmra.mrb[196].mxu1 %v6564_v33 }
 0xde9   : > { %v6565_v56 = vmul.f32 %v6494_v41, %v16303_v23 }
 0xdeb   : > { %12090 = vmatprep.mubr.f32.mxu1 %v6565_v56 }
 0xdec   : > { %12091 = vmatmul.mubr.f32.gmra.mrb[198].mxu1 %v6566_v25 }
 0xded   : > { %8337 = vmatprep.mubr.f32.mxu1 %v13407_v49 }
 0xe43   : > { %v11999_v59 = vpop.f32.mrb[136].mxu1 }
 0xe44   : > { %v6953_v28 = vadd.f32 %v11999_v59, %v2041_v62  ;;  %v6633_v44 = vpop.f32.mrb[137].mxu1 }
 0xe45   : > { %v6952_v40 = vadd.f32 %v6633_v44, %v2041_v62 }
 0xe46   : > { %v7022_v34 = vrot.slane %v6953_v28, 4 }
 0xe47   : > { %v7016_v0 = vrot.slane %v6952_v40, 4  ;;  %v12002_v47 = vpop.f32.mrb[138].mxu1 }
 0xe48   : > { %v7023_v4 = vmax.f32 %v6953_v28, %v7022_v34  ;;  %v16477_v14 = vadd.f32 %v12002_v47, %v2041_v62  ;;  %v6643_v57 = vpop.f32.mrb[139].mxu1 }
 0xe49   : > { %v7017_v27 = vmax.f32 %v6952_v40, %v7016_v0  ;;  %v16479_v7 = vadd.f32 %v6643_v57, %v2041_v62 }
 0xe4a   : > { %v7024_v23 = vrot.slane %v7023_v4, 2  ;;  %v7034_v43 = vrot.slane %v16477_v14, 4 }
 0xe4b   : > { %v7018_v12 = vrot.slane %v7017_v27, 2  ;;  %v7028_v6 = vrot.slane %v16479_v7, 4  ;;  %v12005_v54 = vpop.f32.mrb[140].mxu1 }
 0xe4c   : > { %v7025_v52 = vmax.f32 %v7023_v4, %v7024_v23  ;;  %v7035_v63 = vmax.f32 %v16477_v14, %v7034_v43  ;;  %v16484_v19 = vadd.f32 %v12005_v54, %v2041_v62  ;;  %v6653_v58 = vpop.f32.mrb[141].mxu1 }
 0xe4d   : > { %v7019_v55 = vmax.f32 %v7017_v27, %v7018_v12  ;;  %v7029_v38 = vmax.f32 %v16479_v7, %v7028_v6  ;;  %v16491_v31 = vadd.f32 %v6653_v58, %v2041_v62 }
 0xe4e   : > { %v7026_v17 = vrot.slane %v7025_v52, 1  ;;  %v7036_v50 = vrot.slane %v7035_v63, 2  ;;  %v7046_v42 = vrot.slane %v16484_v19, 4 }
 0xe4f   : > { %v7020_v45 = vrot.slane %v7019_v55, 1  ;;  %v7030_v26 = vrot.slane %v7029_v38, 2  ;;  %v7040_v51 = vrot.slane %v16491_v31, 4  ;;  %v12008_v3 = vpop.f32.mrb[142].mxu1 }
 0xe50   : > { %v7027_v33 = vmax.f32 %v7025_v52, %v7026_v17  ;;  %v7037_v18 = vmax.f32 %v7035_v63, %v7036_v50  ;;  %v7047_v21 = vmax.f32 %v16484_v19, %v7046_v42  ;;  %v16504_v13 = vadd.f32 %v12008_v3, %v2041_v62  ;;  %v6663_v11 = vpop.f32.mrb[143].mxu1  ;;  %v16514_v63 = vld [vmem:[%s18098_s17 + $0x8] sm:$0xff] }
 0xe51   : > { %v7021_v25 = vmax.f32 %v7019_v55, %v7020_v45  ;;  %v7031_v41 = vmax.f32 %v7029_v38, %v7030_v26  ;;  %v7041_v56 = vmax.f32 %v16491_v31, %v7040_v51  ;;  %v16507_v49 = vadd.f32 %v6663_v11, %v2041_v62 }
 0xe52   : > { %v7401_v29 = vsub.f32 %v6953_v28, %v7027_v33  ;;  %v7038_v22 = vrot.slane %v7037_v18, 1  ;;  %v7048_v59 = vrot.slane %v7047_v21, 2  ;;  %v7058_v44 = vrot.slane %v16504_v13, 4 }
 0xe53   : > { %v7400_v34 = vsub.f32 %v6952_v40, %v7021_v25  ;;  %v7032_v0 = vrot.slane %v7031_v41, 1  ;;  %v7042_v47 = vrot.slane %v7041_v56, 2  ;;  %v7052_v4 = vrot.slane %v16507_v49, 4  ;;  %v12011_v57 = vpop.f32.mrb[144].mxu1 }
 0xe54   : > { %v7466_v27 = vmul.f32 1.442695, %v7401_v29  ;;  %v7039_v23 = vmax.f32 %v7037_v18, %v7038_v22  ;;  %v7049_v43 = vmax.f32 %v7047_v21, %v7048_v59  ;;  %v7059_v12 = vmax.f32 %v16504_v13, %v7058_v44  ;;  %v6673_v6 = vpop.f32.mrb[145].mxu1 }
 0xe55   : > { %v7464_v62 = vmul.f32 1.442695, %v7400_v34  ;;  %v7033_v54 = vmax.f32 %v7031_v41, %v7032_v0  ;;  %v7043_v28 = vmax.f32 %v7041_v56, %v7042_v47  ;;  %v7053_v52 = vmax.f32 %v16507_v49, %v7052_v4 }
 0xe56   : > { %13078 = vpow2.f32 %v7466_v27  ;;  %v7403_v40 = vsub.f32 %v16477_v14, %v7039_v23  ;;  %v7050_v58 = vrot.slane %v7049_v43, 1  ;;  %v7060_v55 = vrot.slane %v7059_v12, 2 }
 0xe57   : > { %13080 = vpow2.f32 %v7464_v62  ;;  %v7402_v38 = vsub.f32 %v16479_v7, %v7033_v54  ;;  %v7044_v17 = vrot.slane %v7043_v28, 1  ;;  %v7054_v50 = vrot.slane %v7053_v52, 2  ;;  %v12014_v42 = vpop.f32.mrb[146].mxu1 }
 0xe58   : > { %v7470_v45 = vmul.f32 1.442695, %v7403_v40  ;;  %v7051_v26 = vmax.f32 %v7049_v43, %v7050_v58  ;;  %v7061_v51 = vmax.f32 %v7059_v12, %v7060_v55  ;;  %v16519_v3 = vadd.f32 %v12011_v57, %v16514_v63  ;;  %v6683_v33 = vpop.f32.mrb[147].mxu1 }
 0xe59   : > { %v7468_v18 = vmul.f32 1.442695, %v7402_v38  ;;  %v7045_v21 = vmax.f32 %v7043_v28, %v7044_v17  ;;  %v7055_v11 = vmax.f32 %v7053_v52, %v7054_v50  ;;  %v16522_v14 = vadd.f32 %v6673_v6, %v16514_v63 }
 0xe5a   : > { %13082 = vpow2.f32 %v7470_v45  ;;  %v7405_v25 = vsub.f32 %v16484_v19, %v7051_v26  ;;  %v7062_v7 = vrot.slane %v7061_v51, 1  ;;  %v7070_v41 = vrot.slane %v16519_v3, 4 }
 0xe5b   : > { %13084 = vpow2.f32 %v7468_v18  ;;  %v7404_v56 = vsub.f32 %v16491_v31, %v7045_v21  ;;  %v7056_v29 = vrot.slane %v7055_v11, 1  ;;  %v7064_v22 = vrot.slane %v16522_v14, 4  ;;  %v12017_v59 = vpop.f32.mrb[148].mxu1 }
 0xe5c   : > { %v7474_v44 = vmul.f32 1.442695, %v7405_v25  ;;  %v7063_v34 = vmax.f32 %v7061_v51, %v7062_v7  ;;  %v7071_v0 = vmax.f32 %v16519_v3, %v7070_v41  ;;  %v16530_v47 = vadd.f32 %v12014_v42, %v16514_v63  ;;  %v6693_v4 = vpop.f32.mrb[149].mxu1 }
 0xe5d   : > { %v7472_v57 = vmul.f32 1.442695, %v7404_v56  ;;  %v7057_v19 = vmax.f32 %v7055_v11, %v7056_v29  ;;  %v7065_v27 = vmax.f32 %v16522_v14, %v7064_v22  ;;  %v16534_v23 = vadd.f32 %v6683_v33, %v16514_v63 }
 0xe5e   : > { %13086 = vpow2.f32 %v7474_v44  ;;  %v7407_v31 = vsub.f32 %v16504_v13, %v7063_v34  ;;  %v7072_v43 = vrot.slane %v7071_v0, 2  ;;  %v7082_v12 = vrot.slane %v16530_v47, 4 }
 0xe5f   : > { %13088 = vpow2.f32 %v7472_v57  ;;  %v7406_v6 = vsub.f32 %v16507_v49, %v7057_v19  ;;  %v7066_v62 = vrot.slane %v7065_v27, 2  ;;  %v7076_v54 = vrot.slane %v16534_v23, 4  ;;  %v12020_v28 = vpop.f32.mrb[150].mxu1 }
 0xe60   : > { %v16540_v52 = vpop.eup %13078  ;;  %v7478_v40 = vmul.f32 1.442695, %v7407_v31  ;;  %v7073_v58 = vmax.f32 %v7071_v0, %v7072_v43  ;;  %v7083_v55 = vmax.f32 %v16530_v47, %v7082_v12  ;;  %v16544_v38 = vadd.f32 %v12017_v59, %v16514_v63  ;;  %v6703_v13 = vpop.f32.mrb[151].mxu1 }
 0xe61   : > { %v16546_v17 = vpop.eup %13080  ;;  %v7476_v50 = vmul.f32 1.442695, %v7406_v6  ;;  %v7067_v42 = vmax.f32 %v7065_v27, %v7066_v62  ;;  %v7077_v49 = vmax.f32 %v16534_v23, %v7076_v54  ;;  %v16550_v45 = vadd.f32 %v6693_v4, %v16514_v63 }
 0xe62   : > { %13090 = vpow2.f32 %v7478_v40  ;;  %v7074_v26 = vrot.slane %v7073_v58, 1  ;;  %v7084_v51 = vrot.slane %v7083_v55, 2  ;;  %v7094_v33 = vrot.slane %v16544_v38, 4 }
 0xe63   : > { %13092 = vpow2.f32 %v7476_v50  ;;  %v7068_v18 = vrot.slane %v7067_v42, 1  ;;  %v7078_v21 = vrot.slane %v7077_v49, 2  ;;  %v7088_v11 = vrot.slane %v16550_v45, 4  ;;  %v12023_v25 = vpop.f32.mrb[152].mxu1 }
 0xe64   : > { %v16554_v7 = vpop.eup %13082  ;;  %v7075_v41 = vmax.f32 %v7073_v58, %v7074_v26  ;;  %v7085_v56 = vmax.f32 %v7083_v55, %v7084_v51  ;;  %v7095_v29 = vmax.f32 %v16544_v38, %v7094_v33  ;;  %v16558_v22 = vadd.f32 %v12020_v28, %v16514_v63  ;;  %v6713_v59 = vpop.f32.mrb[153].mxu1  ;;  %v16577_v51 = vld [vmem:[%s18098_s17 + $0x10] sm:$0xff] }
 0xe65   : > { %v16560_v44 = vpop.eup %13084  ;;  %v7069_v34 = vmax.f32 %v7067_v42, %v7068_v18  ;;  %v7079_v0 = vmax.f32 %v7077_v49, %v7078_v21  ;;  %v7089_v4 = vmax.f32 %v16550_v45, %v7088_v11  ;;  %v16564_v57 = vadd.f32 %v6703_v13, %v16514_v63 }
 0xe66   : > { %v7409_v19 = vsub.f32 %v16519_v3, %v7075_v41  ;;  %v7086_v27 = vrot.slane %v7085_v56, 1  ;;  %v7096_v31 = vrot.slane %v7095_v29, 2  ;;  %v7106_v43 = vrot.slane %v16558_v22, 4 }
 0xe67   : > { %v7408_v12 = vsub.f32 %v16522_v14, %v7069_v34  ;;  %v7080_v6 = vrot.slane %v7079_v0, 1  ;;  %v7090_v62 = vrot.slane %v7089_v4, 2  ;;  %v7100_v54 = vrot.slane %v16564_v57, 4  ;;  %v12026_v28 = vpop.f32.mrb[154].mxu1 }
 0xe68   : > { %v16570_v40 = vpop.eup %13086  ;;  %v7482_v58 = vmul.f32 1.442695, %v7409_v19  ;;  %v7087_v55 = vmax.f32 %v7085_v56, %v7086_v27  ;;  %v7097_v63 = vmax.f32 %v7095_v29, %v7096_v31  ;;  %v7107_v13 = vmax.f32 %v16558_v22, %v7106_v43  ;;  %v6723_v3 = vpop.f32.mrb[155].mxu1 }
 0xe69   : > { %v16573_v50 = vpop.eup %13088  ;;  %v7480_v42 = vmul.f32 1.442695, %v7408_v12  ;;  %v7081_v49 = vmax.f32 %v7079_v0, %v7080_v6  ;;  %v7091_v26 = vmax.f32 %v7089_v4, %v7090_v62  ;;  %v7101_v14 = vmax.f32 %v16564_v57, %v7100_v54 }
 0xe6a   : > { %13094 = vpow2.f32 %v7482_v58  ;;  %v7411_v33 = vsub.f32 %v16530_v47, %v7087_v55  ;;  %v7098_v18 = vrot.slane %v7097_v63, 1  ;;  %v7108_v21 = vrot.slane %v7107_v13, 2 }
 0xe6b   : > { %13096 = vpow2.f32 %v7480_v42  ;;  %v7410_v11 = vsub.f32 %v16534_v23, %v7081_v49  ;;  %v7092_v41 = vrot.slane %v7091_v26, 1  ;;  %v7102_v56 = vrot.slane %v7101_v14, 2  ;;  %v12029_v29 = vpop.f32.mrb[156].mxu1 }
 0xe6c   : > { %v16581_v34 = vpop.eup %13090  ;;  %v7486_v19 = vmul.f32 1.442695, %v7411_v33  ;;  %v7099_v0 = vmax.f32 %v7097_v63, %v7098_v18  ;;  %v7109_v4 = vmax.f32 %v7107_v13, %v7108_v21  ;;  %v16584_v27 = vadd.f32 %v12023_v25, %v16577_v51  ;;  %v6733_v31 = vpop.f32.mrb[157].mxu1 }
 0xe6d   : > { %v16586_v43 = vpop.eup %13092  ;;  %v7484_v47 = vmul.f32 1.442695, %v7410_v11  ;;  %v7093_v12 = vmax.f32 %v7091_v26, %v7092_v41  ;;  %v7103_v6 = vmax.f32 %v7101_v14, %v7102_v56  ;;  %v16589_v62 = vadd.f32 %v6713_v59, %v16577_v51 }
 0xe6e   : > { %13098 = vpow2.f32 %v7486_v19  ;;  %v7413_v23 = vsub.f32 %v16544_v38, %v7099_v0  ;;  %v7110_v54 = vrot.slane %v7109_v4, 1  ;;  %v7118_v58 = vrot.slane %v16584_v27, 4 }
 0xe6f   : > { %13100 = vpow2.f32 %v7484_v47  ;;  %v7412_v55 = vsub.f32 %v16550_v45, %v7093_v12  ;;  %v7104_v25 = vrot.slane %v7103_v6, 1  ;;  %v7112_v63 = vrot.slane %v16589_v62, 4  ;;  %v12032_v13 = vpop.f32.mrb[158].mxu1 }
 0xe70   : > { %v7490_v42 = vmul.f32 1.442695, %v7413_v23  ;;  %v7111_v49 = vmax.f32 %v7109_v4, %v7110_v54  ;;  %v7119_v26 = vmax.f32 %v16584_v27, %v7118_v58  ;;  %v16597_v59 = vadd.f32 %v12026_v28, %v16577_v51  ;;  %v6743_v14 = vpop.f32.mrb[159].mxu1 }
 0xe71   : > { %v7488_v33 = vmul.f32 1.442695, %v7412_v55  ;;  %v7105_v38 = vmax.f32 %v7103_v6, %v7104_v25  ;;  %v7113_v18 = vmax.f32 %v16589_v62, %v7112_v63  ;;  %v16601_v21 = vadd.f32 %v6723_v3, %v16577_v51 }
 0xe72   : > { %13102 = vpow2.f32 %v7490_v42  ;;  %v7415_v45 = vsub.f32 %v16558_v22, %v7111_v49  ;;  %v7120_v11 = vrot.slane %v7119_v26, 2  ;;  %v7130_v41 = vrot.slane %v16597_v59, 4 }
 0xe73   : > { %13104 = vpow2.f32 %v7488_v33  ;;  %v7414_v56 = vsub.f32 %v16564_v57, %v7105_v38  ;;  %v7114_v19 = vrot.slane %v7113_v18, 2  ;;  %v7124_v28 = vrot.slane %v16601_v21, 4  ;;  %v16607_v0 = vpop.f32.mrb[160].mxu1 }
 0xe74   : > { %v16609_v4 = vpop.eup %13094  ;;  %v7494_v47 = vmul.f32 1.442695, %v7415_v45  ;;  %v7121_v12 = vmax.f32 %v7119_v26, %v7120_v11  ;;  %v7131_v3 = vmax.f32 %v16597_v59, %v7130_v41  ;;  %v16613_v6 = vadd.f32 %v12029_v29, %v16577_v51  ;;  %v16615_v22 = vpop.f32.mrb[161].mxu1 }
 0xe75   : > { %v16617_v23 = vpop.eup %13096  ;;  %v7492_v54 = vmul.f32 1.442695, %v7414_v56  ;;  %v7115_v57 = vmax.f32 %v7113_v18, %v7114_v19  ;;  %v7125_v58 = vmax.f32 %v16601_v21, %v7124_v28  ;;  %v16621_v55 = vadd.f32 %v6733_v31, %v16577_v51 }
 0xe76   : > { %13106 = vpow2.f32 %v7494_v47  ;;  %v7122_v25 = vrot.slane %v7121_v12, 1  ;;  %v7132_v63 = vrot.slane %v7131_v3, 2  ;;  %v7142_v42 = vrot.slane %v16613_v6, 4 }
 0xe77   : > { %13108 = vpow2.f32 %v7492_v54  ;;  %v7116_v49 = vrot.slane %v7115_v57, 1  ;;  %v7126_v29 = vrot.slane %v7125_v58, 2  ;;  %v7136_v26 = vrot.slane %v16621_v55, 4  ;;  %v16625_v33 = vpop.f32.mrb[162].mxu1 }
 0xe78   : > { %v16627_v38 = vpop.eup %13098  ;;  %v7123_v18 = vmax.f32 %v7121_v12, %v7122_v25  ;;  %v7133_v45 = vmax.f32 %v7131_v3, %v7132_v63  ;;  %v7143_v11 = vmax.f32 %v16613_v6, %v7142_v42  ;;  %v16631_v31 = vadd.f32 %v12032_v13, %v16577_v51  ;;  %v16633_v41 = vpop.f32.mrb[163].mxu1 }
 0xe79   : > { %18100 = vst [vmem:[#allocation78_spill] sm:$0xff] %v16627_v38  ;;  %v16635_v56 = vpop.eup %13100  ;;  %v7117_v19 = vmax.f32 %v7115_v57, %v7116_v49  ;;  %v7127_v28 = vmax.f32 %v7125_v58, %v7126_v29  ;;  %v7137_v47 = vmax.f32 %v16621_v55, %v7136_v26  ;;  %v16639_v54 = vadd.f32 %v6743_v14, %v16577_v51 }
 0xe7a   : > { %18101 = vst [vmem:[#allocation87_spill] sm:$0xff] %v16635_v56  ;;  %v7417_v61 = vsub.f32 %v16584_v27, %v7123_v18  ;;  %v7134_v12 = vrot.slane %v7133_v45, 1  ;;  %v7144_v3 = vrot.slane %v7143_v11, 2  ;;  %v7154_v25 = vrot.slane %v16631_v31, 4 }
 0xe7b   : > { %v7416_v13 = vsub.f32 %v16589_v62, %v7117_v19  ;;  %v7128_v63 = vrot.slane %v7127_v28, 1  ;;  %v7138_v42 = vrot.slane %v7137_v47, 2  ;;  %v7148_v35 = vrot.slane %v16639_v54, 4  ;;  %v16645_v57 = vpop.f32.mrb[164].mxu1 }
 0xe7c   : > { %v16647_v58 = vpop.eup %13102  ;;  %v7498_v49 = vmul.f32 1.442695, %v7417_v61  ;;  %v7135_v51 = vmax.f32 %v7133_v45, %v7134_v12  ;;  %v7145_v14 = vmax.f32 %v7143_v11, %v7144_v3  ;;  %v7155_v27 = vmax.f32 %v16631_v31, %v7154_v25  ;;  %v16650_v29 = vpop.f32.mrb[165].mxu1 }
 0xe7d   : > { %18102 = vst [vmem:[#allocation86_spill] sm:$0xff] %v16647_v58  ;;  %v16652_v26 = vpop.eup %13104  ;;  %v7496_v18 = vmul.f32 1.442695, %v7416_v13  ;;  %v7129_v62 = vmax.f32 %v7127_v28, %v7128_v63  ;;  %v7139_v19 = vmax.f32 %v7137_v47, %v7138_v42  ;;  %v7149_v5 = vmax.f32 %v16639_v54, %v7148_v35 }
 0xe7e   : > { %18103 = vst [vmem:[#allocation90_spill] sm:$0xff] %v16652_v26  ;;  %13110 = vpow2.f32 %v7498_v49  ;;  %v7419_v30 = vsub.f32 %v16597_v59, %v7135_v51  ;;  %v7146_v2 = vrot.slane %v7145_v14, 1  ;;  %v7156_v61 = vrot.slane %v7155_v27, 2 }
 0xe7f   : > { %13112 = vpow2.f32 %v7496_v18  ;;  %v7418_v45 = vsub.f32 %v16601_v21, %v7129_v62  ;;  %v7140_v11 = vrot.slane %v7139_v19, 1  ;;  %v7150_v12 = vrot.slane %v7149_v5, 2  ;;  %v16660_v3 = vpop.f32.mrb[166].mxu1 }
 0xe80   : > { %v16662_v25 = vpop.eup %13106  ;;  %v7502_v28 = vmul.f32 1.442695, %v7419_v30  ;;  %v7147_v47 = vmax.f32 %v7145_v14, %v7146_v2  ;;  %v7157_v13 = vmax.f32 %v7155_v27, %v7156_v61  ;;  %v16666_v35 = vadd.f32 %v16607_v0, %v16656_v8  ;;  %v16668_v63 = vpop.f32.mrb[167].mxu1 }
 0xe81   : > { %18104 = vst [vmem:[#allocation88_spill] sm:$0xff] %v16662_v25  ;;  %v16670_v59 = vpop.eup %13108  ;;  %v7500_v42 = vmul.f32 1.442695, %v7418_v45  ;;  %v7141_v49 = vmax.f32 %v7139_v19, %v7140_v11  ;;  %v7151_v21 = vmax.f32 %v7149_v5, %v7150_v12  ;;  %v16674_v51 = vadd.f32 %v16615_v22, %v16656_v8 }
 0xe82   : > { %18105 = vst [vmem:[#allocation67_spill] sm:$0xff] %v16670_v59  ;;  %13114 = vpow2.f32 %v7502_v28  ;;  %v7421_v30 = vsub.f32 %v16613_v6, %v7147_v47  ;;  %v7158_v2 = vrot.slane %v7157_v13, 1  ;;  %v7166_v14 = vrot.slane %v16666_v35, 4 }
 0xe83   : > { %13116 = vpow2.f32 %v7500_v42  ;;  %v7420_v0 = vsub.f32 %v16621_v55, %v7141_v49  ;;  %v7152_v27 = vrot.slane %v7151_v21, 1  ;;  %v7160_v18 = vrot.slane %v16674_v51, 4  ;;  %v16680_v62 = vpop.f32.mrb[168].mxu1 }
 0xe84   : > { %v7506_v19 = vmul.f32 1.442695, %v7421_v30  ;;  %v7159_v5 = vmax.f32 %v7157_v13, %v7158_v2  ;;  %v7167_v61 = vmax.f32 %v16666_v35, %v7166_v14  ;;  %v16685_v22 = vadd.f32 %v16625_v33, %v16656_v8  ;;  %v16687_v6 = vpop.f32.mrb[169].mxu1 }
 0xe85   : > { %v7504_v45 = vmul.f32 1.442695, %v7420_v0  ;;  %v7153_v11 = vmax.f32 %v7151_v21, %v7152_v27  ;;  %v7161_v12 = vmax.f32 %v16674_v51, %v7160_v18  ;;  %v16692_v55 = vadd.f32 %v16633_v41, %v16656_v8 }
 0xe86   : > { %13118 = vpow2.f32 %v7506_v19  ;;  %v7423_v28 = vsub.f32 %v16631_v31, %v7159_v5  ;;  %v7168_v47 = vrot.slane %v7167_v61, 2  ;;  %v7178_v13 = vrot.slane %v16685_v22, 4 }
 0xe87   : > { %13120 = vpow2.f32 %v7504_v45  ;;  %v7422_v33 = vsub.f32 %v16639_v54, %v7153_v11  ;;  %v7162_v42 = vrot.slane %v7161_v12, 2  ;;  %v7172_v49 = vrot.slane %v16692_v55, 4  ;;  %v16698_v30 = vpop.f32.mrb[170].mxu1 }
 0xe88   : > { %v16700_v21 = vpop.eup %13110  ;;  %v7510_v2 = vmul.f32 1.442695, %v7423_v28  ;;  %v7169_v14 = vmax.f32 %v7167_v61, %v7168_v47  ;;  %v7179_v41 = vmax.f32 %v16685_v22, %v7178_v13  ;;  %v16705_v31 = vadd.f32 %v16645_v57, %v16656_v8  ;;  %v16707_v0 = vpop.f32.mrb[171].mxu1 }
 0xe89   : > { %v16709_v27 = vpop.eup %13112  ;;  %v7508_v54 = vmul.f32 1.442695, %v7422_v33  ;;  %v7163_v18 = vmax.f32 %v7161_v12, %v7162_v42  ;;  %v7173_v19 = vmax.f32 %v16692_v55, %v7172_v49  ;;  %v16714_v5 = vadd.f32 %v16650_v29, %v16656_v8 }
 0xe8a   : > { %13122 = vpow2.f32 %v7510_v2  ;;  %v7170_v61 = vrot.slane %v7169_v14, 1  ;;  %v7180_v45 = vrot.slane %v7179_v41, 2  ;;  %v7190_v11 = vrot.slane %v16705_v31, 4 }
 0xe8b   : > { %13124 = vpow2.f32 %v7508_v54  ;;  %v7164_v57 = vrot.slane %v7163_v18, 1  ;;  %v7174_v28 = vrot.slane %v7173_v19, 2  ;;  %v7184_v47 = vrot.slane %v16714_v5, 4  ;;  %v16718_v13 = vpop.f32.mrb[172].mxu1 }
 0xe8c   : > { %v16720_v33 = vpop.eup %13114  ;;  %v7171_v12 = vmax.f32 %v7169_v14, %v7170_v61  ;;  %v7181_v42 = vmax.f32 %v7179_v41, %v7180_v45  ;;  %v7191_v49 = vmax.f32 %v16705_v31, %v7190_v11  ;;  %v16725_v29 = vadd.f32 %v16660_v3, %v16656_v8  ;;  %v16727_v2 = vpop.f32.mrb[173].mxu1 }
 0xe8d   : > { %v16729_v15 = vpop.eup %13116  ;;  %v7165_v54 = vmax.f32 %v7163_v18, %v7164_v57  ;;  %v7175_v48 = vmax.f32 %v7173_v19, %v7174_v28  ;;  %v7185_v9 = vmax.f32 %v16714_v5, %v7184_v47  ;;  %v16734_v16 = vadd.f32 %v16668_v63, %v16656_v8 }
 0xe8e   : > { %v7425_v14 = vsub.f32 %v16666_v35, %v7171_v12  ;;  %v7182_v41 = vrot.slane %v7181_v42, 1  ;;  %v7192_v61 = vrot.slane %v7191_v49, 2  ;;  %v7202_v45 = vrot.slane %v16725_v29, 4 }
 0xe8f   : > { %v7424_v3 = vsub.f32 %v16674_v51, %v7165_v54  ;;  %v7176_v11 = vrot.slane %v7175_v48, 1  ;;  %v7186_v46 = vrot.slane %v7185_v9, 2  ;;  %v7196_v18 = vrot.slane %v16734_v16, 4  ;;  %v16740_v19 = vpop.f32.mrb[174].mxu1 }
 0xe90   : > { %v16742_v57 = vpop.eup %13118  ;;  %v7514_v28 = vmul.f32 1.442695, %v7425_v14  ;;  %v7183_v8 = vmax.f32 %v7181_v42, %v7182_v41  ;;  %v7193_v63 = vmax.f32 %v7191_v49, %v7192_v61  ;;  %v7203_v35 = vmax.f32 %v16725_v29, %v7202_v45  ;;  %v16745_v47 = vpop.f32.mrb[175].mxu1 }
 0xe91   : > { %v16747_v12 = vpop.eup %13120  ;;  %v7512_v24 = vmul.f32 1.442695, %v7424_v3  ;;  %v7177_v51 = vmax.f32 %v7175_v48, %v7176_v11  ;;  %v7187_v54 = vmax.f32 %v7185_v9, %v7186_v46  ;;  %v7197_v60 = vmax.f32 %v16734_v16, %v7196_v18 }
 0xe92   : > { %13126 = vpow2.f32 %v7514_v28  ;;  %v7427_v20 = vsub.f32 %v16685_v22, %v7183_v8  ;;  %v7194_v10 = vrot.slane %v7193_v63, 1  ;;  %v7204_v14 = vrot.slane %v7203_v35, 2 }
 0xe93   : > { %13128 = vpow2.f32 %v7512_v24  ;;  %v7426_v42 = vsub.f32 %v16692_v55, %v7177_v51  ;;  %v7188_v49 = vrot.slane %v7187_v54, 1  ;;  %v7198_v41 = vrot.slane %v7197_v60, 2  ;;  %v16755_v61 = vpop.f32.mrb[176].mxu1 }
 0xe94   : > { %v16757_v45 = vpop.eup %13122  ;;  %v7518_v48 = vmul.f32 1.442695, %v7427_v20  ;;  %v7195_v46 = vmax.f32 %v7193_v63, %v7194_v10  ;;  %v7205_v9 = vmax.f32 %v7203_v35, %v7204_v14  ;;  %v16761_v3 = vadd.f32 %v16680_v62, %v16751_v32  ;;  %v16763_v11 = vpop.f32.mrb[177].mxu1 }
 0xe95   : > { %v16765_v22 = vpop.eup %13124  ;;  %v7516_v24 = vmul.f32 1.442695, %v7426_v42  ;;  %v7189_v18 = vmax.f32 %v7187_v54, %v7188_v49  ;;  %v7199_v55 = vmax.f32 %v7197_v60, %v7198_v41  ;;  %v16769_v28 = vadd.f32 %v16687_v6, %v16751_v32 }
 0xe96   : > { %13130 = vpow2.f32 %v7518_v48  ;;  %v7429_v20 = vsub.f32 %v16705_v31, %v7195_v46  ;;  %v7206_v10 = vrot.slane %v7205_v9, 1  ;;  %v7214_v8 = vrot.slane %v16761_v3, 4 }
 0xe97   : > { %13132 = vpow2.f32 %v7516_v24  ;;  %v7428_v62 = vsub.f32 %v16714_v5, %v7189_v18  ;;  %v7200_v63 = vrot.slane %v7199_v55, 1  ;;  %v7208_v35 = vrot.slane %v16769_v28, 4  ;;  %v16775_v51 = vpop.f32.mrb[178].mxu1 }
 0xe98   : > { %v7522_v54 = vmul.f32 1.442695, %v7429_v20  ;;  %v7207_v60 = vmax.f32 %v7205_v9, %v7206_v10  ;;  %v7215_v14 = vmax.f32 %v16761_v3, %v7214_v8  ;;  %v16780_v6 = vadd.f32 %v16698_v30, %v16751_v32  ;;  %v16782_v31 = vpop.f32.mrb[179].mxu1 }
 0xe99   : > { %v7520_v42 = vmul.f32 1.442695, %v7428_v62  ;;  %v7201_v49 = vmax.f32 %v7199_v55, %v7200_v63  ;;  %v7209_v41 = vmax.f32 %v16769_v28, %v7208_v35  ;;  %v16787_v5 = vadd.f32 %v16707_v0, %v16751_v32 }
 0xe9a   : > { %13134 = vpow2.f32 %v7522_v54  ;;  %v7431_v48 = vsub.f32 %v16725_v29, %v7207_v60  ;;  %v7216_v46 = vrot.slane %v7215_v14, 2  ;;  %v7226_v9 = vrot.slane %v16780_v6, 4 }
 0xe9b   : > { %13136 = vpow2.f32 %v7520_v42  ;;  %v7430_v30 = vsub.f32 %v16734_v16, %v7201_v49  ;;  %v7210_v24 = vrot.slane %v7209_v41, 2  ;;  %v7220_v18 = vrot.slane %v16787_v5, 4  ;;  %v16793_v20 = vpop.f32.mrb[180].mxu1 }
 0xe9c   : > { %v16795_v55 = vpop.eup %13126  ;;  %v7526_v10 = vmul.f32 1.442695, %v7431_v48  ;;  %v7217_v8 = vmax.f32 %v7215_v14, %v7216_v46  ;;  %v7227_v0 = vmax.f32 %v16780_v6, %v7226_v9  ;;  %v16800_v29 = vadd.f32 %v16718_v13, %v16751_v32  ;;  %v16802_v62 = vpop.f32.mrb[181].mxu1 }
 0xe9d   : > { %v16804_v63 = vpop.eup %13128  ;;  %v7524_v16 = vmul.f32 1.442695, %v7430_v30  ;;  %v7211_v35 = vmax.f32 %v7209_v41, %v7210_v24  ;;  %v7221_v54 = vmax.f32 %v16787_v5, %v7220_v18  ;;  %v16809_v60 = vadd.f32 %v16727_v2, %v16751_v32 }
 0xe9e   : > { %13138 = vpow2.f32 %v7526_v10  ;;  %v7218_v14 = vrot.slane %v7217_v8, 1  ;;  %v7228_v42 = vrot.slane %v7227_v0, 2  ;;  %v7238_v49 = vrot.slane %v16800_v29, 4 }
 0xe9f   : > { %13140 = vpow2.f32 %v7524_v16  ;;  %v7212_v13 = vrot.slane %v7211_v35, 1  ;;  %v7222_v48 = vrot.slane %v7221_v54, 2  ;;  %v7232_v46 = vrot.slane %v16809_v60, 4  ;;  %v16813_v9 = vpop.f32.mrb[182].mxu1 }
 0xea0   : > { %v16815_v30 = vpop.eup %13130  ;;  %v7219_v41 = vmax.f32 %v7217_v8, %v7218_v14  ;;  %v7229_v24 = vmax.f32 %v7227_v0, %v7228_v42  ;;  %v7239_v18 = vmax.f32 %v16800_v29, %v7238_v49  ;;  %v16820_v2 = vadd.f32 %v16740_v19, %v16751_v32  ;;  %v16822_v10 = vpop.f32.mrb[183].mxu1 }
 0xea1   : > { %18106 = vst [vmem:[#allocation92_spill] sm:$0xff] %v16815_v30  ;;  %v16824_v1 = vpop.eup %13132  ;;  %v7213_v16 = vmax.f32 %v7211_v35, %v7212_v13  ;;  %v7223_v25 = vmax.f32 %v7221_v54, %v7222_v48  ;;  %v7233_v59 = vmax.f32 %v16809_v60, %v7232_v46  ;;  %v16829_v58 = vadd.f32 %v16745_v47, %v16751_v32 }
 0xea2   : > { %18107 = vst [vmem:[#allocation94_spill] sm:$0xff] %v16824_v1  ;;  %v7433_v8 = vsub.f32 %v16761_v3, %v7219_v41  ;;  %v7230_v0 = vrot.slane %v7229_v24, 1  ;;  %v7240_v14 = vrot.slane %v7239_v18, 2  ;;  %v7250_v42 = vrot.slane %v16820_v2, 4 }
 0xea3   : > { %v7432_v19 = vsub.f32 %v16769_v28, %v7213_v16  ;;  %v7224_v49 = vrot.slane %v7223_v25, 1  ;;  %v7234_v26 = vrot.slane %v7233_v59, 2  ;;  %v7244_v35 = vrot.slane %v16829_v58, 4  ;;  %v16835_v54 = vpop.f32.mrb[184].mxu1 }
 0xea4   : > { %v16837_v13 = vpop.eup %13134  ;;  %v7530_v48 = vmul.f32 1.442695, %v7433_v8  ;;  %v7231_v32 = vmax.f32 %v7229_v24, %v7230_v0  ;;  %v7241_v47 = vmax.f32 %v7239_v18, %v7240_v14  ;;  %v7251_v3 = vmax.f32 %v16820_v2, %v7250_v42  ;;  %v16840_v46 = vpop.f32.mrb[185].mxu1 }
 0xea5   : > { %18108 = vst [vmem:[#allocation68_spill] sm:$0xff] %v16837_v13  ;;  %v16842_v41 = vpop.eup %13136  ;;  %v7528_v36 = vmul.f32 1.442695, %v7432_v19  ;;  %v7225_v28 = vmax.f32 %v7223_v25, %v7224_v49  ;;  %v7235_v16 = vmax.f32 %v7233_v59, %v7234_v26  ;;  %v7245_v38 = vmax.f32 %v16829_v58, %v7244_v35 }
 0xea6   : > { %18109 = vst [vmem:[#allocation93_spill] sm:$0xff] %v16842_v41  ;;  %13142 = vpow2.f32 %v7530_v48  ;;  %v7435_v56 = vsub.f32 %v16780_v6, %v7231_v32  ;;  %v7242_v13 = vrot.slane %v7241_v47, 1  ;;  %v7252_v8 = vrot.slane %v7251_v3, 2 }
 0xea7   : > { %13144 = vpow2.f32 %v7528_v36  ;;  %v7434_v24 = vsub.f32 %v16787_v5, %v7225_v28  ;;  %v7236_v18 = vrot.slane %v7235_v16, 1  ;;  %v7246_v0 = vrot.slane %v7245_v38, 2  ;;  %v16850_v14 = vpop.f32.mrb[186].mxu1 }
 0xea8   : > { %v16852_v42 = vpop.eup %13138  ;;  %v7534_v25 = vmul.f32 1.442695, %v7435_v56  ;;  %v7243_v26 = vmax.f32 %v7241_v47, %v7242_v13  ;;  %v7253_v59 = vmax.f32 %v7251_v3, %v7252_v8  ;;  %v16856_v19 = vadd.f32 %v16755_v61, %v16846_v53  ;;  %v16858_v49 = vpop.f32.mrb[187].mxu1 }
 0xea9   : > { %18110 = vst [vmem:[#allocation96_spill] sm:$0xff] %v16852_v42  ;;  %v16860_v6 = vpop.eup %13140  ;;  %v7532_v36 = vmul.f32 1.442695, %v7434_v24  ;;  %v7237_v35 = vmax.f32 %v7235_v16, %v7236_v18  ;;  %v7247_v5 = vmax.f32 %v7245_v38, %v7246_v0  ;;  %v16864_v48 = vadd.f32 %v16763_v11, %v16846_v53 }
 0xeaa   : > { %18111 = vst [vmem:[#allocation95_spill] sm:$0xff] %v16860_v6  ;;  %13146 = vpow2.f32 %v7534_v25  ;;  %v7437_v56 = vsub.f32 %v16800_v29, %v7243_v26  ;;  %v7254_v13 = vrot.slane %v7253_v59, 1  ;;  %v7262_v32 = vrot.slane %v16856_v19, 4 }
 0xeab   : > { %13148 = vpow2.f32 %v7532_v36  ;;  %v7436_v61 = vsub.f32 %v16809_v60, %v7237_v35  ;;  %v7248_v47 = vrot.slane %v7247_v5, 1  ;;  %v7256_v3 = vrot.slane %v16864_v48, 4  ;;  %v16870_v28 = vpop.f32.mrb[188].mxu1 }
 0xeac   : > { %v7538_v16 = vmul.f32 1.442695, %v7437_v56  ;;  %v7255_v38 = vmax.f32 %v7253_v59, %v7254_v13  ;;  %v7263_v8 = vmax.f32 %v16856_v19, %v7262_v32  ;;  %v16875_v11 = vadd.f32 %v16775_v51, %v16846_v53  ;;  %v16877_v29 = vpop.f32.mrb[189].mxu1 }
 0xead   : > { %v7536_v24 = vmul.f32 1.442695, %v7436_v61  ;;  %v7249_v18 = vmax.f32 %v7247_v5, %v7248_v47  ;;  %v7257_v0 = vmax.f32 %v16864_v48, %v7256_v3  ;;  %v16882_v60 = vadd.f32 %v16782_v31, %v16846_v53 }
 0xeae   : > { %13150 = vpow2.f32 %v7538_v16  ;;  %v7439_v25 = vsub.f32 %v16820_v2, %v7255_v38  ;;  %v7264_v26 = vrot.slane %v7263_v8, 2  ;;  %v7274_v59 = vrot.slane %v16875_v11, 4 }
 0xeaf   : > { %13152 = vpow2.f32 %v7536_v24  ;;  %v7438_v51 = vsub.f32 %v16829_v58, %v7249_v18  ;;  %v7258_v36 = vrot.slane %v7257_v0, 2  ;;  %v7268_v35 = vrot.slane %v16882_v60, 4  ;;  %v16888_v56 = vpop.f32.mrb[190].mxu1 }
 0xeb0   : > { %v16890_v5 = vpop.eup %13142  ;;  %v7542_v13 = vmul.f32 1.442695, %v7439_v25  ;;  %v7265_v32 = vmax.f32 %v7263_v8, %v7264_v26  ;;  %v7275_v31 = vmax.f32 %v16875_v11, %v7274_v59  ;;  %v16895_v2 = vadd.f32 %v16793_v20, %v16846_v53  ;;  %v16897_v61 = vpop.f32.mrb[191].mxu1 }
 0xeb1   : > { %18112 = vst [vmem:[#allocation98_spill] sm:$0xff] %v16890_v5  ;;  %v16899_v47 = vpop.eup %13144  ;;  %v7540_v58 = vmul.f32 1.442695, %v7438_v51  ;;  %v7259_v3 = vmax.f32 %v7257_v0, %v7258_v36  ;;  %v7269_v16 = vmax.f32 %v16882_v60, %v7268_v35  ;;  %v16904_v38 = vadd.f32 %v16802_v62, %v16846_v53 }
 0xeb2   : > { %18113 = vst [vmem:[#allocation97_spill] sm:$0xff] %v16899_v47  ;;  %13154 = vpow2.f32 %v7542_v13  ;;  %v7266_v8 = vrot.slane %v7265_v32, 1  ;;  %v7276_v24 = vrot.slane %v7275_v31, 2  ;;  %v7286_v18 = vrot.slane %v16895_v2, 4 }
 0xeb3   : > { %13156 = vpow2.f32 %v7540_v58  ;;  %v7260_v20 = vrot.slane %v7259_v3, 1  ;;  %v7270_v25 = vrot.slane %v7269_v16, 2  ;;  %v7280_v26 = vrot.slane %v16904_v38, 4  ;;  %v16908_v59 = vpop.f32.mrb[192].mxu1 }
 0xeb4   : > { %v16910_v51 = vpop.eup %13146  ;;  %v7267_v0 = vmax.f32 %v7265_v32, %v7266_v8  ;;  %v7277_v36 = vmax.f32 %v7275_v31, %v7276_v24  ;;  %v7287_v35 = vmax.f32 %v16895_v2, %v7286_v18  ;;  %v16915_v62 = vadd.f32 %v16813_v9, %v16846_v53  ;;  %v16917_v13 = vpop.f32.mrb[193].mxu1 }
 0xeb5   : > { %18114 = vst [vmem:[#allocation69_spill] sm:$0xff] %v16910_v51  ;;  %18115 = vst [vmem:[#allocation70_spill] sm:$0xff] %v16917_v13  ;;  %v16919_v5 = vpop.eup %13148  ;;  %v7261_v58 = vmax.f32 %v7259_v3, %v7260_v20  ;;  %v7271_v47 = vmax.f32 %v7269_v16, %v7270_v25  ;;  %v7281_v42 = vmax.f32 %v16904_v38, %v7280_v26  ;;  %v7688_v6 = vrot.slane %v16709_v27, 4 }
 0xeb6   : > { %18116 = vst [vmem:[#allocation59_spill] sm:$0xff] %v16919_v5  ;;  %v7441_v51 = vsub.f32 %v16856_v19, %v7267_v0  ;;  %v7278_v32 = vrot.slane %v7277_v36, 1  ;;  %v7288_v31 = vrot.slane %v7287_v35, 2  ;;  %v7298_v8 = vrot.slane %v16915_v62, 4 }
 0xeb7   : > { %v7440_v24 = vsub.f32 %v16864_v48, %v7261_v58  ;;  %v7272_v9 = vrot.slane %v7271_v47, 1  ;;  %v7282_v18 = vrot.slane %v7281_v42, 2  ;;  %v7689_v41 = vadd.f32 %v16709_v27, %v7688_v6  ;;  %v16927_v13 = vpop.f32.mrb[194].mxu1 }
 0xeb8   : > { %18117 = vst [vmem:[#allocation60_spill] sm:$0xff] %v16927_v13  ;;  %v16929_v3 = vpop.eup %13150  ;;  %v7546_v16 = vmul.f32 1.442695, %v7441_v51  ;;  %v7279_v20 = vmax.f32 %v7277_v36, %v7278_v32  ;;  %v7289_v25 = vmax.f32 %v7287_v35, %v7288_v31  ;;  %v7299_v26 = vmax.f32 %v16915_v62, %v7298_v8  ;;  %v16932_v19 = vpop.f32.mrb[195].mxu1 }
 0xeb9   : > { %18118 = vst [vmem:[#allocation61_spill] sm:$0xff] %v16929_v3  ;;  %v16934_v0 = vpop.eup %13152  ;;  %v7544_v5 = vmul.f32 1.442695, %v7440_v24  ;;  %v7273_v30 = vmax.f32 %v7271_v47, %v7272_v9  ;;  %v7283_v48 = vmax.f32 %v7281_v42, %v7282_v18  ;;  %v7690_v58 = vrot.slane %v7689_v41, 2 }
 0xeba   : > { %13158 = vpow2.f32 %v7546_v16  ;;  %v7443_v6 = vsub.f32 %v16875_v11, %v7279_v20  ;;  %v7290_v1 = vrot.slane %v7289_v25, 1  ;;  %v7300_v13 = vrot.slane %v7299_v26, 2 }
 0xebb   : > { %13160 = vpow2.f32 %v7544_v5  ;;  %v7442_v51 = vsub.f32 %v16882_v60, %v7273_v30  ;;  %v7284_v36 = vrot.slane %v7283_v48, 1  ;;  %v7691_v35 = vadd.f32 %v7690_v58, %v7689_v41  ;;  %v16938_v32 = vpop.f32.mrb[196].mxu1 }
 0xebc   : > { %v16940_v31 = vpop.eup %13154  ;;  %v7550_v8 = vmul.f32 1.442695, %v7443_v6  ;;  %v7291_v3 = vmax.f32 %v7289_v25, %v7290_v1  ;;  %v7301_v24 = vmax.f32 %v7299_v26, %v7300_v13  ;;  %v7694_v42 = vrot.slane %v16700_v21, 4  ;;  %v16943_v47 = vpop.f32.mrb[197].mxu1  ;;  %v16957_v6 = vld [vmem:[%s18098_s17 + $0x30] sm:$0xff] }
 0xebd   : > { %18119 = vst [vmem:[#allocation62_spill] sm:$0xff] %v16940_v31  ;;  %v16945_v9 = vpop.eup %13156  ;;  %v7548_v11 = vmul.f32 1.442695, %v7442_v51  ;;  %v7285_v5 = vmax.f32 %v7283_v48, %v7284_v36  ;;  %v7692_v18 = vrot.slane %v7691_v35, 1  ;;  %v16949_v30 = vadd.f32 %v16822_v10, %v16846_v53 }
 0xebe   : > { %18120 = vst [vmem:[#allocation63_spill] sm:$0xff] %v16945_v9  ;;  %13162 = vpow2.f32 %v7550_v8  ;;  %v7445_v41 = vsub.f32 %v16895_v2, %v7291_v3  ;;  %v7302_v60 = vrot.slane %v7301_v24, 1  ;;  %v7695_v1 = vadd.f32 %v16700_v21, %v7694_v42 }
 0xebf   : > { %13164 = vpow2.f32 %v7548_v11  ;;  %v7444_v13 = vsub.f32 %v16904_v38, %v7285_v5  ;;  %v7693_v16 = vadd.f32 %v7692_v18, %v7691_v35  ;;  %v7292_v20 = vrot.slane %v16949_v30, 4 }
 0xec0   : > { %v7554_v25 = vmul.f32 1.442695, %v7445_v41  ;;  %v7303_v26 = vmax.f32 %v7301_v24, %v7302_v60  ;;  %v7696_v48 = vrot.slane %v7695_v1, 2  ;;  %v7592_v58 = vrot.slane %v16546_v17, 4  ;;  %v16971_v41 = vpop.f32.mrb[198].mxu1 }
 0xec1   : > { %v7552_v53 = vmul.f32 1.442695, %v7444_v13  ;;  %13166 = vrcp.f32 %v7693_v16  ;;  %v7293_v10 = vmax.f32 %v16949_v30, %v7292_v20  ;;  %v7598_v2 = vrot.slane %v16540_v52, 4  ;;  %v16977_v20 = vpop.f32.mrb[199].mxu1 }
 0xec2   : > { %13168 = vpow2.f32 %v7554_v25  ;;  %v7447_v3 = vsub.f32 %v16915_v62, %v7303_v26  ;;  %v7697_v38 = vadd.f32 %v7696_v48, %v7695_v1  ;;  %v7593_v51 = vadd.f32 %v16546_v17, %v7592_v58 }
 0xec3   : > { %13170 = vpow2.f32 %v7552_v53  ;;  %v7294_v36 = vrot.slane %v7293_v10, 2  ;;  %v7599_v35 = vadd.f32 %v16540_v52, %v7598_v2  ;;  %v16966_v8 = vadd.f32 %v16835_v54, %v16957_v6 }
 0xec4   : > { %v16968_v24 = vpop.eup %13158  ;;  %v7558_v42 = vmul.f32 1.442695, %v7447_v3  ;;  %v7698_v11 = vrot.slane %v7697_v38, 1  ;;  %v7594_v5 = vrot.slane %v7593_v51, 2  ;;  %v7700_v18 = vrot.slane %v16729_v15, 4 }
 0xec5   : > { %18121 = vst [vmem:[#allocation64_spill] sm:$0xff] %v16968_v24  ;;  %v16973_v62 = vpop.eup %13160  ;;  %v7295_v60 = vmax.f32 %v7293_v10, %v7294_v36  ;;  %v7600_v1 = vrot.slane %v7599_v35, 2  ;;  %v7310_v13 = vrot.slane %v16966_v8, 4  ;;  %v7706_v16 = vrot.slane %v16720_v33, 4 }
 0xec6   : > { %18122 = vst [vmem:[#allocation65_spill] sm:$0xff] %v16973_v62  ;;  %13172 = vpow2.f32 %v7558_v42  ;;  %v7699_v54 = vadd.f32 %v7698_v11, %v7697_v38  ;;  %v7595_v25 = vadd.f32 %v7594_v5, %v7593_v51  ;;  %v7701_v26 = vadd.f32 %v16729_v15, %v7700_v18 }
 0xec7   : > { %v7296_v48 = vrot.slane %v7295_v60, 1  ;;  %v7601_v58 = vadd.f32 %v7600_v1, %v7599_v35  ;;  %v7311_v53 = vmax.f32 %v16966_v8, %v7310_v13  ;;  %v7707_v2 = vadd.f32 %v16720_v33, %v7706_v16 }
 0xec8   : > { %v16982_v3 = vpop.eup %13162  ;;  %13174 = vrcp.f32 %v7699_v54  ;;  %v7596_v10 = vrot.slane %v7595_v25, 1  ;;  %v7702_v36 = vrot.slane %v7701_v26, 2  ;;  %v16986_v24 = vadd.f32 %v16840_v46, %v16957_v6 }
 0xec9   : > { %18123 = vst [vmem:[#allocation72_spill] sm:$0xff] %v16982_v3  ;;  %v16988_v42 = vpop.eup %13164  ;;  %v7297_v38 = vmax.f32 %v7295_v60, %v7296_v48  ;;  %v7602_v51 = vrot.slane %v7601_v58, 1  ;;  %v7312_v11 = vrot.slane %v7311_v53, 2  ;;  %v7708_v5 = vrot.slane %v7707_v2, 2 }
 0xeca   : > { %18124 = vst [vmem:[#allocation99_spill] sm:$0xff] %v16988_v42  ;;  %v7597_v35 = vadd.f32 %v7596_v10, %v7595_v25  ;;  %v7703_v18 = vadd.f32 %v7702_v36, %v7701_v26  ;;  %v7304_v1 = vrot.slane %v16986_v24, 4  ;;  %v7604_v13 = vrot.slane %v16560_v44, 4 }
 0xecb   : > { %v13167_v16 = vpop.eup %13166  ;;  %v7446_v54 = vsub.f32 %v16949_v30, %v7297_v38  ;;  %v7603_v3 = vadd.f32 %v7602_v51, %v7601_v58  ;;  %v7313_v62 = vmax.f32 %v7311_v53, %v7312_v11  ;;  %v7709_v31 = vadd.f32 %v7708_v5, %v7707_v2 }
 0xecc   : > { %v16993_v46 = vpop.eup %13168  ;;  %v8056_v42 = vmul.f32 %v13167_v16, %v16709_v27  ;;  %13176 = vrcp.f32 %v7597_v35  ;;  %v7704_v60 = vrot.slane %v7703_v18, 1  ;;  %v7305_v48 = vmax.f32 %v16986_v24, %v7304_v1 }
 0xecd   : > { %v16997_v25 = vpop.eup %13170  ;;  %v7556_v26 = vmul.f32 1.442695, %v7446_v54  ;;  %13178 = vrcp.f32 %v7603_v3  ;;  %v7314_v10 = vrot.slane %v7313_v62, 1  ;;  %v7710_v36 = vrot.slane %v7709_v31, 1 }
 0xece   : > { %v8120_v9 = vmul.f32 %v8056_v42, %v16488_v39  ;;  %v7705_v30 = vadd.f32 %v7704_v60, %v7703_v18  ;;  %v7306_v58 = vrot.slane %v7305_v48, 2  ;;  %v7605_v53 = vadd.f32 %v16560_v44, %v7604_v13 }
 0xecf   : > { %13180 = vpow2.f32 %v7556_v26  ;;  %v7315_v2 = vmax.f32 %v7313_v62, %v7314_v10  ;;  %v7711_v38 = vadd.f32 %v7710_v36, %v7709_v31  ;;  %v7610_v27 = vrot.slane %v16554_v7, 4 }
 0xed0   : > { %v17002_v51 = vpop.eup %13172  ;;  %13182 = vrcp.f32 %v7705_v30  ;;  %v7307_v11 = vmax.f32 %v7305_v48, %v7306_v58  ;;  %v7606_v5 = vrot.slane %v7605_v53, 2  ;;  %v17006_v3 = vadd.f32 %v16850_v14, %v16957_v6 }
 0xed1   : > { %v7449_v42 = vsub.f32 %v16966_v8, %v7315_v2  ;;  %13184 = vrcp.f32 %v7711_v38  ;;  %v7611_v35 = vadd.f32 %v16554_v7, %v7610_v27  ;;  %v7712_v18 = vrot.slane %v16747_v12, 4 }
 0xed2   : > { %v13175_v62 = vpop.eup %13174  ;;  %v7308_v31 = vrot.slane %v7307_v11, 1  ;;  %v7607_v1 = vadd.f32 %v7606_v5, %v7605_v53  ;;  %v7322_v13 = vrot.slane %v17006_v3, 4  ;;  %v7718_v16 = vrot.slane %v16742_v57, 4 }
 0xed3   : > { %v8057_v54 = vmul.f32 %v13175_v62, %v16700_v21  ;;  %v7562_v60 = vmul.f32 1.442695, %v7449_v42  ;;  %v7612_v48 = vrot.slane %v7611_v35, 2  ;;  %v7713_v14 = vadd.f32 %v16747_v12, %v7712_v18 }
 0xed4   : > { %v7309_v26 = vmax.f32 %v7307_v11, %v7308_v31  ;;  %v7608_v8 = vrot.slane %v7607_v1, 1  ;;  %v7323_v10 = vmax.f32 %v17006_v3, %v7322_v13  ;;  %v7719_v36 = vadd.f32 %v16742_v57, %v7718_v16 }
 0xed5   : > { %v8121_v30 = vmul.f32 %v8057_v54, %v16488_v39  ;;  %13186 = vpow2.f32 %v7562_v60  ;;  %v7613_v58 = vadd.f32 %v7612_v48, %v7611_v35  ;;  %v7714_v53 = vrot.slane %v7713_v14, 2 }
 0xed6   : > { %v13177_v2 = vpop.eup %13176  ;;  %v7448_v38 = vsub.f32 %v16986_v24, %v7309_v26  ;;  %v7609_v27 = vadd.f32 %v7608_v8, %v7607_v1  ;;  %v7324_v21 = vrot.slane %v7323_v10, 2  ;;  %v7720_v5 = vrot.slane %v7719_v36, 2 }
 0xed7   : > { %v13179_v42 = vpop.eup %13178  ;;  %v12277_v62 = vpack.c.bf16 %v8121_v30, %v8120_v9  ;;  %v8040_v11 = vmul.f32 %v13177_v2, %v16546_v17  ;;  %v7614_v18 = vrot.slane %v7613_v58, 1  ;;  %v7715_v31 = vadd.f32 %v7714_v53, %v7713_v14 }
 0xed8   : > { %v8041_v13 = vmul.f32 %v13179_v42, %v16540_v52  ;;  %v7560_v16 = vmul.f32 1.442695, %v7448_v38  ;;  %13188 = vrcp.f32 %v7609_v27  ;;  %v7325_v54 = vmax.f32 %v7323_v10, %v7324_v21 }
 0xed9   : > { %v17021_v60 = vpop.eup %13180  ;;  %12278 = vmatprep.subr.bf16.mxu0 %v12277_v62  ;;  %v8104_v35 = vmul.f32 %v8040_v11, %v16495_v37  ;;  %v7615_v24 = vadd.f32 %v7614_v18, %v7613_v58  ;;  %v7716_v1 = vrot.slane %v7715_v31, 1  ;;  %v7721_v48 = vadd.f32 %v7720_v5, %v7719_v36 }
 0xeda   : > { %v13183_v26 = vpop.eup %13182  ;;  %v8105_v9 = vmul.f32 %v8041_v13, %v16495_v37  ;;  %13190 = vpow2.f32 %v7560_v16  ;;  %v7326_v17 = vrot.slane %v7325_v54, 1  ;;  %v17027_v14 = vadd.f32 %v16858_v49, %v16957_v6 }
 0xedb   : > { %v13185_v52 = vpop.eup %13184  ;;  %v8058_v8 = vmul.f32 %v13183_v26, %v16729_v15  ;;  %13192 = vrcp.f32 %v7615_v24  ;;  %v7717_v10 = vadd.f32 %v7716_v1, %v7715_v31  ;;  %v7722_v30 = vrot.slane %v7721_v48, 1 }
 0xedc   : > { %v12279_v53 = vpack.c.bf16 %v8105_v9, %v8104_v35  ;;  %v8059_v58 = vmul.f32 %v13185_v52, %v16720_v33  ;;  %v7327_v2 = vmax.f32 %v7325_v54, %v7326_v17  ;;  %v7316_v36 = vrot.slane %v17027_v14, 4 }
 0xedd   : > { %v8122_v38 = vmul.f32 %v8058_v8, %v16488_v39  ;;  %v7723_v27 = vadd.f32 %v7722_v30, %v7721_v48  ;;  %13194 = vrcp.f32 %v7717_v10  ;;  %v7616_v21 = vrot.slane %v16573_v50, 4 }
 0xede   : > { %12280 = vmatpush3.bf16.msra.mxu0 %v12279_v53  ;;  %v8123_v49 = vmul.f32 %v8059_v58, %v16488_v39  ;;  %v7451_v15 = vsub.f32 %v17006_v3, %v7327_v2  ;;  %v7317_v5 = vmax.f32 %v17027_v14, %v7316_v36  ;;  %v7622_v42 = vrot.slane %v16570_v40, 4 }
 0xedf   : > { %v17038_v62 = vpop.eup %13186  ;;  %13196 = vrcp.f32 %v7723_v27  ;;  %v7617_v33 = vadd.f32 %v16573_v50, %v7616_v21  ;;  %v17043_v11 = vadd.f32 %v16870_v28, %v16957_v6  ;;  %v7724_v18 = vrot.slane %v16765_v22, 4 }
 0xee0   : > { %v12281_v31 = vpack.c.bf16 %v8123_v49, %v8122_v38  ;;  %v7566_v13 = vmul.f32 1.442695, %v7451_v15  ;;  %v7318_v16 = vrot.slane %v7317_v5, 2  ;;  %v7623_v3 = vadd.f32 %v16570_v40, %v7622_v42 }
 0xee1   : > { %v7618_v54 = vrot.slane %v7617_v33, 2  ;;  %v7334_v35 = vrot.slane %v17043_v11, 4  ;;  %v7725_v24 = vadd.f32 %v16765_v22, %v7724_v18  ;;  %v7730_v1 = vrot.slane %v16757_v45, 4 }
 0xee2   : > { %v13189_v48 = vpop.eup %13188  ;;  %12282 = vmatprep.subr.bf16.mxu0 %v12281_v31  ;;  %13198 = vpow2.f32 %v7566_v13  ;;  %v7319_v26 = vmax.f32 %v7317_v5, %v7318_v16  ;;  %v7624_v28 = vrot.slane %v7623_v3, 2  ;;  %v17052_v9 = vadd.f32 %v16877_v29, %v16957_v6 }
 0xee3   : > { %v8042_v17 = vmul.f32 %v13189_v48, %v16560_v44  ;;  %v7619_v52 = vadd.f32 %v7618_v54, %v7617_v33  ;;  %v7335_v8 = vmax.f32 %v17043_v11, %v7334_v35  ;;  %v7726_v10 = vrot.slane %v7725_v24, 2 }
 0xee4   : > { %v17056_v30 = vpop.eup %13190  ;;  %v7320_v53 = vrot.slane %v7319_v26, 1  ;;  %v7625_v58 = vadd.f32 %v7624_v28, %v7623_v3  ;;  %v7731_v2 = vadd.f32 %v16757_v45, %v7730_v1  ;;  %v7328_v36 = vrot.slane %v17052_v9, 4 }
 0xee5   : > { %v13193_v38 = vpop.eup %13192  ;;  %v8106_v27 = vmul.f32 %v8042_v17, %v16495_v37  ;;  %v7620_v21 = vrot.slane %v7619_v52, 1  ;;  %v7336_v29 = vrot.slane %v7335_v8, 2  ;;  %v7727_v49 = vadd.f32 %v7726_v10, %v7725_v24 }
 0xee6   : > { %v8043_v44 = vmul.f32 %v13193_v38, %v16554_v7  ;;  %v7321_v15 = vmax.f32 %v7319_v26, %v7320_v53  ;;  %v7626_v5 = vrot.slane %v7625_v58, 1  ;;  %v7732_v42 = vrot.slane %v7731_v2, 2 }
 0xee7   : > { %v13195_v33 = vpop.eup %13194  ;;  %v7621_v18 = vadd.f32 %v7620_v21, %v7619_v52  ;;  %v7337_v31 = vmax.f32 %v7335_v8, %v7336_v29  ;;  %v7728_v13 = vrot.slane %v7727_v49, 1  ;;  %v7329_v16 = vmax.f32 %v17052_v9, %v7328_v36 }
 0xee8   : > { %v8107_v3 = vmul.f32 %v8043_v44, %v16495_v37  ;;  %v8060_v54 = vmul.f32 %v13195_v33, %v16747_v12  ;;  %v7450_v35 = vsub.f32 %v17027_v14, %v7321_v15  ;;  %v7627_v1 = vadd.f32 %v7626_v5, %v7625_v58 }
 0xee9   : > { %v13197_v48 = vpop.eup %13196  ;;  %13200 = vrcp.f32 %v7621_v18  ;;  %v7338_v24 = vrot.slane %v7337_v31, 1  ;;  %v7729_v7 = vadd.f32 %v7728_v13, %v7727_v49  ;;  %v7733_v26 = vadd.f32 %v7732_v42, %v7731_v2 }
 0xeea   : > { %v12283_v28 = vpack.c.bf16 %v8107_v3, %v8106_v27  ;;  %v8061_v17 = vmul.f32 %v13197_v48, %v16742_v57  ;;  %v8124_v52 = vmul.f32 %v8060_v54, %v16488_v39  ;;  %v7564_v8 = vmul.f32 1.442695, %v7450_v35 }
 0xeeb   : > { %13202 = vrcp.f32 %v7627_v1  ;;  %v7339_v10 = vmax.f32 %v7337_v31, %v7338_v24  ;;  %v7734_v53 = vrot.slane %v7733_v26, 1  ;;  %v7330_v36 = vrot.slane %v7329_v16, 2 }
 0xeec   : > { %v17068_v38 = vpop.eup %13198  ;;  %12284 = vmatpush3.bf16.msra.mxu0 %v12283_v28  ;;  %v8125_v12 = vmul.f32 %v8061_v17, %v16488_v39  ;;  %13204 = vpow2.f32 %v7564_v8  ;;  %v7628_v14 = vrot.slane %v16586_v43, 4  ;;  %v7634_v58 = vrot.slane %v16581_v34, 4 }
 0xeed   : > { %v7453_v2 = vsub.f32 %v17043_v11, %v7339_v10  ;;  %v7735_v57 = vadd.f32 %v7734_v53, %v7733_v26  ;;  %13206 = vrcp.f32 %v7729_v7  ;;  %v7331_v27 = vmax.f32 %v7329_v16, %v7330_v36 }
 0xeee   : > { %v12285_v21 = vpack.c.bf16 %v8125_v12, %v8124_v52  ;;  %v7629_v29 = vadd.f32 %v16586_v43, %v7628_v14  ;;  %v7635_v49 = vadd.f32 %v16581_v34, %v7634_v58  ;;  %v17078_v44 = vadd.f32 %v16888_v56, %v16957_v6 }
 0xeef   : > { %v7570_v15 = vmul.f32 1.442695, %v7453_v2  ;;  %13208 = vrcp.f32 %v7735_v57  ;;  %v7332_v5 = vrot.slane %v7331_v27, 1  ;;  %v7736_v42 = vrot.slane %v16804_v63, 4 }
 0xef0   : > { %12286 = vmatprep.subr.bf16.mxu0 %v12285_v21  ;;  %v7630_v33 = vrot.slane %v7629_v29, 2  ;;  %v7636_v11 = vrot.slane %v7635_v49, 2  ;;  %v7346_v18 = vrot.slane %v17078_v44, 4  ;;  %v7742_v31 = vrot.slane %v16795_v55, 4 }
 0xef1   : > { %13210 = vpow2.f32 %v7570_v15  ;;  %v7333_v13 = vmax.f32 %v7331_v27, %v7332_v5  ;;  %v7737_v16 = vadd.f32 %v16804_v63, %v7736_v42  ;;  %v17086_v56 = vadd.f32 %v16897_v61, %v16957_v6 }
 0xef2   : > { %v7631_v3 = vadd.f32 %v7630_v33, %v7629_v29  ;;  %v7637_v54 = vadd.f32 %v7636_v11, %v7635_v49  ;;  %v7347_v35 = vmax.f32 %v17078_v44, %v7346_v18  ;;  %v7743_v1 = vadd.f32 %v16795_v55, %v7742_v31  ;;  %v17102_v18 = vld [vmem:[%s18098_s17 + $0x38] sm:$0xff] }
 0xef3   : > { %v13201_v48 = vpop.eup %13200  ;;  %v7452_v24 = vsub.f32 %v17052_v9, %v7333_v13  ;;  %v7738_v7 = vrot.slane %v7737_v16, 2  ;;  %v7340_v26 = vrot.slane %v17086_v56, 4  ;;  %v7640_v28 = vrot.slane %v16617_v23, 4 }
 0xef4   : > { %v8044_v17 = vmul.f32 %v13201_v48, %v16573_v50  ;;  %v7632_v52 = vrot.slane %v7631_v3, 1  ;;  %v7638_v8 = vrot.slane %v7637_v54, 1  ;;  %v7348_v61 = vrot.slane %v7347_v35, 2 }
 0xef5   : > { %v13203_v6 = vpop.eup %13202  ;;  %v7568_v10 = vmul.f32 1.442695, %v7452_v24  ;;  %v7739_v53 = vadd.f32 %v7738_v7, %v7737_v16  ;;  %v7744_v36 = vrot.slane %v7743_v1, 2  ;;  %v7341_v12 = vmax.f32 %v17086_v56, %v7340_v26 }
 0xef6   : > { %v17095_v14 = vpop.eup %13204  ;;  %v8045_v9 = vmul.f32 %v13203_v6, %v16570_v40  ;;  %v8108_v58 = vmul.f32 %v8044_v17, %v16495_v37  ;;  %v7633_v2 = vadd.f32 %v7632_v52, %v7631_v3  ;;  %v7639_v57 = vadd.f32 %v7638_v8, %v7637_v54  ;;  %v18125_v52 = vld [vmem:[#allocation94_spill] sm:$0xff] }
 0xef7   : > { %v13207_v27 = vpop.eup %13206  ;;  %13212 = vpow2.f32 %v7568_v10  ;;  %v7349_v50 = vmax.f32 %v7347_v35, %v7348_v61  ;;  %v7740_v21 = vrot.slane %v7739_v53, 1  ;;  %v7745_v29 = vadd.f32 %v7744_v36, %v7743_v1 }
 0xef8   : > { %v8109_v49 = vmul.f32 %v8045_v9, %v16495_v37  ;;  %v8062_v15 = vmul.f32 %v13207_v27, %v16765_v22  ;;  %13214 = vrcp.f32 %v7633_v2  ;;  %v7342_v5 = vrot.slane %v7341_v12, 2  ;;  %v18127_v2 = vld [vmem:[#allocation70_spill] sm:$0xff] }
 0xef9   : > { %v13209_v42 = vpop.eup %13208  ;;  %13216 = vrcp.f32 %v7639_v57  ;;  %v7350_v33 = vrot.slane %v7349_v50, 1  ;;  %v7741_v40 = vadd.f32 %v7740_v21, %v7739_v53  ;;  %v7746_v11 = vrot.slane %v7745_v29, 1 }
 0xefa   : > { %v12287_v31 = vpack.c.bf16 %v8109_v49, %v8108_v58  ;;  %v8063_v13 = vmul.f32 %v13209_v42, %v16757_v45  ;;  %v8126_v16 = vmul.f32 %v8062_v15, %v16488_v39  ;;  %v7343_v3 = vmax.f32 %v7341_v12, %v7342_v5  ;;  %v18126_v12 = vld [vmem:[#allocation92_spill] sm:$0xff] }
 0xefb   : > { %v17106_v54 = vpop.eup %13210  ;;  %v7351_v35 = vmax.f32 %v7349_v50, %v7350_v33  ;;  %v7747_v1 = vadd.f32 %v7746_v11, %v7745_v29  ;;  %13218 = vrcp.f32 %v7741_v40  ;;  %v7641_v22 = vadd.f32 %v16617_v23, %v7640_v28 }
 0xefc   : > { %12288 = vmatpush3.bf16.msra.mxu0 %v12287_v31  ;;  %v8127_v48 = vmul.f32 %v8063_v13, %v16488_v39  ;;  %v7344_v24 = vrot.slane %v7343_v3, 1  ;;  %v7646_v7 = vrot.slane %v16609_v4, 4  ;;  %v17113_v26 = vadd.f32 %v16908_v59, %v17102_v18 }
 0xefd   : > { %v7455_v45 = vsub.f32 %v17078_v44, %v7351_v35  ;;  %13220 = vrcp.f32 %v7747_v1  ;;  %v7642_v17 = vrot.slane %v7641_v22, 2  ;;  %v7748_v8 = vrot.slane %v18125_v52, 4 }
 0xefe   : > { %v12289_v61 = vpack.c.bf16 %v8127_v48, %v8126_v16  ;;  %v7345_v6 = vmax.f32 %v7343_v3, %v7344_v24  ;;  %v7647_v28 = vadd.f32 %v16609_v4, %v7646_v7  ;;  %v7358_v10 = vrot.slane %v17113_v26, 4 }
 0xeff   : > { %v7574_v39 = vmul.f32 1.442695, %v7455_v45  ;;  %v7643_v53 = vadd.f32 %v7642_v17, %v7641_v22  ;;  %v7749_v36 = vadd.f32 %v18125_v52, %v7748_v8  ;;  %v7754_v9 = vrot.slane %v18126_v12, 4 }
 0xf00   : > { %12290 = vmatprep.subr.bf16.mxu0 %v12289_v61  ;;  %v7454_v59 = vsub.f32 %v17086_v56, %v7345_v6  ;;  %v7648_v44 = vrot.slane %v7647_v28, 2  ;;  %v7359_v58 = vmax.f32 %v17113_v26, %v7358_v10  ;;  %v17125_v57 = vadd.f32 %v18127_v2, %v17102_v18  ;;  %v18130_v2 = vld [vmem:[#allocation78_spill] sm:$0xff] }
 0xf01   : > { %v17127_v27 = vpop.eup %13212  ;;  %13222 = vpow2.f32 %v7574_v39  ;;  %v7644_v50 = vrot.slane %v7643_v53, 1  ;;  %v7750_v21 = vrot.slane %v7749_v36, 2  ;;  %v7755_v29 = vadd.f32 %v18126_v12, %v7754_v9 }
 0xf02   : > { %v13215_v49 = vpop.eup %13214  ;;  %v7572_v15 = vmul.f32 1.442695, %v7454_v59  ;;  %v7649_v5 = vadd.f32 %v7648_v44, %v7647_v28  ;;  %v7360_v42 = vrot.slane %v7359_v58, 2  ;;  %v7352_v56 = vrot.slane %v17125_v57, 4  ;;  %v18128_v28 = vld [vmem:[#allocation87_spill] sm:$0xff] }
 0xf03   : > { %v13217_v33 = vpop.eup %13216  ;;  %v8046_v40 = vmul.f32 %v13215_v49, %v16586_v43  ;;  %v7645_v11 = vadd.f32 %v7644_v50, %v7643_v53  ;;  %v7751_v31 = vadd.f32 %v7750_v21, %v7749_v36  ;;  %v7756_v13 = vrot.slane %v7755_v29, 2  ;;  %v18129_v36 = vld [vmem:[#allocation79_spill] sm:$0xff]  ;;  %v18131_v21 = vld [vmem:[#allocation60_spill] sm:$0xff] }
 0xf04   : > { %v8047_v16 = vmul.f32 %v13217_v33, %v16581_v34  ;;  %13224 = vpow2.f32 %v7572_v15  ;;  %v7650_v3 = vrot.slane %v7649_v5, 1  ;;  %v7361_v35 = vmax.f32 %v7359_v58, %v7360_v42 }
 0xf05   : > { %v13219_v1 = vpop.eup %13218  ;;  %v8110_v22 = vmul.f32 %v8046_v40, %v16495_v37  ;;  %13226 = vrcp.f32 %v7645_v11  ;;  %v7752_v48 = vrot.slane %v7751_v31, 1  ;;  %v7757_v24 = vadd.f32 %v7756_v13, %v7755_v29 }
 0xf06   : > { %v8111_v7 = vmul.f32 %v8047_v16, %v16495_v37  ;;  %v8064_v45 = vmul.f32 %v13219_v1, %v16804_v63  ;;  %v7651_v17 = vadd.f32 %v7650_v3, %v7649_v5  ;;  %v7362_v43 = vrot.slane %v7361_v35, 1  ;;  %v18132_v5 = vld [vmem:[#allocation93_spill] sm:$0xff]  ;;  %v18133_v3 = vld [vmem:[#allocation68_spill] sm:$0xff] }
 0xf07   : > { %v13221_v8 = vpop.eup %13220  ;;  %v7753_v61 = vadd.f32 %v7752_v48, %v7751_v31  ;;  %v7758_v6 = vrot.slane %v7757_v24, 1  ;;  %v7353_v34 = vmax.f32 %v17125_v57, %v7352_v56  ;;  %v7652_v10 = vrot.slane %v18128_v28, 4 }
 0xf08   : > { %v12291_v39 = vpack.c.bf16 %v8111_v7, %v8110_v22  ;;  %v8065_v53 = vmul.f32 %v13221_v8, %v16795_v55  ;;  %v8128_v9 = vmul.f32 %v8064_v45, %v18129_v36  ;;  %13228 = vrcp.f32 %v7651_v17 }
 0xf09   : > { %v7363_v59 = vmax.f32 %v7361_v35, %v7362_v43  ;;  %v7759_v44 = vadd.f32 %v7758_v6, %v7757_v24  ;;  %13230 = vrcp.f32 %v7753_v61  ;;  %v7354_v37 = vrot.slane %v7353_v34, 2 }
 0xf0a   : > { %12292 = vmatpush3.bf16.msra.mxu0 %v12291_v39  ;;  %v8129_v63 = vmul.f32 %v8065_v53, %v18129_v36  ;;  %v7653_v58 = vadd.f32 %v18128_v28, %v7652_v10  ;;  %v7658_v50 = vrot.slane %v18130_v2, 4  ;;  %v17145_v29 = vadd.f32 %v18131_v21, %v17102_v18 }
 0xf0b   : > { %v17147_v49 = vpop.eup %13222  ;;  %v7457_v55 = vsub.f32 %v17113_v26, %v7363_v59  ;;  %13232 = vrcp.f32 %v7759_v44  ;;  %v7355_v15 = vmax.f32 %v7353_v34, %v7354_v37  ;;  %v7760_v42 = vrot.slane %v18132_v5, 4 }
 0xf0c   : > { %v12293_v56 = vpack.c.bf16 %v8129_v63, %v8128_v9  ;;  %v7654_v33 = vrot.slane %v7653_v58, 2  ;;  %v7659_v40 = vadd.f32 %v18130_v2, %v7658_v50  ;;  %v7370_v11 = vrot.slane %v17145_v29, 4 }
 0xf0d   : > { %v7578_v31 = vmul.f32 1.442695, %v7457_v55  ;;  %v7356_v13 = vrot.slane %v7355_v15, 1  ;;  %v7761_v16 = vadd.f32 %v18132_v5, %v7760_v42  ;;  %v7766_v35 = vrot.slane %v18133_v3, 4 }
 0xf0e   : > { %v17155_v1 = vpop.eup %13224  ;;  %12294 = vmatprep.subr.bf16.mxu0 %v12293_v56  ;;  %v7655_v26 = vadd.f32 %v7654_v33, %v7653_v58  ;;  %v7660_v22 = vrot.slane %v7659_v40, 2  ;;  %v7371_v48 = vmax.f32 %v17145_v29, %v7370_v11  ;;  %v17160_v24 = vadd.f32 %v16932_v19, %v17102_v18  ;;  %v18134_v19 = vld [vmem:[#allocation71_spill] sm:$0xff] }
 0xf0f   : > { %v13227_v7 = vpop.eup %13226  ;;  %13234 = vpow2.f32 %v7578_v31  ;;  %v7357_v45 = vmax.f32 %v7355_v15, %v7356_v13  ;;  %v7762_v17 = vrot.slane %v7761_v16, 2  ;;  %v7767_v43 = vadd.f32 %v18133_v3, %v7766_v35 }
 0xf10   : > { %v8048_v8 = vmul.f32 %v13227_v7, %v16617_v23  ;;  %v7656_v61 = vrot.slane %v7655_v26, 1  ;;  %v7661_v6 = vadd.f32 %v7660_v22, %v7659_v40  ;;  %v7372_v34 = vrot.slane %v7371_v48, 2  ;;  %v18135_v7 = vld [vmem:[#allocation90_spill] sm:$0xff] }
 0xf11   : > { %v7456_v10 = vsub.f32 %v17125_v57, %v7357_v45  ;;  %v7763_v39 = vadd.f32 %v7762_v17, %v7761_v16  ;;  %v7768_v53 = vrot.slane %v7767_v43, 2  ;;  %v7364_v9 = vrot.slane %v17160_v24, 4  ;;  %v18136_v17 = vld [vmem:[#allocation86_spill] sm:$0xff] }
 0xf12   : > { %v13229_v59 = vpop.eup %13228  ;;  %v8112_v44 = vmul.f32 %v8048_v8, %v18134_v19  ;;  %v7657_v37 = vadd.f32 %v7656_v61, %v7655_v26  ;;  %v7662_v63 = vrot.slane %v7661_v6, 1  ;;  %v7373_v58 = vmax.f32 %v7371_v48, %v7372_v34 }
 0xf13   : > { %v13231_v50 = vpop.eup %13230  ;;  %v8049_v21 = vmul.f32 %v13229_v59, %v16609_v4  ;;  %v7576_v55 = vmul.f32 1.442695, %v7456_v10  ;;  %v7764_v23 = vrot.slane %v7763_v39, 1  ;;  %v7769_v15 = vadd.f32 %v7768_v53, %v7767_v43 }
 0xf14   : > { %v8066_v42 = vmul.f32 %v13231_v50, %v18125_v52  ;;  %v7663_v56 = vadd.f32 %v7662_v63, %v7661_v6  ;;  %13236 = vrcp.f32 %v7657_v37  ;;  %v7374_v57 = vrot.slane %v7373_v58, 1  ;;  %v18137_v6 = vld [vmem:[#allocation95_spill] sm:$0xff]  ;;  %v18138_v37 = vld [vmem:[#allocation96_spill] sm:$0xff] }
 0xf15   : > { %v13233_v33 = vpop.eup %13232  ;;  %v8113_v40 = vmul.f32 %v8049_v21, %v18134_v19  ;;  %13238 = vpow2.f32 %v7576_v55  ;;  %v7765_v11 = vadd.f32 %v7764_v23, %v7763_v39  ;;  %v7770_v31 = vrot.slane %v7769_v15, 1 }
 0xf16   : > { %v8067_v13 = vmul.f32 %v13233_v33, %v18126_v12  ;;  %v8130_v16 = vmul.f32 %v8066_v42, %v18129_v36  ;;  %13240 = vrcp.f32 %v7663_v56  ;;  %v7375_v4 = vmax.f32 %v7373_v58, %v7374_v57 }
 0xf17   : > { %v12295_v35 = vpack.c.bf16 %v8113_v40, %v8112_v44  ;;  %v7771_v26 = vadd.f32 %v7770_v31, %v7769_v15  ;;  %13242 = vrcp.f32 %v7765_v11  ;;  %v7365_v52 = vmax.f32 %v17160_v24, %v7364_v9  ;;  %v18139_v40 = vld [vmem:[#allocation67_spill] sm:$0xff] }
 0xf18   : > { %v8131_v22 = vmul.f32 %v8067_v13, %v18129_v36  ;;  %v7459_v48 = vsub.f32 %v17145_v29, %v7375_v4  ;;  %v7664_v45 = vrot.slane %v18135_v7, 4  ;;  %v7670_v43 = vrot.slane %v18136_v17, 4 }
 0xf19   : > { %v17177_v8 = vpop.eup %13234  ;;  %12296 = vmatpush3.bf16.msra.mxu0 %v12295_v35  ;;  %13244 = vrcp.f32 %v7771_v26  ;;  %v7366_v12 = vrot.slane %v7365_v52, 2  ;;  %v17181_v61 = vadd.f32 %v16938_v32, %v17102_v18  ;;  %v7772_v34 = vrot.slane %v18137_v6, 4 }
 0xf1a   : > { %v12297_v10 = vpack.c.bf16 %v8131_v22, %v8130_v16  ;;  %v7582_v39 = vmul.f32 1.442695, %v7459_v48  ;;  %v7665_v53 = vadd.f32 %v18135_v7, %v7664_v45  ;;  %v7671_v29 = vadd.f32 %v18136_v17, %v7670_v43 }
 0xf1b   : > { %v7367_v9 = vmax.f32 %v7365_v52, %v7366_v12  ;;  %v7382_v59 = vrot.slane %v17181_v61, 4  ;;  %v7773_v44 = vadd.f32 %v18137_v6, %v7772_v34  ;;  %v7778_v63 = vrot.slane %v18138_v37, 4 }
 0xf1c   : > { %12298 = vmatprep.subr.bf16.mxu0 %v12297_v10  ;;  %13246 = vpow2.f32 %v7582_v39  ;;  %v7666_v58 = vrot.slane %v7665_v53, 2  ;;  %v7672_v32 = vrot.slane %v7671_v29, 2  ;;  %v17191_v50 = vadd.f32 %v16943_v47, %v17102_v18 }
 0xf1d   : > { %v7368_v21 = vrot.slane %v7367_v9, 1  ;;  %v7383_v55 = vmax.f32 %v17181_v61, %v7382_v59  ;;  %v7774_v23 = vrot.slane %v7773_v44, 2  ;;  %v7779_v15 = vadd.f32 %v18138_v37, %v7778_v63 }
 0xf1e   : > { %v13237_v42 = vpop.eup %13236  ;;  %v7667_v56 = vadd.f32 %v7666_v58, %v7665_v53  ;;  %v7673_v57 = vadd.f32 %v7672_v32, %v7671_v29  ;;  %v7376_v33 = vrot.slane %v17191_v50, 4  ;;  %v7676_v11 = vrot.slane %v18139_v40, 4 }
 0xf1f   : > { %v17197_v31 = vpop.eup %13238  ;;  %v8050_v13 = vmul.f32 %v13237_v42, %v18128_v28  ;;  %v7369_v16 = vmax.f32 %v7367_v9, %v7368_v21  ;;  %v7384_v47 = vrot.slane %v7383_v55, 2  ;;  %v7775_v4 = vadd.f32 %v7774_v23, %v7773_v44 }
 0xf20   : > { %v13241_v35 = vpop.eup %13240  ;;  %v7668_v26 = vrot.slane %v7667_v56, 1  ;;  %v7674_v52 = vrot.slane %v7673_v57, 1  ;;  %v7780_v22 = vrot.slane %v7779_v15, 2  ;;  %v7377_v48 = vmax.f32 %v17191_v50, %v7376_v33  ;;  %v18140_v33 = vld [vmem:[#allocation88_spill] sm:$0xff] }
 0xf21   : > { %v13243_v45 = vpop.eup %13242  ;;  %v8051_v43 = vmul.f32 %v13241_v35, %v18130_v2  ;;  %v8114_v12 = vmul.f32 %v8050_v13, %v18134_v19  ;;  %v7458_v34 = vsub.f32 %v17160_v24, %v7369_v16  ;;  %v7385_v10 = vmax.f32 %v7383_v55, %v7384_v47 }
 0xf22   : > { %v8068_v39 = vmul.f32 %v13243_v45, %v18132_v5  ;;  %v7669_v28 = vadd.f32 %v7668_v26, %v7667_v56  ;;  %v7675_v53 = vadd.f32 %v7674_v52, %v7673_v57  ;;  %v7776_v29 = vrot.slane %v7775_v4, 1 }
 0xf23   : > { %v13245_v9 = vpop.eup %13244  ;;  %v8115_v59 = vmul.f32 %v8051_v43, %v18134_v19  ;;  %v7580_v44 = vmul.f32 1.442695, %v7458_v34  ;;  %v7386_v63 = vrot.slane %v7385_v10, 1  ;;  %v7781_v58 = vadd.f32 %v7780_v22, %v7779_v15 }
 0xf24   : > { %v8069_v32 = vmul.f32 %v13245_v9, %v18133_v3  ;;  %v8132_v2 = vmul.f32 %v8068_v39, %v18129_v36  ;;  %13248 = vrcp.f32 %v7669_v28  ;;  %v7777_v21 = vadd.f32 %v7776_v29, %v7775_v4  ;;  %v18141_v29 = vld [vmem:[#allocation97_spill] sm:$0xff] }
 0xf25   : > { %v12299_v23 = vpack.c.bf16 %v8115_v59, %v8114_v12  ;;  %13250 = vpow2.f32 %v7580_v44  ;;  %v7387_v24 = vmax.f32 %v7385_v10, %v7386_v63  ;;  %v7782_v55 = vrot.slane %v7781_v58, 1 }
 0xf26   : > { %v17208_v5 = vpop.eup %13246  ;;  %v8133_v42 = vmul.f32 %v8069_v32, %v18129_v36  ;;  %13252 = vrcp.f32 %v7675_v53  ;;  %v7378_v56 = vrot.slane %v7377_v48, 2  ;;  %v7677_v57 = vadd.f32 %v18139_v40, %v7676_v11 }
 0xf27   : > { %12300 = vmatpush3.bf16.msra.mxu0 %v12299_v23  ;;  %v7461_v15 = vsub.f32 %v17181_v61, %v7387_v24  ;;  %v7783_v3 = vadd.f32 %v7782_v55, %v7781_v58  ;;  %13254 = vrcp.f32 %v7777_v21  ;;  %v7682_v13 = vrot.slane %v18140_v33, 4 }
 0xf28   : > { %v12301_v16 = vpack.c.bf16 %v8133_v42, %v8132_v2  ;;  %v7379_v47 = vmax.f32 %v7377_v48, %v7378_v56  ;;  %v7678_v4 = vrot.slane %v7677_v57, 2  ;;  %v17216_v35 = vadd.f32 %v16971_v41, %v17102_v18 }
 0xf29   : > { %v7586_v26 = vmul.f32 1.442695, %v7461_v15  ;;  %13256 = vrcp.f32 %v7783_v3  ;;  %v7683_v52 = vadd.f32 %v18140_v33, %v7682_v13  ;;  %v17221_v11 = vadd.f32 %v16977_v20, %v17102_v18 }
 0xf2a   : > { %12302 = vmatprep.subr.bf16.mxu0 %v12301_v16  ;;  %v7380_v61 = vrot.slane %v7379_v47, 1  ;;  %v7679_v22 = vadd.f32 %v7678_v4, %v7677_v57  ;;  %v7394_v45 = vrot.slane %v17216_v35, 4  ;;  %v7880_v48 = vrot.slane %v17056_v30, 4 }
 0xf2b   : > { %13258 = vpow2.f32 %v7586_v26  ;;  %v7684_v43 = vrot.slane %v7683_v52, 2  ;;  %v7388_v41 = vrot.slane %v17221_v11, 4  ;;  %v7886_v12 = vrot.slane %v17038_v62, 4 }
 0xf2c   : > { %v7381_v34 = vmax.f32 %v7379_v47, %v7380_v61  ;;  %v7680_v10 = vrot.slane %v7679_v22, 1  ;;  %v7395_v39 = vmax.f32 %v17216_v35, %v7394_v45  ;;  %v7881_v20 = vadd.f32 %v17056_v30, %v7880_v48 }
 0xf2d   : > { %v7685_v18 = vadd.f32 %v7684_v43, %v7683_v52  ;;  %v7389_v28 = vmax.f32 %v17221_v11, %v7388_v41  ;;  %v7887_v53 = vadd.f32 %v17038_v62, %v7886_v12  ;;  %v7784_v9 = vrot.slane %v18141_v29, 4 }
 0xf2e   : > { %v13249_v59 = vpop.eup %13248  ;;  %v7460_v44 = vsub.f32 %v17191_v50, %v7381_v34  ;;  %v7681_v63 = vadd.f32 %v7680_v10, %v7679_v22  ;;  %v7396_v58 = vrot.slane %v7395_v39, 2  ;;  %v7882_v32 = vrot.slane %v7881_v20, 2 }
 0xf2f   : > { %v17233_v2 = vpop.eup %13250  ;;  %v8052_v21 = vmul.f32 %v13249_v59, %v18135_v7  ;;  %v7686_v23 = vrot.slane %v7685_v18, 1  ;;  %v7390_v24 = vrot.slane %v7389_v28, 2  ;;  %v7888_v55 = vrot.slane %v7887_v53, 2 }
 0xf30   : > { %v13253_v42 = vpop.eup %13252  ;;  %v7584_v56 = vmul.f32 1.442695, %v7460_v44  ;;  %13260 = vrcp.f32 %v7681_v63  ;;  %v7397_v57 = vmax.f32 %v7395_v39, %v7396_v58  ;;  %v7883_v15 = vadd.f32 %v7882_v32, %v7881_v20 }
 0xf31   : > { %v13255_v3 = vpop.eup %13254  ;;  %v8053_v13 = vmul.f32 %v13253_v42, %v18136_v17  ;;  %v8116_v50 = vmul.f32 %v8052_v21, %v18134_v19  ;;  %v7687_v16 = vadd.f32 %v7686_v23, %v7685_v18  ;;  %v7391_v47 = vmax.f32 %v7389_v28, %v7390_v24  ;;  %v18142_v28 = vld [vmem:[#allocation98_spill] sm:$0xff]  ;;  %v18143_v42 = vld [vmem:[#allocation59_spill] sm:$0xff] }
 0xf32   : > { %v8070_v4 = vmul.f32 %v13255_v3, %v18137_v6  ;;  %13262 = vpow2.f32 %v7584_v56  ;;  %v7398_v26 = vrot.slane %v7397_v57, 1  ;;  %v7884_v7 = vrot.slane %v7883_v15, 1 }
 0xf33   : > { %v13257_v52 = vpop.eup %13256  ;;  %v8117_v61 = vmul.f32 %v8053_v13, %v18134_v19  ;;  %13264 = vrcp.f32 %v7687_v16  ;;  %v7392_v22 = vrot.slane %v7391_v47, 1  ;;  %v7889_v45 = vadd.f32 %v7888_v55, %v7887_v53 }
 0xf34   : > { %v8071_v48 = vmul.f32 %v13257_v52, %v18138_v37  ;;  %v8134_v43 = vmul.f32 %v8070_v4, %v18129_v36  ;;  %v7399_v17 = vmax.f32 %v7397_v57, %v7398_v26  ;;  %v7885_v41 = vadd.f32 %v7884_v7, %v7883_v15  ;;  %v18144_v4 = vld [vmem:[#allocation69_spill] sm:$0xff] }
 0xf35   : > { %v17242_v12 = vpop.eup %13258  ;;  %v12303_v34 = vpack.c.bf16 %v8117_v61, %v8116_v50  ;;  %v7393_v10 = vmax.f32 %v7391_v47, %v7392_v22  ;;  %v7890_v6 = vrot.slane %v7889_v45, 1  ;;  %v7785_v39 = vadd.f32 %v18141_v29, %v7784_v9 }
 0xf36   : > { %v8135_v20 = vmul.f32 %v8071_v48, %v18129_v36  ;;  %v7463_v18 = vsub.f32 %v17216_v35, %v7399_v17  ;;  %13266 = vrcp.f32 %v7885_v41  ;;  %v7790_v53 = vrot.slane %v18142_v28, 4 }
 0xf37   : > { %12304 = vmatpush3.bf16.msra.mxu0 %v12303_v34  ;;  %v7462_v37 = vsub.f32 %v17221_v11, %v7393_v10  ;;  %v7891_v59 = vadd.f32 %v7890_v6, %v7889_v45  ;;  %v7786_v44 = vrot.slane %v7785_v39, 2  ;;  %v7892_v63 = vrot.slane %v17095_v14, 4 }
 0xf38   : > { %v12305_v58 = vpack.c.bf16 %v8135_v20, %v8134_v43  ;;  %v7590_v32 = vmul.f32 1.442695, %v7463_v18  ;;  %v7791_v21 = vadd.f32 %v18142_v28, %v7790_v53  ;;  %v7898_v9 = vrot.slane %v17068_v38, 4 }
 0xf39   : > { %v7588_v23 = vmul.f32 1.442695, %v7462_v37  ;;  %13268 = vrcp.f32 %v7891_v59  ;;  %v7787_v36 = vadd.f32 %v7786_v44, %v7785_v39  ;;  %v7893_v35 = vadd.f32 %v17095_v14, %v7892_v63  ;;  %v12734_v63 = vld [vmem:[%s14706_s9] sm:$0xff]  }
 0xf3a   : > { %v13261_v24 = vpop.eup %13260  ;;  %12306 = vmatprep.subr.bf16.mxu0 %v12305_v58  ;;  %13270 = vpow2.f32 %v7590_v32  ;;  %v7792_v55 = vrot.slane %v7791_v21, 2  ;;  %v7899_v11 = vadd.f32 %v17068_v38, %v7898_v9  ;;  %v7796_v56 = vrot.slane %v18143_v42, 4 }
 0xf3b   : > { %v8054_v57 = vmul.f32 %v13261_v24, %v18139_v40  ;;  %13272 = vpow2.f32 %v7588_v23  ;;  %v7788_v15 = vrot.slane %v7787_v36, 1  ;;  %v7894_v3 = vrot.slane %v7893_v35, 2  ;;  %v18145_v23 = vld [vmem:[#allocation77_spill] sm:$0xff] }
 0xf3c   : > { %v17256_v13 = vpop.eup %13262  ;;  %v7793_v50 = vadd.f32 %v7792_v55, %v7791_v21  ;;  %v7900_v16 = vrot.slane %v7899_v11, 2  ;;  %v7797_v47 = vadd.f32 %v18143_v42, %v7796_v56  ;;  %v7802_v26 = vrot.slane %v18144_v4, 4 }
 0xf3d   : > { %v13265_v7 = vpop.eup %13264  ;;  %v8118_v52 = vmul.f32 %v8054_v57, %v18134_v19  ;;  %v7789_v61 = vadd.f32 %v7788_v15, %v7787_v36  ;;  %v7895_v22 = vadd.f32 %v7894_v3, %v7893_v35  ;;  %v7904_v45 = vrot.slane %v17127_v27, 4 }
 0xf3e   : > { %v8055_v40 = vmul.f32 %v13265_v7, %v18140_v33  ;;  %v7794_v48 = vrot.slane %v7793_v50, 1  ;;  %v7901_v43 = vadd.f32 %v7900_v16, %v7899_v11  ;;  %v7798_v17 = vrot.slane %v7797_v47, 2 }
 0xf3f   : > { %13274 = vrcp.f32 %v7789_v61  ;;  %v7896_v41 = vrot.slane %v7895_v22, 1  ;;  %v7803_v34 = vadd.f32 %v18144_v4, %v7802_v26  ;;  %v7905_v10 = vadd.f32 %v17127_v27, %v7904_v45 }
 0xf40   : > { %v13267_v6 = vpop.eup %13266  ;;  %v8119_v39 = vmul.f32 %v8055_v40, %v18134_v19  ;;  %v7795_v20 = vadd.f32 %v7794_v48, %v7793_v50  ;;  %v7902_v18 = vrot.slane %v7901_v43, 1  ;;  %v7799_v53 = vadd.f32 %v7798_v17, %v7797_v47  ;;  %v18146_v50 = vld [vmem:[#allocation61_spill] sm:$0xff]  ;;  %v13408_v40 = vld [vmem:[%s18045_s4] sm:$0xff] }
 0xf41   : > { %v8088_v37 = vmul.f32 %v13267_v6, %v17056_v30  ;;  %v7897_v59 = vadd.f32 %v7896_v41, %v7895_v22  ;;  %v7804_v33 = vrot.slane %v7803_v34, 2  ;;  %v7906_v44 = vrot.slane %v7905_v10, 2  ;;  %v12735_v47 = vld [vmem:[%s14706_s9 + $0x8] sm:$0xff]  }
 0xf42   : > { %v12307_v58 = vpack.c.bf16 %v8119_v39, %v8118_v52  ;;  %13276 = vrcp.f32 %v7795_v20  ;;  %v7903_v32 = vadd.f32 %v7902_v18, %v7901_v43  ;;  %v7800_v21 = vrot.slane %v7799_v53, 1  ;;  %v18147_v20 = vld [vmem:[#allocation63_spill] sm:$0xff] }
 0xf43   : > { %v13269_v9 = vpop.eup %13268  ;;  %v8152_v36 = vmul.f32 %v8088_v37, %v18145_v23  ;;  %13278 = vrcp.f32 %v7897_v59  ;;  %v7805_v35 = vadd.f32 %v7804_v33, %v7803_v34  ;;  %v7907_v19 = vadd.f32 %v7906_v44, %v7905_v10  ;;  %v13409_v34 = vld [vmem:[%s18045_s4 + $0x28] sm:$0xff] }
 0xf44   : > { %v17269_v24 = vpop.eup %13270  ;;  %12308 = vmatpush3.bf16.msra.mxu0 %v12307_v58  ;;  %v8089_v30 = vmul.f32 %v13269_v9, %v17038_v62  ;;  %13280 = vrcp.f32 %v7903_v32  ;;  %v7801_v55 = vadd.f32 %v7800_v21, %v7799_v53  ;;  %v7910_v11 = vrot.slane %v17106_v54, 4  ;;  %v12736_v53 = vld [vmem:[%s14706_s9 + $0x10] sm:$0xff]   ;;  %v13410_v21 = vld [vmem:[%s18045_s4 + $0x20] sm:$0xff] }
 0xf45   : > { %v17273_v56 = vpop.eup %13272  ;;  %v7806_v57 = vrot.slane %v7805_v35, 1  ;;  %v7908_v15 = vrot.slane %v7907_v19, 1  ;;  %v7808_v3 = vrot.slane %v16934_v0, 4  ;;  %v7814_v16 = vrot.slane %v18146_v50, 4  ;;  %12093 = vmatprep.subr.bf16.mxu0 %v12734_v63 }
 0xf46   : > { %v8153_v26 = vmul.f32 %v8089_v30, %v18145_v23  ;;  %13282 = vrcp.f32 %v7801_v55  ;;  %v7911_v62 = vadd.f32 %v17106_v54, %v7910_v11  ;;  %v7916_v7 = vrot.slane %v17155_v1, 4  ;;  %v18149_v55 = vld [vmem:[#allocation62_spill] sm:$0xff] }
 0xf47   : > { %v7807_v52 = vadd.f32 %v7806_v57, %v7805_v35  ;;  %v7909_v61 = vadd.f32 %v7908_v15, %v7907_v19  ;;  %v7809_v22 = vadd.f32 %v16934_v0, %v7808_v3  ;;  %v7815_v45 = vadd.f32 %v18146_v50, %v7814_v16  ;;  %8233 = vmatmul.mubr.f32.vlgmr.msra.gmra.mrb[208].mxu0 %v13408_v40 }
 0xf48   : > { %v12309_v48 = vpack.c.bf16 %v8153_v26, %v8152_v36  ;;  %v7912_v43 = vrot.slane %v7911_v62, 2  ;;  %v7917_v17 = vadd.f32 %v17155_v1, %v7916_v7  ;;  %v7922_v41 = vrot.slane %v17147_v49, 4  ;;  %8237 = vmatprep.mubr.f32.mxu0 %v13409_v34  ;;  %12094 = vmatpush3.bf16.msra.mxu0 %v12734_v63  ;;  %v18148_v36 = vld [vmem:[#allocation76_spill] sm:$0xff] }
 0xf49   : > { %v13275_v10 = vpop.eup %13274  ;;  %13284 = vrcp.f32 %v7807_v52  ;;  %v7810_v6 = vrot.slane %v7809_v22, 2  ;;  %v7816_v39 = vrot.slane %v7815_v45, 2  ;;  %v7820_v18 = vrot.slane %v18147_v20, 4  ;;  %12095 = vmatprep.subr.bf16.mxu0 %v12735_v47 }
 0xf4a   : > { %12310 = vmatprep.subr.bf16.mxu1 %v12309_v48  ;;  %v8072_v37 = vmul.f32 %v13275_v10, %v18141_v29  ;;  %v7913_v59 = vadd.f32 %v7912_v43, %v7911_v62  ;;  %13286 = vrcp.f32 %v7909_v61  ;;  %v7918_v33 = vrot.slane %v7917_v17, 2  ;;  %v13411_v29 = vld [vmem:[%s18045_s4 + $0x48] sm:$0xff]  ;;  %v12737_v62 = vld [vmem:[%s14706_s9 + $0x18] sm:$0xff]  }
 0xf4b   : > { %v7811_v44 = vadd.f32 %v7810_v6, %v7809_v22  ;;  %v7817_v58 = vadd.f32 %v7816_v39, %v7815_v45  ;;  %v7923_v63 = vadd.f32 %v17147_v49, %v7922_v41  ;;  %v7821_v32 = vadd.f32 %v18147_v20, %v7820_v18  ;;  %8238 = vmatmul.mubr.f32.gmra.mrb[210].mxu0 %v13410_v21  ;;  %v13413_v6 = vld [vmem:[%s18045_s4 + $0x68] sm:$0xff]  ;;  %v12738_v18 = vld [vmem:[%s14706_s9 + $0x20] sm:$0xff]  }
 0xf4c   : > { %v13277_v9 = vpop.eup %13276  ;;  %v8136_v35 = vmul.f32 %v8072_v37, %v18148_v36  ;;  %v7914_v19 = vrot.slane %v7913_v59, 1  ;;  %v7919_v30 = vadd.f32 %v7918_v33, %v7917_v17  ;;  %v7826_v11 = vrot.slane %v18149_v55, 4  ;;  %8242 = vmatprep.mubr.f32.mxu0 %v13411_v29  ;;  %12096 = vmatpush3.bf16.msra.mxu0 %v12735_v47  ;;  %v13414_v21 = vld [vmem:[%s18045_s4 + $0x60] sm:$0xff]  ;;  %v13415_v29 = vld [vmem:[%s18045_s4 + $0x88] sm:$0xff] }
 0xf4d   : > { %v13279_v57 = vpop.eup %13278  ;;  %v8073_v15 = vmul.f32 %v13277_v9, %v18142_v28  ;;  %v7812_v3 = vrot.slane %v7811_v44, 1  ;;  %v7818_v16 = vrot.slane %v7817_v58, 1  ;;  %v7924_v26 = vrot.slane %v7923_v63, 2  ;;  %12097 = vmatprep.subr.bf16.mxu0 %v12736_v53  ;;  %v13412_v28 = vld [vmem:[%s18045_s4 + $0x40] sm:$0xff] }
 0xf4e   : > { %v13281_v7 = vpop.eup %13280  ;;  %v8090_v52 = vmul.f32 %v13279_v57, %v17095_v14  ;;  %v7915_v61 = vadd.f32 %v7914_v19, %v7913_v59  ;;  %v7920_v22 = vrot.slane %v7919_v30, 1  ;;  %v7822_v45 = vrot.slane %v7821_v32, 2 }
 0xf4f   : > { %v8137_v40 = vmul.f32 %v8073_v15, %v18148_v36  ;;  %v8091_v47 = vmul.f32 %v13281_v7, %v17068_v38  ;;  %v7813_v48 = vadd.f32 %v7812_v3, %v7811_v44  ;;  %v7819_v43 = vadd.f32 %v7818_v16, %v7817_v58  ;;  %8243 = vmatmul.mubr.f32.gmra.mrb[212].mxu0 %v13412_v28  ;;  %v18150_v15 = vld [vmem:[#allocation65_spill] sm:$0xff] }
 0xf50   : > { %v13283_v17 = vpop.eup %13282  ;;  %v8154_v41 = vmul.f32 %v8090_v52, %v18145_v23  ;;  %13288 = vrcp.f32 %v7915_v61  ;;  %v7921_v34 = vadd.f32 %v7920_v22, %v7919_v30  ;;  %v7925_v10 = vadd.f32 %v7924_v26, %v7923_v63  ;;  %8247 = vmatprep.mubr.f32.mxu0 %v13413_v6  ;;  %12098 = vmatpush3.bf16.msra.mxu0 %v12736_v53  ;;  %v13416_v61 = vld [vmem:[%s18045_s4 + $0x80] sm:$0xff] }
 0xf51   : > { %v12311_v14 = vpack.c.bf16 %v8137_v40, %v8136_v35  ;;  %v8155_v39 = vmul.f32 %v8091_v47, %v18145_v23  ;;  %v8074_v38 = vmul.f32 %v13283_v17, %v18143_v42  ;;  %13290 = vrcp.f32 %v7813_v48  ;;  %12099 = vmatprep.subr.bf16.mxu0 %v12737_v62  ;;  %v18151_v40 = vld [vmem:[#allocation64_spill] sm:$0xff] }
 0xf52   : > { %13292 = vrcp.f32 %v7819_v43  ;;  %v7926_v37 = vrot.slane %v7925_v10, 1  ;;  %v7823_v59 = vadd.f32 %v7822_v45, %v7821_v32  ;;  %v7827_v33 = vadd.f32 %v18149_v55, %v7826_v11  ;;  %v13417_v48 = vld [vmem:[%s18045_s4 + $0xa8] sm:$0xff] }
 0xf53   : > { %v13285_v44 = vpop.eup %13284  ;;  %12312 = vmatpush3.bf16.msra.mxu1 %v12311_v14  ;;  %v12313_v58 = vpack.c.bf16 %v8155_v39, %v8154_v41  ;;  %v8138_v53 = vmul.f32 %v8074_v38, %v18148_v36  ;;  %13294 = vrcp.f32 %v7921_v34  ;;  %v7928_v63 = vrot.slane %v17197_v31, 4  ;;  %8248 = vmatmul.mubr.f32.gmra.mrb[214].mxu0 %v13414_v21  ;;  %v18152_v39 = vld [vmem:[#allocation99_spill] sm:$0xff] }
 0xf54   : > { %v13287_v42 = vpop.eup %13286  ;;  %v8075_v9 = vmul.f32 %v13285_v44, %v18144_v4  ;;  %v7927_v35 = vadd.f32 %v7926_v37, %v7925_v10  ;;  %v7824_v19 = vrot.slane %v7823_v59, 1  ;;  %v7828_v30 = vrot.slane %v7827_v33, 2  ;;  %8252 = vmatprep.mubr.f32.mxu0 %v13415_v29  ;;  %12100 = vmatpush3.bf16.msra.mxu0 %v12737_v62 }
 0xf55   : > { %12314 = vmatprep.subr.bf16.mxu1 %v12313_v58  ;;  %v8092_v32 = vmul.f32 %v13287_v42, %v17127_v27  ;;  %v7929_v11 = vadd.f32 %v17197_v31, %v7928_v63  ;;  %v7934_v57 = vrot.slane %v17177_v8, 4  ;;  %v7832_v3 = vrot.slane %v18150_v15, 4  ;;  %12101 = vmatprep.subr.bf16.mxu0 %v12738_v18  ;;  %v13418_v58 = vld [vmem:[%s18045_s4 + $0xa0] sm:$0xff] }
 0xf56   : > { %v8139_v4 = vmul.f32 %v8075_v9, %v18148_v36  ;;  %13296 = vrcp.f32 %v7927_v35  ;;  %v7825_v16 = vadd.f32 %v7824_v19, %v7823_v59  ;;  %v7829_v26 = vadd.f32 %v7828_v30, %v7827_v33  ;;  %v13419_v9 = vld [vmem:[%s18045_s4 + $0xc8] sm:$0xff] }
 0xf57   : > { %v8156_v7 = vmul.f32 %v8092_v32, %v18145_v23  ;;  %v7930_v52 = vrot.slane %v7929_v11, 2  ;;  %v7935_v62 = vadd.f32 %v17177_v8, %v7934_v57  ;;  %v7833_v27 = vadd.f32 %v18150_v15, %v7832_v3  ;;  %8253 = vmatmul.mubr.f32.gmra.mrb[216].mxu0 %v13416_v61 }
 0xf58   : > { %v12315_v22 = vpack.c.bf16 %v8139_v4, %v8138_v53  ;;  %v7830_v45 = vrot.slane %v7829_v26, 1  ;;  %13298 = vrcp.f32 %v7825_v16  ;;  %v7838_v47 = vrot.slane %v18151_v40, 4  ;;  %8257 = vmatprep.mubr.f32.mxu0 %v13417_v48  ;;  %12102 = vmatpush3.bf16.msra.mxu0 %v12738_v18 }
 0xf59   : > { %v7931_v43 = vadd.f32 %v7930_v52, %v7929_v11  ;;  %v7936_v28 = vrot.slane %v7935_v62, 2  ;;  %v7834_v17 = vrot.slane %v7833_v27, 2  ;;  %v7940_v41 = vrot.slane %v17233_v2, 4 }
 0xf5a   : > { %v13289_v34 = vpop.eup %13288  ;;  %12316 = vmatpush3.bf16.msra.mxu1 %v12315_v22  ;;  %v7831_v10 = vadd.f32 %v7830_v45, %v7829_v26  ;;  %v7839_v6 = vadd.f32 %v18151_v40, %v7838_v47  ;;  %v7946_v14 = vrot.slane %v17208_v5, 4  ;;  %v7844_v38 = vrot.slane %v18152_v39, 4  ;;  %v13420_v26 = vld [vmem:[%s18045_s4 + $0xc0] sm:$0xff]  ;;  %v13421_v22 = vld [vmem:[%s18045_s4 + $0xe8] sm:$0xff] }
 0xf5b   : > { %v13291_v37 = vpop.eup %13290  ;;  %v8093_v59 = vmul.f32 %v13289_v34, %v17106_v54  ;;  %v7932_v18 = vrot.slane %v7931_v43, 1  ;;  %v7937_v33 = vadd.f32 %v7936_v28, %v7935_v62  ;;  %v7835_v44 = vadd.f32 %v7834_v17, %v7833_v27  ;;  %8258 = vmatmul.mubr.f32.gmra.mrb[218].mxu0 %v13418_v58 }
 0xf5c   : > { %v13293_v53 = vpop.eup %13292  ;;  %v8076_v63 = vmul.f32 %v13291_v37, %v16934_v0  ;;  %13300 = vrcp.f32 %v7831_v10  ;;  %v7840_v21 = vrot.slane %v7839_v6, 2  ;;  %v7941_v42 = vadd.f32 %v17233_v2, %v7940_v41  ;;  %8262 = vmatprep.mubr.f32.mxu0 %v13419_v9  ;;  %v18153_v10 = vld [vmem:[#allocation72_spill] sm:$0xff] }
 0xf5d   : > { %v13295_v35 = vpop.eup %13294  ;;  %v8157_v19 = vmul.f32 %v8093_v59, %v18145_v23  ;;  %v8077_v54 = vmul.f32 %v13293_v53, %v18146_v50  ;;  %v7933_v30 = vadd.f32 %v7932_v18, %v7931_v43  ;;  %v7938_v29 = vrot.slane %v7937_v33, 1  ;;  %v13422_v37 = vld [vmem:[%s18045_s4 + $0xe0] sm:$0xff] }
 0xf5e   : > { %v8140_v32 = vmul.f32 %v8076_v63, %v18148_v36  ;;  %v8094_v11 = vmul.f32 %v13295_v35, %v17155_v1  ;;  %v7836_v0 = vrot.slane %v7835_v44, 1  ;;  %v7841_v57 = vadd.f32 %v7840_v21, %v7839_v6 }
 0xf5f   : > { %v12317_v3 = vpack.c.bf16 %v8157_v19, %v8156_v7  ;;  %v8141_v4 = vmul.f32 %v8077_v54, %v18148_v36  ;;  %v7939_v16 = vadd.f32 %v7938_v29, %v7937_v33  ;;  %13302 = vrcp.f32 %v7933_v30  ;;  %8263 = vmatmul.mubr.f32.gmra.mrb[220].mxu0 %v13420_v26 }
 0xf60   : > { %v13297_v52 = vpop.eup %13296  ;;  %v8158_v62 = vmul.f32 %v8094_v11, %v18145_v23  ;;  %v7837_v50 = vadd.f32 %v7836_v0, %v7835_v44  ;;  %v7842_v27 = vrot.slane %v7841_v57, 1  ;;  %v7942_v61 = vrot.slane %v7941_v42, 2  ;;  %8267 = vmatprep.mubr.f32.mxu0 %v13421_v22  ;;  %v18154_v22 = vld [vmem:[#allocation85_spill] sm:$0xff] }
 0xf61   : > { %12318 = vmatprep.subr.bf16.mxu1 %v12317_v3  ;;  %v12319_v1 = vpack.c.bf16 %v8141_v4, %v8140_v32  ;;  %v8095_v45 = vmul.f32 %v13297_v52, %v17147_v49  ;;  %13304 = vrcp.f32 %v7939_v16  ;;  %v7947_v7 = vadd.f32 %v17208_v5, %v7946_v14 }
 0xf62   : > { %v13299_v47 = vpop.eup %13298  ;;  %v7843_v48 = vadd.f32 %v7842_v27, %v7841_v57  ;;  %13306 = vrcp.f32 %v7837_v50  ;;  %v7943_v43 = vadd.f32 %v7942_v61, %v7941_v42  ;;  %v7845_v28 = vadd.f32 %v18152_v39, %v7844_v38 }
 0xf63   : > { %12320 = vmatpush3.bf16.msra.mxu1 %v12319_v1  ;;  %v8159_v17 = vmul.f32 %v8095_v45, %v18145_v23  ;;  %v8078_v41 = vmul.f32 %v13299_v47, %v18147_v20  ;;  %v7948_v34 = vrot.slane %v7947_v7, 2  ;;  %v7850_v6 = vrot.slane %v18153_v10, 4  ;;  %8268 = vmatmul.mubr.f32.gmra.mrb[222].mxu0 %v13422_v37 }
 0xf64   : > { %13308 = vrcp.f32 %v7843_v48  ;;  %v7944_v49 = vrot.slane %v7943_v43, 1  ;;  %v7846_v59 = vrot.slane %v7845_v28, 2  ;;  %v7952_v14 = vrot.slane %v17256_v13, 4 }
 0xf65   : > { %v12321_v18 = vpack.c.bf16 %v8159_v17, %v8158_v62  ;;  %v8142_v33 = vmul.f32 %v8078_v41, %v18148_v36  ;;  %v7949_v44 = vadd.f32 %v7948_v34, %v7947_v7  ;;  %v7851_v38 = vadd.f32 %v18153_v10, %v7850_v6  ;;  %v18155_v34 = vld [vmem:[#allocation84_spill] sm:$0xff] }
 0xf66   : > { %v13301_v58 = vpop.eup %13300  ;;  %v7945_v23 = vadd.f32 %v7944_v49, %v7943_v43  ;;  %v7847_v53 = vadd.f32 %v7846_v59, %v7845_v28  ;;  %v7953_v20 = vadd.f32 %v17256_v13, %v7952_v14  ;;  %v7958_v63 = vrot.slane %v17242_v12, 4 }
 0xf67   : > { %12322 = vmatprep.subr.bf16.mxu1 %v12321_v18  ;;  %v8079_v21 = vmul.f32 %v13301_v58, %v18149_v55  ;;  %v7950_v42 = vrot.slane %v7949_v44, 1  ;;  %v7852_v9 = vrot.slane %v7851_v38, 2  ;;  %v7856_v35 = vrot.slane %v16997_v25, 4 }
 0xf68   : > { %13310 = vrcp.f32 %v7945_v23  ;;  %v7848_v19 = vrot.slane %v7847_v53, 1  ;;  %v7954_v54 = vrot.slane %v7953_v20, 2  ;;  %v7959_v30 = vadd.f32 %v17242_v12, %v7958_v63 }
 0xf69   : > { %v13303_v29 = vpop.eup %13302  ;;  %v8143_v32 = vmul.f32 %v8079_v21, %v18148_v36  ;;  %v7951_v11 = vadd.f32 %v7950_v42, %v7949_v44  ;;  %v7853_v0 = vadd.f32 %v7852_v9, %v7851_v38  ;;  %v7857_v57 = vadd.f32 %v16997_v25, %v7856_v35 }
 0xf6a   : > { %v8096_v3 = vmul.f32 %v13303_v29, %v17197_v31  ;;  %v7849_v4 = vadd.f32 %v7848_v19, %v7847_v53  ;;  %v7955_v55 = vadd.f32 %v7954_v54, %v7953_v20  ;;  %v7960_v16 = vrot.slane %v7959_v30, 2 }
 0xf6b   : > { %v13305_v26 = vpop.eup %13304  ;;  %v12323_v52 = vpack.c.bf16 %v8143_v32, %v8142_v33  ;;  %13312 = vrcp.f32 %v7951_v11  ;;  %v7854_v62 = vrot.slane %v7853_v0, 1  ;;  %v7858_v50 = vrot.slane %v7857_v57, 2 }
 0xf6c   : > { %v13307_v27 = vpop.eup %13306  ;;  %v8097_v61 = vmul.f32 %v13305_v26, %v17177_v8  ;;  %v8160_v1 = vmul.f32 %v8096_v3, %v18154_v22  ;;  %13314 = vrcp.f32 %v7849_v4  ;;  %v7956_v36 = vrot.slane %v7955_v55, 1 }
 0xf6d   : > { %12324 = vmatpush3.bf16.msra.mxu1 %v12323_v52  ;;  %v8080_v45 = vmul.f32 %v13307_v27, %v18150_v15  ;;  %v7855_v7 = vadd.f32 %v7854_v62, %v7853_v0  ;;  %v7961_v31 = vadd.f32 %v7960_v16, %v7959_v30  ;;  %v7859_v47 = vadd.f32 %v7858_v50, %v7857_v57 }
 0xf6e   : > { %v13309_v48 = vpop.eup %13308  ;;  %v8161_v43 = vmul.f32 %v8097_v61, %v18154_v22  ;;  %v7957_v28 = vadd.f32 %v7956_v36, %v7955_v55  ;;  %v7862_v17 = vrot.slane %v16993_v46, 4  ;;  %v7964_v41 = vrot.slane %v17273_v56, 4 }
 0xf6f   : > { %v8081_v8 = vmul.f32 %v13309_v48, %v18151_v40  ;;  %v8144_v6 = vmul.f32 %v8080_v45, %v18155_v34  ;;  %13316 = vrcp.f32 %v7855_v7  ;;  %v7962_v37 = vrot.slane %v7961_v31, 1 }
 0xf70   : > { %v12325_v49 = vpack.c.bf16 %v8161_v43, %v8160_v1  ;;  %13318 = vrcp.f32 %v7957_v28  ;;  %v7860_v15 = vrot.slane %v7859_v47, 1  ;;  %v7863_v59 = vadd.f32 %v16993_v46, %v7862_v17 }
 0xf71   : > { %v8145_v14 = vmul.f32 %v8081_v8, %v18155_v34  ;;  %v7963_v18 = vadd.f32 %v7962_v37, %v7961_v31  ;;  %v7965_v33 = vadd.f32 %v17273_v56, %v7964_v41  ;;  %v7970_v44 = vrot.slane %v17269_v24, 4 }
 0xf72   : > { %v13311_v38 = vpop.eup %13310  ;;  %12326 = vmatprep.subr.bf16.mxu1 %v12325_v49  ;;  %v7861_v58 = vadd.f32 %v7860_v15, %v7859_v47  ;;  %v7864_v40 = vrot.slane %v7863_v59, 2  ;;  %v7868_v23 = vrot.slane %v17021_v60, 4  ;;  %v7874_v53 = vrot.slane %v17002_v51, 4 }
 0xf73   : > { %v12327_v20 = vpack.c.bf16 %v8145_v14, %v8144_v6  ;;  %v8098_v63 = vmul.f32 %v13311_v38, %v17233_v2  ;;  %13320 = vrcp.f32 %v7963_v18  ;;  %v7966_v21 = vrot.slane %v7965_v33, 2 }
 0xf74   : > { %v7865_v42 = vadd.f32 %v7864_v40, %v7863_v59  ;;  %13322 = vrcp.f32 %v7861_v58  ;;  %v7971_v9 = vadd.f32 %v17269_v24, %v7970_v44  ;;  %v7869_v35 = vadd.f32 %v17021_v60, %v7868_v23 }
 0xf75   : > { %v13313_v19 = vpop.eup %13312  ;;  %12328 = vmatpush3.bf16.msra.mxu1 %v12327_v20  ;;  %v8162_v54 = vmul.f32 %v8098_v63, %v18154_v22  ;;  %v7967_v30 = vadd.f32 %v7966_v21, %v7965_v33  ;;  %v7875_v29 = vadd.f32 %v17002_v51, %v7874_v53 }
 0xf76   : > { %v13315_v32 = vpop.eup %13314  ;;  %v8099_v11 = vmul.f32 %v13313_v19, %v17208_v5  ;;  %v7866_v0 = vrot.slane %v7865_v42, 1  ;;  %v7972_v2 = vrot.slane %v7971_v9, 2  ;;  %v7870_v57 = vrot.slane %v7869_v35, 2  ;;  %v13429_v19 = vld [vmem:[%s18045_s4 + $0x70] sm:$0xff] }
 0xf77   : > { %v8082_v3 = vmul.f32 %v13315_v32, %v18152_v39  ;;  %v7968_v4 = vrot.slane %v7967_v30, 1  ;;  %v7876_v55 = vrot.slane %v7875_v29, 2  ;;  %v13433_v32 = vld [vmem:[%s18045_s4 + $0xb0] sm:$0xff] }
 0xf78   : > { %v8163_v16 = vmul.f32 %v8099_v11, %v18154_v22  ;;  %v7867_v26 = vadd.f32 %v7866_v0, %v7865_v42  ;;  %v7973_v52 = vadd.f32 %v7972_v2, %v7971_v9  ;;  %v7871_v62 = vadd.f32 %v7870_v57, %v7869_v35  ;;  %v13423_v9 = vld [vmem:[%s18045_s4 + $0x10] sm:$0xff]  ;;  %v13434_v11 = vld [vmem:[%s18045_s4 + $0xd8] sm:$0xff] }
 0xf79   : > { %v13317_v50 = vpop.eup %13316  ;;  %v8146_v27 = vmul.f32 %v8082_v3, %v18155_v34  ;;  %v7969_v61 = vadd.f32 %v7968_v4, %v7967_v30  ;;  %v7877_v1 = vadd.f32 %v7876_v55, %v7875_v29  ;;  %v13427_v35 = vld [vmem:[%s18045_s4 + $0x50] sm:$0xff]  ;;  %v13432_v29 = vld [vmem:[%s18045_s4 + $0xb8] sm:$0xff]  ;;  %v18156_v3 = vmov 0   ;;  %v12739_v4 = vld [vmem:[%s14706_s9 + $0x28] sm:$0xff]  }
 0xf7a   : > { %v13319_v36 = vpop.eup %13318  ;;  %v12329_v45 = vpack.c.bf16 %v8163_v16, %v8162_v54  ;;  %v8083_v5 = vmul.f32 %v13317_v50, %v18153_v10  ;;  %13324 = vrcp.f32 %v7867_v26  ;;  %v7974_v7 = vrot.slane %v7973_v52, 1  ;;  %v13430_v54 = vld [vmem:[%s18045_s4 + $0x98] sm:$0xff]  ;;  %v13431_v30 = vld [vmem:[%s18045_s4 + $0x90] sm:$0xff]  ;;  %12103 = vmatprep.subr.bf16.mxu0 %v12739_v4 }
 0xf7b   : > { %v8100_v39 = vmul.f32 %v13319_v36, %v17256_v13  ;;  %13326 = vrcp.f32 %v7969_v61  ;;  %v7872_v31 = vrot.slane %v7871_v62, 1  ;;  %v7878_v47 = vrot.slane %v7877_v1, 1  ;;  %v13435_v0 = vld [vmem:[%s18045_s4 + $0xd0] sm:$0xff]  ;;  %v13436_v2 = vld [vmem:[%s18045_s4 + $0xf8] sm:$0xff]  ;;  %12104 = vmatpush3.bf16.msra.mxu0 %v12739_v4 }
 0xf7c   : > { %12330 = vmatprep.subr.bf16.mxu1 %v12329_v45  ;;  %v8147_v48 = vmul.f32 %v8083_v5, %v18155_v34  ;;  %v7975_v43 = vadd.f32 %v7974_v7, %v7973_v52  ;;  %v13437_v57 = vld [vmem:[%s18045_s4 + $0xf0] sm:$0xff]  ;;  %v12741_v16 = vld [vmem:[%s14706_s9 + $0x38] sm:$0xff]  }
 0xf7d   : > { %v13321_v28 = vpop.eup %13320  ;;  %v8164_v17 = vmul.f32 %v8100_v39, %v18154_v22  ;;  %v7873_v41 = vadd.f32 %v7872_v31, %v7871_v62  ;;  %v7879_v8 = vadd.f32 %v7878_v47, %v7877_v1  ;;  %v12740_v55 = vld [vmem:[%s14706_s9 + $0x30] sm:$0xff]   ;;  %v12747_v62 = vld [vmem:[%s14709_s11 + $0xc] ss:$16 sps:$4 sm:$0xff]   ;;  %s18157_s9 = scalar_lea.vmem [#allocation16], %s14658_s16 }
 0xf7e   : > { %v13323_v6 = vpop.eup %13322  ;;  %v12331_v37 = vpack.c.bf16 %v8147_v48, %v8146_v27  ;;  %v8101_v10 = vmul.f32 %v13321_v28, %v17242_v12  ;;  %13328 = vrcp.f32 %v7975_v43  ;;  %12105 = vmatprep.subr.bf16.mxu0 %v12740_v55  ;;  %v12742_v26 = vld [vmem:[%s14709_s11] ss:$16 sps:$4 sm:$0xff]   ;;  %v12744_v52 = vld [vmem:[%s14709_s11 + $0x4] ss:$16 sps:$4 sm:$0xff]  }
 0xf7f   : > { %v8084_v49 = vmul.f32 %v13323_v6, %v16997_v25  ;;  %13330 = vrcp.f32 %v7873_v41  ;;  %12106 = vmatpush3.bf16.msra.mxu0 %v12740_v55  ;;  %v12750_v50 = vld [vmem:[%s14709_s11 + $0x24] ss:$16 sps:$4 sm:$0xff]   ;;  %v12748_v27 = vld [vmem:[%s14709_s11 + $0x20] ss:$16 sps:$4 sm:$0xff]  }
 0xf80   : > { %12332 = vmatpush3.bf16.msra.mxu1 %v12331_v37  ;;  %v8165_v13 = vmul.f32 %v8101_v10, %v18154_v22  ;;  %13332 = vrcp.f32 %v7879_v8  ;;  %12107 = vmatprep.subr.bf16.mxu0 %v12741_v16  ;;  %v12756_v61 = vld [vmem:[%s14709_s11 + $0x44] ss:$16 sps:$4 sm:$0xff]   ;;  %v12754_v1 = vld [vmem:[%s14709_s11 + $0x40] ss:$16 sps:$4 sm:$0xff]  }
 0xf81   : > { %v8148_v15 = vmul.f32 %v8084_v49, %v18155_v34  ;;  %v12762_v36 = vld [vmem:[%s14709_s11 + $0x64] ss:$16 sps:$4 sm:$0xff]   ;;  %v12760_v45 = vld [vmem:[%s14709_s11 + $0x60] ss:$16 sps:$4 sm:$0xff]  }
 0xf82   : > { %v12333_v59 = vpack.c.bf16 %v8165_v13, %v8164_v17  ;;  %v12768_v5 = vld [vmem:[%s14709_s11 + $0x84] ss:$16 sps:$4 sm:$0xff]   ;;  %v12766_v39 = vld [vmem:[%s14709_s11 + $0x80] ss:$16 sps:$4 sm:$0xff]  }
 0xf83   : > { %12108 = vmatpush3.bf16.msra.mxu0 %v12741_v16  ;;  %v12774_v47 = vld [vmem:[%s14709_s11 + $0xa4] ss:$16 sps:$4 sm:$0xff]   ;;  %v12772_v28 = vld [vmem:[%s14709_s11 + $0xa0] ss:$16 sps:$4 sm:$0xff]  }
 0xf84   : > { %v13325_v14 = vpop.eup %13324  ;;  %12334 = vmatprep.subr.bf16.mxu1 %v12333_v59  ;;  %8865 = vmatprep.subr.bf16.mxu0 %v12747_v62  ;;  %v12759_v62 = vld [vmem:[%s14709_s11 + $0x4c] ss:$16 sps:$4 sm:$0xff]  }
 0xf85   : > { %v13327_v18 = vpop.eup %13326  ;;  %v8085_v33 = vmul.f32 %v13325_v14, %v16993_v46 }
 0xf86   : > { %v8102_v44 = vmul.f32 %v13327_v18, %v17273_v56 }
 0xf87   : > { %v8149_v12 = vmul.f32 %v8085_v33, %v18155_v34 }
 0xf88   : > { %v13329_v38 = vpop.eup %13328  ;;  %v8166_v25 = vmul.f32 %v8102_v44, %v18154_v22 }
 0xf89   : > { %v13331_v58 = vpop.eup %13330  ;;  %v12335_v40 = vpack.c.bf16 %v8149_v12, %v8148_v15  ;;  %v8103_v23 = vmul.f32 %v13329_v38, %v17269_v24 }
 0xf8a   : > { %v13333_v53 = vpop.eup %13332  ;;  %v8086_v20 = vmul.f32 %v13331_v58, %v17021_v60  ;;  %v13424_v60 = vld [vmem:[%s18045_s4 + $0x38] sm:$0xff] }
 0xf8b   : > { %12336 = vmatpush3.bf16.msra.mxu1 %v12335_v40  ;;  %v8167_v46 = vmul.f32 %v8103_v23, %v18154_v22  ;;  %v8087_v56 = vmul.f32 %v13333_v53, %v17002_v51  ;;  %v13425_v22 = vld [vmem:[%s18045_s4 + $0x30] sm:$0xff]  ;;  %v13426_v51 = vld [vmem:[%s18045_s4 + $0x58] sm:$0xff] }
 0xf8c   : > { %v8150_v63 = vmul.f32 %v8086_v20, %v18155_v34 }
 0xf8d   : > { %v12337_v21 = vpack.c.bf16 %v8167_v46, %v8166_v25  ;;  %v8151_v42 = vmul.f32 %v8087_v56, %v18155_v34  ;;  %v13428_v34 = vld [vmem:[%s18045_s4 + $0x78] sm:$0xff] }
 0xf8f   : > { %12338 = vmatprep.subr.bf16.mxu1 %v12337_v21  ;;  %v12339_v24 = vpack.c.bf16 %v8151_v42, %v8150_v63 }
 0xf91   : > { %12340 = vmatpush3.bf16.msra.mxu1 %v12339_v24 }
 0xf92   : > { %8792 = vmatprep.subr.bf16.mxu1 %v12744_v52 }
 0xf94   : > { %8338 = vmatmul.mubr.f32.vlgmr.msra.gmra.mrb[200].mxu1 %v13423_v9 }
 0xf95   : > { %8342 = vmatprep.mubr.f32.mxu1 %v13424_v60  ;;  %8793 = vmatpush1.bf16.msra.mxu1 %v12742_v26  ;;  %v12751_v26 = vld [vmem:[%s14709_s11 + $0x28] ss:$16 sps:$4 sm:$0xff]  }
 0xf96   : > { %8794 = vmatprep.subr.bf16.mxu1 %v12750_v50 }
 0xf98   : > { %8343 = vmatmul.mubr.f32.gmra.mrb[202].mxu1 %v13425_v22 }
 0xf99   : > { %8347 = vmatprep.mubr.f32.mxu1 %v13426_v51  ;;  %8795 = vmatpush1.bf16.msra.mxu1 %v12748_v27 }
 0xf9a   : > { %8796 = vmatprep.subr.bf16.mxu1 %v12756_v61 }
 0xf9c   : > { %8348 = vmatmul.mubr.f32.gmra.mrb[204].mxu1 %v13427_v35 }
 0xf9d   : > { %8352 = vmatprep.mubr.f32.mxu1 %v13428_v34  ;;  %8797 = vmatpush1.bf16.msra.mxu1 %v12754_v1  ;;  %v12757_v1 = vld [vmem:[%s14709_s11 + $0x48] ss:$16 sps:$4 sm:$0xff]  }
 0xf9e   : > { %8798 = vmatprep.subr.bf16.mxu1 %v12762_v36 }
 0xfa0   : > { %8353 = vmatmul.mubr.f32.gmra.mrb[206].mxu1 %v13429_v19 }
 0xfa1   : > { %8357 = vmatprep.mubr.f32.mxu1 %v13430_v54  ;;  %8799 = vmatpush1.bf16.msra.mxu1 %v12760_v45 }
 0xfa2   : > { %8800 = vmatprep.subr.bf16.mxu1 %v12768_v5  ;;  %v12765_v5 = vld [vmem:[%s14709_s11 + $0x6c] ss:$16 sps:$4 sm:$0xff]  }
 0xfa4   : > { %8358 = vmatmul.mubr.f32.gmra.mrb[208].mxu1 %v13431_v30 }
 0xfa5   : > { %8362 = vmatprep.mubr.f32.mxu1 %v13432_v29  ;;  %8801 = vmatpush1.bf16.msra.mxu1 %v12766_v39 }
 0xfa6   : > { %8802 = vmatprep.subr.bf16.mxu1 %v12774_v47  ;;  %v12763_v47 = vld [vmem:[%s14709_s11 + $0x68] ss:$16 sps:$4 sm:$0xff]  }
 0xfa8   : > { %8363 = vmatmul.mubr.f32.gmra.mrb[210].mxu1 %v13433_v32 }
 0xfa9   : > { %8367 = vmatprep.mubr.f32.mxu1 %v13434_v11  ;;  %8803 = vmatpush1.bf16.msra.mxu1 %v12772_v28  ;;  %v12745_v11 = vld [vmem:[%s14709_s11 + $0x8] ss:$16 sps:$4 sm:$0xff]  }
 0xfac   : > { %8368 = vmatmul.mubr.f32.gmra.mrb[212].mxu1 %v13435_v0 }
 0xfad   : > { %8372 = vmatprep.mubr.f32.mxu1 %v13436_v2 }
 0xfb0   : > { %8373 = vmatmul.mubr.f32.gmra.mrb[214].mxu1 %v13437_v57  ;;  %v12753_v57 = vld [vmem:[%s14709_s11 + $0x2c] ss:$16 sps:$4 sm:$0xff]  }
 0xfb1   : > { %8824 = vmatprep.mubr.bf16.mxu1 %v18156_v3 }
0x101a   : > { %v11329_v7 = vpop.f32.mrb[208].mxu0 }
0x101b   : > { %v11330_v31 = vpop.f32.mrb[209].mxu0 }
0x101c   : > { %v11331_v48 = vadd.f32 %v11330_v31, %v11329_v7 }
0x101e   : > { %v11332_v43 = vpop.f32.mrb[210].mxu0 }
0x101f   : > { %v11333_v17 = vpop.f32.mrb[211].mxu0 }
0x1020   : > { %v11334_v41 = vadd.f32 %v11333_v17, %v11332_v43  ;;  %v12771_v43 = vld [vmem:[%s14709_s11 + $0x8c] ss:$16 sps:$4 sm:$0xff]   ;;  %v12769_v17 = vld [vmem:[%s14709_s11 + $0x88] ss:$16 sps:$4 sm:$0xff]  }
0x1022   : > { %v11335_v8 = vpop.f32.mrb[212].mxu0 }
0x1023   : > { %v11336_v6 = vpop.f32.mrb[213].mxu0 }
0x1024   : > { %v11337_v37 = vadd.f32 %v11336_v6, %v11335_v8  ;;  %v12777_v8 = vld [vmem:[%s14709_s11 + $0xac] ss:$16 sps:$4 sm:$0xff]   ;;  %v12775_v6 = vld [vmem:[%s14709_s11 + $0xa8] ss:$16 sps:$4 sm:$0xff]  }
0x1026   : > { %v11338_v10 = vpop.f32.mrb[214].mxu0 }
0x1027   : > { %v11339_v49 = vpop.f32.mrb[215].mxu0 }
0x1028   : > { %v11340_v13 = vadd.f32 %v11339_v49, %v11338_v10  ;;  %v12780_v10 = vld [vmem:[%s14709_s11 + $0xc4] ss:$16 sps:$4 sm:$0xff]   ;;  %v12781_v49 = vld [vmem:[%s14709_s11 + $0xc8] ss:$16 sps:$4 sm:$0xff]  }
0x1029   : > { %8804 = vmatprep.subr.bf16.mxu1 %v12780_v10  ;;  %v18165_v10 = vld [vmem:[#allocation83_spill] sm:$0xff] }
0x102a   : > { %v11341_v15 = vpop.f32.mrb[216].mxu0 }
0x102b   : > { %v11342_v59 = vpop.f32.mrb[217].mxu0 }
0x102c   : > { %v11343_v14 = vadd.f32 %v11342_v59, %v11341_v15  ;;  %v12784_v15 = vld [vmem:[%s14709_s11 + $0xe0] ss:$16 sps:$4 sm:$0xff]   ;;  %v12786_v59 = vld [vmem:[%s14709_s11 + $0xe4] ss:$16 sps:$4 sm:$0xff]  }
0x102e   : > { %v11344_v18 = vpop.f32.mrb[218].mxu0 }
0x102f   : > { %v11345_v33 = vpop.f32.mrb[219].mxu0 }
0x1030   : > { %v11346_v44 = vadd.f32 %v11345_v33, %v11344_v18  ;;  %v12789_v18 = vld [vmem:[%s14709_s11 + $0xec] ss:$16 sps:$4 sm:$0xff]   ;;  %v12790_v33 = vld [vmem:[%s14686_s3 + $0x40] sm:$0xff]  }
0x1032   : > { %v11347_v12 = vpop.f32.mrb[220].mxu0 }
0x1033   : > { %v11348_v38 = vpop.f32.mrb[221].mxu0 }
0x1034   : > { %v11349_v25 = vadd.f32 %v11348_v38, %v11347_v12  ;;  %v17459_v12 = vld [vmem:[%s18157_s9] ss:$0 sm:$0xff] }
0x1036   : > { %v11350_v58 = vpop.f32.mrb[222].mxu0 }
0x1037   : > { %v11351_v40 = vpop.f32.mrb[223].mxu0 }
0x1038   : > { %v11352_v23 = vadd.f32 %v11351_v40, %v11350_v58 }
0x1067   : > { %v11385_v53 = vpop.f32.mrb[200].mxu1 }
0x1068   : > { %v11386_v20 = vpop.f32.mrb[201].mxu1 }
0x1069   : > { %v11387_v46 = vadd.f32 %v11386_v20, %v11385_v53  ;;  %v18158_v20 = vld [vmem:[#allocation80_spill] sm:$0xff] }
0x106b   : > { %v8340_v56 = vadd.f32 %v11387_v46, %v11331_v48  ;;  %v11388_v63 = vpop.f32.mrb[202].mxu1 }
0x106c   : > { %v11389_v21 = vpop.f32.mrb[203].mxu1 }
0x106d   : > { %v11390_v42 = vadd.f32 %v11389_v21, %v11388_v63 }
0x106f   : > { %v8345_v24 = vadd.f32 %v11390_v42, %v11334_v41  ;;  %v11391_v9 = vpop.f32.mrb[204].mxu1 }
0x1070   : > { %v11392_v60 = vpop.f32.mrb[205].mxu1 }
0x1071   : > { %v11393_v22 = vadd.f32 %v11392_v60, %v11391_v9  ;;  %v8378_v51 = vpack.c.bf16 %v8345_v24, %v8340_v56  ;;  %v18159_v56 = vld [vmem:[#allocation89_spill] sm:$0xff]  ;;  %v12792_v24 = vld [vmem:[%s14686_s3] sm:$0xff]  }
0x1072   : > { %v17474_v9 = vld [vmem:[%s14686_s3 + $0x80] sm:$0xff]   ;;  %v12794_v60 = vld [vmem:[%s14686_s3 + $0x48] sm:$0xff]  }
0x1073   : > { %v8350_v35 = vadd.f32 %v11393_v22, %v11337_v37  ;;  %v11394_v34 = vpop.f32.mrb[206].mxu1  ;;  %12109 = vmatprep.mubr.bf16.mxu0 %v8378_v51  ;;  %v12778_v37 = vld [vmem:[%s14709_s11 + $0xc0] ss:$16 sps:$4 sm:$0xff]  }
0x1074   : > { %v11395_v19 = vpop.f32.mrb[207].mxu1  ;;  %8805 = vmatpush1.bf16.msra.mxu1 %v12778_v37  ;;  %v17478_v22 = vld [vmem:[%s14686_s3 + $0xc8] sm:$0xff]  }
0x1075   : > { %v11396_v54 = vadd.f32 %v11395_v19, %v11394_v34  ;;  %8806 = vmatprep.subr.bf16.mxu1 %v12786_v59  ;;  %v12796_v19 = vld [vmem:[%s14686_s3 + $0x8] sm:$0xff]   ;;  %v12814_v59 = vld [vmem:[%s14686_s3 + $0x70] sm:$0xff]  }
0x1077   : > { %v8355_v30 = vadd.f32 %v11396_v54, %v11340_v13  ;;  %v11397_v29 = vpop.f32.mrb[208].mxu1  ;;  %v12783_v13 = vld [vmem:[%s14709_s11 + $0xcc] ss:$16 sps:$4 sm:$0xff]  }
0x1078   : > { %v11398_v32 = vpop.f32.mrb[209].mxu1  ;;  %8807 = vmatpush1.bf16.msra.mxu1 %v12784_v15  ;;  %v17489_v54 = vld [vmem:[%s14686_s3 + $0x88] sm:$0xff]  }
0x1079   : > { %v8379_v0 = vpack.c.bf16 %v8355_v30, %v8350_v35  ;;  %v11399_v2 = vadd.f32 %v11398_v32, %v11397_v29  ;;  %11421 = vmatprep.subr.bf16.mxu1 %v12790_v33  ;;  %v18160_v35 = vld [vmem:[#allocation73_spill] sm:$0xff]  ;;  %v18161_v32 = vld [vmem:[#allocation75_spill] sm:$0xff] }
0x107a   : > { %v12798_v30 = vld [vmem:[%s14686_s3 + $0x50] sm:$0xff]   ;;  %v17559_v15 = vld [vmem:[%s14686_s3 + $0xa8] sm:$0xff]  }
0x107b   : > { %12110 = vmatmul.mubr.bf16.vlgmr.msra.gmra.mrb[224].mxu0 %v8379_v0  ;;  %v8360_v4 = vadd.f32 %v11399_v2, %v11343_v14  ;;  %v11400_v55 = vpop.f32.mrb[210].mxu1  ;;  %v12787_v14 = vld [vmem:[%s14709_s11 + $0xe8] ss:$16 sps:$4 sm:$0xff]   ;;  %s18171_s11 = sld [smem:[#allocation51_spill]] }
0x107c   : > { %v11401_v16 = vpop.f32.mrb[211].mxu1  ;;  %8866 = vmatpush1.bf16.msra.mxu0 %v12745_v11  ;;  %v17494_v29 = vld [vmem:[%s14686_s3 + $0xd0] sm:$0xff]  }
0x107d   : > { %v11402_v52 = vadd.f32 %v11401_v16, %v11400_v55  ;;  %8867 = vmatprep.subr.bf16.mxu0 %v12753_v57  ;;  %v12800_v57 = vld [vmem:[%s14686_s3 + $0x10] sm:$0xff]   ;;  %v12802_v16 = vld [vmem:[%s14686_s3 + $0x58] sm:$0xff]  }
0x107e   : > { %v17568_v33 = vld [vmem:[%s14686_s3 + $0xb0] sm:$0xff]  }
0x107f   : > { %v8365_v50 = vadd.f32 %v11402_v52, %v11346_v44  ;;  %v11403_v27 = vpop.f32.mrb[212].mxu1  ;;  %v17454_v44 = vld [vmem:[%s14686_s3 + $0xc0] sm:$0xff]  }
0x1080   : > { %v11404_v61 = vpop.f32.mrb[213].mxu1  ;;  %8868 = vmatpush1.bf16.msra.mxu0 %v12751_v26  ;;  %v17509_v26 = vld [vmem:[%s14686_s3 + $0xd8] sm:$0xff]  }
0x1081   : > { %v11405_v36 = vadd.f32 %v11404_v61, %v11403_v27  ;;  %v8380_v45 = vpack.c.bf16 %v8365_v50, %v8360_v4  ;;  %8869 = vmatprep.subr.bf16.mxu0 %v12759_v62  ;;  %v17504_v4 = vld [vmem:[%s14686_s3 + $0x90] sm:$0xff]   ;;  %v12804_v61 = vld [vmem:[%s14686_s3 + $0x18] sm:$0xff]   ;;  %p10680_p0 = scmp.ne.s32.totalorder %s18171_s11, 2 }
0x1082   : > { %s18173_s7 = sld [smem:[#allocation29_spill]] (!%p10680_p0)  ;;  %vm9883_vm1 = vcmask (!%p10680_p0), 1041409   ;;  %vm9885_vm2 = vcmask (!%p10680_p0), 1042434   ;;  %vm9887_vm3 = vcmask (!%p10680_p0), 1043459   ;;  %vm9889_vm4 = vcmask (!%p10680_p0), 1044484   ;;  %s18180_s10 = sld [smem:[#allocation48_spill]] (!%p10680_p0) }
0x1083   : > { %v8370_v7 = vadd.f32 %v11405_v36, %v11349_v25  ;;  %v11406_v39 = vpop.f32.mrb[214].mxu1  ;;  %12113 = vmatprep.mubr.bf16.mxu0 %v8380_v45  ;;  %v12806_v36 = vld [vmem:[%s14686_s3 + $0x60] sm:$0xff]   ;;  %vm9891_vm5 = vcmask (!%p10680_p0), 1045509   ;;  %vm9893_vm6 = vcmask (!%p10680_p0), 1046534   ;;  %vm9895_vm7 = vcmask (!%p10680_p0), 1047559  }
0x1084   : > { %v11407_v31 = vpop.f32.mrb[215].mxu1  ;;  %8870 = vmatpush1.bf16.msra.mxu0 %v12757_v1  ;;  %v17518_v1 = vld [vmem:[%s14686_s3 + $0x98] sm:$0xff]   ;;  %v17523_v45 = vld [vmem:[%s14686_s3 + $0xe0] sm:$0xff]   ;;  %vm9898_vm8 = vcmask (!%p10680_p0), 64512   ;;  %vm9912_vm9 = vcmask (!%p10680_p0), 7172  }
0x1085   : > { %v11408_v48 = vadd.f32 %v11407_v31, %v11406_v39  ;;  %8871 = vmatprep.subr.bf16.mxu0 %v12765_v5  ;;  %v18162_v5 = vld [vmem:[#allocation74_spill] sm:$0xff]  ;;  %v18163_v39 = vld [vmem:[#allocation91_spill] sm:$0xff] }
0x1087   : > { %v8375_v28 = vadd.f32 %v11408_v48, %v11352_v23 }
0x1088   : > { %8872 = vmatpush1.bf16.msra.mxu0 %v12763_v47 }
0x1089   : > { %v8381_v41 = vpack.c.bf16 %v8375_v28, %v8370_v7  ;;  %8873 = vmatprep.subr.bf16.mxu0 %v12771_v43  ;;  %v12808_v43 = vld [vmem:[%s14686_s3 + $0x20] sm:$0xff]  }
0x108a   : > { %v17537_v28 = vld [vmem:[%s14686_s3 + $0xa0] sm:$0xff]  }
0x108b   : > { %12114 = vmatmul.mubr.bf16.gmra.mrb[228].mxu0 %v8381_v41  ;;  %v17542_v41 = vld [vmem:[%s14686_s3 + $0xe8] sm:$0xff]  }
0x108c   : > { %8874 = vmatpush1.bf16.msra.mxu0 %v12769_v17  ;;  %8897 = vmatprep.mubr.bf16.mxu0 %v18156_v3  ;;  %v12810_v17 = vld [vmem:[%s14686_s3 + $0x68] sm:$0xff]  }
0x108d   : > { %8875 = vmatprep.subr.bf16.mxu0 %v12777_v8 }
0x1090   : > { %8876 = vmatpush1.bf16.msra.mxu0 %v12775_v6  ;;  %v18164_v6 = vld [vmem:[#allocation82_spill] sm:$0xff] }
0x1091   : > { %8877 = vmatprep.subr.bf16.mxu0 %v12783_v13 }
0x1094   : > { %8878 = vmatpush1.bf16.msra.mxu0 %v12781_v49 }
0x1095   : > { %8879 = vmatprep.subr.bf16.mxu0 %v12789_v18  ;;  %v12816_v18 = vld [vmem:[%s14686_s3 + $0x30] sm:$0xff]  }
0x1098   : > { %8880 = vmatpush1.bf16.msra.mxu0 %v12787_v14  ;;  %v17564_v14 = vld [vmem:[%s14686_s3 + $0xf0] sm:$0xff]  }
0x1099   : > { %11461 = vmatprep.subr.bf16.mxu0 %v17454_v44 }
0x114e   : > { %v12111_v38 = vpop.f32.mrb[224].mxu0 }
0x114f   : > { %v8470_v25 = vpop.f32.mrb[225].mxu0  ;;  %v8479_v51 = vadd.f32 %v12111_v38, %v17459_v12  ;;  %v17572_v38 = vld [vmem:[%s14686_s3 + $0xf8] sm:$0xff]  }
0x1150   : > { %v8471_v58 = vadd.f32 %v17459_v12, %v8470_v25  ;;  %v12112_v40 = vpop.f32.mrb[226].mxu0  ;;  %v12820_v25 = vld [vmem:[%s14686_s3 + $0x38] sm:$0xff]  }
0x1151   : > { %v8473_v23 = vpop.f32.mrb[227].mxu0  ;;  %v8482_v21 = vadd.f32 %v12112_v40, %v17459_v12  ;;  %v17497_v11 = vadd.f32 %v8479_v51, %v18161_v32  ;;  %v8541_v40 = vld [vmem:[%s14684_s5] sm:$0xf] }
0x1152   : > { %v8474_v53 = vadd.f32 %v17459_v12, %v8473_v23  ;;  %v17464_v46 = vadd.f32 %v8471_v58, %v18158_v20  ;;  %v17578_v58 = vld [vmem:[%s14686_s3 + $0xb8] sm:$0xff]  }
0x1153   : > { %v17484_v34 = vadd.f32 %v8482_v21, %v18160_v35  ;;  %v18166_v23 = vld [vmem:[#allocation58_spill] sm:$0xff]  ;;  %v18168_v21 = vld [vmem:[#allocation57_spill] sm:$0xff] }
0x1154   : > { %v17467_v63 = vadd.f32 %v8474_v53, %v18159_v56  ;;  %v17585_v53 = vrot.slane %v8541_v40, %v18166_v23  ;;  %v18167_v20 = vld [vmem:[#allocation66_spill] sm:$0xff] }
0x1155   : > { %v8608_v2 = vpack.c.bf16 %v17484_v34, %v17497_v11  ;;  %v17588_v56 = vrot.slane %v8541_v40, %v18167_v20 }
0x1156   : > { %v8607_v42 = vpack.c.bf16 %v17467_v63, %v17464_v46 }
0x1158   : > { %8825 = vmatmul.mubr.bf16.vlgmr.msra.gmra.mrb[216].mxu1 %v8607_v42  ;;  %8898 = vmatmul.mubr.bf16.vlgmr.msra.gmra.mrb[232].mxu0 %v8607_v42  ;;  %v17591_v42 = vrot.slane %v8541_v40, %v18168_v21 }
0x1159   : > { %8834 = vmatprep.mubr.bf16.mxu1 %v18156_v3  ;;  %8907 = vmatprep.mubr.bf16.mxu0 %v18156_v3 }
0x115a   : > { %11422 = vmatpush3.bf16.msra.mxu1 %v12792_v24  ;;  %11462 = vmatpush3.bf16.msra.mxu0 %v17474_v9  ;;  %v18169_v24 = vld [vmem:[#allocation81_spill] sm:$0xff] }
0x115b   : > { %11423 = vmatprep.subr.bf16.mxu1 %v12794_v60  ;;  %11463 = vmatprep.subr.bf16.mxu0 %v17478_v22  ;;  %v17594_v60 = vrot.slane %v8541_v40, %v18169_v24 }
0x115e   : > { %v12115_v0 = vpop.f32.mrb[228].mxu0  ;;  %11424 = vmatpush3.bf16.msra.mxu1 %v12796_v19  ;;  %11464 = vmatpush3.bf16.msra.mxu0 %v17489_v54 }
0x115f   : > { %v8486_v55 = vpop.f32.mrb[229].mxu0  ;;  %11425 = vmatprep.subr.bf16.mxu1 %v12798_v30  ;;  %11465 = vmatprep.subr.bf16.mxu0 %v17494_v29  ;;  %v8495_v8 = vadd.f32 %v12115_v0, %v17459_v12 }
0x1160   : > { %v8487_v52 = vadd.f32 %v17459_v12, %v8486_v55  ;;  %v12116_v62 = vpop.f32.mrb[230].mxu0  ;;  %8835 = vmatmul.mubr.bf16.gmra.mrb[220].mxu1 %v8608_v2  ;;  %8908 = vmatmul.mubr.bf16.gmra.mrb[236].mxu0 %v8608_v2 }
0x1161   : > { %v8489_v50 = vpop.f32.mrb[231].mxu0  ;;  %8844 = vmatprep.mubr.bf16.mxu1 %v18156_v3  ;;  %8917 = vmatprep.mubr.bf16.mxu0 %v18156_v3  ;;  %v8498_v47 = vadd.f32 %v12116_v62, %v17459_v12  ;;  %v17553_v49 = vadd.f32 %v8495_v8, %v18165_v10 }
0x1162   : > { %v8490_v27 = vadd.f32 %v17459_v12, %v8489_v50  ;;  %11426 = vmatpush3.bf16.msra.mxu1 %v12800_v57  ;;  %11466 = vmatpush3.bf16.msra.mxu0 %v17504_v4  ;;  %v17526_v7 = vadd.f32 %v8487_v52, %v18162_v5  ;;  %v12818_v12 = vld [vmem:[%s14686_s3 + $0x78] sm:$0xff]  }
0x1163   : > { %11427 = vmatprep.subr.bf16.mxu1 %v12802_v16  ;;  %11467 = vmatprep.subr.bf16.mxu0 %v17509_v26  ;;  %v17548_v37 = vadd.f32 %v8498_v47, %v18164_v6 }
0x1164   : > { %v17529_v31 = vadd.f32 %v8490_v27, %v18163_v39 }
0x1165   : > { %v8610_v13 = vpack.c.bf16 %v17548_v37, %v17553_v49 }
0x1166   : > { %v8609_v48 = vpack.c.bf16 %v17529_v31, %v17526_v7  ;;  %11428 = vmatpush3.bf16.msra.mxu1 %v12804_v61  ;;  %11468 = vmatpush3.bf16.msra.mxu0 %v17518_v1 }
0x1167   : > { %11429 = vmatprep.subr.bf16.mxu1 %v12806_v36  ;;  %11469 = vmatprep.subr.bf16.mxu0 %v17523_v45 }
0x1168   : > { %8845 = vmatmul.mubr.bf16.gmra.mrb[224].mxu1 %v8609_v48  ;;  %8918 = vmatmul.mubr.bf16.gmra.mrb[240].mxu0 %v8609_v48 }
0x1169   : > { %8854 = vmatprep.mubr.bf16.mxu1 %v18156_v3  ;;  %8927 = vmatprep.mubr.bf16.mxu0 %v18156_v3  ;;  %v12812_v3 = vld [vmem:[%s14686_s3 + $0x28] sm:$0xff]   ;;  %s18170_s3 = scalar_lea.vmem [#allocation19], %s14658_s16  ;;  %s18172_s16 = sld [smem:[#allocation47_spill]] (!%p10680_p0) }
0x116a   : > { %11430 = vmatpush3.bf16.msra.mxu1 %v12808_v43  ;;  %11470 = vmatpush3.bf16.msra.mxu0 %v17537_v28 }
0x116b   : > { %11431 = vmatprep.subr.bf16.mxu1 %v12810_v17  ;;  %11471 = vmatprep.subr.bf16.mxu0 %v17542_v41 }
0x116e   : > { %11432 = vmatpush3.bf16.msra.mxu1 %v12812_v3  ;;  %11472 = vmatpush3.bf16.msra.mxu0 %v17559_v15 }
0x116f   : > { %11433 = vmatprep.subr.bf16.mxu1 %v12814_v59  ;;  %11473 = vmatprep.subr.bf16.mxu0 %v17564_v14 }
0x1170   : > { %8855 = vmatmul.mubr.bf16.gmra.mrb[228].mxu1 %v8610_v13  ;;  %8928 = vmatmul.mubr.bf16.gmra.mrb[244].mxu0 %v8610_v13 }
0x1172   : > { %11434 = vmatpush3.bf16.msra.mxu1 %v12816_v18  ;;  %11474 = vmatpush3.bf16.msra.mxu0 %v17568_v33 }
0x1173   : > { %11435 = vmatprep.subr.bf16.mxu1 %v12818_v12  ;;  %11475 = vmatprep.subr.bf16.mxu0 %v17572_v38 }
0x1176   : > { %11436 = vmatpush3.bf16.msra.mxu1 %v12820_v25  ;;  %11476 = vmatpush3.bf16.msra.mxu0 %v17578_v58 }
0x1177   : > { %12341 = vmatprep.subr.bf16.mxu1 %v17454_v44 }
0x122b   : > { %v8826_v51 = vpop.f32.mrb[216].mxu1  ;;  %v8899_v35 = vpop.f32.mrb[232].mxu0 }
0x122c   : > { %v8827_v19 = vadd.f32 %v8826_v51, %v17585_v53  ;;  %v8900_v30 = vadd.f32 %v8899_v35, %v17588_v56  ;;  %v8828_v44 = vpop.f32.mrb[217].mxu1  ;;  %v8901_v32 = vpop.f32.mrb[233].mxu0 }
0x122d   : > { %v8829_v0 = vadd.f32 %v8828_v44, %v17591_v42  ;;  %v8902_v2 = vadd.f32 %v8901_v32, %v17594_v60  ;;  %v8830_v57 = vpop.f32.mrb[218].mxu1  ;;  %v8903_v55 = vpop.f32.mrb[234].mxu0 }
0x122e   : > { %v8831_v16 = vadd.f32 %v8830_v57, %v17585_v53  ;;  %v8904_v52 = vadd.f32 %v8903_v55, %v17588_v56  ;;  %v8832_v62 = vpop.f32.mrb[219].mxu1  ;;  %v8905_v50 = vpop.f32.mrb[235].mxu0  ;;  %v8938_v36 = vmax.f32 %v8827_v19, 0.0  ;;  %v8940_v5 = vmax.f32 %v8900_v30, 0.0 }
0x122f   : > { %v8833_v27 = vadd.f32 %v8832_v62, %v17591_v42  ;;  %v8906_v61 = vadd.f32 %v8905_v50, %v17594_v60  ;;  %v8939_v48 = vmax.f32 %v8829_v0, 0.0  ;;  %v8941_v43 = vmax.f32 %v8902_v2, 0.0 }
0x1230   : > { %v8942_v39 = vmax.f32 %v8831_v16, 0.0  ;;  %v8944_v47 = vmax.f32 %v8904_v52, 0.0 }
0x1231   : > { %v8943_v17 = vmax.f32 %v8833_v27, 0.0  ;;  %v8945_v8 = vmax.f32 %v8906_v61, 0.0 }
0x1232   : > { %v8970_v6 = vpack.c.bf16 %v8942_v39, %v8938_v36  ;;  %v8972_v10 = vpack.c.bf16 %v8944_v47, %v8940_v5 }
0x1233   : > { %v8971_v13 = vpack.c.bf16 %v8943_v17, %v8939_v48  ;;  %v8973_v3 = vpack.c.bf16 %v8945_v8, %v8941_v43  ;;  %v8836_v59 = vpop.f32.mrb[220].mxu1  ;;  %v8909_v18 = vpop.f32.mrb[236].mxu0 }
0x1234   : > { %v8837_v12 = vadd.f32 %v8836_v59, %v17585_v53  ;;  %v8910_v25 = vadd.f32 %v8909_v18, %v17588_v56  ;;  %v8838_v40 = vpop.f32.mrb[221].mxu1  ;;  %v8911_v23 = vpop.f32.mrb[237].mxu0 }
0x1235   : > { %v8839_v20 = vadd.f32 %v8838_v40, %v17591_v42  ;;  %v8912_v21 = vadd.f32 %v8911_v23, %v17594_v60  ;;  %v8840_v24 = vpop.f32.mrb[222].mxu1  ;;  %v8913_v51 = vpop.f32.mrb[238].mxu0  ;;  %9216 = vmatprep.mubr.bf16.mxu1 %v8971_v13  ;;  %9281 = vmatprep.mubr.bf16.mxu0 %v8973_v3 }
0x1236   : > { %v8841_v35 = vadd.f32 %v8840_v24, %v17585_v53  ;;  %v8914_v19 = vadd.f32 %v8913_v51, %v17588_v56  ;;  %v8842_v30 = vpop.f32.mrb[223].mxu1  ;;  %v8915_v44 = vpop.f32.mrb[239].mxu0  ;;  %9217 = vmatmul.mubr.bf16.vlgmr.msra.gmra.mrb[232].mxu1 %v8970_v6  ;;  %9282 = vmatmul.mubr.bf16.vlgmr.msra.gmra.mrb[248].mxu0 %v8972_v10  ;;  %v8946_v2 = vmax.f32 %v8837_v12, 0.0  ;;  %v8948_v57 = vmax.f32 %v8910_v25, 0.0 }
0x1237   : > { %v8843_v32 = vadd.f32 %v8842_v30, %v17591_v42  ;;  %v8916_v0 = vadd.f32 %v8915_v44, %v17594_v60  ;;  %12349 = vmatpush3.bf16.msra.mxu1 %v17474_v9  ;;  %v8947_v52 = vmax.f32 %v8839_v20, 0.0  ;;  %v8949_v62 = vmax.f32 %v8912_v21, 0.0 }
0x1238   : > { %v8950_v55 = vmax.f32 %v8841_v35, 0.0  ;;  %v8952_v16 = vmax.f32 %v8914_v19, 0.0  ;;  %12342 = vmatprep.subr.bf16.mxu1 %v17478_v22 }
0x1239   : > { %v8951_v50 = vmax.f32 %v8843_v32, 0.0  ;;  %v8953_v27 = vmax.f32 %v8916_v0, 0.0 }
0x123a   : > { %v8974_v61 = vpack.c.bf16 %v8950_v55, %v8946_v2  ;;  %v8976_v36 = vpack.c.bf16 %v8952_v16, %v8948_v57 }
0x123b   : > { %v8975_v5 = vpack.c.bf16 %v8951_v50, %v8947_v52  ;;  %v8977_v39 = vpack.c.bf16 %v8953_v27, %v8949_v62  ;;  %v8846_v47 = vpop.f32.mrb[224].mxu1  ;;  %v8919_v48 = vpop.f32.mrb[240].mxu0  ;;  %12350 = vmatpush3.bf16.msra.mxu1 %v17489_v54 }
0x123c   : > { %v8847_v9 = vadd.f32 %v8846_v47, %v17585_v53  ;;  %v8920_v43 = vadd.f32 %v8919_v48, %v17588_v56  ;;  %v8848_v17 = vpop.f32.mrb[225].mxu1  ;;  %v8921_v8 = vpop.f32.mrb[241].mxu0  ;;  %12343 = vmatprep.subr.bf16.mxu1 %v17494_v29 }
0x123d   : > { %v8849_v22 = vadd.f32 %v8848_v17, %v17591_v42  ;;  %v8922_v6 = vadd.f32 %v8921_v8, %v17594_v60  ;;  %v8850_v10 = vpop.f32.mrb[226].mxu1  ;;  %v8923_v13 = vpop.f32.mrb[242].mxu0  ;;  %9224 = vmatprep.mubr.bf16.mxu1 %v8975_v5  ;;  %9289 = vmatprep.mubr.bf16.mxu0 %v8977_v39 }
0x123e   : > { %v8851_v3 = vadd.f32 %v8850_v10, %v17585_v53  ;;  %v8924_v54 = vadd.f32 %v8923_v13, %v17588_v56  ;;  %v8852_v59 = vpop.f32.mrb[227].mxu1  ;;  %v8925_v18 = vpop.f32.mrb[243].mxu0  ;;  %9225 = vmatmul.mubr.bf16.gmra.mrb[236].mxu1 %v8974_v61  ;;  %9290 = vmatmul.mubr.bf16.gmra.mrb[252].mxu0 %v8976_v36  ;;  %v8954_v25 = vmax.f32 %v8847_v9, 0.0  ;;  %v8956_v40 = vmax.f32 %v8920_v43, 0.0 }
0x123f   : > { %v8853_v12 = vadd.f32 %v8852_v59, %v17591_v42  ;;  %v8926_v29 = vadd.f32 %v8925_v18, %v17594_v60  ;;  %12351 = vmatpush3.bf16.msra.mxu1 %v17504_v4  ;;  %v8955_v21 = vmax.f32 %v8849_v22, 0.0  ;;  %v8957_v24 = vmax.f32 %v8922_v6, 0.0 }
0x1240   : > { %v8958_v23 = vmax.f32 %v8851_v3, 0.0  ;;  %v8960_v20 = vmax.f32 %v8924_v54, 0.0  ;;  %12344 = vmatprep.subr.bf16.mxu1 %v17509_v26 }
0x1241   : > { %v8959_v51 = vmax.f32 %v8853_v12, 0.0  ;;  %v8961_v35 = vmax.f32 %v8926_v29, 0.0 }
0x1242   : > { %v8978_v19 = vpack.c.bf16 %v8958_v23, %v8954_v25  ;;  %v8980_v30 = vpack.c.bf16 %v8960_v20, %v8956_v40 }
0x1243   : > { %v8979_v44 = vpack.c.bf16 %v8959_v51, %v8955_v21  ;;  %v8981_v32 = vpack.c.bf16 %v8961_v35, %v8957_v24  ;;  %v8856_v0 = vpop.f32.mrb[228].mxu1  ;;  %v8929_v2 = vpop.f32.mrb[244].mxu0  ;;  %12352 = vmatpush3.bf16.msra.mxu1 %v17518_v1 }
0x1244   : > { %v8857_v4 = vadd.f32 %v8856_v0, %v17585_v53  ;;  %v8930_v57 = vadd.f32 %v8929_v2, %v17588_v56  ;;  %v8858_v55 = vpop.f32.mrb[229].mxu1  ;;  %v8931_v16 = vpop.f32.mrb[245].mxu0  ;;  %12345 = vmatprep.subr.bf16.mxu1 %v17523_v45 }
0x1245   : > { %v8859_v26 = vadd.f32 %v8858_v55, %v17591_v42  ;;  %v8932_v52 = vadd.f32 %v8931_v16, %v17594_v60  ;;  %v8860_v62 = vpop.f32.mrb[230].mxu1  ;;  %v8933_v50 = vpop.f32.mrb[246].mxu0  ;;  %9232 = vmatprep.mubr.bf16.mxu1 %v8979_v44  ;;  %9297 = vmatprep.mubr.bf16.mxu0 %v8981_v32 }
0x1246   : > { %v8861_v27 = vadd.f32 %v8860_v62, %v17585_v53  ;;  %v8934_v1 = vadd.f32 %v8933_v50, %v17588_v56  ;;  %v8862_v61 = vpop.f32.mrb[231].mxu1  ;;  %v8935_v36 = vpop.f32.mrb[247].mxu0  ;;  %9233 = vmatmul.mubr.bf16.gmra.mrb[240].mxu1 %v8978_v19  ;;  %9298 = vmatmul.mubr.bf16.gmra.mrb[0].mxu0 %v8980_v30  ;;  %v8962_v39 = vmax.f32 %v8857_v4, 0.0  ;;  %v8964_v47 = vmax.f32 %v8930_v57, 0.0 }
0x1247   : > { %v8863_v5 = vadd.f32 %v8862_v61, %v17591_v42  ;;  %v8936_v45 = vadd.f32 %v8935_v36, %v17594_v60  ;;  %12353 = vmatpush3.bf16.msra.mxu1 %v17537_v28  ;;  %v8963_v43 = vmax.f32 %v8859_v26, 0.0  ;;  %v8965_v53 = vmax.f32 %v8932_v52, 0.0  ;;  %v17645_v42 = vld [vmem:[%s18170_s3] ss:$0 sm:$0xff] }
0x1248   : > { %v8966_v48 = vmax.f32 %v8861_v27, 0.0  ;;  %v8968_v9 = vmax.f32 %v8934_v1, 0.0  ;;  %12346 = vmatprep.subr.bf16.mxu1 %v17542_v41 }
0x1249   : > { %v8967_v17 = vmax.f32 %v8863_v5, 0.0  ;;  %v8969_v56 = vmax.f32 %v8936_v45, 0.0 }
0x124a   : > { %v8982_v8 = vpack.c.bf16 %v8966_v48, %v8962_v39  ;;  %v8984_v22 = vpack.c.bf16 %v8968_v9, %v8964_v47 }
0x124b   : > { %v8983_v6 = vpack.c.bf16 %v8967_v17, %v8963_v43  ;;  %v8985_v10 = vpack.c.bf16 %v8969_v56, %v8965_v53  ;;  %12354 = vmatpush3.bf16.msra.mxu1 %v17559_v15 }
0x124c   : > { %12347 = vmatprep.subr.bf16.mxu1 %v17564_v14 }
0x124d   : > { %9240 = vmatprep.mubr.bf16.mxu1 %v8983_v6 }
0x124e   : > { %9241 = vmatmul.mubr.bf16.gmra.mrb[244].mxu1 %v8982_v8 }
0x124f   : > { %12355 = vmatpush3.bf16.msra.mxu1 %v17568_v33  ;;  %9305 = vmatprep.mubr.bf16.mxu1 %v8985_v10 }
0x1250   : > { %12348 = vmatprep.subr.bf16.mxu1 %v17572_v38 }
0x1253   : > { %12356 = vmatpush3.bf16.msra.mxu1 %v17578_v58 }
0x1256   : > { %9306 = vmatmul.mubr.bf16.vlgmr.msra.gmra.mrb[248].mxu1 %v8984_v22 }
0x1309   : > { %v11437_v28 = vpop.f32.mrb[232].mxu1  ;;  %v11477_v41 = vpop.f32.mrb[248].mxu0 }
0x130a   : > { %v11438_v60 = vpop.f32.mrb[233].mxu1  ;;  %v11478_v13 = vpop.f32.mrb[249].mxu0 }
0x130b   : > { %v11439_v15 = vadd.f32 %v11438_v60, %v11437_v28  ;;  %v11479_v3 = vadd.f32 %v11478_v13, %v11477_v41  ;;  %v11440_v14 = vpop.f32.mrb[234].mxu1  ;;  %v11480_v54 = vpop.f32.mrb[250].mxu0 }
0x130c   : > { %v11441_v59 = vpop.f32.mrb[235].mxu1  ;;  %v11481_v18 = vpop.f32.mrb[251].mxu0 }
0x130d   : > { %v9219_v33 = vadd.f32 %v11439_v15, %v17645_v42  ;;  %v11442_v12 = vadd.f32 %v11441_v59, %v11440_v14  ;;  %v11482_v38 = vadd.f32 %v11481_v18, %v11480_v54 }
0x130f   : > { %v9284_v29 = vadd.f32 %v11479_v3, %v9219_v33  ;;  %v9222_v58 = vadd.f32 %v11442_v12, %v17645_v42  ;;  %v13440_v12 = vld [vmem:[#allocation20 + $0x4] ss:$8 sps:$4 sm:$0xff] (!%p10680_p0)  }
0x1310   : > { %9479 = vmatprep.subr.bf16.mxu0 (!%p10680_p0), %v13440_v12 }
0x1311   : > { %v17650_v25 = vadd.f32 %v9284_v29, %v17464_v46  ;;  %v9287_v40 = vadd.f32 %v11482_v38, %v9222_v58  ;;  %v11443_v23 = vpop.f32.mrb[236].mxu1  ;;  %v11483_v20 = vpop.f32.mrb[252].mxu0  ;;  %v13442_v38 = vld [vmem:[#allocation20] ss:$8 sps:$4 sm:$0xff] (!%p10680_p0)   ;;  %v14063_v29 = vmov (!%p10680_p0), 0  }
0x1312   : > { %v11444_v21 = vpop.f32.mrb[237].mxu1  ;;  %v11484_v24 = vpop.f32.mrb[253].mxu0  ;;  %9511 = vmatprep.mubr.bf16.mxu0 (!%p10680_p0), %v14063_v29  ;;  %13438 = vset.pattern.permute.xlu0 (!%p10680_p0), %v14063_v29  ;;  %v13448_v58 = vld [vmem:[#allocation20 + $0x20] ss:$8 sps:$4 sm:$0xff] (!%p10680_p0)  }
0x1313   : > { %9322 = vst [vmem:[#allocation2] sm:$0xff] %v17650_v25  ;;  %v17654_v51 = vadd.f32 %v9287_v40, %v17467_v63  ;;  %v11445_v35 = vadd.f32 %v11444_v21, %v11443_v23  ;;  %v11485_v19 = vadd.f32 %v11484_v24, %v11483_v20  ;;  %v11446_v30 = vpop.f32.mrb[238].mxu1  ;;  %v11486_v44 = vpop.f32.mrb[254].mxu0  ;;  %13439 = vset.pattern.permute.xlu1 (!%p10680_p0), %v14063_v29  ;;  %v13449_v40 = vld [vmem:[#allocation20 + $0x34] ss:$8 sps:$4 sm:$0xff] (!%p10680_p0)  }
0x1314   : > { %v11447_v32 = vpop.f32.mrb[239].mxu1  ;;  %v11487_v0 = vpop.f32.mrb[255].mxu0  ;;  %9480 = vmatpush1.bf16.msra.mxu0 (!%p10680_p0), %v13442_v38  ;;  %v13451_v23 = vld [vmem:[#allocation20 + $0x30] ss:$8 sps:$4 sm:$0xff] (!%p10680_p0)   ;;  %v13452_v20 = vld [vmem:[#allocation20 + $0x44] ss:$8 sps:$4 sm:$0xff] (!%p10680_p0)  }
0x1315   : > { %9323 = vst [vmem:[#allocation2 + $0x8] sm:$0xff] %v17654_v51  ;;  %v9227_v46 = vadd.f32 %v11445_v35, %v17645_v42  ;;  %v11448_v2 = vadd.f32 %v11447_v32, %v11446_v30  ;;  %v11488_v4 = vadd.f32 %v11487_v0, %v11486_v44  ;;  %v13464_v21 = vld [vmem:[%s18172_s16 + $0x40] sm:$0xff] (!%p10680_p0)   ;;  %v13467_v30 = vld [vmem:[%s18172_s16 + $0x8] sm:$0xff] (!%p10680_p0)   ;;  %v13468_v44 = vld [vmem:[%s18172_s16 + $0x50] sm:$0xff] (!%p10680_p0)  }
0x1316   : > { %v13465_v24 = vld [vmem:[%s18172_s16] sm:$0xff] (!%p10680_p0)   ;;  %11501 = vmatprep.subr.bf16.mxu1 (!%p10680_p0), %v13464_v21 }
0x1317   : > { %v9292_v57 = vadd.f32 %v11485_v19, %v9227_v46  ;;  %v9230_v55 = vadd.f32 %v11448_v2, %v17645_v42  ;;  %v13454_v35 = vld [vmem:[#allocation20 + $0x40] ss:$8 sps:$4 sm:$0xff] (!%p10680_p0)   ;;  %11502 = vmatpush3.bf16.msra.mxu1 (!%p10680_p0), %v13465_v24  ;;  %v13455_v32 = vld [vmem:[#allocation20 + $0x54] ss:$8 sps:$4 sm:$0xff] (!%p10680_p0)   ;;  %v13457_v0 = vld [vmem:[#allocation20 + $0x50] ss:$8 sps:$4 sm:$0xff] (!%p10680_p0)  }
0x1318   : > { %v13466_v19 = vld [vmem:[%s18172_s16 + $0x48] sm:$0xff] (!%p10680_p0)   ;;  %v13469_v46 = vld [vmem:[%s18172_s16 + $0x10] sm:$0xff] (!%p10680_p0)   ;;  %v13470_v2 = vld [vmem:[%s18172_s16 + $0x58] sm:$0xff] (!%p10680_p0)  }
0x1319   : > { %v17660_v16 = vadd.f32 %v9292_v57, %v17497_v11  ;;  %v9295_v63 = vadd.f32 %v11488_v4, %v9230_v55  ;;  %v11449_v26 = vpop.f32.mrb[240].mxu1  ;;  %v11489_v52 = vpop.f32.mrb[0].mxu0  ;;  %11503 = vmatprep.subr.bf16.mxu1 (!%p10680_p0), %v13466_v19  ;;  %v13458_v4 = vld [vmem:[#allocation20 + $0x64] ss:$8 sps:$4 sm:$0xff] (!%p10680_p0)   ;;  %v13460_v57 = vld [vmem:[#allocation20 + $0x60] ss:$8 sps:$4 sm:$0xff] (!%p10680_p0)  }
0x131a   : > { %v11450_v62 = vpop.f32.mrb[241].mxu1  ;;  %v11490_v50 = vpop.f32.mrb[1].mxu0  ;;  %v13471_v55 = vld [vmem:[%s18172_s16 + $0x18] sm:$0xff] (!%p10680_p0)  }
0x131b   : > { %9324 = vst [vmem:[#allocation2 + $0x10] sm:$0xff] %v17660_v16  ;;  %v17664_v27 = vadd.f32 %v9295_v63, %v17484_v34  ;;  %v11451_v1 = vadd.f32 %v11450_v62, %v11449_v26  ;;  %v11491_v61 = vadd.f32 %v11490_v50, %v11489_v52  ;;  %v11452_v36 = vpop.f32.mrb[242].mxu1  ;;  %v11492_v5 = vpop.f32.mrb[2].mxu0  ;;  %11504 = vmatpush3.bf16.msra.mxu1 (!%p10680_p0), %v13467_v30  ;;  %v13472_v63 = vld [vmem:[%s18172_s16 + $0x60] sm:$0xff] (!%p10680_p0)   ;;  %v13474_v50 = vld [vmem:[%s18172_s16 + $0x68] sm:$0xff] (!%p10680_p0)  }
0x131c   : > { %v11453_v45 = vpop.f32.mrb[243].mxu1  ;;  %v11493_v39 = vpop.f32.mrb[3].mxu0  ;;  %11505 = vmatprep.subr.bf16.mxu1 (!%p10680_p0), %v13468_v44  ;;  %v13461_v26 = vld [vmem:[#allocation20 + $0x74] ss:$8 sps:$4 sm:$0xff] (!%p10680_p0)   ;;  %v13463_v62 = vld [vmem:[#allocation20 + $0x70] ss:$8 sps:$4 sm:$0xff] (!%p10680_p0)  }
0x131d   : > { %9325 = vst [vmem:[#allocation2 + $0x18] sm:$0xff] %v17664_v27  ;;  %v9235_v11 = vadd.f32 %v11451_v1, %v17645_v42  ;;  %v11454_v47 = vadd.f32 %v11453_v45, %v11452_v36  ;;  %v11494_v48 = vadd.f32 %v11493_v39, %v11492_v5  ;;  %v13473_v52 = vld [vmem:[%s18172_s16 + $0x20] sm:$0xff] (!%p10680_p0)   ;;  %v9384_v1 = vpack.c.bf16 (!%p10680_p0), %v17654_v51, %v17650_v25  ;;  %v13475_v36 = vld [vmem:[%s18172_s16 + $0x28] sm:$0xff] (!%p10680_p0)   ;;  %v13476_v5 = vld [vmem:[%s18172_s16 + $0x70] sm:$0xff] (!%p10680_p0)  }
0x131e   : > { %v13477_v45 = vld [vmem:[%s18172_s16 + $0x30] sm:$0xff] (!%p10680_p0)   ;;  %v9743_v39 = vld [vmem:[%s18173_s7] sm:$0xff] (!%p10680_p0) }
0x131f   : > { %v9300_v9 = vadd.f32 %v11491_v61, %v9235_v11  ;;  %v9238_v43 = vadd.f32 %v11454_v47, %v17645_v42  ;;  %11506 = vmatpush3.bf16.msra.mxu1 (!%p10680_p0), %v13469_v46  ;;  %v9385_v61 = vpack.c.bf16 (!%p10680_p0), %v17664_v27, %v17660_v16  ;;  %v13478_v16 = vld [vmem:[%s18172_s16 + $0x78] sm:$0xff] (!%p10680_p0)  }
0x1320   : > { %11507 = vmatprep.subr.bf16.mxu1 (!%p10680_p0), %v13470_v2  ;;  %v13479_v27 = vld [vmem:[%s18172_s16 + $0x38] sm:$0xff] (!%p10680_p0)  }
0x1321   : > { %v17670_v53 = vadd.f32 %v9300_v9, %v17526_v7  ;;  %v9303_v34 = vadd.f32 %v11494_v48, %v9238_v43  ;;  %v11455_v17 = vpop.f32.mrb[244].mxu1  ;;  %v18174_v11 = vld [vmem:[#allocation58_spill] sm:$0xff] (!%p10680_p0)  ;;  %v18176_v43 = vld [vmem:[#allocation57_spill] sm:$0xff] (!%p10680_p0) }
0x1322   : > { %v11456_v56 = vpop.f32.mrb[245].mxu1  ;;  %v9748_v47 = vrot.slane (!%p10680_p0), %v9743_v39, %v18174_v11  ;;  %v18175_v48 = vld [vmem:[#allocation66_spill] sm:$0xff] (!%p10680_p0) }
0x1323   : > { %9326 = vst [vmem:[#allocation2 + $0x20] sm:$0xff] %v17670_v53  ;;  %v17674_v8 = vadd.f32 %v9303_v34, %v17529_v31  ;;  %v11457_v22 = vadd.f32 %v11456_v56, %v11455_v17  ;;  %v11458_v6 = vpop.f32.mrb[246].mxu1  ;;  %11508 = vmatpush3.bf16.msra.mxu1 (!%p10680_p0), %v13471_v55  ;;  %v9762_v9 = vrot.slane (!%p10680_p0), %v9743_v39, %v18175_v48  ;;  %v18177_v34 = vld [vmem:[#allocation81_spill] sm:$0xff] (!%p10680_p0)  ;;  %v18178_v56 = vld [vmem:[#allocation56_spill] sm:$0xff] (!%p10680_p0) }
0x1324   : > { %v11459_v10 = vpop.f32.mrb[247].mxu1  ;;  %11509 = vmatprep.subr.bf16.mxu1 (!%p10680_p0), %v13472_v63  ;;  %9750 = vbcast.lane.b32.xlu0 (!%p10680_p0), %v9748_v47, 256  ;;  %v9769_v17 = vrot.slane (!%p10680_p0), %v9743_v39, %v18177_v34 }
0x1325   : > { %9327 = vst [vmem:[#allocation2 + $0x28] sm:$0xff] %v17674_v8  ;;  %v11460_v28 = vadd.f32 %v11459_v10, %v11458_v6  ;;  %v9243_v13 = vadd.f32 %v11457_v22, %v17645_v42  ;;  %v9386_v25 = vpack.c.bf16 (!%p10680_p0), %v17674_v8, %v17670_v53  ;;  %v9755_v53 = vrot.slane (!%p10680_p0), %v9743_v39, %v18176_v43 }
0x1326   : > { %9764 = vbcast.lane.b32.xlu1 (!%p10680_p0), %v9762_v9, 256  ;;  %v9775_v8 = vsub.s32 (!%p10680_p0), 4, %v18178_v56  ;;  %v9782_v22 = vsub.s32 (!%p10680_p0), 5, %v18178_v56 }
0x1327   : > { %v9246_v14 = vadd.f32 %v11460_v28, %v17645_v42  ;;  %v13446_v42 = vld [vmem:[#allocation20 + $0x24] ss:$8 sps:$4 sm:$0xff] (!%p10680_p0)   ;;  %11510 = vmatpush3.bf16.msra.mxu1 (!%p10680_p0), %v13473_v52  ;;  %v9789_v28 = vsub.s32 (!%p10680_p0), 6, %v18178_v56 }
0x1328   : > { %11511 = vmatprep.subr.bf16.mxu1 (!%p10680_p0), %v13474_v50  ;;  %9757 = vbcast.lane.b32.xlu0 (!%p10680_p0), %v9755_v53, 256  ;;  %v9776_v6 = vrot.slane (!%p10680_p0), %v9743_v39, %v9775_v8  ;;  %v9783_v10 = vrot.slane (!%p10680_p0), %v9743_v39, %v9782_v22 }
0x1329   : > { %v11495_v41 = vpop.f32.mrb[248].mxu1 }
0x132a   : > { %v11496_v60 = vpop.f32.mrb[249].mxu1  ;;  %9771 = vbcast.lane.b32.xlu1 (!%p10680_p0), %v9769_v17, 256 }
0x132b   : > { %v11497_v7 = vadd.f32 %v11496_v60, %v11495_v41  ;;  %v11498_v15 = vpop.f32.mrb[250].mxu1  ;;  %11512 = vmatpush3.bf16.msra.mxu1 (!%p10680_p0), %v13475_v36  ;;  %v9796_v41 = vsub.s32 (!%p10680_p0), 7, %v18178_v56  ;;  %v9790_v60 = vrot.slane (!%p10680_p0), %v9743_v39, %v9789_v28 }
0x132c   : > { %v11499_v3 = vpop.f32.mrb[251].mxu1  ;;  %11513 = vmatprep.subr.bf16.mxu1 (!%p10680_p0), %v13476_v5  ;;  %9778 = vbcast.lane.b32.xlu0 (!%p10680_p0), %v9776_v6, 256 }
0x132d   : > { %v9308_v54 = vadd.f32 %v11497_v7, %v9243_v13  ;;  %v11500_v59 = vadd.f32 %v11499_v3, %v11498_v15  ;;  %9333 = sbr.rel (%p10680_p0) target bundleno = 5713 (0x1651), region = 216  ;;  %v9797_v13 = vrot.slane (!%p10680_p0), %v9743_v39, %v9796_v41  ;;  %v9350_v7 = vld [vmem:[#allocation21] sm:$0x3] (!%p10680_p0) }
0x132e   : > { %9785 = vbcast.lane.b32.xlu1 (!%p10680_p0), %v9783_v10, 256  ;;  %v9392_v15 = vrot.slane (!%p10680_p0), %v9350_v7, %v18174_v11  ;;  %v9396_v3 = vrot.slane (!%p10680_p0), %v9350_v7, %v18176_v43 }
0x132f   : > { %v17680_v31 = vadd.f32 %v9308_v54, %v17553_v49  ;;  %v9311_v18 = vadd.f32 %v11500_v59, %v9246_v14  ;;  %v13443_v49 = vld [vmem:[#allocation20 + $0x14] ss:$8 sps:$4 sm:$0xff] (!%p10680_p0)   ;;  %11514 = vmatpush3.bf16.msra.mxu1 (!%p10680_p0), %v13477_v45 }
0x1330   : > { %9481 = vmatprep.subr.bf16.mxu0 (!%p10680_p0), %v13443_v49  ;;  %11515 = vmatprep.subr.bf16.mxu1 (!%p10680_p0), %v13478_v16 }
0x1331   : > { %9328 = vst [vmem:[#allocation2 + $0x30] sm:$0xff] %v17680_v31  ;;  %v17684_v33 = vadd.f32 %v9311_v18, %v17548_v37  ;;  %v13445_v37 = vld [vmem:[#allocation20 + $0x10] ss:$8 sps:$4 sm:$0xff] (!%p10680_p0)   ;;  %9792 = vbcast.lane.b32.xlu0 (!%p10680_p0), %v9790_v60, 256 }
0x1332   : > { %9482 = vmatpush1.bf16.msra.mxu0 (!%p10680_p0), %v13445_v37  ;;  %9799 = vbcast.lane.b32.xlu1 (!%p10680_p0), %v9797_v13, 256  ;;  %v10697_v13 = vld [vmem:[#allocation3] ss:$0 sm:$0xff] (!%p10680_p0) }
0x1333   : > { %9329 = vst [vmem:[#allocation2 + $0x38] sm:$0xff] %v17684_v33  ;;  %9483 = vmatprep.subr.bf16.mxu0 (!%p10680_p0), %v13446_v42  ;;  %v9387_v51 = vpack.c.bf16 (!%p10680_p0), %v17684_v33, %v17680_v31  ;;  %11516 = vmatpush3.bf16.msra.mxu1 (!%p10680_p0), %v13479_v27 }
0x1336   : > { %9484 = vmatpush1.bf16.msra.mxu0 %v13448_v58 }
0x1337   : > { %9485 = vmatprep.subr.bf16.mxu0 %v13449_v40 }
0x133a   : > { %9486 = vmatpush1.bf16.msra.mxu0 %v13451_v23 }
0x133b   : > { %9487 = vmatprep.subr.bf16.mxu0 %v13452_v20 }
0x133e   : > { %9488 = vmatpush1.bf16.msra.mxu0 %v13454_v35 }
0x133f   : > { %9489 = vmatprep.subr.bf16.mxu0 %v13455_v32 }
0x1342   : > { %9490 = vmatpush1.bf16.msra.mxu0 %v13457_v0 }
0x1343   : > { %9491 = vmatprep.subr.bf16.mxu0 %v13458_v4 }
0x1346   : > { %9492 = vmatpush1.bf16.msra.mxu0 %v13460_v57 }
0x1347   : > { %9493 = vmatprep.subr.bf16.mxu0 %v13461_v26 }
0x134a   : > { %9494 = vmatpush1.bf16.msra.mxu0 %v13463_v62 }
0x134d   : > { %9512 = vmatmul.mubr.bf16.vlgmr.msra.gmra.mrb[0].mxu0 %v9384_v1 }
0x134e   : > { %9521 = vmatprep.mubr.bf16.mxu0 %v14063_v29 }
0x1355   : > { %9522 = vmatmul.mubr.bf16.gmra.mrb[4].mxu0 %v9385_v61 }
0x1356   : > { %9531 = vmatprep.mubr.bf16.mxu0 %v14063_v29 }
0x135d   : > { %9532 = vmatmul.mubr.bf16.gmra.mrb[8].mxu0 %v9386_v25 }
0x135e   : > { %9541 = vmatprep.mubr.bf16.mxu0 %v14063_v29 }
0x1365   : > { %9542 = vmatmul.mubr.bf16.gmra.mrb[12].mxu0 %v9387_v51 }
0x1396   : > { %v9751_v28 = vpop.permute.xlu0 %9750 }
0x1420   : > { %v9513_v14 = vpop.f32.mrb[0].mxu0 }
0x1421   : > { %v9514_v54 = vadd.f32 %v9513_v14, %v9392_v15  ;;  %v9515_v59 = vpop.f32.mrb[1].mxu0 }
0x1422   : > { %v9516_v31 = vadd.f32 %v9515_v59, %v9396_v3  ;;  %v9517_v18 = vpop.f32.mrb[2].mxu0 }
0x1423   : > { %v9518_v33 = vadd.f32 %v9517_v18, %v9392_v15  ;;  %v9519_v12 = vpop.f32.mrb[3].mxu0  ;;  %v9552_v29 = vmax.f32 %v9514_v54, 0.0 }
0x1424   : > { %v9520_v38 = vadd.f32 %v9519_v12, %v9396_v3  ;;  %v9553_v37 = vmax.f32 %v9516_v31, 0.0  ;;  %v9758_v31 = vpop.permute.xlu0 %9757 }
0x1425   : > { %v9554_v49 = vmax.f32 %v9518_v33, 0.0  ;;  %v9765_v33 = vpop.permute.xlu1 %9764 }
0x1426   : > { %v9555_v42 = vmax.f32 %v9520_v38, 0.0 }
0x1427   : > { %v9568_v58 = vpack.c.bf16 %v9554_v49, %v9552_v29 }
0x1428   : > { %v9523_v40 = vpop.f32.mrb[4].mxu0  ;;  %v9569_v23 = vpack.c.bf16 %v9555_v42, %v9553_v37 }
0x1429   : > { %v9524_v20 = vadd.f32 %v9523_v40, %v9392_v15  ;;  %v9525_v21 = vpop.f32.mrb[5].mxu0 }
0x142a   : > { %v9526_v24 = vadd.f32 %v9525_v21, %v9396_v3  ;;  %v9527_v35 = vpop.f32.mrb[6].mxu0  ;;  %9710 = vmatprep.mubr.bf16.mxu1 %v9569_v23  ;;  %v9772_v23 = vpop.permute.xlu1 %9771 }
0x142b   : > { %v9528_v19 = vadd.f32 %v9527_v35, %v9392_v15  ;;  %v9529_v30 = vpop.f32.mrb[7].mxu0  ;;  %9711 = vmatmul.mubr.bf16.vlgmr.msra.gmra.mrb[0].mxu1 %v9568_v58  ;;  %v9556_v32 = vmax.f32 %v9524_v20, 0.0 }
0x142c   : > { %v9530_v44 = vadd.f32 %v9529_v30, %v9396_v3  ;;  %v9557_v46 = vmax.f32 %v9526_v24, 0.0 }
0x142d   : > { %v9558_v0 = vmax.f32 %v9528_v19, 0.0 }
0x142e   : > { %v9559_v2 = vmax.f32 %v9530_v44, 0.0 }
0x142f   : > { %v9570_v4 = vpack.c.bf16 %v9558_v0, %v9556_v32  ;;  %v9779_v0 = vpop.permute.xlu0 %9778 }
0x1430   : > { %v9571_v57 = vpack.c.bf16 %v9559_v2, %v9557_v46  ;;  %v9533_v55 = vpop.f32.mrb[8].mxu0 }
0x1431   : > { %v9534_v63 = vadd.f32 %v9533_v55, %v9392_v15  ;;  %v9535_v26 = vpop.f32.mrb[9].mxu0 }
0x1432   : > { %v9536_v52 = vadd.f32 %v9535_v26, %v9396_v3  ;;  %v9537_v62 = vpop.f32.mrb[10].mxu0  ;;  %9718 = vmatprep.mubr.bf16.mxu1 %v9571_v57 }
0x1433   : > { %v9538_v50 = vadd.f32 %v9537_v62, %v9392_v15  ;;  %v9539_v1 = vpop.f32.mrb[11].mxu0  ;;  %9719 = vmatmul.mubr.bf16.gmra.mrb[4].mxu1 %v9570_v4  ;;  %v9560_v25 = vmax.f32 %v9534_v63, 0.0  ;;  %v9786_v4 = vpop.permute.xlu1 %9785 }
0x1434   : > { %v9540_v61 = vadd.f32 %v9539_v1, %v9396_v3  ;;  %v9561_v36 = vmax.f32 %v9536_v52, 0.0 }
0x1435   : > { %v9562_v51 = vmax.f32 %v9538_v50, 0.0 }
0x1436   : > { %v9563_v5 = vmax.f32 %v9540_v61, 0.0  ;;  %v9793_v61 = vpop.permute.xlu0 %9792 }
0x1437   : > { %v9572_v45 = vpack.c.bf16 %v9562_v51, %v9560_v25 }
0x1438   : > { %v9573_v16 = vpack.c.bf16 %v9563_v5, %v9561_v36  ;;  %v9543_v27 = vpop.f32.mrb[12].mxu0  ;;  %v9800_v36 = vpop.permute.xlu1 %9799 }
0x1439   : > { %v9544_v39 = vadd.f32 %v9543_v27, %v9392_v15  ;;  %v9545_v11 = vpop.f32.mrb[13].mxu0  ;;  %v18179_v27 = vlaneseq }
0x143a   : > { %v9546_v47 = vadd.f32 %v9545_v11, %v9396_v3  ;;  %v9547_v48 = vpop.f32.mrb[14].mxu0  ;;  %9726 = vmatprep.mubr.bf16.mxu1 %v9573_v16 }
0x143b   : > { %v9548_v9 = vadd.f32 %v9547_v48, %v9392_v15  ;;  %v9549_v43 = vpop.f32.mrb[15].mxu0  ;;  %9727 = vmatmul.mubr.bf16.gmra.mrb[8].mxu1 %v9572_v45  ;;  %v9564_v34 = vmax.f32 %v9544_v39, 0.0  ;;  %v9850_v39 = vand.u32 127, %v18179_v27 }
0x143c   : > { %v9550_v53 = vadd.f32 %v9549_v43, %v9396_v3  ;;  %v9565_v8 = vmax.f32 %v9546_v47, 0.0 }
0x143d   : > { %v9566_v17 = vmax.f32 %v9548_v9, 0.0  ;;  %v9853_v48 = vsub.s32 %v9850_v39, %v18178_v56 }
0x143e   : > { %v9567_v22 = vmax.f32 %v9550_v53, 0.0 }
0x143f   : > { %v9574_v6 = vpack.c.bf16 %v9566_v17, %v9564_v34 }
0x1440   : > { %v9575_v10 = vpack.c.bf16 %v9567_v22, %v9565_v8 }
0x1442   : > { %9734 = vmatprep.mubr.bf16.mxu1 %v9575_v10 }
0x1443   : > { %9735 = vmatmul.mubr.bf16.gmra.mrb[12].mxu1 %v9574_v6 }
0x14fe   : > { %v11517_v41 = vpop.f32.mrb[0].mxu1 }
0x14ff   : > { %v11518_v60 = vpop.f32.mrb[1].mxu1 }
0x1500   : > { %v11519_v7 = vadd.f32 %v11518_v60, %v11517_v41  ;;  %v11520_v14 = vpop.f32.mrb[2].mxu1 }
0x1501   : > { %v11521_v54 = vpop.f32.mrb[3].mxu1 }
0x1502   : > { %v9713_v59 = vadd.f32 %v11519_v7, %v10697_v13  ;;  %v11522_v15 = vadd.f32 %v11521_v54, %v11520_v14 }
0x1504   : > { %v9809_v18 = vmul.f32 %v9751_v28, %v9713_v59  ;;  %v9716_v3 = vadd.f32 %v11522_v15, %v10697_v13 }
0x1506   : > { %v9810_v12 = vmul.f32 %v9758_v31, %v9716_v3  ;;  %v11523_v38 = vpop.f32.mrb[4].mxu1  ;;  %9826 = vperm.xlu0 %13438, %v9809_v18  }
0x1507   : > { %v11524_v29 = vpop.f32.mrb[5].mxu1 }
0x1508   : > { %v11525_v49 = vadd.f32 %v11524_v29, %v11523_v38  ;;  %v11526_v37 = vpop.f32.mrb[6].mxu1  ;;  %9829 = vperm.xlu1 %13439, %v9810_v12  }
0x1509   : > { %v11527_v42 = vpop.f32.mrb[7].mxu1 }
0x150a   : > { %v9721_v58 = vadd.f32 %v11525_v49, %v10697_v13  ;;  %v11528_v40 = vadd.f32 %v11527_v42, %v11526_v37 }
0x150c   : > { %v9811_v20 = vmul.f32 %v9765_v33, %v9721_v58  ;;  %v9724_v21 = vadd.f32 %v11528_v40, %v10697_v13 }
0x150e   : > { %v9812_v24 = vmul.f32 %v9772_v23, %v9724_v21  ;;  %v11529_v35 = vpop.f32.mrb[8].mxu1  ;;  %9832 = vperm.xlu1 %13439, %v9811_v20  }
0x150f   : > { %v11530_v19 = vpop.f32.mrb[9].mxu1 }
0x1510   : > { %v11531_v30 = vadd.f32 %v11530_v19, %v11529_v35  ;;  %v11532_v44 = vpop.f32.mrb[10].mxu1  ;;  %9835 = vperm.xlu0 %13438, %v9812_v24  }
0x1511   : > { %v11533_v32 = vpop.f32.mrb[11].mxu1 }
0x1512   : > { %v11534_v46 = vadd.f32 %v11533_v32, %v11532_v44  ;;  %v9729_v2 = vadd.f32 %v11531_v30, %v10697_v13 }
0x1514   : > { %v9813_v57 = vmul.f32 %v9779_v0, %v9729_v2  ;;  %v9732_v55 = vadd.f32 %v11534_v46, %v10697_v13 }
0x1516   : > { %v9814_v63 = vmul.f32 %v9786_v4, %v9732_v55  ;;  %v11535_v26 = vpop.f32.mrb[12].mxu1  ;;  %9838 = vperm.xlu1 %13439, %v9813_v57  }
0x1517   : > { %v11536_v52 = vpop.f32.mrb[13].mxu1 }
0x1518   : > { %v11537_v62 = vadd.f32 %v11536_v52, %v11535_v26  ;;  %v11538_v50 = vpop.f32.mrb[14].mxu1  ;;  %9841 = vperm.xlu0 %13438, %v9814_v63  }
0x1519   : > { %v11539_v1 = vpop.f32.mrb[15].mxu1 }
0x151a   : > { %v11540_v25 = vadd.f32 %v11539_v1, %v11538_v50  ;;  %v9737_v51 = vadd.f32 %v11537_v62, %v10697_v13 }
0x151c   : > { %v9815_v5 = vmul.f32 %v9793_v61, %v9737_v51  ;;  %v9740_v45 = vadd.f32 %v11540_v25, %v10697_v13 }
0x151e   : > { %v9816_v16 = vmul.f32 %v9800_v36, %v9740_v45  ;;  %9844 = vperm.xlu1 %13439, %v9815_v5  }
0x1520   : > { %9847 = vperm.xlu0 %13438, %v9816_v16  }
0x1585   : > { %v9827_v47 = vpop.permute.xlu0 %9826 }
0x1586   : > { %v9854_v17 = vrot.slane %v9827_v47, %v9853_v48 }
0x1587   : > { %v9830_v11 = vpop.permute.xlu1 %9829 }
0x1588   : > { %v9858_v43 = vrot.slane %v9830_v11, %v9853_v48 }
0x158a   : > { %v9884_v22 = vsel %vm9883_vm1, %v9858_v43, %v9854_v17 }
0x158d   : > { %v9833_v9 = vpop.permute.xlu1 %9832 }
0x158e   : > { %v9862_v53 = vrot.slane %v9833_v9, %v9853_v48 }
0x158f   : > { %v9836_v34 = vpop.permute.xlu0 %9835 }
0x1590   : > { %v9866_v6 = vrot.slane %v9836_v34, %v9853_v48  ;;  %v9886_v10 = vsel %vm9885_vm2, %v9862_v53, %v9884_v22 }
0x1592   : > { %v9888_v60 = vsel %vm9887_vm3, %v9866_v6, %v9886_v10 }
0x1595   : > { %v9839_v8 = vpop.permute.xlu1 %9838 }
0x1596   : > { %v9870_v28 = vrot.slane %v9839_v8, %v9853_v48 }
0x1597   : > { %v9842_v41 = vpop.permute.xlu0 %9841 }
0x1598   : > { %v9874_v13 = vrot.slane %v9842_v41, %v9853_v48  ;;  %v9890_v7 = vsel %vm9889_vm4, %v9870_v28, %v9888_v60 }
0x159a   : > { %v9892_v54 = vsel %vm9891_vm5, %v9874_v13, %v9890_v7 }
0x159d   : > { %v9845_v56 = vpop.permute.xlu1 %9844 }
0x159e   : > { %v9878_v14 = vrot.slane %v9845_v56, %v9853_v48 }
0x159f   : > { %v9848_v59 = vpop.permute.xlu0 %9847 }
0x15a0   : > { %v9882_v15 = vrot.slane %v9848_v59, %v9853_v48  ;;  %v9894_v31 = vsel %vm9893_vm6, %v9878_v14, %v9892_v54 }
0x15a2   : > { %v9896_v18 = vsel %vm9895_vm7, %v9882_v15, %v9894_v31 }
0x15a3   : > { %v9899_v3 = vsel %vm9898_vm8, %v9896_v18, 0.0 }
0x15a4   : > { %9900 = vadd.xlane.f32.xlu1 %v9899_v3 }
0x1631   : > { %v9901_v33 = vpop.xlane.xlu1 %9900 }
0x1632   : > { %v9903_v12 = vrot.slane %v9901_v33, 4 }
0x1634   : > { %v9905_v38 = vsub.f32 %v9901_v33, %v9903_v12 }
0x1636   : > { %v10714_v29 = vmul.f32 -1.442695, %v9905_v38 }
0x1638   : > { %13480 = vpow2.f32 %v10714_v29 }
0x1642   : > { %v13481_v49 = vpop.eup %13480 }
0x1643   : > { %v9909_v37 = vadd.f32 1.0, %v13481_v49 }
0x1645   : > { %13482 = vrcp.f32 %v9909_v37 }
0x164f   : > { %v13483_v42 = vpop.eup %13482 }
0x1650   : > { %9913 = vst.msk [vmem:[%s18180_s10 - $0x4] sm:$0xf0] %vm9912_vm9, %v13483_v42 }
0x1651 PF: > { %s18181_s28 = sld [smem:[#allocation52_spill]]  ;;  %s18182_s22 = sld [smem:[#allocation49_spill]] }
0x1652   : > { %s18183_s23 = sld [smem:[#allocation50_spill]]  ;;  %s18184_s26 = sld [smem:[#allocation53_spill]] }
0x1657   : > { %p75_p10 = scmp.ge.s32.totalorder %s18181_s28, 5  }
0x1659   :  { %77 = sbr.rel (!%p75_p10) target bundleno = 62 (0x3e), region = 367 }
0x1660   :  { %9925 = vsyncpa [#allocation5], 1 }
0x1661   :  { %9927 = vsyncpa [#allocation5 + $0x1], 1 }
0x1662   :  { %9928 = vsyncpa [#allocation7], 1 }
0x1663   :  { %9929 = vsyncpa [#allocation22], 1 }

</bundles_post_ra>
